<compile_context>
chip_gen: v5e
topology: v5e:2x2
jax: 0.10.0
libtpu: 0.0.40
codegen_flags: <defaults>
</compile_context>

<pallas_src>
import functools
import math

import jax
import jax.numpy as jnp
from jax.experimental import pallas as pl
from jax.experimental.pallas import tpu as pltpu

NEG_INF = -1e9


def _round_up(x, m):
    return (x + m - 1) // m * m


# ----------------------------------------------------------------------------
# Tiled matmul kernel:  y = act((x @ w) * scale + bias)   (bf16 in, f32 acc)
# ----------------------------------------------------------------------------

def _mm_kernel(x_ref, w_ref, s_ref, b_ref, o_ref, acc_ref, *, act):
    @pl.when(pl.program_id(2) == 0)
    def _():
        acc_ref[...] = jnp.zeros_like(acc_ref)

    # Inputs arrive already in bf16 (cast before DMA -> half the HBM traffic).
    acc_ref[...] += jnp.dot(x_ref[...], w_ref[...],
                            preferred_element_type=jnp.float32)

    @pl.when(pl.program_id(2) == pl.num_programs(2) - 1)
    def _():
        y = acc_ref[...] * s_ref[...] + b_ref[...]
        if act == "relu":
            y = jnp.maximum(y, 0.0)
        o_ref[...] = y.astype(o_ref.dtype)


def mm_scale_bias_act(x, w, scale=None, bias=None, act=None,
                      out_dtype=jnp.float32,
                      tm_max=256, tn_max=256, tk_max=2048):
    """(M,K)@(K,N) with per-output-channel scale/bias and optional relu.

    * bf16 operands are produced in the wrapper (before the DMA).
    * K / N use full-extent blocks when they fit (exempt from the (8,128)
      divisibility rule) so small K (e.g. conv1's 27) is never zero-padded.
    * The row axis is split into >= 2 parallel tiles when the (i,j) grid would
      otherwise be a single tile, so both v7x TensorCores get work.
    """
    M, K = x.shape
    K2, N = w.shape
    assert K == K2
    if scale is None:
        scale = jnp.ones((N,), jnp.float32)
    if bias is None:
        bias = jnp.zeros((N,), jnp.float32)

    # K tiling: full-extent when it fits, else 128-aligned tiles + zero pad.
    if K <= tk_max:
        tk, Kp = K, K
    else:
        tk, Kp = tk_max, _round_up(K, tk_max)
    # N tiling: full-extent when it fits, else 128-multiple tiles.
    if N <= tn_max:
        tn, Np = N, N
    else:
        tn, Np = tn_max, _round_up(N, tn_max)
    # M tiling (8-aligned); ensure at least two parallel (i,j) tiles if possible.
    tm = min(tm_max, _round_up(M, 8))
    if (Np // tn) == 1 and (_round_up(M, tm) // tm) == 1 and M >= 16:
        tm = _round_up((M + 1) // 2, 8)
    Mp = _round_up(M, tm)

    xb = x.astype(jnp.bfloat16)
    wb = w.astype(jnp.bfloat16)
    if Mp != M or Kp != K:
        xb = jnp.pad(xb, ((0, Mp - M), (0, Kp - K)))
    if Kp != K or Np != N:
        wb = jnp.pad(wb, ((0, Kp - K), (0, Np - N)))
    sp = scale.reshape(1, N).astype(jnp.float32)
    bp = bias.reshape(1, N).astype(jnp.float32)
    if Np != N:
        sp = jnp.pad(sp, ((0, 0), (0, Np - N)))
        bp = jnp.pad(bp, ((0, 0), (0, Np - N)))

    grid = (Mp // tm, Np // tn, Kp // tk)
    out = pl.pallas_call(
        functools.partial(_mm_kernel, act=act),
        grid=grid,
        in_specs=[
            pl.BlockSpec((tm, tk), lambda i, j, k: (i, k)),
            pl.BlockSpec((tk, tn), lambda i, j, k: (k, j)),
            pl.BlockSpec((1, tn), lambda i, j, k: (0, j)),
            pl.BlockSpec((1, tn), lambda i, j, k: (0, j)),
        ],
        out_specs=pl.BlockSpec((tm, tn), lambda i, j, k: (i, j)),
        out_shape=jax.ShapeDtypeStruct((Mp, Np), out_dtype),
        scratch_shapes=[pltpu.VMEM((tm, tn), jnp.float32)],
        compiler_params=pltpu.CompilerParams(
            dimension_semantics=("parallel", "parallel", "arbitrary"),
            vmem_limit_bytes=32 * 1024 * 1024,
        ),
    )(xb, wb, sp, bp)
    if Mp != M or Np != N:
        out = out[:M, :N]
    return out


# ----------------------------------------------------------------------------
# In-kernel helpers (f32 epilogues, bf16 MXU operands)
# ----------------------------------------------------------------------------

def _ln_f32(x, g, b, eps):
    mu = jnp.mean(x, axis=-1, keepdims=True)
    var = jnp.mean(jnp.square(x - mu), axis=-1, keepdims=True)
    return (x - mu) * jax.lax.rsqrt(var + eps) * g + b


def _mha(q, kv, bias, wo, bo, n_heads):
    """Multi-head attention on flattened (batch-major) rows.

    q:    (Nq, D)  bf16 query rows (ALREADY scaled by 1/sqrt(dh) via weight fold)
    kv:   (Nk, 2D) bf16 [K | V] rows
    bias: (Nq, Nk) f32 additive bias (key padding + block-diagonal batch mask)
    wo:   (D, D)   bf16 output projection, bo: (1, D) f32

    Head outputs are accumulated straight through per-head slices of wo (no
    lane-axis concat); softmax normalization is deferred to the (Nq, dh) head
    output (Nq*dh multiplies per head instead of Nq*Nk).
    """
    D = q.shape[-1]
    dh = D // n_heads
    out = None
    for h in range(n_heads):
        qh = q[:, h * dh:(h + 1) * dh]
        kh = kv[:, h * dh:(h + 1) * dh]
        vh = kv[:, D + h * dh:D + (h + 1) * dh]
        s = jax.lax.dot_general(qh, kh, (((1,), (1,)), ((), ())),
                                preferred_element_type=jnp.float32) + bias
        m = jnp.max(s, axis=-1, keepdims=True)
        p = jnp.exp(s - m)
        l = jnp.sum(p, axis=-1, keepdims=True)
        oh = jnp.dot(p.astype(jnp.bfloat16), vh,
                     preferred_element_type=jnp.float32)
        oh = oh * pl.reciprocal(l, approx=False)        # deferred normalization
        c = jnp.dot(oh.astype(jnp.bfloat16), wo[h * dh:(h + 1) * dh, :],
                    preferred_element_type=jnp.float32)
        out = c if out is None else out + c
    return out + bo


# ----------------------------------------------------------------------------
# Fused encoder stack: embed1 + all encoder layers + final encoder LayerNorm
# ----------------------------------------------------------------------------
# TODO(synk): for long sequences / large d_model the whole-stack-resident design
# must switch to a flash-style key-tiled attention (and a row grid so both v7x
# TensorCores are used); at these shapes call-count reduction dominates.

def _encoder_stack_kernel(*refs, num, n_heads, eps):
    src_ref, q_bid_ref, k_bid_ref, pad_ref, we_ref, be_ref = refs[:6]
    layer_refs = refs[6:6 + 12 * num]
    encg_ref, encb_ref = refs[6 + 12 * num:8 + 12 * num]
    o_ref = refs[8 + 12 * num]

    # Block-diagonal (per-batch) + key-padding additive bias, built once in VMEM
    # from O(Nq + Nk) inputs, reused by every layer and head.
    bias = jnp.where(q_bid_ref[...] == k_bid_ref[...], 0.0, NEG_INF) + pad_ref[...]

    # embed1 fused in (src rows arrive as bf16).
    x = jnp.dot(src_ref[...], we_ref[...],
                preferred_element_type=jnp.float32) + be_ref[...]
    D = x.shape[-1]

    for l in range(num):
        (wqkv, bqkv, wo, bo, ln1g, ln1b,
         w1, b1, w2, b2, ln2g, ln2b) = layer_refs[12 * l:12 * (l + 1)]
        xb = x.astype(jnp.bfloat16)                       # cast once, reuse
        qkv = jnp.dot(xb, wqkv[...],
                      preferred_element_type=jnp.float32) + bqkv[...]
        qkvb = qkv.astype(jnp.bfloat16)
        a = _mha(qkvb[:, :D], qkvb[:, D:], bias, wo[...], bo[...], n_heads)
        x1 = _ln_f32(x + a, ln1g[...], ln1b[...], eps)
        x1b = x1.astype(jnp.bfloat16)
        h = jnp.maximum(jnp.dot(x1b, w1[...],
                                preferred_element_type=jnp.float32) + b1[...], 0.0)
        h = jnp.dot(h.astype(jnp.bfloat16), w2[...],
                    preferred_element_type=jnp.float32) + b2[...]
        x = _ln_f32(x1 + h, ln2g[...], ln2b[...], eps)

    # final encoder LayerNorm fused in; mem output in bf16 (its only consumers
    # are the decoder's bf16 matmuls -> numerically identical, half the DMA).
    o_ref[...] = _ln_f32(x, encg_ref[...], encb_ref[...], eps).astype(o_ref.dtype)


def encoder_stack(src_feat, src_mask, params, *, B, S, n_heads, eps=1e-5):
    Me = B * S
    D = params["embed1_w"].shape[1]
    dh = D // n_heads
    scale = 1.0 / math.sqrt(dh)
    f32, bf16 = jnp.float32, jnp.bfloat16
    r = lambda a: a.reshape(1, -1).astype(f32)

    q_bid = jnp.repeat(jnp.arange(B, dtype=jnp.int32), S).reshape(Me, 1)
    k_bid = jnp.repeat(jnp.arange(B, dtype=jnp.int32), S).reshape(1, Me)
    if src_mask is None:
        pad = jnp.zeros((1, Me), f32)
    else:
        pad = jnp.where(src_mask, NEG_INF, 0.0).astype(f32).reshape(1, Me)

    args = [src_feat.astype(bf16), q_bid, k_bid, pad,
            params["embed1_w"].astype(bf16), r(params["embed1_b"])]
    for p in params["enc_layers"]:
        # fold the 1/sqrt(dh) softmax scale into the Q columns (weight prep).
        wqkv = jnp.concatenate([p["wqkv"][:, :D] * scale, p["wqkv"][:, D:]], axis=1)
        bqkv = jnp.concatenate([p["bqkv"][:D] * scale, p["bqkv"][D:]])
        args += [wqkv.astype(bf16), r(bqkv),
                 p["wo"].astype(bf16), r(p["bo"]),
                 r(p["ln1_g"]), r(p["ln1_b"]),
                 p["w1"].astype(bf16), r(p["b1"]),
                 p["w2"].astype(bf16), r(p["b2"]),
                 r(p["ln2_g"]), r(p["ln2_b"])]
    args += [r(params["enc_norm_g"]), r(params["enc_norm_b"])]

    num = len(params["enc_layers"])
    return pl.pallas_call(
        functools.partial(_encoder_stack_kernel, num=num, n_heads=n_heads, eps=eps),
        out_shape=jax.ShapeDtypeStruct((Me, D), bf16),
        compiler_params=pltpu.CompilerParams(vmem_limit_bytes=32 * 1024 * 1024),
    )(*args)


# ----------------------------------------------------------------------------
# Fused decoder stack: all decoder layers + final LayerNorm + fc1
# ----------------------------------------------------------------------------

def _decoder_stack_kernel(*refs, num, n_heads, eps):
    (x_ref, mem_ref, tq_bid_ref, tk_bid_ref, sk_bid_ref, spad_ref) = refs[:6]
    layer_refs = refs[6:6 + 20 * num]
    dng_ref, dnb_ref, fcw_ref, fcb_ref = refs[6 + 20 * num:10 + 20 * num]
    o_ref = refs[10 + 20 * num]

    # self-attn bias: padding (tgt_key_padding_mask) + block-diagonal batches.
    sbias = jnp.where(tq_bid_ref[...] == tk_bid_ref[...], 0.0, NEG_INF) + spad_ref[...]
    # cross-attn bias: block-diagonal only (memory_key_padding_mask=None in the
    # reference module).  No causal mask: the module never passes a tgt_mask.
    cbias = jnp.where(tq_bid_ref[...] == sk_bid_ref[...], 0.0, NEG_INF)

    x = x_ref[...]
    D = x.shape[-1]
    memb = mem_ref[...]                                   # bf16 encoder memory

    for l in range(num):
        (wqkv, bqkv, wo, bo, ln1g, ln1b,
         wq_c, bq_c, wkv_c, bkv_c, wo_c, bo_c, ln2g, ln2b,
         w1, b1, w2, b2, ln3g, ln3b) = layer_refs[20 * l:20 * (l + 1)]

        # self-attention (fused QKV)
        xb = x.astype(jnp.bfloat16)
        qkv = jnp.dot(xb, wqkv[...],
                      preferred_element_type=jnp.float32) + bqkv[...]
        qkvb = qkv.astype(jnp.bfloat16)
        a = _mha(qkvb[:, :D], qkvb[:, D:], sbias, wo[...], bo[...], n_heads)
        x1 = _ln_f32(x + a, ln1g[...], ln1b[...], eps)

        # cross-attention (Q from x1, fused KV from encoder memory)
        x1b = x1.astype(jnp.bfloat16)
        qc = jnp.dot(x1b, wq_c[...],
                     preferred_element_type=jnp.float32) + bq_c[...]
        kvc = jnp.dot(memb, wkv_c[...],
                      preferred_element_type=jnp.float32) + bkv_c[...]
        a2 = _mha(qc.astype(jnp.bfloat16), kvc.astype(jnp.bfloat16), cbias,
                  wo_c[...], bo_c[...], n_heads)
        x2 = _ln_f32(x1 + a2, ln2g[...], ln2b[...], eps)

        # FFN
        x2b = x2.astype(jnp.bfloat16)
        h = jnp.maximum(jnp.dot(x2b, w1[...],
                                preferred_element_type=jnp.float32) + b1[...], 0.0)
        h = jnp.dot(h.astype(jnp.bfloat16), w2[...],
                    preferred_element_type=jnp.float32) + b2[...]
        x = _ln_f32(x2 + h, ln3g[...], ln3b[...], eps)

    # final decoder LayerNorm fused with fc1.
    y = _ln_f32(x, dng_ref[...], dnb_ref[...], eps)
    o_ref[...] = jnp.dot(y.astype(jnp.bfloat16), fcw_ref[...],
                         preferred_element_type=jnp.float32) + fcb_ref[...]


def decoder_stack(trg_x, mem, trg_mask, params, *, B, S, T, n_heads, eps=1e-5):
    Md, Me = B * T, B * S
    D = params["embed1_w"].shape[1]
    V = params["fc1_w"].shape[1]
    dh = D // n_heads
    scale = 1.0 / math.sqrt(dh)
    f32, bf16 = jnp.float32, jnp.bfloat16
    r = lambda a: a.reshape(1, -1).astype(f32)

    tq_bid = jnp.repeat(jnp.arange(B, dtype=jnp.int32), T).reshape(Md, 1)
    tk_bid = jnp.repeat(jnp.arange(B, dtype=jnp.int32), T).reshape(1, Md)
    sk_bid = jnp.repeat(jnp.arange(B, dtype=jnp.int32), S).reshape(1, Me)
    if trg_mask is None:
        spad = jnp.zeros((1, Md), f32)
    else:
        spad = jnp.where(trg_mask, NEG_INF, 0.0).astype(f32).reshape(1, Md)

    args = [trg_x.astype(f32), mem.astype(bf16), tq_bid, tk_bid, sk_bid, spad]
    for p in params["dec_layers"]:
        wqkv = jnp.concatenate([p["wqkv"][:, :D] * scale, p["wqkv"][:, D:]], axis=1)
        bqkv = jnp.concatenate([p["bqkv"][:D] * scale, p["bqkv"][D:]])
        args += [wqkv.astype(bf16), r(bqkv),
                 p["wo"].astype(bf16), r(p["bo"]),
                 r(p["ln1_g"]), r(p["ln1_b"]),
                 (p["wq_c"] * scale).astype(bf16), r(p["bq_c"] * scale),
                 p["wkv_c"].astype(bf16), r(p["bkv_c"]),
                 p["wo_c"].astype(bf16), r(p["bo_c"]),
                 r(p["ln2_g"]), r(p["ln2_b"]),
                 p["w1"].astype(bf16), r(p["b1"]),
                 p["w2"].astype(bf16), r(p["b2"]),
                 r(p["ln3_g"]), r(p["ln3_b"])]
    args += [r(params["dec_norm_g"]), r(params["dec_norm_b"]),
             params["fc1_w"].astype(bf16), r(params["fc1_b"])]

    num = len(params["dec_layers"])
    return pl.pallas_call(
        functools.partial(_decoder_stack_kernel, num=num, n_heads=n_heads, eps=eps),
        out_shape=jax.ShapeDtypeStruct((Md, V), f32),
        compiler_params=pltpu.CompilerParams(vmem_limit_bytes=32 * 1024 * 1024),
    )(*args)


# ----------------------------------------------------------------------------
# JAX glue: conv (im2col + fused matmul/BN/relu) and the full forward pass
# ----------------------------------------------------------------------------

def _im2col_nhwc(x_nhwc, stride=2, pad=1, ksize=3):
    # TODO(synk): the im2col gather could move inside the Pallas kernel (strided
    # in-kernel loads) to avoid materializing the patches tensor in HBM.
    B, H, W, C = x_nhwc.shape
    Ho = (H + 2 * pad - ksize) // stride + 1
    Wo = (W + 2 * pad - ksize) // stride + 1
    xp = jnp.pad(x_nhwc, ((0, 0), (pad, pad), (pad, pad), (0, 0)))
    cols = []
    for i in range(ksize):
        for j in range(ksize):
            cols.append(xp[:, i:i + stride * Ho:stride, j:j + stride * Wo:stride, :])
    patches = jnp.concatenate(cols, axis=-1).reshape(B * Ho * Wo, ksize * ksize * C)
    return patches, Ho, Wo


def conv_bn_relu_nhwc(x_nhwc, w_oihw, bn, eps=1e-5):
    """Conv2d(k=3, s=2, p=1, bias=False) + BatchNorm(eval) + ReLU, NHWC in/out.
    matmul + BN affine + relu run fused in the tiled Pallas matmul kernel;
    the activation is stored in bf16 (its only consumers are bf16 matmuls)."""
    B = x_nhwc.shape[0]
    Cout = w_oihw.shape[0]
    patches, Ho, Wo = _im2col_nhwc(x_nhwc)
    wmat = jnp.transpose(w_oihw, (2, 3, 1, 0)).reshape(-1, Cout)
    scale = bn["gamma"] * jax.lax.rsqrt(bn["var"] + eps)
    bias = bn["beta"] - bn["mean"] * scale
    y = mm_scale_bias_act(patches, wmat, scale=scale, bias=bias, act="relu",
                          out_dtype=jnp.bfloat16)
    return y.reshape(B, Ho, Wo, Cout)


def pytransformer_forward(params, src, trg, src_mask, trg_mask=None, *, n_heads):
    B = src.shape[0]

    # Conv2dBlock (dropout p=0.1 -> identity in eval mode); NHWC end-to-end,
    # bf16 activations (consumers are bf16 MXU matmuls).
    x = jnp.transpose(src, (0, 2, 3, 1)).astype(jnp.bfloat16)   # NCHW -> NHWC once
    x = conv_bn_relu_nhwc(x, params["conv1_w"], params["bn1"])
    x = conv_bn_relu_nhwc(x, params["conv2_w"], params["bn2"])
    x_nchw = jnp.transpose(x, (0, 3, 1, 2))                     # back to NCHW once

    # src = src.reshape(B, W', -1) -- exact raw NCHW row-major reshape as PyTorch
    Wp = x_nchw.shape[-1]
    src_feat = x_nchw.reshape(B, Wp, -1)

    D = params["embed1_w"].shape[1]
    S = Wp
    T = trg.shape[1]

    # embed2 (Embedding lookup) -- gather stays in XLA glue.
    trg_x = jnp.take(params["embed2_w"], trg, axis=0).reshape(B * T, D)

    # One pallas_call for embed1 + the whole encoder (+ final LN), one for the
    # whole decoder (+ final LN + fc1).
    mem = encoder_stack(src_feat.reshape(B * S, -1), src_mask, params,
                        B=B, S=S, n_heads=n_heads)
    logits = decoder_stack(trg_x, mem, trg_mask, params,
                           B=B, S=S, T=T, n_heads=n_heads)
    return logits.reshape(B, T, -1)


# ----------------------------------------------------------------------------
# Deterministic parameter init
# ----------------------------------------------------------------------------

def init_params(key, src_vocab, trg_vocab, d_model, ff_dim, num, n_heads):
    keys = iter(jax.random.split(key, 1024))

    def w(shape, s=0.02):
        return jax.random.normal(next(keys), shape, jnp.float32) * s

    def zeros(n):
        return jnp.zeros((n,), jnp.float32)

    def ones(n):
        return jnp.ones((n,), jnp.float32)

    def bn_params(c):
        return dict(gamma=ones(c), beta=zeros(c), mean=zeros(c), var=ones(c))

    def enc_layer():
        return dict(
            wqkv=w((d_model, 3 * d_model)), bqkv=zeros(3 * d_model),
            wo=w((d_model, d_model)), bo=zeros(d_model),
            ln1_g=ones(d_model), ln1_b=zeros(d_model),
            w1=w((d_model, ff_dim)), b1=zeros(ff_dim),
            w2=w((ff_dim, d_model)), b2=zeros(d_model),
            ln2_g=ones(d_model), ln2_b=zeros(d_model))

    def dec_layer():
        return dict(
            wqkv=w((d_model, 3 * d_model)), bqkv=zeros(3 * d_model),
            wo=w((d_model, d_model)), bo=zeros(d_model),
            ln1_g=ones(d_model), ln1_b=zeros(d_model),
            wq_c=w((d_model, d_model)), bq_c=zeros(d_model),
            wkv_c=w((d_model, 2 * d_model)), bkv_c=zeros(2 * d_model),
            wo_c=w((d_model, d_model)), bo_c=zeros(d_model),
            ln2_g=ones(d_model), ln2_b=zeros(d_model),
            w1=w((d_model, ff_dim)), b1=zeros(ff_dim),
            w2=w((ff_dim, d_model)), b2=zeros(d_model),
            ln3_g=ones(d_model), ln3_b=zeros(d_model))

    in_dim = int(64 * src_vocab / 12)
    return dict(
        conv1_w=w((64, 3, 3, 3)), conv2_w=w((64, 64, 3, 3)),
        bn1=bn_params(64), bn2=bn_params(64),
        embed1_w=w((in_dim, d_model)), embed1_b=zeros(d_model),
        embed2_w=w((trg_vocab, d_model), 1.0),
        enc_layers=[enc_layer() for _ in range(num)],
        dec_layers=[dec_layer() for _ in range(num)],
        enc_norm_g=ones(d_model), enc_norm_b=zeros(d_model),
        dec_norm_g=ones(d_model), dec_norm_b=zeros(d_model),
        fc1_w=w((d_model, trg_vocab)), fc1_b=zeros(trg_vocab))


# ----------------------------------------------------------------------------
# Main
# ----------------------------------------------------------------------------

if __name__ == "__main__":
    # embed1 in_dim = 64*src_vocab/12 must equal 64*H' (H' = H/4 after two
    # stride-2 convs). src_vocab=48, H=16 -> H'=4 -> 256.
    src_vocab, trg_vocab = 48, 16
    d_model, ff_dim, num, n_heads = 32, 64, 2, 4

    key = jax.random.PRNGKey(0)
    pkey, xkey, tkey = jax.random.split(key, 3)

    params = init_params(pkey, src_vocab, trg_vocab, d_model, ff_dim, num, n_heads)

    B, H, W = 2, 16, 16
    src = jax.random.normal(xkey, (B, 3, H, W), jnp.float32)          # NCHW like PyTorch
    T = 8
    trg = jax.random.randint(tkey, (B, T), 0, trg_vocab, dtype=jnp.int32)

    S = W // 4                                                        # encoder seq = W'
    src_mask = jnp.zeros((B, S), bool).at[1, S - 1].set(True)         # True = padded key
    trg_mask = None

    # TODO(synk): training-mode Dropout / batch-statistics BatchNorm and the
    # `infer=True` branch are not implemented (eval-mode forward only).
    fwd = jax.jit(functools.partial(pytransformer_forward, n_heads=n_heads))
    out = fwd(params, src, trg, src_mask, trg_mask)
    out = jax.block_until_ready(out)
    assert out.shape == (B, T, trg_vocab) and out.dtype == jnp.float32
    assert bool(jnp.all(jnp.isfinite(out)))
    print("KERNEL_OK")
</pallas_src>

<mosaic_0001>
module attributes {stable_mosaic.version = 11 : i64} {
  func.func @_mm_kernel(%arg0: i32, %arg1: i32, %arg2: i32, %arg3: memref<64x27xbf16, #tpu.memory_space<vmem>>, %arg4: memref<27x64xbf16, #tpu.memory_space<vmem>>, %arg5: memref<1x64xf32, #tpu.memory_space<vmem>>, %arg6: memref<1x64xf32, #tpu.memory_space<vmem>>, %arg7: memref<64x64xbf16, #tpu.memory_space<vmem>>, %arg8: memref<64x64xf32, #tpu.memory_space<vmem>>) attributes {dimension_semantics = [#tpu.dimension_semantics<parallel>, #tpu.dimension_semantics<parallel>, #tpu.dimension_semantics<arbitrary>], iteration_bounds = array<i64: 2, 1, 1>, scalar_prefetch = 0 : i64, scratch_operands = 1 : i64, tpu.core_type = #tpu.core_type<tc>, window_params = [{transform_indices = @transform_0, window_bounds = array<i64: 64, 27>}, {transform_indices = @transform_1, window_bounds = array<i64: 27, 64>}, {transform_indices = @transform_2, window_bounds = array<i64: 1, 64>}, {transform_indices = @transform_3, window_bounds = array<i64: 1, 64>}, {transform_indices = @transform_4, window_bounds = array<i64: 64, 64>}]} {
    %c0_i32 = arith.constant 0 : i32
    %0 = arith.cmpi eq, %arg2, %c0_i32 : i32
    %1 = arith.extui %0 : i1 to i32
    %c0_i32_0 = arith.constant 0 : i32
    %2 = arith.cmpi ne, %1, %c0_i32_0 : i32
    scf.if %2 {
      %cst_10 = arith.constant 0.000000e+00 : f32
      %12 = vector.broadcast %cst_10 : f32 to vector<64x64xf32>
      %c0_11 = arith.constant 0 : index
      %c0_12 = arith.constant 0 : index
      %13 = vector.load %arg8[%c0_11, %c0_12] : memref<64x64xf32, #tpu.memory_space<vmem>>, vector<64x64xf32>
      tpu.vector_store %arg8[%c0_11, %c0_12], %12 {strides = array<i32>} : memref<64x64xf32, #tpu.memory_space<vmem>>, vector<64x64xf32>,
    } else {
    }
    %c0 = arith.constant 0 : index
    %c0_1 = arith.constant 0 : index
    %3 = vector.load %arg8[%c0, %c0_1] : memref<64x64xf32, #tpu.memory_space<vmem>>, vector<64x64xf32>
    %c0_2 = arith.constant 0 : index
    %c0_3 = arith.constant 0 : index
    %4 = vector.load %arg3[%c0_2, %c0_3] : memref<64x27xbf16, #tpu.memory_space<vmem>>, vector<64x27xbf16>
    %c0_4 = arith.constant 0 : index
    %c0_5 = arith.constant 0 : index
    %5 = vector.load %arg4[%c0_4, %c0_5] : memref<27x64xbf16, #tpu.memory_space<vmem>>, vector<27x64xbf16>
    %cst = arith.constant dense<0.000000e+00> : vector<64x64xf32>
    %6 = tpu.matmul %4, %5, %cst {dimension_numbers = #tpu.dot_dimension_numbers<[1], [0], [0], [1], [0, 0, 1, 1], [], []>} : vector<64x27xbf16>, vector<27x64xbf16>, vector<64x64xf32> -> vector<64x64xf32>
    %7 = arith.addf %3, %6 : vector<64x64xf32>
    %c0_6 = arith.constant 0 : index
    %c0_7 = arith.constant 0 : index
    %8 = vector.load %arg8[%c0_6, %c0_7] : memref<64x64xf32, #tpu.memory_space<vmem>>, vector<64x64xf32>
    tpu.vector_store %arg8[%c0_6, %c0_7], %7 {strides = array<i32>} : memref<64x64xf32, #tpu.memory_space<vmem>>, vector<64x64xf32>,
    %c0_i32_8 = arith.constant 0 : i32
    %9 = arith.cmpi eq, %arg2, %c0_i32_8 : i32
    %10 = arith.extui %9 : i1 to i32
    %c0_i32_9 = arith.constant 0 : i32
    %11 = arith.cmpi ne, %10, %c0_i32_9 : i32
    scf.if %11 {
      %c0_10 = arith.constant 0 : index
      %c0_11 = arith.constant 0 : index
      %12 = vector.load %arg8[%c0_10, %c0_11] : memref<64x64xf32, #tpu.memory_space<vmem>>, vector<64x64xf32>
      %c0_12 = arith.constant 0 : index
      %c0_13 = arith.constant 0 : index
      %13 = vector.load %arg5[%c0_12, %c0_13] : memref<1x64xf32, #tpu.memory_space<vmem>>, vector<1x64xf32>
      %14 = vector.broadcast %13 : vector<1x64xf32> to vector<64x64xf32>
      %15 = arith.mulf %12, %14 : vector<64x64xf32>
      %c0_14 = arith.constant 0 : index
      %c0_15 = arith.constant 0 : index
      %16 = vector.load %arg6[%c0_14, %c0_15] : memref<1x64xf32, #tpu.memory_space<vmem>>, vector<1x64xf32>
      %17 = vector.broadcast %16 : vector<1x64xf32> to vector<64x64xf32>
      %18 = arith.addf %15, %17 : vector<64x64xf32>
      %cst_16 = arith.constant 0.000000e+00 : f32
      %19 = vector.broadcast %cst_16 : f32 to vector<64x64xf32>
      %20 = arith.maximumf %18, %19 : vector<64x64xf32>
      %21 = arith.truncf %20 : vector<64x64xf32> to vector<64x64xbf16>
      %c0_17 = arith.constant 0 : index
      %c0_18 = arith.constant 0 : index
      %22 = vector.load %arg7[%c0_17, %c0_18] : memref<64x64xbf16, #tpu.memory_space<vmem>>, vector<64x64xbf16>
      tpu.vector_store %arg7[%c0_17, %c0_18], %21 {strides = array<i32>} : memref<64x64xbf16, #tpu.memory_space<vmem>>, vector<64x64xbf16>,
    } else {
    }
    return
  }
  func.func @transform_0(%arg0: i32, %arg1: i32, %arg2: i32) -> (i32, i32) {
    %c0_i32 = arith.constant 0 : i32
    return %arg0, %arg2 : i32, i32
  }
  func.func @transform_1(%arg0: i32, %arg1: i32, %arg2: i32) -> (i32, i32) {
    %c0_i32 = arith.constant 0 : i32
    return %arg2, %arg1 : i32, i32
  }
  func.func @transform_2(%arg0: i32, %arg1: i32, %arg2: i32) -> (i32, i32) {
    %c0_i32 = arith.constant 0 : i32
    %c0_i32_0 = arith.constant 0 : i32
    return %c0_i32, %arg1 : i32, i32
  }
  func.func @transform_3(%arg0: i32, %arg1: i32, %arg2: i32) -> (i32, i32) {
    %c0_i32 = arith.constant 0 : i32
    %c0_i32_0 = arith.constant 0 : i32
    return %c0_i32, %arg1 : i32, i32
  }
  func.func @transform_4(%arg0: i32, %arg1: i32, %arg2: i32) -> (i32, i32) {
    %c0_i32 = arith.constant 0 : i32
    return %arg0, %arg1 : i32, i32
  }
}

module attributes {stable_mosaic.version = 11 : i64} {
  func.func @_mm_kernel(%arg0: i32, %arg1: i32, %arg2: i32, %arg3: memref<16x576xbf16, #tpu.memory_space<vmem>>, %arg4: memref<576x64xbf16, #tpu.memory_space<vmem>>, %arg5: memref<1x64xf32, #tpu.memory_space<vmem>>, %arg6: memref<1x64xf32, #tpu.memory_space<vmem>>, %arg7: memref<16x64xbf16, #tpu.memory_space<vmem>>, %arg8: memref<16x64xf32, #tpu.memory_space<vmem>>) attributes {dimension_semantics = [#tpu.dimension_semantics<parallel>, #tpu.dimension_semantics<parallel>, #tpu.dimension_semantics<arbitrary>], iteration_bounds = array<i64: 2, 1, 1>, scalar_prefetch = 0 : i64, scratch_operands = 1 : i64, tpu.core_type = #tpu.core_type<tc>, window_params = [{transform_indices = @transform_0, window_bounds = array<i64: 16, 576>}, {transform_indices = @transform_1, window_bounds = array<i64: 576, 64>}, {transform_indices = @transform_2, window_bounds = array<i64: 1, 64>}, {transform_indices = @transform_3, window_bounds = array<i64: 1, 64>}, {transform_indices = @transform_4, window_bounds = array<i64: 16, 64>}]} {
    %c0_i32 = arith.constant 0 : i32
    %0 = arith.cmpi eq, %arg2, %c0_i32 : i32
    %1 = arith.extui %0 : i1 to i32
    %c0_i32_0 = arith.constant 0 : i32
    %2 = arith.cmpi ne, %1, %c0_i32_0 : i32
    scf.if %2 {
      %cst_10 = arith.constant 0.000000e+00 : f32
      %12 = vector.broadcast %cst_10 : f32 to vector<16x64xf32>
      %c0_11 = arith.constant 0 : index
      %c0_12 = arith.constant 0 : index
      %13 = vector.load %arg8[%c0_11, %c0_12] : memref<16x64xf32, #tpu.memory_space<vmem>>, vector<16x64xf32>
      tpu.vector_store %arg8[%c0_11, %c0_12], %12 {strides = array<i32>} : memref<16x64xf32, #tpu.memory_space<vmem>>, vector<16x64xf32>,
    } else {
    }
    %c0 = arith.constant 0 : index
    %c0_1 = arith.constant 0 : index
    %3 = vector.load %arg8[%c0, %c0_1] : memref<16x64xf32, #tpu.memory_space<vmem>>, vector<16x64xf32>
    %c0_2 = arith.constant 0 : index
    %c0_3 = arith.constant 0 : index
    %4 = vector.load %arg3[%c0_2, %c0_3] : memref<16x576xbf16, #tpu.memory_space<vmem>>, vector<16x576xbf16>
    %c0_4 = arith.constant 0 : index
    %c0_5 = arith.constant 0 : index
    %5 = vector.load %arg4[%c0_4, %c0_5] : memref<576x64xbf16, #tpu.memory_space<vmem>>, vector<576x64xbf16>
    %cst = arith.constant dense<0.000000e+00> : vector<16x64xf32>
    %6 = tpu.matmul %4, %5, %cst {dimension_numbers = #tpu.dot_dimension_numbers<[1], [0], [0], [1], [0, 0, 1, 1], [], []>} : vector<16x576xbf16>, vector<576x64xbf16>, vector<16x64xf32> -> vector<16x64xf32>
    %7 = arith.addf %3, %6 : vector<16x64xf32>
    %c0_6 = arith.constant 0 : index
    %c0_7 = arith.constant 0 : index
    %8 = vector.load %arg8[%c0_6, %c0_7] : memref<16x64xf32, #tpu.memory_space<vmem>>, vector<16x64xf32>
    tpu.vector_store %arg8[%c0_6, %c0_7], %7 {strides = array<i32>} : memref<16x64xf32, #tpu.memory_space<vmem>>, vector<16x64xf32>,
    %c0_i32_8 = arith.constant 0 : i32
    %9 = arith.cmpi eq, %arg2, %c0_i32_8 : i32
    %10 = arith.extui %9 : i1 to i32
    %c0_i32_9 = arith.constant 0 : i32
    %11 = arith.cmpi ne, %10, %c0_i32_9 : i32
    scf.if %11 {
      %c0_10 = arith.constant 0 : index
      %c0_11 = arith.constant 0 : index
      %12 = vector.load %arg8[%c0_10, %c0_11] : memref<16x64xf32, #tpu.memory_space<vmem>>, vector<16x64xf32>
      %c0_12 = arith.constant 0 : index
      %c0_13 = arith.constant 0 : index
      %13 = vector.load %arg5[%c0_12, %c0_13] : memref<1x64xf32, #tpu.memory_space<vmem>>, vector<1x64xf32>
      %14 = vector.broadcast %13 : vector<1x64xf32> to vector<16x64xf32>
      %15 = arith.mulf %12, %14 : vector<16x64xf32>
      %c0_14 = arith.constant 0 : index
      %c0_15 = arith.constant 0 : index
      %16 = vector.load %arg6[%c0_14, %c0_15] : memref<1x64xf32, #tpu.memory_space<vmem>>, vector<1x64xf32>
      %17 = vector.broadcast %16 : vector<1x64xf32> to vector<16x64xf32>
      %18 = arith.addf %15, %17 : vector<16x64xf32>
      %cst_16 = arith.constant 0.000000e+00 : f32
      %19 = vector.broadcast %cst_16 : f32 to vector<16x64xf32>
      %20 = arith.maximumf %18, %19 : vector<16x64xf32>
      %21 = arith.truncf %20 : vector<16x64xf32> to vector<16x64xbf16>
      %c0_17 = arith.constant 0 : index
      %c0_18 = arith.constant 0 : index
      %22 = vector.load %arg7[%c0_17, %c0_18] : memref<16x64xbf16, #tpu.memory_space<vmem>>, vector<16x64xbf16>
      tpu.vector_store %arg7[%c0_17, %c0_18], %21 {strides = array<i32>} : memref<16x64xbf16, #tpu.memory_space<vmem>>, vector<16x64xbf16>,
    } else {
    }
    return
  }
  func.func @transform_0(%arg0: i32, %arg1: i32, %arg2: i32) -> (i32, i32) {
    %c0_i32 = arith.constant 0 : i32
    return %arg0, %arg2 : i32, i32
  }
  func.func @transform_1(%arg0: i32, %arg1: i32, %arg2: i32) -> (i32, i32) {
    %c0_i32 = arith.constant 0 : i32
    return %arg2, %arg1 : i32, i32
  }
  func.func @transform_2(%arg0: i32, %arg1: i32, %arg2: i32) -> (i32, i32) {
    %c0_i32 = arith.constant 0 : i32
    %c0_i32_0 = arith.constant 0 : i32
    return %c0_i32, %arg1 : i32, i32
  }
  func.func @transform_3(%arg0: i32, %arg1: i32, %arg2: i32) -> (i32, i32) {
    %c0_i32 = arith.constant 0 : i32
    %c0_i32_0 = arith.constant 0 : i32
    return %c0_i32, %arg1 : i32, i32
  }
  func.func @transform_4(%arg0: i32, %arg1: i32, %arg2: i32) -> (i32, i32) {
    %c0_i32 = arith.constant 0 : i32
    return %arg0, %arg1 : i32, i32
  }
}

module attributes {stable_mosaic.version = 11 : i64} {
  func.func @_encoder_stack_kernel(%arg0: memref<8x256xbf16, #tpu.memory_space<vmem>>, %arg1: memref<8x1xi32, #tpu.memory_space<vmem>>, %arg2: memref<1x8xi32, #tpu.memory_space<vmem>>, %arg3: memref<1x8xf32, #tpu.memory_space<vmem>>, %arg4: memref<256x32xbf16, #tpu.memory_space<vmem>>, %arg5: memref<1x32xf32, #tpu.memory_space<vmem>>, %arg6: memref<32x96xbf16, #tpu.memory_space<vmem>>, %arg7: memref<1x96xf32, #tpu.memory_space<vmem>>, %arg8: memref<32x32xbf16, #tpu.memory_space<vmem>>, %arg9: memref<1x32xf32, #tpu.memory_space<vmem>>, %arg10: memref<1x32xf32, #tpu.memory_space<vmem>>, %arg11: memref<1x32xf32, #tpu.memory_space<vmem>>, %arg12: memref<32x64xbf16, #tpu.memory_space<vmem>>, %arg13: memref<1x64xf32, #tpu.memory_space<vmem>>, %arg14: memref<64x32xbf16, #tpu.memory_space<vmem>>, %arg15: memref<1x32xf32, #tpu.memory_space<vmem>>, %arg16: memref<1x32xf32, #tpu.memory_space<vmem>>, %arg17: memref<1x32xf32, #tpu.memory_space<vmem>>, %arg18: memref<32x96xbf16, #tpu.memory_space<vmem>>, %arg19: memref<1x96xf32, #tpu.memory_space<vmem>>, %arg20: memref<32x32xbf16, #tpu.memory_space<vmem>>, %arg21: memref<1x32xf32, #tpu.memory_space<vmem>>, %arg22: memref<1x32xf32, #tpu.memory_space<vmem>>, %arg23: memref<1x32xf32, #tpu.memory_space<vmem>>, %arg24: memref<32x64xbf16, #tpu.memory_space<vmem>>, %arg25: memref<1x64xf32, #tpu.memory_space<vmem>>, %arg26: memref<64x32xbf16, #tpu.memory_space<vmem>>, %arg27: memref<1x32xf32, #tpu.memory_space<vmem>>, %arg28: memref<1x32xf32, #tpu.memory_space<vmem>>, %arg29: memref<1x32xf32, #tpu.memory_space<vmem>>, %arg30: memref<1x32xf32, #tpu.memory_space<vmem>>, %arg31: memref<1x32xf32, #tpu.memory_space<vmem>>, %arg32: memref<8x32xbf16, #tpu.memory_space<vmem>>) attributes {dimension_semantics = [], scalar_prefetch = 0 : i64, scratch_operands = 0 : i64, tpu.core_type = #tpu.core_type<tc>} {
    %c0 = arith.constant 0 : index
    %c0_0 = arith.constant 0 : index
    %0 = vector.load %arg1[%c0, %c0_0] : memref<8x1xi32, #tpu.memory_space<vmem>>, vector<8x1xi32>
    %c0_1 = arith.constant 0 : index
    %c0_2 = arith.constant 0 : index
    %1 = vector.load %arg2[%c0_1, %c0_2] : memref<1x8xi32, #tpu.memory_space<vmem>>, vector<1x8xi32>
    %2 = vector.broadcast %0 : vector<8x1xi32> to vector<8x8xi32>
    %3 = vector.broadcast %1 : vector<1x8xi32> to vector<8x8xi32>
    %4 = arith.cmpi eq, %2, %3 : vector<8x8xi32>
    %cst = arith.constant 0.000000e+00 : f32
    %cst_3 = arith.constant -1.000000e+09 : f32
    %5 = vector.broadcast %cst : f32 to vector<8x8xf32>
    %6 = vector.broadcast %cst_3 : f32 to vector<8x8xf32>
    %7 = arith.select %4, %5, %6 : vector<8x8xi1>, vector<8x8xf32>
    %c0_4 = arith.constant 0 : index
    %c0_5 = arith.constant 0 : index
    %8 = vector.load %arg3[%c0_4, %c0_5] : memref<1x8xf32, #tpu.memory_space<vmem>>, vector<1x8xf32>
    %9 = vector.broadcast %8 : vector<1x8xf32> to vector<8x8xf32>
    %10 = arith.addf %7, %9 : vector<8x8xf32>
    %c0_6 = arith.constant 0 : index
    %c0_7 = arith.constant 0 : index
    %11 = vector.load %arg0[%c0_6, %c0_7] : memref<8x256xbf16, #tpu.memory_space<vmem>>, vector<8x256xbf16>
    %c0_8 = arith.constant 0 : index
    %c0_9 = arith.constant 0 : index
    %12 = vector.load %arg4[%c0_8, %c0_9] : memref<256x32xbf16, #tpu.memory_space<vmem>>, vector<256x32xbf16>
    %cst_10 = arith.constant dense<0.000000e+00> : vector<8x32xf32>
    %13 = tpu.matmul %11, %12, %cst_10 {dimension_numbers = #tpu.dot_dimension_numbers<[1], [0], [0], [1], [0, 0, 1, 1], [], []>} : vector<8x256xbf16>, vector<256x32xbf16>, vector<8x32xf32> -> vector<8x32xf32>
    %c0_11 = arith.constant 0 : index
    %c0_12 = arith.constant 0 : index
    %14 = vector.load %arg5[%c0_11, %c0_12] : memref<1x32xf32, #tpu.memory_space<vmem>>, vector<1x32xf32>
    %15 = vector.broadcast %14 : vector<1x32xf32> to vector<8x32xf32>
    %16 = arith.addf %13, %15 : vector<8x32xf32>
    %17 = arith.truncf %16 : vector<8x32xf32> to vector<8x32xbf16>
    %c0_13 = arith.constant 0 : index
    %c0_14 = arith.constant 0 : index
    %18 = vector.load %arg6[%c0_13, %c0_14] : memref<32x96xbf16, #tpu.memory_space<vmem>>, vector<32x96xbf16>
    %cst_15 = arith.constant dense<0.000000e+00> : vector<8x96xf32>
    %19 = tpu.matmul %17, %18, %cst_15 {dimension_numbers = #tpu.dot_dimension_numbers<[1], [0], [0], [1], [0, 0, 1, 1], [], []>} : vector<8x32xbf16>, vector<32x96xbf16>, vector<8x96xf32> -> vector<8x96xf32>
    %c0_16 = arith.constant 0 : index
    %c0_17 = arith.constant 0 : index
    %20 = vector.load %arg7[%c0_16, %c0_17] : memref<1x96xf32, #tpu.memory_space<vmem>>, vector<1x96xf32>
    %21 = vector.broadcast %20 : vector<1x96xf32> to vector<8x96xf32>
    %22 = arith.addf %19, %21 : vector<8x96xf32>
    %23 = arith.truncf %22 : vector<8x96xf32> to vector<8x96xbf16>
    %24 = vector.extract_strided_slice %23 {offsets = [0, 0], sizes = [8, 32], strides = [1, 1]} : vector<8x96xbf16> to vector<8x32xbf16>
    %25 = vector.extract_strided_slice %23 {offsets = [0, 32], sizes = [8, 64], strides = [1, 1]} : vector<8x96xbf16> to vector<8x64xbf16>
    %c0_18 = arith.constant 0 : index
    %c0_19 = arith.constant 0 : index
    %26 = vector.load %arg8[%c0_18, %c0_19] : memref<32x32xbf16, #tpu.memory_space<vmem>>, vector<32x32xbf16>
    %c0_20 = arith.constant 0 : index
    %c0_21 = arith.constant 0 : index
    %27 = vector.load %arg9[%c0_20, %c0_21] : memref<1x32xf32, #tpu.memory_space<vmem>>, vector<1x32xf32>
    %28 = vector.extract_strided_slice %24 {offsets = [0, 0], sizes = [8, 8], strides = [1, 1]} : vector<8x32xbf16> to vector<8x8xbf16>
    %29 = vector.extract_strided_slice %25 {offsets = [0, 0], sizes = [8, 8], strides = [1, 1]} : vector<8x64xbf16> to vector<8x8xbf16>
    %30 = vector.extract_strided_slice %25 {offsets = [0, 32], sizes = [8, 8], strides = [1, 1]} : vector<8x64xbf16> to vector<8x8xbf16>
    %cst_22 = arith.constant dense<0.000000e+00> : vector<8x8xf32>
    %31 = tpu.matmul %28, %29, %cst_22 {dimension_numbers = #tpu.dot_dimension_numbers<[1], [1], [0], [0], [0, 0, 1, 0], [], []>} : vector<8x8xbf16>, vector<8x8xbf16>, vector<8x8xf32> -> vector<8x8xf32>
    %32 = arith.addf %31, %10 : vector<8x8xf32>
    %cst_23 = arith.constant dense<0xFF800000> : vector<8xf32>
    %33 = vector.multi_reduction <maximumf>, %32, %cst_23 [1] : vector<8x8xf32> to vector<8xf32>
    %34 = vector.shape_cast %33 : vector<8xf32> to vector<8x1xf32>
    %35 = vector.broadcast %34 : vector<8x1xf32> to vector<8x8xf32>
    %36 = arith.subf %32, %35 : vector<8x8xf32>
    %37 = math.exp %36 : vector<8x8xf32>
    %cst_24 = arith.constant dense<0.000000e+00> : vector<8xf32>
    %38 = vector.multi_reduction <add>, %37, %cst_24 [1] : vector<8x8xf32> to vector<8xf32>
    %39 = vector.shape_cast %38 : vector<8xf32> to vector<8x1xf32>
    %40 = arith.truncf %37 : vector<8x8xf32> to vector<8x8xbf16>
    %cst_25 = arith.constant dense<0.000000e+00> : vector<8x8xf32>
    %41 = tpu.matmul %40, %30, %cst_25 {dimension_numbers = #tpu.dot_dimension_numbers<[1], [0], [0], [1], [0, 0, 1, 1], [], []>} : vector<8x8xbf16>, vector<8x8xbf16>, vector<8x8xf32> -> vector<8x8xf32>
    %42 = tpu.reciprocal %39 : vector<8x1xf32> -> vector<8x1xf32>
    %43 = vector.broadcast %42 : vector<8x1xf32> to vector<8x8xf32>
    %44 = arith.mulf %41, %43 : vector<8x8xf32>
    %45 = arith.truncf %44 : vector<8x8xf32> to vector<8x8xbf16>
    %46 = vector.extract_strided_slice %26 {offsets = [0, 0], sizes = [8, 32], strides = [1, 1]} : vector<32x32xbf16> to vector<8x32xbf16>
    %cst_26 = arith.constant dense<0.000000e+00> : vector<8x32xf32>
    %47 = tpu.matmul %45, %46, %cst_26 {dimension_numbers = #tpu.dot_dimension_numbers<[1], [0], [0], [1], [0, 0, 1, 1], [], []>} : vector<8x8xbf16>, vector<8x32xbf16>, vector<8x32xf32> -> vector<8x32xf32>
    %48 = vector.extract_strided_slice %24 {offsets = [0, 8], sizes = [8, 8], strides = [1, 1]} : vector<8x32xbf16> to vector<8x8xbf16>
    %49 = vector.extract_strided_slice %25 {offsets = [0, 8], sizes = [8, 8], strides = [1, 1]} : vector<8x64xbf16> to vector<8x8xbf16>
    %50 = vector.extract_strided_slice %25 {offsets = [0, 40], sizes = [8, 8], strides = [1, 1]} : vector<8x64xbf16> to vector<8x8xbf16>
    %cst_27 = arith.constant dense<0.000000e+00> : vector<8x8xf32>
    %51 = tpu.matmul %48, %49, %cst_27 {dimension_numbers = #tpu.dot_dimension_numbers<[1], [1], [0], [0], [0, 0, 1, 0], [], []>} : vector<8x8xbf16>, vector<8x8xbf16>, vector<8x8xf32> -> vector<8x8xf32>
    %52 = arith.addf %51, %10 : vector<8x8xf32>
    %cst_28 = arith.constant dense<0xFF800000> : vector<8xf32>
    %53 = vector.multi_reduction <maximumf>, %52, %cst_28 [1] : vector<8x8xf32> to vector<8xf32>
    %54 = vector.shape_cast %53 : vector<8xf32> to vector<8x1xf32>
    %55 = vector.broadcast %54 : vector<8x1xf32> to vector<8x8xf32>
    %56 = arith.subf %52, %55 : vector<8x8xf32>
    %57 = math.exp %56 : vector<8x8xf32>
    %cst_29 = arith.constant dense<0.000000e+00> : vector<8xf32>
    %58 = vector.multi_reduction <add>, %57, %cst_29 [1] : vector<8x8xf32> to vector<8xf32>
    %59 = vector.shape_cast %58 : vector<8xf32> to vector<8x1xf32>
    %60 = arith.truncf %57 : vector<8x8xf32> to vector<8x8xbf16>
    %cst_30 = arith.constant dense<0.000000e+00> : vector<8x8xf32>
    %61 = tpu.matmul %60, %50, %cst_30 {dimension_numbers = #tpu.dot_dimension_numbers<[1], [0], [0], [1], [0, 0, 1, 1], [], []>} : vector<8x8xbf16>, vector<8x8xbf16>, vector<8x8xf32> -> vector<8x8xf32>
    %62 = tpu.reciprocal %59 : vector<8x1xf32> -> vector<8x1xf32>
    %63 = vector.broadcast %62 : vector<8x1xf32> to vector<8x8xf32>
    %64 = arith.mulf %61, %63 : vector<8x8xf32>
    %65 = arith.truncf %64 : vector<8x8xf32> to vector<8x8xbf16>
    %66 = vector.extract_strided_slice %26 {offsets = [8, 0], sizes = [8, 32], strides = [1, 1]} : vector<32x32xbf16> to vector<8x32xbf16>
    %cst_31 = arith.constant dense<0.000000e+00> : vector<8x32xf32>
    %67 = tpu.matmul %65, %66, %cst_31 {dimension_numbers = #tpu.dot_dimension_numbers<[1], [0], [0], [1], [0, 0, 1, 1], [], []>} : vector<8x8xbf16>, vector<8x32xbf16>, vector<8x32xf32> -> vector<8x32xf32>
    %68 = arith.addf %47, %67 : vector<8x32xf32>
    %69 = vector.extract_strided_slice %24 {offsets = [0, 16], sizes = [8, 8], strides = [1, 1]} : vector<8x32xbf16> to vector<8x8xbf16>
    %70 = vector.extract_strided_slice %25 {offsets = [0, 16], sizes = [8, 8], strides = [1, 1]} : vector<8x64xbf16> to vector<8x8xbf16>
    %71 = vector.extract_strided_slice %25 {offsets = [0, 48], sizes = [8, 8], strides = [1, 1]} : vector<8x64xbf16> to vector<8x8xbf16>
    %cst_32 = arith.constant dense<0.000000e+00> : vector<8x8xf32>
    %72 = tpu.matmul %69, %70, %cst_32 {dimension_numbers = #tpu.dot_dimension_numbers<[1], [1], [0], [0], [0, 0, 1, 0], [], []>} : vector<8x8xbf16>, vector<8x8xbf16>, vector<8x8xf32> -> vector<8x8xf32>
    %73 = arith.addf %72, %10 : vector<8x8xf32>
    %cst_33 = arith.constant dense<0xFF800000> : vector<8xf32>
    %74 = vector.multi_reduction <maximumf>, %73, %cst_33 [1] : vector<8x8xf32> to vector<8xf32>
    %75 = vector.shape_cast %74 : vector<8xf32> to vector<8x1xf32>
    %76 = vector.broadcast %75 : vector<8x1xf32> to vector<8x8xf32>
    %77 = arith.subf %73, %76 : vector<8x8xf32>
    %78 = math.exp %77 : vector<8x8xf32>
    %cst_34 = arith.constant dense<0.000000e+00> : vector<8xf32>
    %79 = vector.multi_reduction <add>, %78, %cst_34 [1] : vector<8x8xf32> to vector<8xf32>
    %80 = vector.shape_cast %79 : vector<8xf32> to vector<8x1xf32>
    %81 = arith.truncf %78 : vector<8x8xf32> to vector<8x8xbf16>
    %cst_35 = arith.constant dense<0.000000e+00> : vector<8x8xf32>
    %82 = tpu.matmul %81, %71, %cst_35 {dimension_numbers = #tpu.dot_dimension_numbers<[1], [0], [0], [1], [0, 0, 1, 1], [], []>} : vector<8x8xbf16>, vector<8x8xbf16>, vector<8x8xf32> -> vector<8x8xf32>
    %83 = tpu.reciprocal %80 : vector<8x1xf32> -> vector<8x1xf32>
    %84 = vector.broadcast %83 : vector<8x1xf32> to vector<8x8xf32>
    %85 = arith.mulf %82, %84 : vector<8x8xf32>
    %86 = arith.truncf %85 : vector<8x8xf32> to vector<8x8xbf16>
    %87 = vector.extract_strided_slice %26 {offsets = [16, 0], sizes = [8, 32], strides = [1, 1]} : vector<32x32xbf16> to vector<8x32xbf16>
    %cst_36 = arith.constant dense<0.000000e+00> : vector<8x32xf32>
    %88 = tpu.matmul %86, %87, %cst_36 {dimension_numbers = #tpu.dot_dimension_numbers<[1], [0], [0], [1], [0, 0, 1, 1], [], []>} : vector<8x8xbf16>, vector<8x32xbf16>, vector<8x32xf32> -> vector<8x32xf32>
    %89 = arith.addf %68, %88 : vector<8x32xf32>
    %90 = vector.extract_strided_slice %24 {offsets = [0, 24], sizes = [8, 8], strides = [1, 1]} : vector<8x32xbf16> to vector<8x8xbf16>
    %91 = vector.extract_strided_slice %25 {offsets = [0, 24], sizes = [8, 8], strides = [1, 1]} : vector<8x64xbf16> to vector<8x8xbf16>
    %92 = vector.extract_strided_slice %25 {offsets = [0, 56], sizes = [8, 8], strides = [1, 1]} : vector<8x64xbf16> to vector<8x8xbf16>
    %cst_37 = arith.constant dense<0.000000e+00> : vector<8x8xf32>
    %93 = tpu.matmul %90, %91, %cst_37 {dimension_numbers = #tpu.dot_dimension_numbers<[1], [1], [0], [0], [0, 0, 1, 0], [], []>} : vector<8x8xbf16>, vector<8x8xbf16>, vector<8x8xf32> -> vector<8x8xf32>
    %94 = arith.addf %93, %10 : vector<8x8xf32>
    %cst_38 = arith.constant dense<0xFF800000> : vector<8xf32>
    %95 = vector.multi_reduction <maximumf>, %94, %cst_38 [1] : vector<8x8xf32> to vector<8xf32>
    %96 = vector.shape_cast %95 : vector<8xf32> to vector<8x1xf32>
    %97 = vector.broadcast %96 : vector<8x1xf32> to vector<8x8xf32>
    %98 = arith.subf %94, %97 : vector<8x8xf32>
    %99 = math.exp %98 : vector<8x8xf32>
    %cst_39 = arith.constant dense<0.000000e+00> : vector<8xf32>
    %100 = vector.multi_reduction <add>, %99, %cst_39 [1] : vector<8x8xf32> to vector<8xf32>
    %101 = vector.shape_cast %100 : vector<8xf32> to vector<8x1xf32>
    %102 = arith.truncf %99 : vector<8x8xf32> to vector<8x8xbf16>
    %cst_40 = arith.constant dense<0.000000e+00> : vector<8x8xf32>
    %103 = tpu.matmul %102, %92, %cst_40 {dimension_numbers = #tpu.dot_dimension_numbers<[1], [0], [0], [1], [0, 0, 1, 1], [], []>} : vector<8x8xbf16>, vector<8x8xbf16>, vector<8x8xf32> -> vector<8x8xf32>
    %104 = tpu.reciprocal %101 : vector<8x1xf32> -> vector<8x1xf32>
    %105 = vector.broadcast %104 : vector<8x1xf32> to vector<8x8xf32>
    %106 = arith.mulf %103, %105 : vector<8x8xf32>
    %107 = arith.truncf %106 : vector<8x8xf32> to vector<8x8xbf16>
    %108 = vector.extract_strided_slice %26 {offsets = [24, 0], sizes = [8, 32], strides = [1, 1]} : vector<32x32xbf16> to vector<8x32xbf16>
    %cst_41 = arith.constant dense<0.000000e+00> : vector<8x32xf32>
    %109 = tpu.matmul %107, %108, %cst_41 {dimension_numbers = #tpu.dot_dimension_numbers<[1], [0], [0], [1], [0, 0, 1, 1], [], []>} : vector<8x8xbf16>, vector<8x32xbf16>, vector<8x32xf32> -> vector<8x32xf32>
    %110 = arith.addf %89, %109 : vector<8x32xf32>
    %111 = vector.broadcast %27 : vector<1x32xf32> to vector<8x32xf32>
    %112 = arith.addf %110, %111 : vector<8x32xf32>
    %113 = arith.addf %16, %112 : vector<8x32xf32>
    %c0_42 = arith.constant 0 : index
    %c0_43 = arith.constant 0 : index
    %114 = vector.load %arg10[%c0_42, %c0_43] : memref<1x32xf32, #tpu.memory_space<vmem>>, vector<1x32xf32>
    %c0_44 = arith.constant 0 : index
    %c0_45 = arith.constant 0 : index
    %115 = vector.load %arg11[%c0_44, %c0_45] : memref<1x32xf32, #tpu.memory_space<vmem>>, vector<1x32xf32>
    %cst_46 = arith.constant dense<0.000000e+00> : vector<8xf32>
    %116 = vector.multi_reduction <add>, %113, %cst_46 [1] : vector<8x32xf32> to vector<8xf32>
    %117 = vector.shape_cast %116 : vector<8xf32> to vector<8x1xf32>
    %cst_47 = arith.constant 3.200000e+01 : f32
    %118 = vector.broadcast %cst_47 : f32 to vector<8x1xf32>
    %119 = arith.divf %117, %118 : vector<8x1xf32>
    %120 = vector.broadcast %119 : vector<8x1xf32> to vector<8x32xf32>
    %121 = arith.subf %113, %120 : vector<8x32xf32>
    %122 = arith.mulf %121, %121 : vector<8x32xf32>
    %cst_48 = arith.constant dense<0.000000e+00> : vector<8xf32>
    %123 = vector.multi_reduction <add>, %122, %cst_48 [1] : vector<8x32xf32> to vector<8xf32>
    %124 = vector.shape_cast %123 : vector<8xf32> to vector<8x1xf32>
    %cst_49 = arith.constant 3.200000e+01 : f32
    %125 = vector.broadcast %cst_49 : f32 to vector<8x1xf32>
    %126 = arith.divf %124, %125 : vector<8x1xf32>
    %127 = vector.broadcast %119 : vector<8x1xf32> to vector<8x32xf32>
    %128 = arith.subf %113, %127 : vector<8x32xf32>
    %cst_50 = arith.constant 9.99999974E-6 : f32
    %129 = vector.broadcast %cst_50 : f32 to vector<8x1xf32>
    %130 = arith.addf %126, %129 : vector<8x1xf32>
    %131 = math.rsqrt %130 : vector<8x1xf32>
    %132 = vector.broadcast %131 : vector<8x1xf32> to vector<8x32xf32>
    %133 = arith.mulf %128, %132 : vector<8x32xf32>
    %134 = vector.broadcast %114 : vector<1x32xf32> to vector<8x32xf32>
    %135 = arith.mulf %133, %134 : vector<8x32xf32>
    %136 = vector.broadcast %115 : vector<1x32xf32> to vector<8x32xf32>
    %137 = arith.addf %135, %136 : vector<8x32xf32>
    %138 = arith.truncf %137 : vector<8x32xf32> to vector<8x32xbf16>
    %c0_51 = arith.constant 0 : index
    %c0_52 = arith.constant 0 : index
    %139 = vector.load %arg12[%c0_51, %c0_52] : memref<32x64xbf16, #tpu.memory_space<vmem>>, vector<32x64xbf16>
    %cst_53 = arith.constant dense<0.000000e+00> : vector<8x64xf32>
    %140 = tpu.matmul %138, %139, %cst_53 {dimension_numbers = #tpu.dot_dimension_numbers<[1], [0], [0], [1], [0, 0, 1, 1], [], []>} : vector<8x32xbf16>, vector<32x64xbf16>, vector<8x64xf32> -> vector<8x64xf32>
    %c0_54 = arith.constant 0 : index
    %c0_55 = arith.constant 0 : index
    %141 = vector.load %arg13[%c0_54, %c0_55] : memref<1x64xf32, #tpu.memory_space<vmem>>, vector<1x64xf32>
    %142 = vector.broadcast %141 : vector<1x64xf32> to vector<8x64xf32>
    %143 = arith.addf %140, %142 : vector<8x64xf32>
    %cst_56 = arith.constant 0.000000e+00 : f32
    %144 = vector.broadcast %cst_56 : f32 to vector<8x64xf32>
    %145 = arith.maximumf %143, %144 : vector<8x64xf32>
    %146 = arith.truncf %145 : vector<8x64xf32> to vector<8x64xbf16>
    %c0_57 = arith.constant 0 : index
    %c0_58 = arith.constant 0 : index
    %147 = vector.load %arg14[%c0_57, %c0_58] : memref<64x32xbf16, #tpu.memory_space<vmem>>, vector<64x32xbf16>
    %cst_59 = arith.constant dense<0.000000e+00> : vector<8x32xf32>
    %148 = tpu.matmul %146, %147, %cst_59 {dimension_numbers = #tpu.dot_dimension_numbers<[1], [0], [0], [1], [0, 0, 1, 1], [], []>} : vector<8x64xbf16>, vector<64x32xbf16>, vector<8x32xf32> -> vector<8x32xf32>
    %c0_60 = arith.constant 0 : index
    %c0_61 = arith.constant 0 : index
    %149 = vector.load %arg15[%c0_60, %c0_61] : memref<1x32xf32, #tpu.memory_space<vmem>>, vector<1x32xf32>
    %150 = vector.broadcast %149 : vector<1x32xf32> to vector<8x32xf32>
    %151 = arith.addf %148, %150 : vector<8x32xf32>
    %152 = arith.addf %137, %151 : vector<8x32xf32>
    %c0_62 = arith.constant 0 : index
    %c0_63 = arith.constant 0 : index
    %153 = vector.load %arg16[%c0_62, %c0_63] : memref<1x32xf32, #tpu.memory_space<vmem>>, vector<1x32xf32>
    %c0_64 = arith.constant 0 : index
    %c0_65 = arith.constant 0 : index
    %154 = vector.load %arg17[%c0_64, %c0_65] : memref<1x32xf32, #tpu.memory_space<vmem>>, vector<1x32xf32>
    %cst_66 = arith.constant dense<0.000000e+00> : vector<8xf32>
    %155 = vector.multi_reduction <add>, %152, %cst_66 [1] : vector<8x32xf32> to vector<8xf32>
    %156 = vector.shape_cast %155 : vector<8xf32> to vector<8x1xf32>
    %cst_67 = arith.constant 3.200000e+01 : f32
    %157 = vector.broadcast %cst_67 : f32 to vector<8x1xf32>
    %158 = arith.divf %156, %157 : vector<8x1xf32>
    %159 = vector.broadcast %158 : vector<8x1xf32> to vector<8x32xf32>
    %160 = arith.subf %152, %159 : vector<8x32xf32>
    %161 = arith.mulf %160, %160 : vector<8x32xf32>
    %cst_68 = arith.constant dense<0.000000e+00> : vector<8xf32>
    %162 = vector.multi_reduction <add>, %161, %cst_68 [1] : vector<8x32xf32> to vector<8xf32>
    %163 = vector.shape_cast %162 : vector<8xf32> to vector<8x1xf32>
    %cst_69 = arith.constant 3.200000e+01 : f32
    %164 = vector.broadcast %cst_69 : f32 to vector<8x1xf32>
    %165 = arith.divf %163, %164 : vector<8x1xf32>
    %166 = vector.broadcast %158 : vector<8x1xf32> to vector<8x32xf32>
    %167 = arith.subf %152, %166 : vector<8x32xf32>
    %cst_70 = arith.constant 9.99999974E-6 : f32
    %168 = vector.broadcast %cst_70 : f32 to vector<8x1xf32>
    %169 = arith.addf %165, %168 : vector<8x1xf32>
    %170 = math.rsqrt %169 : vector<8x1xf32>
    %171 = vector.broadcast %170 : vector<8x1xf32> to vector<8x32xf32>
    %172 = arith.mulf %167, %171 : vector<8x32xf32>
    %173 = vector.broadcast %153 : vector<1x32xf32> to vector<8x32xf32>
    %174 = arith.mulf %172, %173 : vector<8x32xf32>
    %175 = vector.broadcast %154 : vector<1x32xf32> to vector<8x32xf32>
    %176 = arith.addf %174, %175 : vector<8x32xf32>
    %177 = arith.truncf %176 : vector<8x32xf32> to vector<8x32xbf16>
    %c0_71 = arith.constant 0 : index
    %c0_72 = arith.constant 0 : index
    %178 = vector.load %arg18[%c0_71, %c0_72] : memref<32x96xbf16, #tpu.memory_space<vmem>>, vector<32x96xbf16>
    %cst_73 = arith.constant dense<0.000000e+00> : vector<8x96xf32>
    %179 = tpu.matmul %177, %178, %cst_73 {dimension_numbers = #tpu.dot_dimension_numbers<[1], [0], [0], [1], [0, 0, 1, 1], [], []>} : vector<8x32xbf16>, vector<32x96xbf16>, vector<8x96xf32> -> vector<8x96xf32>
    %c0_74 = arith.constant 0 : index
    %c0_75 = arith.constant 0 : index
    %180 = vector.load %arg19[%c0_74, %c0_75] : memref<1x96xf32, #tpu.memory_space<vmem>>, vector<1x96xf32>
    %181 = vector.broadcast %180 : vector<1x96xf32> to vector<8x96xf32>
    %182 = arith.addf %179, %181 : vector<8x96xf32>
    %183 = arith.truncf %182 : vector<8x96xf32> to vector<8x96xbf16>
    %184 = vector.extract_strided_slice %183 {offsets = [0, 0], sizes = [8, 32], strides = [1, 1]} : vector<8x96xbf16> to vector<8x32xbf16>
    %185 = vector.extract_strided_slice %183 {offsets = [0, 32], sizes = [8, 64], strides = [1, 1]} : vector<8x96xbf16> to vector<8x64xbf16>
    %c0_76 = arith.constant 0 : index
    %c0_77 = arith.constant 0 : index
    %186 = vector.load %arg20[%c0_76, %c0_77] : memref<32x32xbf16, #tpu.memory_space<vmem>>, vector<32x32xbf16>
    %c0_78 = arith.constant 0 : index
    %c0_79 = arith.constant 0 : index
    %187 = vector.load %arg21[%c0_78, %c0_79] : memref<1x32xf32, #tpu.memory_space<vmem>>, vector<1x32xf32>
    %188 = vector.extract_strided_slice %184 {offsets = [0, 0], sizes = [8, 8], strides = [1, 1]} : vector<8x32xbf16> to vector<8x8xbf16>
    %189 = vector.extract_strided_slice %185 {offsets = [0, 0], sizes = [8, 8], strides = [1, 1]} : vector<8x64xbf16> to vector<8x8xbf16>
    %190 = vector.extract_strided_slice %185 {offsets = [0, 32], sizes = [8, 8], strides = [1, 1]} : vector<8x64xbf16> to vector<8x8xbf16>
    %cst_80 = arith.constant dense<0.000000e+00> : vector<8x8xf32>
    %191 = tpu.matmul %188, %189, %cst_80 {dimension_numbers = #tpu.dot_dimension_numbers<[1], [1], [0], [0], [0, 0, 1, 0], [], []>} : vector<8x8xbf16>, vector<8x8xbf16>, vector<8x8xf32> -> vector<8x8xf32>
    %192 = arith.addf %191, %10 : vector<8x8xf32>
    %cst_81 = arith.constant dense<0xFF800000> : vector<8xf32>
    %193 = vector.multi_reduction <maximumf>, %192, %cst_81 [1] : vector<8x8xf32> to vector<8xf32>
    %194 = vector.shape_cast %193 : vector<8xf32> to vector<8x1xf32>
    %195 = vector.broadcast %194 : vector<8x1xf32> to vector<8x8xf32>
    %196 = arith.subf %192, %195 : vector<8x8xf32>
    %197 = math.exp %196 : vector<8x8xf32>
    %cst_82 = arith.constant dense<0.000000e+00> : vector<8xf32>
    %198 = vector.multi_reduction <add>, %197, %cst_82 [1] : vector<8x8xf32> to vector<8xf32>
    %199 = vector.shape_cast %198 : vector<8xf32> to vector<8x1xf32>
    %200 = arith.truncf %197 : vector<8x8xf32> to vector<8x8xbf16>
    %cst_83 = arith.constant dense<0.000000e+00> : vector<8x8xf32>
    %201 = tpu.matmul %200, %190, %cst_83 {dimension_numbers = #tpu.dot_dimension_numbers<[1], [0], [0], [1], [0, 0, 1, 1], [], []>} : vector<8x8xbf16>, vector<8x8xbf16>, vector<8x8xf32> -> vector<8x8xf32>
    %202 = tpu.reciprocal %199 : vector<8x1xf32> -> vector<8x1xf32>
    %203 = vector.broadcast %202 : vector<8x1xf32> to vector<8x8xf32>
    %204 = arith.mulf %201, %203 : vector<8x8xf32>
    %205 = arith.truncf %204 : vector<8x8xf32> to vector<8x8xbf16>
    %206 = vector.extract_strided_slice %186 {offsets = [0, 0], sizes = [8, 32], strides = [1, 1]} : vector<32x32xbf16> to vector<8x32xbf16>
    %cst_84 = arith.constant dense<0.000000e+00> : vector<8x32xf32>
    %207 = tpu.matmul %205, %206, %cst_84 {dimension_numbers = #tpu.dot_dimension_numbers<[1], [0], [0], [1], [0, 0, 1, 1], [], []>} : vector<8x8xbf16>, vector<8x32xbf16>, vector<8x32xf32> -> vector<8x32xf32>
    %208 = vector.extract_strided_slice %184 {offsets = [0, 8], sizes = [8, 8], strides = [1, 1]} : vector<8x32xbf16> to vector<8x8xbf16>
    %209 = vector.extract_strided_slice %185 {offsets = [0, 8], sizes = [8, 8], strides = [1, 1]} : vector<8x64xbf16> to vector<8x8xbf16>
    %210 = vector.extract_strided_slice %185 {offsets = [0, 40], sizes = [8, 8], strides = [1, 1]} : vector<8x64xbf16> to vector<8x8xbf16>
    %cst_85 = arith.constant dense<0.000000e+00> : vector<8x8xf32>
    %211 = tpu.matmul %208, %209, %cst_85 {dimension_numbers = #tpu.dot_dimension_numbers<[1], [1], [0], [0], [0, 0, 1, 0], [], []>} : vector<8x8xbf16>, vector<8x8xbf16>, vector<8x8xf32> -> vector<8x8xf32>
    %212 = arith.addf %211, %10 : vector<8x8xf32>
    %cst_86 = arith.constant dense<0xFF800000> : vector<8xf32>
    %213 = vector.multi_reduction <maximumf>, %212, %cst_86 [1] : vector<8x8xf32> to vector<8xf32>
    %214 = vector.shape_cast %213 : vector<8xf32> to vector<8x1xf32>
    %215 = vector.broadcast %214 : vector<8x1xf32> to vector<8x8xf32>
    %216 = arith.subf %212, %215 : vector<8x8xf32>
    %217 = math.exp %216 : vector<8x8xf32>
    %cst_87 = arith.constant dense<0.000000e+00> : vector<8xf32>
    %218 = vector.multi_reduction <add>, %217, %cst_87 [1] : vector<8x8xf32> to vector<8xf32>
    %219 = vector.shape_cast %218 : vector<8xf32> to vector<8x1xf32>
    %220 = arith.truncf %217 : vector<8x8xf32> to vector<8x8xbf16>
    %cst_88 = arith.constant dense<0.000000e+00> : vector<8x8xf32>
    %221 = tpu.matmul %220, %210, %cst_88 {dimension_numbers = #tpu.dot_dimension_numbers<[1], [0], [0], [1], [0, 0, 1, 1], [], []>} : vector<8x8xbf16>, vector<8x8xbf16>, vector<8x8xf32> -> vector<8x8xf32>
    %222 = tpu.reciprocal %219 : vector<8x1xf32> -> vector<8x1xf32>
    %223 = vector.broadcast %222 : vector<8x1xf32> to vector<8x8xf32>
    %224 = arith.mulf %221, %223 : vector<8x8xf32>
    %225 = arith.truncf %224 : vector<8x8xf32> to vector<8x8xbf16>
    %226 = vector.extract_strided_slice %186 {offsets = [8, 0], sizes = [8, 32], strides = [1, 1]} : vector<32x32xbf16> to vector<8x32xbf16>
    %cst_89 = arith.constant dense<0.000000e+00> : vector<8x32xf32>
    %227 = tpu.matmul %225, %226, %cst_89 {dimension_numbers = #tpu.dot_dimension_numbers<[1], [0], [0], [1], [0, 0, 1, 1], [], []>} : vector<8x8xbf16>, vector<8x32xbf16>, vector<8x32xf32> -> vector<8x32xf32>
    %228 = arith.addf %207, %227 : vector<8x32xf32>
    %229 = vector.extract_strided_slice %184 {offsets = [0, 16], sizes = [8, 8], strides = [1, 1]} : vector<8x32xbf16> to vector<8x8xbf16>
    %230 = vector.extract_strided_slice %185 {offsets = [0, 16], sizes = [8, 8], strides = [1, 1]} : vector<8x64xbf16> to vector<8x8xbf16>
    %231 = vector.extract_strided_slice %185 {offsets = [0, 48], sizes = [8, 8], strides = [1, 1]} : vector<8x64xbf16> to vector<8x8xbf16>
    %cst_90 = arith.constant dense<0.000000e+00> : vector<8x8xf32>
    %232 = tpu.matmul %229, %230, %cst_90 {dimension_numbers = #tpu.dot_dimension_numbers<[1], [1], [0], [0], [0, 0, 1, 0], [], []>} : vector<8x8xbf16>, vector<8x8xbf16>, vector<8x8xf32> -> vector<8x8xf32>
    %233 = arith.addf %232, %10 : vector<8x8xf32>
    %cst_91 = arith.constant dense<0xFF800000> : vector<8xf32>
    %234 = vector.multi_reduction <maximumf>, %233, %cst_91 [1] : vector<8x8xf32> to vector<8xf32>
    %235 = vector.shape_cast %234 : vector<8xf32> to vector<8x1xf32>
    %236 = vector.broadcast %235 : vector<8x1xf32> to vector<8x8xf32>
    %237 = arith.subf %233, %236 : vector<8x8xf32>
    %238 = math.exp %237 : vector<8x8xf32>
    %cst_92 = arith.constant dense<0.000000e+00> : vector<8xf32>
    %239 = vector.multi_reduction <add>, %238, %cst_92 [1] : vector<8x8xf32> to vector<8xf32>
    %240 = vector.shape_cast %239 : vector<8xf32> to vector<8x1xf32>
    %241 = arith.truncf %238 : vector<8x8xf32> to vector<8x8xbf16>
    %cst_93 = arith.constant dense<0.000000e+00> : vector<8x8xf32>
    %242 = tpu.matmul %241, %231, %cst_93 {dimension_numbers = #tpu.dot_dimension_numbers<[1], [0], [0], [1], [0, 0, 1, 1], [], []>} : vector<8x8xbf16>, vector<8x8xbf16>, vector<8x8xf32> -> vector<8x8xf32>
    %243 = tpu.reciprocal %240 : vector<8x1xf32> -> vector<8x1xf32>
    %244 = vector.broadcast %243 : vector<8x1xf32> to vector<8x8xf32>
    %245 = arith.mulf %242, %244 : vector<8x8xf32>
    %246 = arith.truncf %245 : vector<8x8xf32> to vector<8x8xbf16>
    %247 = vector.extract_strided_slice %186 {offsets = [16, 0], sizes = [8, 32], strides = [1, 1]} : vector<32x32xbf16> to vector<8x32xbf16>
    %cst_94 = arith.constant dense<0.000000e+00> : vector<8x32xf32>
    %248 = tpu.matmul %246, %247, %cst_94 {dimension_numbers = #tpu.dot_dimension_numbers<[1], [0], [0], [1], [0, 0, 1, 1], [], []>} : vector<8x8xbf16>, vector<8x32xbf16>, vector<8x32xf32> -> vector<8x32xf32>
    %249 = arith.addf %228, %248 : vector<8x32xf32>
    %250 = vector.extract_strided_slice %184 {offsets = [0, 24], sizes = [8, 8], strides = [1, 1]} : vector<8x32xbf16> to vector<8x8xbf16>
    %251 = vector.extract_strided_slice %185 {offsets = [0, 24], sizes = [8, 8], strides = [1, 1]} : vector<8x64xbf16> to vector<8x8xbf16>
    %252 = vector.extract_strided_slice %185 {offsets = [0, 56], sizes = [8, 8], strides = [1, 1]} : vector<8x64xbf16> to vector<8x8xbf16>
    %cst_95 = arith.constant dense<0.000000e+00> : vector<8x8xf32>
    %253 = tpu.matmul %250, %251, %cst_95 {dimension_numbers = #tpu.dot_dimension_numbers<[1], [1], [0], [0], [0, 0, 1, 0], [], []>} : vector<8x8xbf16>, vector<8x8xbf16>, vector<8x8xf32> -> vector<8x8xf32>
    %254 = arith.addf %253, %10 : vector<8x8xf32>
    %cst_96 = arith.constant dense<0xFF800000> : vector<8xf32>
    %255 = vector.multi_reduction <maximumf>, %254, %cst_96 [1] : vector<8x8xf32> to vector<8xf32>
    %256 = vector.shape_cast %255 : vector<8xf32> to vector<8x1xf32>
    %257 = vector.broadcast %256 : vector<8x1xf32> to vector<8x8xf32>
    %258 = arith.subf %254, %257 : vector<8x8xf32>
    %259 = math.exp %258 : vector<8x8xf32>
    %cst_97 = arith.constant dense<0.000000e+00> : vector<8xf32>
    %260 = vector.multi_reduction <add>, %259, %cst_97 [1] : vector<8x8xf32> to vector<8xf32>
    %261 = vector.shape_cast %260 : vector<8xf32> to vector<8x1xf32>
    %262 = arith.truncf %259 : vector<8x8xf32> to vector<8x8xbf16>
    %cst_98 = arith.constant dense<0.000000e+00> : vector<8x8xf32>
    %263 = tpu.matmul %262, %252, %cst_98 {dimension_numbers = #tpu.dot_dimension_numbers<[1], [0], [0], [1], [0, 0, 1, 1], [], []>} : vector<8x8xbf16>, vector<8x8xbf16>, vector<8x8xf32> -> vector<8x8xf32>
    %264 = tpu.reciprocal %261 : vector<8x1xf32> -> vector<8x1xf32>
    %265 = vector.broadcast %264 : vector<8x1xf32> to vector<8x8xf32>
    %266 = arith.mulf %263, %265 : vector<8x8xf32>
    %267 = arith.truncf %266 : vector<8x8xf32> to vector<8x8xbf16>
    %268 = vector.extract_strided_slice %186 {offsets = [24, 0], sizes = [8, 32], strides = [1, 1]} : vector<32x32xbf16> to vector<8x32xbf16>
    %cst_99 = arith.constant dense<0.000000e+00> : vector<8x32xf32>
    %269 = tpu.matmul %267, %268, %cst_99 {dimension_numbers = #tpu.dot_dimension_numbers<[1], [0], [0], [1], [0, 0, 1, 1], [], []>} : vector<8x8xbf16>, vector<8x32xbf16>, vector<8x32xf32> -> vector<8x32xf32>
    %270 = arith.addf %249, %269 : vector<8x32xf32>
    %271 = vector.broadcast %187 : vector<1x32xf32> to vector<8x32xf32>
    %272 = arith.addf %270, %271 : vector<8x32xf32>
    %273 = arith.addf %176, %272 : vector<8x32xf32>
    %c0_100 = arith.constant 0 : index
    %c0_101 = arith.constant 0 : index
    %274 = vector.load %arg22[%c0_100, %c0_101] : memref<1x32xf32, #tpu.memory_space<vmem>>, vector<1x32xf32>
    %c0_102 = arith.constant 0 : index
    %c0_103 = arith.constant 0 : index
    %275 = vector.load %arg23[%c0_102, %c0_103] : memref<1x32xf32, #tpu.memory_space<vmem>>, vector<1x32xf32>
    %cst_104 = arith.constant dense<0.000000e+00> : vector<8xf32>
    %276 = vector.multi_reduction <add>, %273, %cst_104 [1] : vector<8x32xf32> to vector<8xf32>
    %277 = vector.shape_cast %276 : vector<8xf32> to vector<8x1xf32>
    %cst_105 = arith.constant 3.200000e+01 : f32
    %278 = vector.broadcast %cst_105 : f32 to vector<8x1xf32>
    %279 = arith.divf %277, %278 : vector<8x1xf32>
    %280 = vector.broadcast %279 : vector<8x1xf32> to vector<8x32xf32>
    %281 = arith.subf %273, %280 : vector<8x32xf32>
    %282 = arith.mulf %281, %281 : vector<8x32xf32>
    %cst_106 = arith.constant dense<0.000000e+00> : vector<8xf32>
    %283 = vector.multi_reduction <add>, %282, %cst_106 [1] : vector<8x32xf32> to vector<8xf32>
    %284 = vector.shape_cast %283 : vector<8xf32> to vector<8x1xf32>
    %cst_107 = arith.constant 3.200000e+01 : f32
    %285 = vector.broadcast %cst_107 : f32 to vector<8x1xf32>
    %286 = arith.divf %284, %285 : vector<8x1xf32>
    %287 = vector.broadcast %279 : vector<8x1xf32> to vector<8x32xf32>
    %288 = arith.subf %273, %287 : vector<8x32xf32>
    %cst_108 = arith.constant 9.99999974E-6 : f32
    %289 = vector.broadcast %cst_108 : f32 to vector<8x1xf32>
    %290 = arith.addf %286, %289 : vector<8x1xf32>
    %291 = math.rsqrt %290 : vector<8x1xf32>
    %292 = vector.broadcast %291 : vector<8x1xf32> to vector<8x32xf32>
    %293 = arith.mulf %288, %292 : vector<8x32xf32>
    %294 = vector.broadcast %274 : vector<1x32xf32> to vector<8x32xf32>
    %295 = arith.mulf %293, %294 : vector<8x32xf32>
    %296 = vector.broadcast %275 : vector<1x32xf32> to vector<8x32xf32>
    %297 = arith.addf %295, %296 : vector<8x32xf32>
    %298 = arith.truncf %297 : vector<8x32xf32> to vector<8x32xbf16>
    %c0_109 = arith.constant 0 : index
    %c0_110 = arith.constant 0 : index
    %299 = vector.load %arg24[%c0_109, %c0_110] : memref<32x64xbf16, #tpu.memory_space<vmem>>, vector<32x64xbf16>
    %cst_111 = arith.constant dense<0.000000e+00> : vector<8x64xf32>
    %300 = tpu.matmul %298, %299, %cst_111 {dimension_numbers = #tpu.dot_dimension_numbers<[1], [0], [0], [1], [0, 0, 1, 1], [], []>} : vector<8x32xbf16>, vector<32x64xbf16>, vector<8x64xf32> -> vector<8x64xf32>
    %c0_112 = arith.constant 0 : index
    %c0_113 = arith.constant 0 : index
    %301 = vector.load %arg25[%c0_112, %c0_113] : memref<1x64xf32, #tpu.memory_space<vmem>>, vector<1x64xf32>
    %302 = vector.broadcast %301 : vector<1x64xf32> to vector<8x64xf32>
    %303 = arith.addf %300, %302 : vector<8x64xf32>
    %cst_114 = arith.constant 0.000000e+00 : f32
    %304 = vector.broadcast %cst_114 : f32 to vector<8x64xf32>
    %305 = arith.maximumf %303, %304 : vector<8x64xf32>
    %306 = arith.truncf %305 : vector<8x64xf32> to vector<8x64xbf16>
    %c0_115 = arith.constant 0 : index
    %c0_116 = arith.constant 0 : index
    %307 = vector.load %arg26[%c0_115, %c0_116] : memref<64x32xbf16, #tpu.memory_space<vmem>>, vector<64x32xbf16>
    %cst_117 = arith.constant dense<0.000000e+00> : vector<8x32xf32>
    %308 = tpu.matmul %306, %307, %cst_117 {dimension_numbers = #tpu.dot_dimension_numbers<[1], [0], [0], [1], [0, 0, 1, 1], [], []>} : vector<8x64xbf16>, vector<64x32xbf16>, vector<8x32xf32> -> vector<8x32xf32>
    %c0_118 = arith.constant 0 : index
    %c0_119 = arith.constant 0 : index
    %309 = vector.load %arg27[%c0_118, %c0_119] : memref<1x32xf32, #tpu.memory_space<vmem>>, vector<1x32xf32>
    %310 = vector.broadcast %309 : vector<1x32xf32> to vector<8x32xf32>
    %311 = arith.addf %308, %310 : vector<8x32xf32>
    %312 = arith.addf %297, %311 : vector<8x32xf32>
    %c0_120 = arith.constant 0 : index
    %c0_121 = arith.constant 0 : index
    %313 = vector.load %arg28[%c0_120, %c0_121] : memref<1x32xf32, #tpu.memory_space<vmem>>, vector<1x32xf32>
    %c0_122 = arith.constant 0 : index
    %c0_123 = arith.constant 0 : index
    %314 = vector.load %arg29[%c0_122, %c0_123] : memref<1x32xf32, #tpu.memory_space<vmem>>, vector<1x32xf32>
    %cst_124 = arith.constant dense<0.000000e+00> : vector<8xf32>
    %315 = vector.multi_reduction <add>, %312, %cst_124 [1] : vector<8x32xf32> to vector<8xf32>
    %316 = vector.shape_cast %315 : vector<8xf32> to vector<8x1xf32>
    %cst_125 = arith.constant 3.200000e+01 : f32
    %317 = vector.broadcast %cst_125 : f32 to vector<8x1xf32>
    %318 = arith.divf %316, %317 : vector<8x1xf32>
    %319 = vector.broadcast %318 : vector<8x1xf32> to vector<8x32xf32>
    %320 = arith.subf %312, %319 : vector<8x32xf32>
    %321 = arith.mulf %320, %320 : vector<8x32xf32>
    %cst_126 = arith.constant dense<0.000000e+00> : vector<8xf32>
    %322 = vector.multi_reduction <add>, %321, %cst_126 [1] : vector<8x32xf32> to vector<8xf32>
    %323 = vector.shape_cast %322 : vector<8xf32> to vector<8x1xf32>
    %cst_127 = arith.constant 3.200000e+01 : f32
    %324 = vector.broadcast %cst_127 : f32 to vector<8x1xf32>
    %325 = arith.divf %323, %324 : vector<8x1xf32>
    %326 = vector.broadcast %318 : vector<8x1xf32> to vector<8x32xf32>
    %327 = arith.subf %312, %326 : vector<8x32xf32>
    %cst_128 = arith.constant 9.99999974E-6 : f32
    %328 = vector.broadcast %cst_128 : f32 to vector<8x1xf32>
    %329 = arith.addf %325, %328 : vector<8x1xf32>
    %330 = math.rsqrt %329 : vector<8x1xf32>
    %331 = vector.broadcast %330 : vector<8x1xf32> to vector<8x32xf32>
    %332 = arith.mulf %327, %331 : vector<8x32xf32>
    %333 = vector.broadcast %313 : vector<1x32xf32> to vector<8x32xf32>
    %334 = arith.mulf %332, %333 : vector<8x32xf32>
    %335 = vector.broadcast %314 : vector<1x32xf32> to vector<8x32xf32>
    %336 = arith.addf %334, %335 : vector<8x32xf32>
    %c0_129 = arith.constant 0 : index
    %c0_130 = arith.constant 0 : index
    %337 = vector.load %arg30[%c0_129, %c0_130] : memref<1x32xf32, #tpu.memory_space<vmem>>, vector<1x32xf32>
    %c0_131 = arith.constant 0 : index
    %c0_132 = arith.constant 0 : index
    %338 = vector.load %arg31[%c0_131, %c0_132] : memref<1x32xf32, #tpu.memory_space<vmem>>, vector<1x32xf32>
    %cst_133 = arith.constant dense<0.000000e+00> : vector<8xf32>
    %339 = vector.multi_reduction <add>, %336, %cst_133 [1] : vector<8x32xf32> to vector<8xf32>
    %340 = vector.shape_cast %339 : vector<8xf32> to vector<8x1xf32>
    %cst_134 = arith.constant 3.200000e+01 : f32
    %341 = vector.broadcast %cst_134 : f32 to vector<8x1xf32>
    %342 = arith.divf %340, %341 : vector<8x1xf32>
    %343 = vector.broadcast %342 : vector<8x1xf32> to vector<8x32xf32>
    %344 = arith.subf %336, %343 : vector<8x32xf32>
    %345 = arith.mulf %344, %344 : vector<8x32xf32>
    %cst_135 = arith.constant dense<0.000000e+00> : vector<8xf32>
    %346 = vector.multi_reduction <add>, %345, %cst_135 [1] : vector<8x32xf32> to vector<8xf32>
    %347 = vector.shape_cast %346 : vector<8xf32> to vector<8x1xf32>
    %cst_136 = arith.constant 3.200000e+01 : f32
    %348 = vector.broadcast %cst_136 : f32 to vector<8x1xf32>
    %349 = arith.divf %347, %348 : vector<8x1xf32>
    %350 = vector.broadcast %342 : vector<8x1xf32> to vector<8x32xf32>
    %351 = arith.subf %336, %350 : vector<8x32xf32>
    %cst_137 = arith.constant 9.99999974E-6 : f32
    %352 = vector.broadcast %cst_137 : f32 to vector<8x1xf32>
    %353 = arith.addf %349, %352 : vector<8x1xf32>
    %354 = math.rsqrt %353 : vector<8x1xf32>
    %355 = vector.broadcast %354 : vector<8x1xf32> to vector<8x32xf32>
    %356 = arith.mulf %351, %355 : vector<8x32xf32>
    %357 = vector.broadcast %337 : vector<1x32xf32> to vector<8x32xf32>
    %358 = arith.mulf %356, %357 : vector<8x32xf32>
    %359 = vector.broadcast %338 : vector<1x32xf32> to vector<8x32xf32>
    %360 = arith.addf %358, %359 : vector<8x32xf32>
    %361 = arith.truncf %360 : vector<8x32xf32> to vector<8x32xbf16>
    %c0_138 = arith.constant 0 : index
    %c0_139 = arith.constant 0 : index
    %362 = vector.load %arg32[%c0_138, %c0_139] : memref<8x32xbf16, #tpu.memory_space<vmem>>, vector<8x32xbf16>
    tpu.vector_store %arg32[%c0_138, %c0_139], %361 {strides = array<i32>} : memref<8x32xbf16, #tpu.memory_space<vmem>>, vector<8x32xbf16>,
    return
  }
}

module attributes {stable_mosaic.version = 11 : i64} {
  func.func @_decoder_stack_kernel(%arg0: memref<16x32xf32, #tpu.memory_space<vmem>>, %arg1: memref<8x32xbf16, #tpu.memory_space<vmem>>, %arg2: memref<16x1xi32, #tpu.memory_space<vmem>>, %arg3: memref<1x16xi32, #tpu.memory_space<vmem>>, %arg4: memref<1x8xi32, #tpu.memory_space<vmem>>, %arg5: memref<1x16xf32, #tpu.memory_space<vmem>>, %arg6: memref<32x96xbf16, #tpu.memory_space<vmem>>, %arg7: memref<1x96xf32, #tpu.memory_space<vmem>>, %arg8: memref<32x32xbf16, #tpu.memory_space<vmem>>, %arg9: memref<1x32xf32, #tpu.memory_space<vmem>>, %arg10: memref<1x32xf32, #tpu.memory_space<vmem>>, %arg11: memref<1x32xf32, #tpu.memory_space<vmem>>, %arg12: memref<32x32xbf16, #tpu.memory_space<vmem>>, %arg13: memref<1x32xf32, #tpu.memory_space<vmem>>, %arg14: memref<32x64xbf16, #tpu.memory_space<vmem>>, %arg15: memref<1x64xf32, #tpu.memory_space<vmem>>, %arg16: memref<32x32xbf16, #tpu.memory_space<vmem>>, %arg17: memref<1x32xf32, #tpu.memory_space<vmem>>, %arg18: memref<1x32xf32, #tpu.memory_space<vmem>>, %arg19: memref<1x32xf32, #tpu.memory_space<vmem>>, %arg20: memref<32x64xbf16, #tpu.memory_space<vmem>>, %arg21: memref<1x64xf32, #tpu.memory_space<vmem>>, %arg22: memref<64x32xbf16, #tpu.memory_space<vmem>>, %arg23: memref<1x32xf32, #tpu.memory_space<vmem>>, %arg24: memref<1x32xf32, #tpu.memory_space<vmem>>, %arg25: memref<1x32xf32, #tpu.memory_space<vmem>>, %arg26: memref<32x96xbf16, #tpu.memory_space<vmem>>, %arg27: memref<1x96xf32, #tpu.memory_space<vmem>>, %arg28: memref<32x32xbf16, #tpu.memory_space<vmem>>, %arg29: memref<1x32xf32, #tpu.memory_space<vmem>>, %arg30: memref<1x32xf32, #tpu.memory_space<vmem>>, %arg31: memref<1x32xf32, #tpu.memory_space<vmem>>, %arg32: memref<32x32xbf16, #tpu.memory_space<vmem>>, %arg33: memref<1x32xf32, #tpu.memory_space<vmem>>, %arg34: memref<32x64xbf16, #tpu.memory_space<vmem>>, %arg35: memref<1x64xf32, #tpu.memory_space<vmem>>, %arg36: memref<32x32xbf16, #tpu.memory_space<vmem>>, %arg37: memref<1x32xf32, #tpu.memory_space<vmem>>, %arg38: memref<1x32xf32, #tpu.memory_space<vmem>>, %arg39: memref<1x32xf32, #tpu.memory_space<vmem>>, %arg40: memref<32x64xbf16, #tpu.memory_space<vmem>>, %arg41: memref<1x64xf32, #tpu.memory_space<vmem>>, %arg42: memref<64x32xbf16, #tpu.memory_space<vmem>>, %arg43: memref<1x32xf32, #tpu.memory_space<vmem>>, %arg44: memref<1x32xf32, #tpu.memory_space<vmem>>, %arg45: memref<1x32xf32, #tpu.memory_space<vmem>>, %arg46: memref<1x32xf32, #tpu.memory_space<vmem>>, %arg47: memref<1x32xf32, #tpu.memory_space<vmem>>, %arg48: memref<32x16xbf16, #tpu.memory_space<vmem>>, %arg49: memref<1x16xf32, #tpu.memory_space<vmem>>, %arg50: memref<16x16xf32, #tpu.memory_space<vmem>>) attributes {dimension_semantics = [], scalar_prefetch = 0 : i64, scratch_operands = 0 : i64, tpu.core_type = #tpu.core_type<tc>} {
    %c0 = arith.constant 0 : index
    %c0_0 = arith.constant 0 : index
    %0 = vector.load %arg2[%c0, %c0_0] : memref<16x1xi32, #tpu.memory_space<vmem>>, vector<16x1xi32>
    %c0_1 = arith.constant 0 : index
    %c0_2 = arith.constant 0 : index
    %1 = vector.load %arg3[%c0_1, %c0_2] : memref<1x16xi32, #tpu.memory_space<vmem>>, vector<1x16xi32>
    %2 = vector.broadcast %0 : vector<16x1xi32> to vector<16x16xi32>
    %3 = vector.broadcast %1 : vector<1x16xi32> to vector<16x16xi32>
    %4 = arith.cmpi eq, %2, %3 : vector<16x16xi32>
    %cst = arith.constant 0.000000e+00 : f32
    %cst_3 = arith.constant -1.000000e+09 : f32
    %5 = vector.broadcast %cst : f32 to vector<16x16xf32>
    %6 = vector.broadcast %cst_3 : f32 to vector<16x16xf32>
    %7 = arith.select %4, %5, %6 : vector<16x16xi1>, vector<16x16xf32>
    %c0_4 = arith.constant 0 : index
    %c0_5 = arith.constant 0 : index
    %8 = vector.load %arg5[%c0_4, %c0_5] : memref<1x16xf32, #tpu.memory_space<vmem>>, vector<1x16xf32>
    %9 = vector.broadcast %8 : vector<1x16xf32> to vector<16x16xf32>
    %10 = arith.addf %7, %9 : vector<16x16xf32>
    %c0_6 = arith.constant 0 : index
    %c0_7 = arith.constant 0 : index
    %11 = vector.load %arg2[%c0_6, %c0_7] : memref<16x1xi32, #tpu.memory_space<vmem>>, vector<16x1xi32>
    %c0_8 = arith.constant 0 : index
    %c0_9 = arith.constant 0 : index
    %12 = vector.load %arg4[%c0_8, %c0_9] : memref<1x8xi32, #tpu.memory_space<vmem>>, vector<1x8xi32>
    %13 = vector.broadcast %11 : vector<16x1xi32> to vector<16x8xi32>
    %14 = vector.broadcast %12 : vector<1x8xi32> to vector<16x8xi32>
    %15 = arith.cmpi eq, %13, %14 : vector<16x8xi32>
    %cst_10 = arith.constant 0.000000e+00 : f32
    %cst_11 = arith.constant -1.000000e+09 : f32
    %16 = vector.broadcast %cst_10 : f32 to vector<16x8xf32>
    %17 = vector.broadcast %cst_11 : f32 to vector<16x8xf32>
    %18 = arith.select %15, %16, %17 : vector<16x8xi1>, vector<16x8xf32>
    %c0_12 = arith.constant 0 : index
    %c0_13 = arith.constant 0 : index
    %19 = vector.load %arg0[%c0_12, %c0_13] : memref<16x32xf32, #tpu.memory_space<vmem>>, vector<16x32xf32>
    %c0_14 = arith.constant 0 : index
    %c0_15 = arith.constant 0 : index
    %20 = vector.load %arg1[%c0_14, %c0_15] : memref<8x32xbf16, #tpu.memory_space<vmem>>, vector<8x32xbf16>
    %21 = arith.truncf %19 : vector<16x32xf32> to vector<16x32xbf16>
    %c0_16 = arith.constant 0 : index
    %c0_17 = arith.constant 0 : index
    %22 = vector.load %arg6[%c0_16, %c0_17] : memref<32x96xbf16, #tpu.memory_space<vmem>>, vector<32x96xbf16>
    %cst_18 = arith.constant dense<0.000000e+00> : vector<16x96xf32>
    %23 = tpu.matmul %21, %22, %cst_18 {dimension_numbers = #tpu.dot_dimension_numbers<[1], [0], [0], [1], [0, 0, 1, 1], [], []>} : vector<16x32xbf16>, vector<32x96xbf16>, vector<16x96xf32> -> vector<16x96xf32>
    %c0_19 = arith.constant 0 : index
    %c0_20 = arith.constant 0 : index
    %24 = vector.load %arg7[%c0_19, %c0_20] : memref<1x96xf32, #tpu.memory_space<vmem>>, vector<1x96xf32>
    %25 = vector.broadcast %24 : vector<1x96xf32> to vector<16x96xf32>
    %26 = arith.addf %23, %25 : vector<16x96xf32>
    %27 = arith.truncf %26 : vector<16x96xf32> to vector<16x96xbf16>
    %28 = vector.extract_strided_slice %27 {offsets = [0, 0], sizes = [16, 32], strides = [1, 1]} : vector<16x96xbf16> to vector<16x32xbf16>
    %29 = vector.extract_strided_slice %27 {offsets = [0, 32], sizes = [16, 64], strides = [1, 1]} : vector<16x96xbf16> to vector<16x64xbf16>
    %c0_21 = arith.constant 0 : index
    %c0_22 = arith.constant 0 : index
    %30 = vector.load %arg8[%c0_21, %c0_22] : memref<32x32xbf16, #tpu.memory_space<vmem>>, vector<32x32xbf16>
    %c0_23 = arith.constant 0 : index
    %c0_24 = arith.constant 0 : index
    %31 = vector.load %arg9[%c0_23, %c0_24] : memref<1x32xf32, #tpu.memory_space<vmem>>, vector<1x32xf32>
    %32 = vector.extract_strided_slice %28 {offsets = [0, 0], sizes = [16, 8], strides = [1, 1]} : vector<16x32xbf16> to vector<16x8xbf16>
    %33 = vector.extract_strided_slice %29 {offsets = [0, 0], sizes = [16, 8], strides = [1, 1]} : vector<16x64xbf16> to vector<16x8xbf16>
    %34 = vector.extract_strided_slice %29 {offsets = [0, 32], sizes = [16, 8], strides = [1, 1]} : vector<16x64xbf16> to vector<16x8xbf16>
    %cst_25 = arith.constant dense<0.000000e+00> : vector<16x16xf32>
    %35 = tpu.matmul %32, %33, %cst_25 {dimension_numbers = #tpu.dot_dimension_numbers<[1], [1], [0], [0], [0, 0, 1, 0], [], []>} : vector<16x8xbf16>, vector<16x8xbf16>, vector<16x16xf32> -> vector<16x16xf32>
    %36 = arith.addf %35, %10 : vector<16x16xf32>
    %cst_26 = arith.constant dense<0xFF800000> : vector<16xf32>
    %37 = vector.multi_reduction <maximumf>, %36, %cst_26 [1] : vector<16x16xf32> to vector<16xf32>
    %38 = vector.shape_cast %37 : vector<16xf32> to vector<16x1xf32>
    %39 = vector.broadcast %38 : vector<16x1xf32> to vector<16x16xf32>
    %40 = arith.subf %36, %39 : vector<16x16xf32>
    %41 = math.exp %40 : vector<16x16xf32>
    %cst_27 = arith.constant dense<0.000000e+00> : vector<16xf32>
    %42 = vector.multi_reduction <add>, %41, %cst_27 [1] : vector<16x16xf32> to vector<16xf32>
    %43 = vector.shape_cast %42 : vector<16xf32> to vector<16x1xf32>
    %44 = arith.truncf %41 : vector<16x16xf32> to vector<16x16xbf16>
    %cst_28 = arith.constant dense<0.000000e+00> : vector<16x8xf32>
    %45 = tpu.matmul %44, %34, %cst_28 {dimension_numbers = #tpu.dot_dimension_numbers<[1], [0], [0], [1], [0, 0, 1, 1], [], []>} : vector<16x16xbf16>, vector<16x8xbf16>, vector<16x8xf32> -> vector<16x8xf32>
    %46 = tpu.reciprocal %43 : vector<16x1xf32> -> vector<16x1xf32>
    %47 = vector.broadcast %46 : vector<16x1xf32> to vector<16x8xf32>
    %48 = arith.mulf %45, %47 : vector<16x8xf32>
    %49 = arith.truncf %48 : vector<16x8xf32> to vector<16x8xbf16>
    %50 = vector.extract_strided_slice %30 {offsets = [0, 0], sizes = [8, 32], strides = [1, 1]} : vector<32x32xbf16> to vector<8x32xbf16>
    %cst_29 = arith.constant dense<0.000000e+00> : vector<16x32xf32>
    %51 = tpu.matmul %49, %50, %cst_29 {dimension_numbers = #tpu.dot_dimension_numbers<[1], [0], [0], [1], [0, 0, 1, 1], [], []>} : vector<16x8xbf16>, vector<8x32xbf16>, vector<16x32xf32> -> vector<16x32xf32>
    %52 = vector.extract_strided_slice %28 {offsets = [0, 8], sizes = [16, 8], strides = [1, 1]} : vector<16x32xbf16> to vector<16x8xbf16>
    %53 = vector.extract_strided_slice %29 {offsets = [0, 8], sizes = [16, 8], strides = [1, 1]} : vector<16x64xbf16> to vector<16x8xbf16>
    %54 = vector.extract_strided_slice %29 {offsets = [0, 40], sizes = [16, 8], strides = [1, 1]} : vector<16x64xbf16> to vector<16x8xbf16>
    %cst_30 = arith.constant dense<0.000000e+00> : vector<16x16xf32>
    %55 = tpu.matmul %52, %53, %cst_30 {dimension_numbers = #tpu.dot_dimension_numbers<[1], [1], [0], [0], [0, 0, 1, 0], [], []>} : vector<16x8xbf16>, vector<16x8xbf16>, vector<16x16xf32> -> vector<16x16xf32>
    %56 = arith.addf %55, %10 : vector<16x16xf32>
    %cst_31 = arith.constant dense<0xFF800000> : vector<16xf32>
    %57 = vector.multi_reduction <maximumf>, %56, %cst_31 [1] : vector<16x16xf32> to vector<16xf32>
    %58 = vector.shape_cast %57 : vector<16xf32> to vector<16x1xf32>
    %59 = vector.broadcast %58 : vector<16x1xf32> to vector<16x16xf32>
    %60 = arith.subf %56, %59 : vector<16x16xf32>
    %61 = math.exp %60 : vector<16x16xf32>
    %cst_32 = arith.constant dense<0.000000e+00> : vector<16xf32>
    %62 = vector.multi_reduction <add>, %61, %cst_32 [1] : vector<16x16xf32> to vector<16xf32>
    %63 = vector.shape_cast %62 : vector<16xf32> to vector<16x1xf32>
    %64 = arith.truncf %61 : vector<16x16xf32> to vector<16x16xbf16>
    %cst_33 = arith.constant dense<0.000000e+00> : vector<16x8xf32>
    %65 = tpu.matmul %64, %54, %cst_33 {dimension_numbers = #tpu.dot_dimension_numbers<[1], [0], [0], [1], [0, 0, 1, 1], [], []>} : vector<16x16xbf16>, vector<16x8xbf16>, vector<16x8xf32> -> vector<16x8xf32>
    %66 = tpu.reciprocal %63 : vector<16x1xf32> -> vector<16x1xf32>
    %67 = vector.broadcast %66 : vector<16x1xf32> to vector<16x8xf32>
    %68 = arith.mulf %65, %67 : vector<16x8xf32>
    %69 = arith.truncf %68 : vector<16x8xf32> to vector<16x8xbf16>
    %70 = vector.extract_strided_slice %30 {offsets = [8, 0], sizes = [8, 32], strides = [1, 1]} : vector<32x32xbf16> to vector<8x32xbf16>
    %cst_34 = arith.constant dense<0.000000e+00> : vector<16x32xf32>
    %71 = tpu.matmul %69, %70, %cst_34 {dimension_numbers = #tpu.dot_dimension_numbers<[1], [0], [0], [1], [0, 0, 1, 1], [], []>} : vector<16x8xbf16>, vector<8x32xbf16>, vector<16x32xf32> -> vector<16x32xf32>
    %72 = arith.addf %51, %71 : vector<16x32xf32>
    %73 = vector.extract_strided_slice %28 {offsets = [0, 16], sizes = [16, 8], strides = [1, 1]} : vector<16x32xbf16> to vector<16x8xbf16>
    %74 = vector.extract_strided_slice %29 {offsets = [0, 16], sizes = [16, 8], strides = [1, 1]} : vector<16x64xbf16> to vector<16x8xbf16>
    %75 = vector.extract_strided_slice %29 {offsets = [0, 48], sizes = [16, 8], strides = [1, 1]} : vector<16x64xbf16> to vector<16x8xbf16>
    %cst_35 = arith.constant dense<0.000000e+00> : vector<16x16xf32>
    %76 = tpu.matmul %73, %74, %cst_35 {dimension_numbers = #tpu.dot_dimension_numbers<[1], [1], [0], [0], [0, 0, 1, 0], [], []>} : vector<16x8xbf16>, vector<16x8xbf16>, vector<16x16xf32> -> vector<16x16xf32>
    %77 = arith.addf %76, %10 : vector<16x16xf32>
    %cst_36 = arith.constant dense<0xFF800000> : vector<16xf32>
    %78 = vector.multi_reduction <maximumf>, %77, %cst_36 [1] : vector<16x16xf32> to vector<16xf32>
    %79 = vector.shape_cast %78 : vector<16xf32> to vector<16x1xf32>
    %80 = vector.broadcast %79 : vector<16x1xf32> to vector<16x16xf32>
    %81 = arith.subf %77, %80 : vector<16x16xf32>
    %82 = math.exp %81 : vector<16x16xf32>
    %cst_37 = arith.constant dense<0.000000e+00> : vector<16xf32>
    %83 = vector.multi_reduction <add>, %82, %cst_37 [1] : vector<16x16xf32> to vector<16xf32>
    %84 = vector.shape_cast %83 : vector<16xf32> to vector<16x1xf32>
    %85 = arith.truncf %82 : vector<16x16xf32> to vector<16x16xbf16>
    %cst_38 = arith.constant dense<0.000000e+00> : vector<16x8xf32>
    %86 = tpu.matmul %85, %75, %cst_38 {dimension_numbers = #tpu.dot_dimension_numbers<[1], [0], [0], [1], [0, 0, 1, 1], [], []>} : vector<16x16xbf16>, vector<16x8xbf16>, vector<16x8xf32> -> vector<16x8xf32>
    %87 = tpu.reciprocal %84 : vector<16x1xf32> -> vector<16x1xf32>
    %88 = vector.broadcast %87 : vector<16x1xf32> to vector<16x8xf32>
    %89 = arith.mulf %86, %88 : vector<16x8xf32>
    %90 = arith.truncf %89 : vector<16x8xf32> to vector<16x8xbf16>
    %91 = vector.extract_strided_slice %30 {offsets = [16, 0], sizes = [8, 32], strides = [1, 1]} : vector<32x32xbf16> to vector<8x32xbf16>
    %cst_39 = arith.constant dense<0.000000e+00> : vector<16x32xf32>
    %92 = tpu.matmul %90, %91, %cst_39 {dimension_numbers = #tpu.dot_dimension_numbers<[1], [0], [0], [1], [0, 0, 1, 1], [], []>} : vector<16x8xbf16>, vector<8x32xbf16>, vector<16x32xf32> -> vector<16x32xf32>
    %93 = arith.addf %72, %92 : vector<16x32xf32>
    %94 = vector.extract_strided_slice %28 {offsets = [0, 24], sizes = [16, 8], strides = [1, 1]} : vector<16x32xbf16> to vector<16x8xbf16>
    %95 = vector.extract_strided_slice %29 {offsets = [0, 24], sizes = [16, 8], strides = [1, 1]} : vector<16x64xbf16> to vector<16x8xbf16>
    %96 = vector.extract_strided_slice %29 {offsets = [0, 56], sizes = [16, 8], strides = [1, 1]} : vector<16x64xbf16> to vector<16x8xbf16>
    %cst_40 = arith.constant dense<0.000000e+00> : vector<16x16xf32>
    %97 = tpu.matmul %94, %95, %cst_40 {dimension_numbers = #tpu.dot_dimension_numbers<[1], [1], [0], [0], [0, 0, 1, 0], [], []>} : vector<16x8xbf16>, vector<16x8xbf16>, vector<16x16xf32> -> vector<16x16xf32>
    %98 = arith.addf %97, %10 : vector<16x16xf32>
    %cst_41 = arith.constant dense<0xFF800000> : vector<16xf32>
    %99 = vector.multi_reduction <maximumf>, %98, %cst_41 [1] : vector<16x16xf32> to vector<16xf32>
    %100 = vector.shape_cast %99 : vector<16xf32> to vector<16x1xf32>
    %101 = vector.broadcast %100 : vector<16x1xf32> to vector<16x16xf32>
    %102 = arith.subf %98, %101 : vector<16x16xf32>
    %103 = math.exp %102 : vector<16x16xf32>
    %cst_42 = arith.constant dense<0.000000e+00> : vector<16xf32>
    %104 = vector.multi_reduction <add>, %103, %cst_42 [1] : vector<16x16xf32> to vector<16xf32>
    %105 = vector.shape_cast %104 : vector<16xf32> to vector<16x1xf32>
    %106 = arith.truncf %103 : vector<16x16xf32> to vector<16x16xbf16>
    %cst_43 = arith.constant dense<0.000000e+00> : vector<16x8xf32>
    %107 = tpu.matmul %106, %96, %cst_43 {dimension_numbers = #tpu.dot_dimension_numbers<[1], [0], [0], [1], [0, 0, 1, 1], [], []>} : vector<16x16xbf16>, vector<16x8xbf16>, vector<16x8xf32> -> vector<16x8xf32>
    %108 = tpu.reciprocal %105 : vector<16x1xf32> -> vector<16x1xf32>
    %109 = vector.broadcast %108 : vector<16x1xf32> to vector<16x8xf32>
    %110 = arith.mulf %107, %109 : vector<16x8xf32>
    %111 = arith.truncf %110 : vector<16x8xf32> to vector<16x8xbf16>
    %112 = vector.extract_strided_slice %30 {offsets = [24, 0], sizes = [8, 32], strides = [1, 1]} : vector<32x32xbf16> to vector<8x32xbf16>
    %cst_44 = arith.constant dense<0.000000e+00> : vector<16x32xf32>
    %113 = tpu.matmul %111, %112, %cst_44 {dimension_numbers = #tpu.dot_dimension_numbers<[1], [0], [0], [1], [0, 0, 1, 1], [], []>} : vector<16x8xbf16>, vector<8x32xbf16>, vector<16x32xf32> -> vector<16x32xf32>
    %114 = arith.addf %93, %113 : vector<16x32xf32>
    %115 = vector.broadcast %31 : vector<1x32xf32> to vector<16x32xf32>
    %116 = arith.addf %114, %115 : vector<16x32xf32>
    %117 = arith.addf %19, %116 : vector<16x32xf32>
    %c0_45 = arith.constant 0 : index
    %c0_46 = arith.constant 0 : index
    %118 = vector.load %arg10[%c0_45, %c0_46] : memref<1x32xf32, #tpu.memory_space<vmem>>, vector<1x32xf32>
    %c0_47 = arith.constant 0 : index
    %c0_48 = arith.constant 0 : index
    %119 = vector.load %arg11[%c0_47, %c0_48] : memref<1x32xf32, #tpu.memory_space<vmem>>, vector<1x32xf32>
    %cst_49 = arith.constant dense<0.000000e+00> : vector<16xf32>
    %120 = vector.multi_reduction <add>, %117, %cst_49 [1] : vector<16x32xf32> to vector<16xf32>
    %121 = vector.shape_cast %120 : vector<16xf32> to vector<16x1xf32>
    %cst_50 = arith.constant 3.200000e+01 : f32
    %122 = vector.broadcast %cst_50 : f32 to vector<16x1xf32>
    %123 = arith.divf %121, %122 : vector<16x1xf32>
    %124 = vector.broadcast %123 : vector<16x1xf32> to vector<16x32xf32>
    %125 = arith.subf %117, %124 : vector<16x32xf32>
    %126 = arith.mulf %125, %125 : vector<16x32xf32>
    %cst_51 = arith.constant dense<0.000000e+00> : vector<16xf32>
    %127 = vector.multi_reduction <add>, %126, %cst_51 [1] : vector<16x32xf32> to vector<16xf32>
    %128 = vector.shape_cast %127 : vector<16xf32> to vector<16x1xf32>
    %cst_52 = arith.constant 3.200000e+01 : f32
    %129 = vector.broadcast %cst_52 : f32 to vector<16x1xf32>
    %130 = arith.divf %128, %129 : vector<16x1xf32>
    %131 = vector.broadcast %123 : vector<16x1xf32> to vector<16x32xf32>
    %132 = arith.subf %117, %131 : vector<16x32xf32>
    %cst_53 = arith.constant 9.99999974E-6 : f32
    %133 = vector.broadcast %cst_53 : f32 to vector<16x1xf32>
    %134 = arith.addf %130, %133 : vector<16x1xf32>
    %135 = math.rsqrt %134 : vector<16x1xf32>
    %136 = vector.broadcast %135 : vector<16x1xf32> to vector<16x32xf32>
    %137 = arith.mulf %132, %136 : vector<16x32xf32>
    %138 = vector.broadcast %118 : vector<1x32xf32> to vector<16x32xf32>
    %139 = arith.mulf %137, %138 : vector<16x32xf32>
    %140 = vector.broadcast %119 : vector<1x32xf32> to vector<16x32xf32>
    %141 = arith.addf %139, %140 : vector<16x32xf32>
    %142 = arith.truncf %141 : vector<16x32xf32> to vector<16x32xbf16>
    %c0_54 = arith.constant 0 : index
    %c0_55 = arith.constant 0 : index
    %143 = vector.load %arg12[%c0_54, %c0_55] : memref<32x32xbf16, #tpu.memory_space<vmem>>, vector<32x32xbf16>
    %cst_56 = arith.constant dense<0.000000e+00> : vector<16x32xf32>
    %144 = tpu.matmul %142, %143, %cst_56 {dimension_numbers = #tpu.dot_dimension_numbers<[1], [0], [0], [1], [0, 0, 1, 1], [], []>} : vector<16x32xbf16>, vector<32x32xbf16>, vector<16x32xf32> -> vector<16x32xf32>
    %c0_57 = arith.constant 0 : index
    %c0_58 = arith.constant 0 : index
    %145 = vector.load %arg13[%c0_57, %c0_58] : memref<1x32xf32, #tpu.memory_space<vmem>>, vector<1x32xf32>
    %146 = vector.broadcast %145 : vector<1x32xf32> to vector<16x32xf32>
    %147 = arith.addf %144, %146 : vector<16x32xf32>
    %c0_59 = arith.constant 0 : index
    %c0_60 = arith.constant 0 : index
    %148 = vector.load %arg14[%c0_59, %c0_60] : memref<32x64xbf16, #tpu.memory_space<vmem>>, vector<32x64xbf16>
    %cst_61 = arith.constant dense<0.000000e+00> : vector<8x64xf32>
    %149 = tpu.matmul %20, %148, %cst_61 {dimension_numbers = #tpu.dot_dimension_numbers<[1], [0], [0], [1], [0, 0, 1, 1], [], []>} : vector<8x32xbf16>, vector<32x64xbf16>, vector<8x64xf32> -> vector<8x64xf32>
    %c0_62 = arith.constant 0 : index
    %c0_63 = arith.constant 0 : index
    %150 = vector.load %arg15[%c0_62, %c0_63] : memref<1x64xf32, #tpu.memory_space<vmem>>, vector<1x64xf32>
    %151 = vector.broadcast %150 : vector<1x64xf32> to vector<8x64xf32>
    %152 = arith.addf %149, %151 : vector<8x64xf32>
    %153 = arith.truncf %147 : vector<16x32xf32> to vector<16x32xbf16>
    %154 = arith.truncf %152 : vector<8x64xf32> to vector<8x64xbf16>
    %c0_64 = arith.constant 0 : index
    %c0_65 = arith.constant 0 : index
    %155 = vector.load %arg16[%c0_64, %c0_65] : memref<32x32xbf16, #tpu.memory_space<vmem>>, vector<32x32xbf16>
    %c0_66 = arith.constant 0 : index
    %c0_67 = arith.constant 0 : index
    %156 = vector.load %arg17[%c0_66, %c0_67] : memref<1x32xf32, #tpu.memory_space<vmem>>, vector<1x32xf32>
    %157 = vector.extract_strided_slice %153 {offsets = [0, 0], sizes = [16, 8], strides = [1, 1]} : vector<16x32xbf16> to vector<16x8xbf16>
    %158 = vector.extract_strided_slice %154 {offsets = [0, 0], sizes = [8, 8], strides = [1, 1]} : vector<8x64xbf16> to vector<8x8xbf16>
    %159 = vector.extract_strided_slice %154 {offsets = [0, 32], sizes = [8, 8], strides = [1, 1]} : vector<8x64xbf16> to vector<8x8xbf16>
    %cst_68 = arith.constant dense<0.000000e+00> : vector<16x8xf32>
    %160 = tpu.matmul %157, %158, %cst_68 {dimension_numbers = #tpu.dot_dimension_numbers<[1], [1], [0], [0], [0, 0, 1, 0], [], []>} : vector<16x8xbf16>, vector<8x8xbf16>, vector<16x8xf32> -> vector<16x8xf32>
    %161 = arith.addf %160, %18 : vector<16x8xf32>
    %cst_69 = arith.constant dense<0xFF800000> : vector<16xf32>
    %162 = vector.multi_reduction <maximumf>, %161, %cst_69 [1] : vector<16x8xf32> to vector<16xf32>
    %163 = vector.shape_cast %162 : vector<16xf32> to vector<16x1xf32>
    %164 = vector.broadcast %163 : vector<16x1xf32> to vector<16x8xf32>
    %165 = arith.subf %161, %164 : vector<16x8xf32>
    %166 = math.exp %165 : vector<16x8xf32>
    %cst_70 = arith.constant dense<0.000000e+00> : vector<16xf32>
    %167 = vector.multi_reduction <add>, %166, %cst_70 [1] : vector<16x8xf32> to vector<16xf32>
    %168 = vector.shape_cast %167 : vector<16xf32> to vector<16x1xf32>
    %169 = arith.truncf %166 : vector<16x8xf32> to vector<16x8xbf16>
    %cst_71 = arith.constant dense<0.000000e+00> : vector<16x8xf32>
    %170 = tpu.matmul %169, %159, %cst_71 {dimension_numbers = #tpu.dot_dimension_numbers<[1], [0], [0], [1], [0, 0, 1, 1], [], []>} : vector<16x8xbf16>, vector<8x8xbf16>, vector<16x8xf32> -> vector<16x8xf32>
    %171 = tpu.reciprocal %168 : vector<16x1xf32> -> vector<16x1xf32>
    %172 = vector.broadcast %171 : vector<16x1xf32> to vector<16x8xf32>
    %173 = arith.mulf %170, %172 : vector<16x8xf32>
    %174 = arith.truncf %173 : vector<16x8xf32> to vector<16x8xbf16>
    %175 = vector.extract_strided_slice %155 {offsets = [0, 0], sizes = [8, 32], strides = [1, 1]} : vector<32x32xbf16> to vector<8x32xbf16>
    %cst_72 = arith.constant dense<0.000000e+00> : vector<16x32xf32>
    %176 = tpu.matmul %174, %175, %cst_72 {dimension_numbers = #tpu.dot_dimension_numbers<[1], [0], [0], [1], [0, 0, 1, 1], [], []>} : vector<16x8xbf16>, vector<8x32xbf16>, vector<16x32xf32> -> vector<16x32xf32>
    %177 = vector.extract_strided_slice %153 {offsets = [0, 8], sizes = [16, 8], strides = [1, 1]} : vector<16x32xbf16> to vector<16x8xbf16>
    %178 = vector.extract_strided_slice %154 {offsets = [0, 8], sizes = [8, 8], strides = [1, 1]} : vector<8x64xbf16> to vector<8x8xbf16>
    %179 = vector.extract_strided_slice %154 {offsets = [0, 40], sizes = [8, 8], strides = [1, 1]} : vector<8x64xbf16> to vector<8x8xbf16>
    %cst_73 = arith.constant dense<0.000000e+00> : vector<16x8xf32>
    %180 = tpu.matmul %177, %178, %cst_73 {dimension_numbers = #tpu.dot_dimension_numbers<[1], [1], [0], [0], [0, 0, 1, 0], [], []>} : vector<16x8xbf16>, vector<8x8xbf16>, vector<16x8xf32> -> vector<16x8xf32>
    %181 = arith.addf %180, %18 : vector<16x8xf32>
    %cst_74 = arith.constant dense<0xFF800000> : vector<16xf32>
    %182 = vector.multi_reduction <maximumf>, %181, %cst_74 [1] : vector<16x8xf32> to vector<16xf32>
    %183 = vector.shape_cast %182 : vector<16xf32> to vector<16x1xf32>
    %184 = vector.broadcast %183 : vector<16x1xf32> to vector<16x8xf32>
    %185 = arith.subf %181, %184 : vector<16x8xf32>
    %186 = math.exp %185 : vector<16x8xf32>
    %cst_75 = arith.constant dense<0.000000e+00> : vector<16xf32>
    %187 = vector.multi_reduction <add>, %186, %cst_75 [1] : vector<16x8xf32> to vector<16xf32>
    %188 = vector.shape_cast %187 : vector<16xf32> to vector<16x1xf32>
    %189 = arith.truncf %186 : vector<16x8xf32> to vector<16x8xbf16>
    %cst_76 = arith.constant dense<0.000000e+00> : vector<16x8xf32>
    %190 = tpu.matmul %189, %179, %cst_76 {dimension_numbers = #tpu.dot_dimension_numbers<[1], [0], [0], [1], [0, 0, 1, 1], [], []>} : vector<16x8xbf16>, vector<8x8xbf16>, vector<16x8xf32> -> vector<16x8xf32>
    %191 = tpu.reciprocal %188 : vector<16x1xf32> -> vector<16x1xf32>
    %192 = vector.broadcast %191 : vector<16x1xf32> to vector<16x8xf32>
    %193 = arith.mulf %190, %192 : vector<16x8xf32>
    %194 = arith.truncf %193 : vector<16x8xf32> to vector<16x8xbf16>
    %195 = vector.extract_strided_slice %155 {offsets = [8, 0], sizes = [8, 32], strides = [1, 1]} : vector<32x32xbf16> to vector<8x32xbf16>
    %cst_77 = arith.constant dense<0.000000e+00> : vector<16x32xf32>
    %196 = tpu.matmul %194, %195, %cst_77 {dimension_numbers = #tpu.dot_dimension_numbers<[1], [0], [0], [1], [0, 0, 1, 1], [], []>} : vector<16x8xbf16>, vector<8x32xbf16>, vector<16x32xf32> -> vector<16x32xf32>
    %197 = arith.addf %176, %196 : vector<16x32xf32>
    %198 = vector.extract_strided_slice %153 {offsets = [0, 16], sizes = [16, 8], strides = [1, 1]} : vector<16x32xbf16> to vector<16x8xbf16>
    %199 = vector.extract_strided_slice %154 {offsets = [0, 16], sizes = [8, 8], strides = [1, 1]} : vector<8x64xbf16> to vector<8x8xbf16>
    %200 = vector.extract_strided_slice %154 {offsets = [0, 48], sizes = [8, 8], strides = [1, 1]} : vector<8x64xbf16> to vector<8x8xbf16>
    %cst_78 = arith.constant dense<0.000000e+00> : vector<16x8xf32>
    %201 = tpu.matmul %198, %199, %cst_78 {dimension_numbers = #tpu.dot_dimension_numbers<[1], [1], [0], [0], [0, 0, 1, 0], [], []>} : vector<16x8xbf16>, vector<8x8xbf16>, vector<16x8xf32> -> vector<16x8xf32>
    %202 = arith.addf %201, %18 : vector<16x8xf32>
    %cst_79 = arith.constant dense<0xFF800000> : vector<16xf32>
    %203 = vector.multi_reduction <maximumf>, %202, %cst_79 [1] : vector<16x8xf32> to vector<16xf32>
    %204 = vector.shape_cast %203 : vector<16xf32> to vector<16x1xf32>
    %205 = vector.broadcast %204 : vector<16x1xf32> to vector<16x8xf32>
    %206 = arith.subf %202, %205 : vector<16x8xf32>
    %207 = math.exp %206 : vector<16x8xf32>
    %cst_80 = arith.constant dense<0.000000e+00> : vector<16xf32>
    %208 = vector.multi_reduction <add>, %207, %cst_80 [1] : vector<16x8xf32> to vector<16xf32>
    %209 = vector.shape_cast %208 : vector<16xf32> to vector<16x1xf32>
    %210 = arith.truncf %207 : vector<16x8xf32> to vector<16x8xbf16>
    %cst_81 = arith.constant dense<0.000000e+00> : vector<16x8xf32>
    %211 = tpu.matmul %210, %200, %cst_81 {dimension_numbers = #tpu.dot_dimension_numbers<[1], [0], [0], [1], [0, 0, 1, 1], [], []>} : vector<16x8xbf16>, vector<8x8xbf16>, vector<16x8xf32> -> vector<16x8xf32>
    %212 = tpu.reciprocal %209 : vector<16x1xf32> -> vector<16x1xf32>
    %213 = vector.broadcast %212 : vector<16x1xf32> to vector<16x8xf32>
    %214 = arith.mulf %211, %213 : vector<16x8xf32>
    %215 = arith.truncf %214 : vector<16x8xf32> to vector<16x8xbf16>
    %216 = vector.extract_strided_slice %155 {offsets = [16, 0], sizes = [8, 32], strides = [1, 1]} : vector<32x32xbf16> to vector<8x32xbf16>
    %cst_82 = arith.constant dense<0.000000e+00> : vector<16x32xf32>
    %217 = tpu.matmul %215, %216, %cst_82 {dimension_numbers = #tpu.dot_dimension_numbers<[1], [0], [0], [1], [0, 0, 1, 1], [], []>} : vector<16x8xbf16>, vector<8x32xbf16>, vector<16x32xf32> -> vector<16x32xf32>
    %218 = arith.addf %197, %217 : vector<16x32xf32>
    %219 = vector.extract_strided_slice %153 {offsets = [0, 24], sizes = [16, 8], strides = [1, 1]} : vector<16x32xbf16> to vector<16x8xbf16>
    %220 = vector.extract_strided_slice %154 {offsets = [0, 24], sizes = [8, 8], strides = [1, 1]} : vector<8x64xbf16> to vector<8x8xbf16>
    %221 = vector.extract_strided_slice %154 {offsets = [0, 56], sizes = [8, 8], strides = [1, 1]} : vector<8x64xbf16> to vector<8x8xbf16>
    %cst_83 = arith.constant dense<0.000000e+00> : vector<16x8xf32>
    %222 = tpu.matmul %219, %220, %cst_83 {dimension_numbers = #tpu.dot_dimension_numbers<[1], [1], [0], [0], [0, 0, 1, 0], [], []>} : vector<16x8xbf16>, vector<8x8xbf16>, vector<16x8xf32> -> vector<16x8xf32>
    %223 = arith.addf %222, %18 : vector<16x8xf32>
    %cst_84 = arith.constant dense<0xFF800000> : vector<16xf32>
    %224 = vector.multi_reduction <maximumf>, %223, %cst_84 [1] : vector<16x8xf32> to vector<16xf32>
    %225 = vector.shape_cast %224 : vector<16xf32> to vector<16x1xf32>
    %226 = vector.broadcast %225 : vector<16x1xf32> to vector<16x8xf32>
    %227 = arith.subf %223, %226 : vector<16x8xf32>
    %228 = math.exp %227 : vector<16x8xf32>
    %cst_85 = arith.constant dense<0.000000e+00> : vector<16xf32>
    %229 = vector.multi_reduction <add>, %228, %cst_85 [1] : vector<16x8xf32> to vector<16xf32>
    %230 = vector.shape_cast %229 : vector<16xf32> to vector<16x1xf32>
    %231 = arith.truncf %228 : vector<16x8xf32> to vector<16x8xbf16>
    %cst_86 = arith.constant dense<0.000000e+00> : vector<16x8xf32>
    %232 = tpu.matmul %231, %221, %cst_86 {dimension_numbers = #tpu.dot_dimension_numbers<[1], [0], [0], [1], [0, 0, 1, 1], [], []>} : vector<16x8xbf16>, vector<8x8xbf16>, vector<16x8xf32> -> vector<16x8xf32>
    %233 = tpu.reciprocal %230 : vector<16x1xf32> -> vector<16x1xf32>
    %234 = vector.broadcast %233 : vector<16x1xf32> to vector<16x8xf32>
    %235 = arith.mulf %232, %234 : vector<16x8xf32>
    %236 = arith.truncf %235 : vector<16x8xf32> to vector<16x8xbf16>
    %237 = vector.extract_strided_slice %155 {offsets = [24, 0], sizes = [8, 32], strides = [1, 1]} : vector<32x32xbf16> to vector<8x32xbf16>
    %cst_87 = arith.constant dense<0.000000e+00> : vector<16x32xf32>
    %238 = tpu.matmul %236, %237, %cst_87 {dimension_numbers = #tpu.dot_dimension_numbers<[1], [0], [0], [1], [0, 0, 1, 1], [], []>} : vector<16x8xbf16>, vector<8x32xbf16>, vector<16x32xf32> -> vector<16x32xf32>
    %239 = arith.addf %218, %238 : vector<16x32xf32>
    %240 = vector.broadcast %156 : vector<1x32xf32> to vector<16x32xf32>
    %241 = arith.addf %239, %240 : vector<16x32xf32>
    %242 = arith.addf %141, %241 : vector<16x32xf32>
    %c0_88 = arith.constant 0 : index
    %c0_89 = arith.constant 0 : index
    %243 = vector.load %arg18[%c0_88, %c0_89] : memref<1x32xf32, #tpu.memory_space<vmem>>, vector<1x32xf32>
    %c0_90 = arith.constant 0 : index
    %c0_91 = arith.constant 0 : index
    %244 = vector.load %arg19[%c0_90, %c0_91] : memref<1x32xf32, #tpu.memory_space<vmem>>, vector<1x32xf32>
    %cst_92 = arith.constant dense<0.000000e+00> : vector<16xf32>
    %245 = vector.multi_reduction <add>, %242, %cst_92 [1] : vector<16x32xf32> to vector<16xf32>
    %246 = vector.shape_cast %245 : vector<16xf32> to vector<16x1xf32>
    %cst_93 = arith.constant 3.200000e+01 : f32
    %247 = vector.broadcast %cst_93 : f32 to vector<16x1xf32>
    %248 = arith.divf %246, %247 : vector<16x1xf32>
    %249 = vector.broadcast %248 : vector<16x1xf32> to vector<16x32xf32>
    %250 = arith.subf %242, %249 : vector<16x32xf32>
    %251 = arith.mulf %250, %250 : vector<16x32xf32>
    %cst_94 = arith.constant dense<0.000000e+00> : vector<16xf32>
    %252 = vector.multi_reduction <add>, %251, %cst_94 [1] : vector<16x32xf32> to vector<16xf32>
    %253 = vector.shape_cast %252 : vector<16xf32> to vector<16x1xf32>
    %cst_95 = arith.constant 3.200000e+01 : f32
    %254 = vector.broadcast %cst_95 : f32 to vector<16x1xf32>
    %255 = arith.divf %253, %254 : vector<16x1xf32>
    %256 = vector.broadcast %248 : vector<16x1xf32> to vector<16x32xf32>
    %257 = arith.subf %242, %256 : vector<16x32xf32>
    %cst_96 = arith.constant 9.99999974E-6 : f32
    %258 = vector.broadcast %cst_96 : f32 to vector<16x1xf32>
    %259 = arith.addf %255, %258 : vector<16x1xf32>
    %260 = math.rsqrt %259 : vector<16x1xf32>
    %261 = vector.broadcast %260 : vector<16x1xf32> to vector<16x32xf32>
    %262 = arith.mulf %257, %261 : vector<16x32xf32>
    %263 = vector.broadcast %243 : vector<1x32xf32> to vector<16x32xf32>
    %264 = arith.mulf %262, %263 : vector<16x32xf32>
    %265 = vector.broadcast %244 : vector<1x32xf32> to vector<16x32xf32>
    %266 = arith.addf %264, %265 : vector<16x32xf32>
    %267 = arith.truncf %266 : vector<16x32xf32> to vector<16x32xbf16>
    %c0_97 = arith.constant 0 : index
    %c0_98 = arith.constant 0 : index
    %268 = vector.load %arg20[%c0_97, %c0_98] : memref<32x64xbf16, #tpu.memory_space<vmem>>, vector<32x64xbf16>
    %cst_99 = arith.constant dense<0.000000e+00> : vector<16x64xf32>
    %269 = tpu.matmul %267, %268, %cst_99 {dimension_numbers = #tpu.dot_dimension_numbers<[1], [0], [0], [1], [0, 0, 1, 1], [], []>} : vector<16x32xbf16>, vector<32x64xbf16>, vector<16x64xf32> -> vector<16x64xf32>
    %c0_100 = arith.constant 0 : index
    %c0_101 = arith.constant 0 : index
    %270 = vector.load %arg21[%c0_100, %c0_101] : memref<1x64xf32, #tpu.memory_space<vmem>>, vector<1x64xf32>
    %271 = vector.broadcast %270 : vector<1x64xf32> to vector<16x64xf32>
    %272 = arith.addf %269, %271 : vector<16x64xf32>
    %cst_102 = arith.constant 0.000000e+00 : f32
    %273 = vector.broadcast %cst_102 : f32 to vector<16x64xf32>
    %274 = arith.maximumf %272, %273 : vector<16x64xf32>
    %275 = arith.truncf %274 : vector<16x64xf32> to vector<16x64xbf16>
    %c0_103 = arith.constant 0 : index
    %c0_104 = arith.constant 0 : index
    %276 = vector.load %arg22[%c0_103, %c0_104] : memref<64x32xbf16, #tpu.memory_space<vmem>>, vector<64x32xbf16>
    %cst_105 = arith.constant dense<0.000000e+00> : vector<16x32xf32>
    %277 = tpu.matmul %275, %276, %cst_105 {dimension_numbers = #tpu.dot_dimension_numbers<[1], [0], [0], [1], [0, 0, 1, 1], [], []>} : vector<16x64xbf16>, vector<64x32xbf16>, vector<16x32xf32> -> vector<16x32xf32>
    %c0_106 = arith.constant 0 : index
    %c0_107 = arith.constant 0 : index
    %278 = vector.load %arg23[%c0_106, %c0_107] : memref<1x32xf32, #tpu.memory_space<vmem>>, vector<1x32xf32>
    %279 = vector.broadcast %278 : vector<1x32xf32> to vector<16x32xf32>
    %280 = arith.addf %277, %279 : vector<16x32xf32>
    %281 = arith.addf %266, %280 : vector<16x32xf32>
    %c0_108 = arith.constant 0 : index
    %c0_109 = arith.constant 0 : index
    %282 = vector.load %arg24[%c0_108, %c0_109] : memref<1x32xf32, #tpu.memory_space<vmem>>, vector<1x32xf32>
    %c0_110 = arith.constant 0 : index
    %c0_111 = arith.constant 0 : index
    %283 = vector.load %arg25[%c0_110, %c0_111] : memref<1x32xf32, #tpu.memory_space<vmem>>, vector<1x32xf32>
    %cst_112 = arith.constant dense<0.000000e+00> : vector<16xf32>
    %284 = vector.multi_reduction <add>, %281, %cst_112 [1] : vector<16x32xf32> to vector<16xf32>
    %285 = vector.shape_cast %284 : vector<16xf32> to vector<16x1xf32>
    %cst_113 = arith.constant 3.200000e+01 : f32
    %286 = vector.broadcast %cst_113 : f32 to vector<16x1xf32>
    %287 = arith.divf %285, %286 : vector<16x1xf32>
    %288 = vector.broadcast %287 : vector<16x1xf32> to vector<16x32xf32>
    %289 = arith.subf %281, %288 : vector<16x32xf32>
    %290 = arith.mulf %289, %289 : vector<16x32xf32>
    %cst_114 = arith.constant dense<0.000000e+00> : vector<16xf32>
    %291 = vector.multi_reduction <add>, %290, %cst_114 [1] : vector<16x32xf32> to vector<16xf32>
    %292 = vector.shape_cast %291 : vector<16xf32> to vector<16x1xf32>
    %cst_115 = arith.constant 3.200000e+01 : f32
    %293 = vector.broadcast %cst_115 : f32 to vector<16x1xf32>
    %294 = arith.divf %292, %293 : vector<16x1xf32>
    %295 = vector.broadcast %287 : vector<16x1xf32> to vector<16x32xf32>
    %296 = arith.subf %281, %295 : vector<16x32xf32>
    %cst_116 = arith.constant 9.99999974E-6 : f32
    %297 = vector.broadcast %cst_116 : f32 to vector<16x1xf32>
    %298 = arith.addf %294, %297 : vector<16x1xf32>
    %299 = math.rsqrt %298 : vector<16x1xf32>
    %300 = vector.broadcast %299 : vector<16x1xf32> to vector<16x32xf32>
    %301 = arith.mulf %296, %300 : vector<16x32xf32>
    %302 = vector.broadcast %282 : vector<1x32xf32> to vector<16x32xf32>
    %303 = arith.mulf %301, %302 : vector<16x32xf32>
    %304 = vector.broadcast %283 : vector<1x32xf32> to vector<16x32xf32>
    %305 = arith.addf %303, %304 : vector<16x32xf32>
    %306 = arith.truncf %305 : vector<16x32xf32> to vector<16x32xbf16>
    %c0_117 = arith.constant 0 : index
    %c0_118 = arith.constant 0 : index
    %307 = vector.load %arg26[%c0_117, %c0_118] : memref<32x96xbf16, #tpu.memory_space<vmem>>, vector<32x96xbf16>
    %cst_119 = arith.constant dense<0.000000e+00> : vector<16x96xf32>
    %308 = tpu.matmul %306, %307, %cst_119 {dimension_numbers = #tpu.dot_dimension_numbers<[1], [0], [0], [1], [0, 0, 1, 1], [], []>} : vector<16x32xbf16>, vector<32x96xbf16>, vector<16x96xf32> -> vector<16x96xf32>
    %c0_120 = arith.constant 0 : index
    %c0_121 = arith.constant 0 : index
    %309 = vector.load %arg27[%c0_120, %c0_121] : memref<1x96xf32, #tpu.memory_space<vmem>>, vector<1x96xf32>
    %310 = vector.broadcast %309 : vector<1x96xf32> to vector<16x96xf32>
    %311 = arith.addf %308, %310 : vector<16x96xf32>
    %312 = arith.truncf %311 : vector<16x96xf32> to vector<16x96xbf16>
    %313 = vector.extract_strided_slice %312 {offsets = [0, 0], sizes = [16, 32], strides = [1, 1]} : vector<16x96xbf16> to vector<16x32xbf16>
    %314 = vector.extract_strided_slice %312 {offsets = [0, 32], sizes = [16, 64], strides = [1, 1]} : vector<16x96xbf16> to vector<16x64xbf16>
    %c0_122 = arith.constant 0 : index
    %c0_123 = arith.constant 0 : index
    %315 = vector.load %arg28[%c0_122, %c0_123] : memref<32x32xbf16, #tpu.memory_space<vmem>>, vector<32x32xbf16>
    %c0_124 = arith.constant 0 : index
    %c0_125 = arith.constant 0 : index
    %316 = vector.load %arg29[%c0_124, %c0_125] : memref<1x32xf32, #tpu.memory_space<vmem>>, vector<1x32xf32>
    %317 = vector.extract_strided_slice %313 {offsets = [0, 0], sizes = [16, 8], strides = [1, 1]} : vector<16x32xbf16> to vector<16x8xbf16>
    %318 = vector.extract_strided_slice %314 {offsets = [0, 0], sizes = [16, 8], strides = [1, 1]} : vector<16x64xbf16> to vector<16x8xbf16>
    %319 = vector.extract_strided_slice %314 {offsets = [0, 32], sizes = [16, 8], strides = [1, 1]} : vector<16x64xbf16> to vector<16x8xbf16>
    %cst_126 = arith.constant dense<0.000000e+00> : vector<16x16xf32>
    %320 = tpu.matmul %317, %318, %cst_126 {dimension_numbers = #tpu.dot_dimension_numbers<[1], [1], [0], [0], [0, 0, 1, 0], [], []>} : vector<16x8xbf16>, vector<16x8xbf16>, vector<16x16xf32> -> vector<16x16xf32>
    %321 = arith.addf %320, %10 : vector<16x16xf32>
    %cst_127 = arith.constant dense<0xFF800000> : vector<16xf32>
    %322 = vector.multi_reduction <maximumf>, %321, %cst_127 [1] : vector<16x16xf32> to vector<16xf32>
    %323 = vector.shape_cast %322 : vector<16xf32> to vector<16x1xf32>
    %324 = vector.broadcast %323 : vector<16x1xf32> to vector<16x16xf32>
    %325 = arith.subf %321, %324 : vector<16x16xf32>
    %326 = math.exp %325 : vector<16x16xf32>
    %cst_128 = arith.constant dense<0.000000e+00> : vector<16xf32>
    %327 = vector.multi_reduction <add>, %326, %cst_128 [1] : vector<16x16xf32> to vector<16xf32>
    %328 = vector.shape_cast %327 : vector<16xf32> to vector<16x1xf32>
    %329 = arith.truncf %326 : vector<16x16xf32> to vector<16x16xbf16>
    %cst_129 = arith.constant dense<0.000000e+00> : vector<16x8xf32>
    %330 = tpu.matmul %329, %319, %cst_129 {dimension_numbers = #tpu.dot_dimension_numbers<[1], [0], [0], [1], [0, 0, 1, 1], [], []>} : vector<16x16xbf16>, vector<16x8xbf16>, vector<16x8xf32> -> vector<16x8xf32>
    %331 = tpu.reciprocal %328 : vector<16x1xf32> -> vector<16x1xf32>
    %332 = vector.broadcast %331 : vector<16x1xf32> to vector<16x8xf32>
    %333 = arith.mulf %330, %332 : vector<16x8xf32>
    %334 = arith.truncf %333 : vector<16x8xf32> to vector<16x8xbf16>
    %335 = vector.extract_strided_slice %315 {offsets = [0, 0], sizes = [8, 32], strides = [1, 1]} : vector<32x32xbf16> to vector<8x32xbf16>
    %cst_130 = arith.constant dense<0.000000e+00> : vector<16x32xf32>
    %336 = tpu.matmul %334, %335, %cst_130 {dimension_numbers = #tpu.dot_dimension_numbers<[1], [0], [0], [1], [0, 0, 1, 1], [], []>} : vector<16x8xbf16>, vector<8x32xbf16>, vector<16x32xf32> -> vector<16x32xf32>
    %337 = vector.extract_strided_slice %313 {offsets = [0, 8], sizes = [16, 8], strides = [1, 1]} : vector<16x32xbf16> to vector<16x8xbf16>
    %338 = vector.extract_strided_slice %314 {offsets = [0, 8], sizes = [16, 8], strides = [1, 1]} : vector<16x64xbf16> to vector<16x8xbf16>
    %339 = vector.extract_strided_slice %314 {offsets = [0, 40], sizes = [16, 8], strides = [1, 1]} : vector<16x64xbf16> to vector<16x8xbf16>
    %cst_131 = arith.constant dense<0.000000e+00> : vector<16x16xf32>
    %340 = tpu.matmul %337, %338, %cst_131 {dimension_numbers = #tpu.dot_dimension_numbers<[1], [1], [0], [0], [0, 0, 1, 0], [], []>} : vector<16x8xbf16>, vector<16x8xbf16>, vector<16x16xf32> -> vector<16x16xf32>
    %341 = arith.addf %340, %10 : vector<16x16xf32>
    %cst_132 = arith.constant dense<0xFF800000> : vector<16xf32>
    %342 = vector.multi_reduction <maximumf>, %341, %cst_132 [1] : vector<16x16xf32> to vector<16xf32>
    %343 = vector.shape_cast %342 : vector<16xf32> to vector<16x1xf32>
    %344 = vector.broadcast %343 : vector<16x1xf32> to vector<16x16xf32>
    %345 = arith.subf %341, %344 : vector<16x16xf32>
    %346 = math.exp %345 : vector<16x16xf32>
    %cst_133 = arith.constant dense<0.000000e+00> : vector<16xf32>
    %347 = vector.multi_reduction <add>, %346, %cst_133 [1] : vector<16x16xf32> to vector<16xf32>
    %348 = vector.shape_cast %347 : vector<16xf32> to vector<16x1xf32>
    %349 = arith.truncf %346 : vector<16x16xf32> to vector<16x16xbf16>
    %cst_134 = arith.constant dense<0.000000e+00> : vector<16x8xf32>
    %350 = tpu.matmul %349, %339, %cst_134 {dimension_numbers = #tpu.dot_dimension_numbers<[1], [0], [0], [1], [0, 0, 1, 1], [], []>} : vector<16x16xbf16>, vector<16x8xbf16>, vector<16x8xf32> -> vector<16x8xf32>
    %351 = tpu.reciprocal %348 : vector<16x1xf32> -> vector<16x1xf32>
    %352 = vector.broadcast %351 : vector<16x1xf32> to vector<16x8xf32>
    %353 = arith.mulf %350, %352 : vector<16x8xf32>
    %354 = arith.truncf %353 : vector<16x8xf32> to vector<16x8xbf16>
    %355 = vector.extract_strided_slice %315 {offsets = [8, 0], sizes = [8, 32], strides = [1, 1]} : vector<32x32xbf16> to vector<8x32xbf16>
    %cst_135 = arith.constant dense<0.000000e+00> : vector<16x32xf32>
    %356 = tpu.matmul %354, %355, %cst_135 {dimension_numbers = #tpu.dot_dimension_numbers<[1], [0], [0], [1], [0, 0, 1, 1], [], []>} : vector<16x8xbf16>, vector<8x32xbf16>, vector<16x32xf32> -> vector<16x32xf32>
    %357 = arith.addf %336, %356 : vector<16x32xf32>
    %358 = vector.extract_strided_slice %313 {offsets = [0, 16], sizes = [16, 8], strides = [1, 1]} : vector<16x32xbf16> to vector<16x8xbf16>
    %359 = vector.extract_strided_slice %314 {offsets = [0, 16], sizes = [16, 8], strides = [1, 1]} : vector<16x64xbf16> to vector<16x8xbf16>
    %360 = vector.extract_strided_slice %314 {offsets = [0, 48], sizes = [16, 8], strides = [1, 1]} : vector<16x64xbf16> to vector<16x8xbf16>
    %cst_136 = arith.constant dense<0.000000e+00> : vector<16x16xf32>
    %361 = tpu.matmul %358, %359, %cst_136 {dimension_numbers = #tpu.dot_dimension_numbers<[1], [1], [0], [0], [0, 0, 1, 0], [], []>} : vector<16x8xbf16>, vector<16x8xbf16>, vector<16x16xf32> -> vector<16x16xf32>
    %362 = arith.addf %361, %10 : vector<16x16xf32>
    %cst_137 = arith.constant dense<0xFF800000> : vector<16xf32>
    %363 = vector.multi_reduction <maximumf>, %362, %cst_137 [1] : vector<16x16xf32> to vector<16xf32>
    %364 = vector.shape_cast %363 : vector<16xf32> to vector<16x1xf32>
    %365 = vector.broadcast %364 : vector<16x1xf32> to vector<16x16xf32>
    %366 = arith.subf %362, %365 : vector<16x16xf32>
    %367 = math.exp %366 : vector<16x16xf32>
    %cst_138 = arith.constant dense<0.000000e+00> : vector<16xf32>
    %368 = vector.multi_reduction <add>, %367, %cst_138 [1] : vector<16x16xf32> to vector<16xf32>
    %369 = vector.shape_cast %368 : vector<16xf32> to vector<16x1xf32>
    %370 = arith.truncf %367 : vector<16x16xf32> to vector<16x16xbf16>
    %cst_139 = arith.constant dense<0.000000e+00> : vector<16x8xf32>
    %371 = tpu.matmul %370, %360, %cst_139 {dimension_numbers = #tpu.dot_dimension_numbers<[1], [0], [0], [1], [0, 0, 1, 1], [], []>} : vector<16x16xbf16>, vector<16x8xbf16>, vector<16x8xf32> -> vector<16x8xf32>
    %372 = tpu.reciprocal %369 : vector<16x1xf32> -> vector<16x1xf32>
    %373 = vector.broadcast %372 : vector<16x1xf32> to vector<16x8xf32>
    %374 = arith.mulf %371, %373 : vector<16x8xf32>
    %375 = arith.truncf %374 : vector<16x8xf32> to vector<16x8xbf16>
    %376 = vector.extract_strided_slice %315 {offsets = [16, 0], sizes = [8, 32], strides = [1, 1]} : vector<32x32xbf16> to vector<8x32xbf16>
    %cst_140 = arith.constant dense<0.000000e+00> : vector<16x32xf32>
    %377 = tpu.matmul %375, %376, %cst_140 {dimension_numbers = #tpu.dot_dimension_numbers<[1], [0], [0], [1], [0, 0, 1, 1], [], []>} : vector<16x8xbf16>, vector<8x32xbf16>, vector<16x32xf32> -> vector<16x32xf32>
    %378 = arith.addf %357, %377 : vector<16x32xf32>
    %379 = vector.extract_strided_slice %313 {offsets = [0, 24], sizes = [16, 8], strides = [1, 1]} : vector<16x32xbf16> to vector<16x8xbf16>
    %380 = vector.extract_strided_slice %314 {offsets = [0, 24], sizes = [16, 8], strides = [1, 1]} : vector<16x64xbf16> to vector<16x8xbf16>
    %381 = vector.extract_strided_slice %314 {offsets = [0, 56], sizes = [16, 8], strides = [1, 1]} : vector<16x64xbf16> to vector<16x8xbf16>
    %cst_141 = arith.constant dense<0.000000e+00> : vector<16x16xf32>
    %382 = tpu.matmul %379, %380, %cst_141 {dimension_numbers = #tpu.dot_dimension_numbers<[1], [1], [0], [0], [0, 0, 1, 0], [], []>} : vector<16x8xbf16>, vector<16x8xbf16>, vector<16x16xf32> -> vector<16x16xf32>
    %383 = arith.addf %382, %10 : vector<16x16xf32>
    %cst_142 = arith.constant dense<0xFF800000> : vector<16xf32>
    %384 = vector.multi_reduction <maximumf>, %383, %cst_142 [1] : vector<16x16xf32> to vector<16xf32>
    %385 = vector.shape_cast %384 : vector<16xf32> to vector<16x1xf32>
    %386 = vector.broadcast %385 : vector<16x1xf32> to vector<16x16xf32>
    %387 = arith.subf %383, %386 : vector<16x16xf32>
    %388 = math.exp %387 : vector<16x16xf32>
    %cst_143 = arith.constant dense<0.000000e+00> : vector<16xf32>
    %389 = vector.multi_reduction <add>, %388, %cst_143 [1] : vector<16x16xf32> to vector<16xf32>
    %390 = vector.shape_cast %389 : vector<16xf32> to vector<16x1xf32>
    %391 = arith.truncf %388 : vector<16x16xf32> to vector<16x16xbf16>
    %cst_144 = arith.constant dense<0.000000e+00> : vector<16x8xf32>
    %392 = tpu.matmul %391, %381, %cst_144 {dimension_numbers = #tpu.dot_dimension_numbers<[1], [0], [0], [1], [0, 0, 1, 1], [], []>} : vector<16x16xbf16>, vector<16x8xbf16>, vector<16x8xf32> -> vector<16x8xf32>
    %393 = tpu.reciprocal %390 : vector<16x1xf32> -> vector<16x1xf32>
    %394 = vector.broadcast %393 : vector<16x1xf32> to vector<16x8xf32>
    %395 = arith.mulf %392, %394 : vector<16x8xf32>
    %396 = arith.truncf %395 : vector<16x8xf32> to vector<16x8xbf16>
    %397 = vector.extract_strided_slice %315 {offsets = [24, 0], sizes = [8, 32], strides = [1, 1]} : vector<32x32xbf16> to vector<8x32xbf16>
    %cst_145 = arith.constant dense<0.000000e+00> : vector<16x32xf32>
    %398 = tpu.matmul %396, %397, %cst_145 {dimension_numbers = #tpu.dot_dimension_numbers<[1], [0], [0], [1], [0, 0, 1, 1], [], []>} : vector<16x8xbf16>, vector<8x32xbf16>, vector<16x32xf32> -> vector<16x32xf32>
    %399 = arith.addf %378, %398 : vector<16x32xf32>
    %400 = vector.broadcast %316 : vector<1x32xf32> to vector<16x32xf32>
    %401 = arith.addf %399, %400 : vector<16x32xf32>
    %402 = arith.addf %305, %401 : vector<16x32xf32>
    %c0_146 = arith.constant 0 : index
    %c0_147 = arith.constant 0 : index
    %403 = vector.load %arg30[%c0_146, %c0_147] : memref<1x32xf32, #tpu.memory_space<vmem>>, vector<1x32xf32>
    %c0_148 = arith.constant 0 : index
    %c0_149 = arith.constant 0 : index
    %404 = vector.load %arg31[%c0_148, %c0_149] : memref<1x32xf32, #tpu.memory_space<vmem>>, vector<1x32xf32>
    %cst_150 = arith.constant dense<0.000000e+00> : vector<16xf32>
    %405 = vector.multi_reduction <add>, %402, %cst_150 [1] : vector<16x32xf32> to vector<16xf32>
    %406 = vector.shape_cast %405 : vector<16xf32> to vector<16x1xf32>
    %cst_151 = arith.constant 3.200000e+01 : f32
    %407 = vector.broadcast %cst_151 : f32 to vector<16x1xf32>
    %408 = arith.divf %406, %407 : vector<16x1xf32>
    %409 = vector.broadcast %408 : vector<16x1xf32> to vector<16x32xf32>
    %410 = arith.subf %402, %409 : vector<16x32xf32>
    %411 = arith.mulf %410, %410 : vector<16x32xf32>
    %cst_152 = arith.constant dense<0.000000e+00> : vector<16xf32>
    %412 = vector.multi_reduction <add>, %411, %cst_152 [1] : vector<16x32xf32> to vector<16xf32>
    %413 = vector.shape_cast %412 : vector<16xf32> to vector<16x1xf32>
    %cst_153 = arith.constant 3.200000e+01 : f32
    %414 = vector.broadcast %cst_153 : f32 to vector<16x1xf32>
    %415 = arith.divf %413, %414 : vector<16x1xf32>
    %416 = vector.broadcast %408 : vector<16x1xf32> to vector<16x32xf32>
    %417 = arith.subf %402, %416 : vector<16x32xf32>
    %cst_154 = arith.constant 9.99999974E-6 : f32
    %418 = vector.broadcast %cst_154 : f32 to vector<16x1xf32>
    %419 = arith.addf %415, %418 : vector<16x1xf32>
    %420 = math.rsqrt %419 : vector<16x1xf32>
    %421 = vector.broadcast %420 : vector<16x1xf32> to vector<16x32xf32>
    %422 = arith.mulf %417, %421 : vector<16x32xf32>
    %423 = vector.broadcast %403 : vector<1x32xf32> to vector<16x32xf32>
    %424 = arith.mulf %422, %423 : vector<16x32xf32>
    %425 = vector.broadcast %404 : vector<1x32xf32> to vector<16x32xf32>
    %426 = arith.addf %424, %425 : vector<16x32xf32>
    %427 = arith.truncf %426 : vector<16x32xf32> to vector<16x32xbf16>
    %c0_155 = arith.constant 0 : index
    %c0_156 = arith.constant 0 : index
    %428 = vector.load %arg32[%c0_155, %c0_156] : memref<32x32xbf16, #tpu.memory_space<vmem>>, vector<32x32xbf16>
    %cst_157 = arith.constant dense<0.000000e+00> : vector<16x32xf32>
    %429 = tpu.matmul %427, %428, %cst_157 {dimension_numbers = #tpu.dot_dimension_numbers<[1], [0], [0], [1], [0, 0, 1, 1], [], []>} : vector<16x32xbf16>, vector<32x32xbf16>, vector<16x32xf32> -> vector<16x32xf32>
    %c0_158 = arith.constant 0 : index
    %c0_159 = arith.constant 0 : index
    %430 = vector.load %arg33[%c0_158, %c0_159] : memref<1x32xf32, #tpu.memory_space<vmem>>, vector<1x32xf32>
    %431 = vector.broadcast %430 : vector<1x32xf32> to vector<16x32xf32>
    %432 = arith.addf %429, %431 : vector<16x32xf32>
    %c0_160 = arith.constant 0 : index
    %c0_161 = arith.constant 0 : index
    %433 = vector.load %arg34[%c0_160, %c0_161] : memref<32x64xbf16, #tpu.memory_space<vmem>>, vector<32x64xbf16>
    %cst_162 = arith.constant dense<0.000000e+00> : vector<8x64xf32>
    %434 = tpu.matmul %20, %433, %cst_162 {dimension_numbers = #tpu.dot_dimension_numbers<[1], [0], [0], [1], [0, 0, 1, 1], [], []>} : vector<8x32xbf16>, vector<32x64xbf16>, vector<8x64xf32> -> vector<8x64xf32>
    %c0_163 = arith.constant 0 : index
    %c0_164 = arith.constant 0 : index
    %435 = vector.load %arg35[%c0_163, %c0_164] : memref<1x64xf32, #tpu.memory_space<vmem>>, vector<1x64xf32>
    %436 = vector.broadcast %435 : vector<1x64xf32> to vector<8x64xf32>
    %437 = arith.addf %434, %436 : vector<8x64xf32>
    %438 = arith.truncf %432 : vector<16x32xf32> to vector<16x32xbf16>
    %439 = arith.truncf %437 : vector<8x64xf32> to vector<8x64xbf16>
    %c0_165 = arith.constant 0 : index
    %c0_166 = arith.constant 0 : index
    %440 = vector.load %arg36[%c0_165, %c0_166] : memref<32x32xbf16, #tpu.memory_space<vmem>>, vector<32x32xbf16>
    %c0_167 = arith.constant 0 : index
    %c0_168 = arith.constant 0 : index
    %441 = vector.load %arg37[%c0_167, %c0_168] : memref<1x32xf32, #tpu.memory_space<vmem>>, vector<1x32xf32>
    %442 = vector.extract_strided_slice %438 {offsets = [0, 0], sizes = [16, 8], strides = [1, 1]} : vector<16x32xbf16> to vector<16x8xbf16>
    %443 = vector.extract_strided_slice %439 {offsets = [0, 0], sizes = [8, 8], strides = [1, 1]} : vector<8x64xbf16> to vector<8x8xbf16>
    %444 = vector.extract_strided_slice %439 {offsets = [0, 32], sizes = [8, 8], strides = [1, 1]} : vector<8x64xbf16> to vector<8x8xbf16>
    %cst_169 = arith.constant dense<0.000000e+00> : vector<16x8xf32>
    %445 = tpu.matmul %442, %443, %cst_169 {dimension_numbers = #tpu.dot_dimension_numbers<[1], [1], [0], [0], [0, 0, 1, 0], [], []>} : vector<16x8xbf16>, vector<8x8xbf16>, vector<16x8xf32> -> vector<16x8xf32>
    %446 = arith.addf %445, %18 : vector<16x8xf32>
    %cst_170 = arith.constant dense<0xFF800000> : vector<16xf32>
    %447 = vector.multi_reduction <maximumf>, %446, %cst_170 [1] : vector<16x8xf32> to vector<16xf32>
    %448 = vector.shape_cast %447 : vector<16xf32> to vector<16x1xf32>
    %449 = vector.broadcast %448 : vector<16x1xf32> to vector<16x8xf32>
    %450 = arith.subf %446, %449 : vector<16x8xf32>
    %451 = math.exp %450 : vector<16x8xf32>
    %cst_171 = arith.constant dense<0.000000e+00> : vector<16xf32>
    %452 = vector.multi_reduction <add>, %451, %cst_171 [1] : vector<16x8xf32> to vector<16xf32>
    %453 = vector.shape_cast %452 : vector<16xf32> to vector<16x1xf32>
    %454 = arith.truncf %451 : vector<16x8xf32> to vector<16x8xbf16>
    %cst_172 = arith.constant dense<0.000000e+00> : vector<16x8xf32>
    %455 = tpu.matmul %454, %444, %cst_172 {dimension_numbers = #tpu.dot_dimension_numbers<[1], [0], [0], [1], [0, 0, 1, 1], [], []>} : vector<16x8xbf16>, vector<8x8xbf16>, vector<16x8xf32> -> vector<16x8xf32>
    %456 = tpu.reciprocal %453 : vector<16x1xf32> -> vector<16x1xf32>
    %457 = vector.broadcast %456 : vector<16x1xf32> to vector<16x8xf32>
    %458 = arith.mulf %455, %457 : vector<16x8xf32>
    %459 = arith.truncf %458 : vector<16x8xf32> to vector<16x8xbf16>
    %460 = vector.extract_strided_slice %440 {offsets = [0, 0], sizes = [8, 32], strides = [1, 1]} : vector<32x32xbf16> to vector<8x32xbf16>
    %cst_173 = arith.constant dense<0.000000e+00> : vector<16x32xf32>
    %461 = tpu.matmul %459, %460, %cst_173 {dimension_numbers = #tpu.dot_dimension_numbers<[1], [0], [0], [1], [0, 0, 1, 1], [], []>} : vector<16x8xbf16>, vector<8x32xbf16>, vector<16x32xf32> -> vector<16x32xf32>
    %462 = vector.extract_strided_slice %438 {offsets = [0, 8], sizes = [16, 8], strides = [1, 1]} : vector<16x32xbf16> to vector<16x8xbf16>
    %463 = vector.extract_strided_slice %439 {offsets = [0, 8], sizes = [8, 8], strides = [1, 1]} : vector<8x64xbf16> to vector<8x8xbf16>
    %464 = vector.extract_strided_slice %439 {offsets = [0, 40], sizes = [8, 8], strides = [1, 1]} : vector<8x64xbf16> to vector<8x8xbf16>
    %cst_174 = arith.constant dense<0.000000e+00> : vector<16x8xf32>
    %465 = tpu.matmul %462, %463, %cst_174 {dimension_numbers = #tpu.dot_dimension_numbers<[1], [1], [0], [0], [0, 0, 1, 0], [], []>} : vector<16x8xbf16>, vector<8x8xbf16>, vector<16x8xf32> -> vector<16x8xf32>
    %466 = arith.addf %465, %18 : vector<16x8xf32>
    %cst_175 = arith.constant dense<0xFF800000> : vector<16xf32>
    %467 = vector.multi_reduction <maximumf>, %466, %cst_175 [1] : vector<16x8xf32> to vector<16xf32>
    %468 = vector.shape_cast %467 : vector<16xf32> to vector<16x1xf32>
    %469 = vector.broadcast %468 : vector<16x1xf32> to vector<16x8xf32>
    %470 = arith.subf %466, %469 : vector<16x8xf32>
    %471 = math.exp %470 : vector<16x8xf32>
    %cst_176 = arith.constant dense<0.000000e+00> : vector<16xf32>
    %472 = vector.multi_reduction <add>, %471, %cst_176 [1] : vector<16x8xf32> to vector<16xf32>
    %473 = vector.shape_cast %472 : vector<16xf32> to vector<16x1xf32>
    %474 = arith.truncf %471 : vector<16x8xf32> to vector<16x8xbf16>
    %cst_177 = arith.constant dense<0.000000e+00> : vector<16x8xf32>
    %475 = tpu.matmul %474, %464, %cst_177 {dimension_numbers = #tpu.dot_dimension_numbers<[1], [0], [0], [1], [0, 0, 1, 1], [], []>} : vector<16x8xbf16>, vector<8x8xbf16>, vector<16x8xf32> -> vector<16x8xf32>
    %476 = tpu.reciprocal %473 : vector<16x1xf32> -> vector<16x1xf32>
    %477 = vector.broadcast %476 : vector<16x1xf32> to vector<16x8xf32>
    %478 = arith.mulf %475, %477 : vector<16x8xf32>
    %479 = arith.truncf %478 : vector<16x8xf32> to vector<16x8xbf16>
    %480 = vector.extract_strided_slice %440 {offsets = [8, 0], sizes = [8, 32], strides = [1, 1]} : vector<32x32xbf16> to vector<8x32xbf16>
    %cst_178 = arith.constant dense<0.000000e+00> : vector<16x32xf32>
    %481 = tpu.matmul %479, %480, %cst_178 {dimension_numbers = #tpu.dot_dimension_numbers<[1], [0], [0], [1], [0, 0, 1, 1], [], []>} : vector<16x8xbf16>, vector<8x32xbf16>, vector<16x32xf32> -> vector<16x32xf32>
    %482 = arith.addf %461, %481 : vector<16x32xf32>
    %483 = vector.extract_strided_slice %438 {offsets = [0, 16], sizes = [16, 8], strides = [1, 1]} : vector<16x32xbf16> to vector<16x8xbf16>
    %484 = vector.extract_strided_slice %439 {offsets = [0, 16], sizes = [8, 8], strides = [1, 1]} : vector<8x64xbf16> to vector<8x8xbf16>
    %485 = vector.extract_strided_slice %439 {offsets = [0, 48], sizes = [8, 8], strides = [1, 1]} : vector<8x64xbf16> to vector<8x8xbf16>
    %cst_179 = arith.constant dense<0.000000e+00> : vector<16x8xf32>
    %486 = tpu.matmul %483, %484, %cst_179 {dimension_numbers = #tpu.dot_dimension_numbers<[1], [1], [0], [0], [0, 0, 1, 0], [], []>} : vector<16x8xbf16>, vector<8x8xbf16>, vector<16x8xf32> -> vector<16x8xf32>
    %487 = arith.addf %486, %18 : vector<16x8xf32>
    %cst_180 = arith.constant dense<0xFF800000> : vector<16xf32>
    %488 = vector.multi_reduction <maximumf>, %487, %cst_180 [1] : vector<16x8xf32> to vector<16xf32>
    %489 = vector.shape_cast %488 : vector<16xf32> to vector<16x1xf32>
    %490 = vector.broadcast %489 : vector<16x1xf32> to vector<16x8xf32>
    %491 = arith.subf %487, %490 : vector<16x8xf32>
    %492 = math.exp %491 : vector<16x8xf32>
    %cst_181 = arith.constant dense<0.000000e+00> : vector<16xf32>
    %493 = vector.multi_reduction <add>, %492, %cst_181 [1] : vector<16x8xf32> to vector<16xf32>
    %494 = vector.shape_cast %493 : vector<16xf32> to vector<16x1xf32>
    %495 = arith.truncf %492 : vector<16x8xf32> to vector<16x8xbf16>
    %cst_182 = arith.constant dense<0.000000e+00> : vector<16x8xf32>
    %496 = tpu.matmul %495, %485, %cst_182 {dimension_numbers = #tpu.dot_dimension_numbers<[1], [0], [0], [1], [0, 0, 1, 1], [], []>} : vector<16x8xbf16>, vector<8x8xbf16>, vector<16x8xf32> -> vector<16x8xf32>
    %497 = tpu.reciprocal %494 : vector<16x1xf32> -> vector<16x1xf32>
    %498 = vector.broadcast %497 : vector<16x1xf32> to vector<16x8xf32>
    %499 = arith.mulf %496, %498 : vector<16x8xf32>
    %500 = arith.truncf %499 : vector<16x8xf32> to vector<16x8xbf16>
    %501 = vector.extract_strided_slice %440 {offsets = [16, 0], sizes = [8, 32], strides = [1, 1]} : vector<32x32xbf16> to vector<8x32xbf16>
    %cst_183 = arith.constant dense<0.000000e+00> : vector<16x32xf32>
    %502 = tpu.matmul %500, %501, %cst_183 {dimension_numbers = #tpu.dot_dimension_numbers<[1], [0], [0], [1], [0, 0, 1, 1], [], []>} : vector<16x8xbf16>, vector<8x32xbf16>, vector<16x32xf32> -> vector<16x32xf32>
    %503 = arith.addf %482, %502 : vector<16x32xf32>
    %504 = vector.extract_strided_slice %438 {offsets = [0, 24], sizes = [16, 8], strides = [1, 1]} : vector<16x32xbf16> to vector<16x8xbf16>
    %505 = vector.extract_strided_slice %439 {offsets = [0, 24], sizes = [8, 8], strides = [1, 1]} : vector<8x64xbf16> to vector<8x8xbf16>
    %506 = vector.extract_strided_slice %439 {offsets = [0, 56], sizes = [8, 8], strides = [1, 1]} : vector<8x64xbf16> to vector<8x8xbf16>
    %cst_184 = arith.constant dense<0.000000e+00> : vector<16x8xf32>
    %507 = tpu.matmul %504, %505, %cst_184 {dimension_numbers = #tpu.dot_dimension_numbers<[1], [1], [0], [0], [0, 0, 1, 0], [], []>} : vector<16x8xbf16>, vector<8x8xbf16>, vector<16x8xf32> -> vector<16x8xf32>
    %508 = arith.addf %507, %18 : vector<16x8xf32>
    %cst_185 = arith.constant dense<0xFF800000> : vector<16xf32>
    %509 = vector.multi_reduction <maximumf>, %508, %cst_185 [1] : vector<16x8xf32> to vector<16xf32>
    %510 = vector.shape_cast %509 : vector<16xf32> to vector<16x1xf32>
    %511 = vector.broadcast %510 : vector<16x1xf32> to vector<16x8xf32>
    %512 = arith.subf %508, %511 : vector<16x8xf32>
    %513 = math.exp %512 : vector<16x8xf32>
    %cst_186 = arith.constant dense<0.000000e+00> : vector<16xf32>
    %514 = vector.multi_reduction <add>, %513, %cst_186 [1] : vector<16x8xf32> to vector<16xf32>
    %515 = vector.shape_cast %514 : vector<16xf32> to vector<16x1xf32>
    %516 = arith.truncf %513 : vector<16x8xf32> to vector<16x8xbf16>
    %cst_187 = arith.constant dense<0.000000e+00> : vector<16x8xf32>
    %517 = tpu.matmul %516, %506, %cst_187 {dimension_numbers = #tpu.dot_dimension_numbers<[1], [0], [0], [1], [0, 0, 1, 1], [], []>} : vector<16x8xbf16>, vector<8x8xbf16>, vector<16x8xf32> -> vector<16x8xf32>
    %518 = tpu.reciprocal %515 : vector<16x1xf32> -> vector<16x1xf32>
    %519 = vector.broadcast %518 : vector<16x1xf32> to vector<16x8xf32>
    %520 = arith.mulf %517, %519 : vector<16x8xf32>
    %521 = arith.truncf %520 : vector<16x8xf32> to vector<16x8xbf16>
    %522 = vector.extract_strided_slice %440 {offsets = [24, 0], sizes = [8, 32], strides = [1, 1]} : vector<32x32xbf16> to vector<8x32xbf16>
    %cst_188 = arith.constant dense<0.000000e+00> : vector<16x32xf32>
    %523 = tpu.matmul %521, %522, %cst_188 {dimension_numbers = #tpu.dot_dimension_numbers<[1], [0], [0], [1], [0, 0, 1, 1], [], []>} : vector<16x8xbf16>, vector<8x32xbf16>, vector<16x32xf32> -> vector<16x32xf32>
    %524 = arith.addf %503, %523 : vector<16x32xf32>
    %525 = vector.broadcast %441 : vector<1x32xf32> to vector<16x32xf32>
    %526 = arith.addf %524, %525 : vector<16x32xf32>
    %527 = arith.addf %426, %526 : vector<16x32xf32>
    %c0_189 = arith.constant 0 : index
    %c0_190 = arith.constant 0 : index
    %528 = vector.load %arg38[%c0_189, %c0_190] : memref<1x32xf32, #tpu.memory_space<vmem>>, vector<1x32xf32>
    %c0_191 = arith.constant 0 : index
    %c0_192 = arith.constant 0 : index
    %529 = vector.load %arg39[%c0_191, %c0_192] : memref<1x32xf32, #tpu.memory_space<vmem>>, vector<1x32xf32>
    %cst_193 = arith.constant dense<0.000000e+00> : vector<16xf32>
    %530 = vector.multi_reduction <add>, %527, %cst_193 [1] : vector<16x32xf32> to vector<16xf32>
    %531 = vector.shape_cast %530 : vector<16xf32> to vector<16x1xf32>
    %cst_194 = arith.constant 3.200000e+01 : f32
    %532 = vector.broadcast %cst_194 : f32 to vector<16x1xf32>
    %533 = arith.divf %531, %532 : vector<16x1xf32>
    %534 = vector.broadcast %533 : vector<16x1xf32> to vector<16x32xf32>
    %535 = arith.subf %527, %534 : vector<16x32xf32>
    %536 = arith.mulf %535, %535 : vector<16x32xf32>
    %cst_195 = arith.constant dense<0.000000e+00> : vector<16xf32>
    %537 = vector.multi_reduction <add>, %536, %cst_195 [1] : vector<16x32xf32> to vector<16xf32>
    %538 = vector.shape_cast %537 : vector<16xf32> to vector<16x1xf32>
    %cst_196 = arith.constant 3.200000e+01 : f32
    %539 = vector.broadcast %cst_196 : f32 to vector<16x1xf32>
    %540 = arith.divf %538, %539 : vector<16x1xf32>
    %541 = vector.broadcast %533 : vector<16x1xf32> to vector<16x32xf32>
    %542 = arith.subf %527, %541 : vector<16x32xf32>
    %cst_197 = arith.constant 9.99999974E-6 : f32
    %543 = vector.broadcast %cst_197 : f32 to vector<16x1xf32>
    %544 = arith.addf %540, %543 : vector<16x1xf32>
    %545 = math.rsqrt %544 : vector<16x1xf32>
    %546 = vector.broadcast %545 : vector<16x1xf32> to vector<16x32xf32>
    %547 = arith.mulf %542, %546 : vector<16x32xf32>
    %548 = vector.broadcast %528 : vector<1x32xf32> to vector<16x32xf32>
    %549 = arith.mulf %547, %548 : vector<16x32xf32>
    %550 = vector.broadcast %529 : vector<1x32xf32> to vector<16x32xf32>
    %551 = arith.addf %549, %550 : vector<16x32xf32>
    %552 = arith.truncf %551 : vector<16x32xf32> to vector<16x32xbf16>
    %c0_198 = arith.constant 0 : index
    %c0_199 = arith.constant 0 : index
    %553 = vector.load %arg40[%c0_198, %c0_199] : memref<32x64xbf16, #tpu.memory_space<vmem>>, vector<32x64xbf16>
    %cst_200 = arith.constant dense<0.000000e+00> : vector<16x64xf32>
    %554 = tpu.matmul %552, %553, %cst_200 {dimension_numbers = #tpu.dot_dimension_numbers<[1], [0], [0], [1], [0, 0, 1, 1], [], []>} : vector<16x32xbf16>, vector<32x64xbf16>, vector<16x64xf32> -> vector<16x64xf32>
    %c0_201 = arith.constant 0 : index
    %c0_202 = arith.constant 0 : index
    %555 = vector.load %arg41[%c0_201, %c0_202] : memref<1x64xf32, #tpu.memory_space<vmem>>, vector<1x64xf32>
    %556 = vector.broadcast %555 : vector<1x64xf32> to vector<16x64xf32>
    %557 = arith.addf %554, %556 : vector<16x64xf32>
    %cst_203 = arith.constant 0.000000e+00 : f32
    %558 = vector.broadcast %cst_203 : f32 to vector<16x64xf32>
    %559 = arith.maximumf %557, %558 : vector<16x64xf32>
    %560 = arith.truncf %559 : vector<16x64xf32> to vector<16x64xbf16>
    %c0_204 = arith.constant 0 : index
    %c0_205 = arith.constant 0 : index
    %561 = vector.load %arg42[%c0_204, %c0_205] : memref<64x32xbf16, #tpu.memory_space<vmem>>, vector<64x32xbf16>
    %cst_206 = arith.constant dense<0.000000e+00> : vector<16x32xf32>
    %562 = tpu.matmul %560, %561, %cst_206 {dimension_numbers = #tpu.dot_dimension_numbers<[1], [0], [0], [1], [0, 0, 1, 1], [], []>} : vector<16x64xbf16>, vector<64x32xbf16>, vector<16x32xf32> -> vector<16x32xf32>
    %c0_207 = arith.constant 0 : index
    %c0_208 = arith.constant 0 : index
    %563 = vector.load %arg43[%c0_207, %c0_208] : memref<1x32xf32, #tpu.memory_space<vmem>>, vector<1x32xf32>
    %564 = vector.broadcast %563 : vector<1x32xf32> to vector<16x32xf32>
    %565 = arith.addf %562, %564 : vector<16x32xf32>
    %566 = arith.addf %551, %565 : vector<16x32xf32>
    %c0_209 = arith.constant 0 : index
    %c0_210 = arith.constant 0 : index
    %567 = vector.load %arg44[%c0_209, %c0_210] : memref<1x32xf32, #tpu.memory_space<vmem>>, vector<1x32xf32>
    %c0_211 = arith.constant 0 : index
    %c0_212 = arith.constant 0 : index
    %568 = vector.load %arg45[%c0_211, %c0_212] : memref<1x32xf32, #tpu.memory_space<vmem>>, vector<1x32xf32>
    %cst_213 = arith.constant dense<0.000000e+00> : vector<16xf32>
    %569 = vector.multi_reduction <add>, %566, %cst_213 [1] : vector<16x32xf32> to vector<16xf32>
    %570 = vector.shape_cast %569 : vector<16xf32> to vector<16x1xf32>
    %cst_214 = arith.constant 3.200000e+01 : f32
    %571 = vector.broadcast %cst_214 : f32 to vector<16x1xf32>
    %572 = arith.divf %570, %571 : vector<16x1xf32>
    %573 = vector.broadcast %572 : vector<16x1xf32> to vector<16x32xf32>
    %574 = arith.subf %566, %573 : vector<16x32xf32>
    %575 = arith.mulf %574, %574 : vector<16x32xf32>
    %cst_215 = arith.constant dense<0.000000e+00> : vector<16xf32>
    %576 = vector.multi_reduction <add>, %575, %cst_215 [1] : vector<16x32xf32> to vector<16xf32>
    %577 = vector.shape_cast %576 : vector<16xf32> to vector<16x1xf32>
    %cst_216 = arith.constant 3.200000e+01 : f32
    %578 = vector.broadcast %cst_216 : f32 to vector<16x1xf32>
    %579 = arith.divf %577, %578 : vector<16x1xf32>
    %580 = vector.broadcast %572 : vector<16x1xf32> to vector<16x32xf32>
    %581 = arith.subf %566, %580 : vector<16x32xf32>
    %cst_217 = arith.constant 9.99999974E-6 : f32
    %582 = vector.broadcast %cst_217 : f32 to vector<16x1xf32>
    %583 = arith.addf %579, %582 : vector<16x1xf32>
    %584 = math.rsqrt %583 : vector<16x1xf32>
    %585 = vector.broadcast %584 : vector<16x1xf32> to vector<16x32xf32>
    %586 = arith.mulf %581, %585 : vector<16x32xf32>
    %587 = vector.broadcast %567 : vector<1x32xf32> to vector<16x32xf32>
    %588 = arith.mulf %586, %587 : vector<16x32xf32>
    %589 = vector.broadcast %568 : vector<1x32xf32> to vector<16x32xf32>
    %590 = arith.addf %588, %589 : vector<16x32xf32>
    %c0_218 = arith.constant 0 : index
    %c0_219 = arith.constant 0 : index
    %591 = vector.load %arg46[%c0_218, %c0_219] : memref<1x32xf32, #tpu.memory_space<vmem>>, vector<1x32xf32>
    %c0_220 = arith.constant 0 : index
    %c0_221 = arith.constant 0 : index
    %592 = vector.load %arg47[%c0_220, %c0_221] : memref<1x32xf32, #tpu.memory_space<vmem>>, vector<1x32xf32>
    %cst_222 = arith.constant dense<0.000000e+00> : vector<16xf32>
    %593 = vector.multi_reduction <add>, %590, %cst_222 [1] : vector<16x32xf32> to vector<16xf32>
    %594 = vector.shape_cast %593 : vector<16xf32> to vector<16x1xf32>
    %cst_223 = arith.constant 3.200000e+01 : f32
    %595 = vector.broadcast %cst_223 : f32 to vector<16x1xf32>
    %596 = arith.divf %594, %595 : vector<16x1xf32>
    %597 = vector.broadcast %596 : vector<16x1xf32> to vector<16x32xf32>
    %598 = arith.subf %590, %597 : vector<16x32xf32>
    %599 = arith.mulf %598, %598 : vector<16x32xf32>
    %cst_224 = arith.constant dense<0.000000e+00> : vector<16xf32>
    %600 = vector.multi_reduction <add>, %599, %cst_224 [1] : vector<16x32xf32> to vector<16xf32>
    %601 = vector.shape_cast %600 : vector<16xf32> to vector<16x1xf32>
    %cst_225 = arith.constant 3.200000e+01 : f32
    %602 = vector.broadcast %cst_225 : f32 to vector<16x1xf32>
    %603 = arith.divf %601, %602 : vector<16x1xf32>
    %604 = vector.broadcast %596 : vector<16x1xf32> to vector<16x32xf32>
    %605 = arith.subf %590, %604 : vector<16x32xf32>
    %cst_226 = arith.constant 9.99999974E-6 : f32
    %606 = vector.broadcast %cst_226 : f32 to vector<16x1xf32>
    %607 = arith.addf %603, %606 : vector<16x1xf32>
    %608 = math.rsqrt %607 : vector<16x1xf32>
    %609 = vector.broadcast %608 : vector<16x1xf32> to vector<16x32xf32>
    %610 = arith.mulf %605, %609 : vector<16x32xf32>
    %611 = vector.broadcast %591 : vector<1x32xf32> to vector<16x32xf32>
    %612 = arith.mulf %610, %611 : vector<16x32xf32>
    %613 = vector.broadcast %592 : vector<1x32xf32> to vector<16x32xf32>
    %614 = arith.addf %612, %613 : vector<16x32xf32>
    %615 = arith.truncf %614 : vector<16x32xf32> to vector<16x32xbf16>
    %c0_227 = arith.constant 0 : index
    %c0_228 = arith.constant 0 : index
    %616 = vector.load %arg48[%c0_227, %c0_228] : memref<32x16xbf16, #tpu.memory_space<vmem>>, vector<32x16xbf16>
    %cst_229 = arith.constant dense<0.000000e+00> : vector<16x16xf32>
    %617 = tpu.matmul %615, %616, %cst_229 {dimension_numbers = #tpu.dot_dimension_numbers<[1], [0], [0], [1], [0, 0, 1, 1], [], []>} : vector<16x32xbf16>, vector<32x16xbf16>, vector<16x16xf32> -> vector<16x16xf32>
    %c0_230 = arith.constant 0 : index
    %c0_231 = arith.constant 0 : index
    %618 = vector.load %arg49[%c0_230, %c0_231] : memref<1x16xf32, #tpu.memory_space<vmem>>, vector<1x16xf32>
    %619 = vector.broadcast %618 : vector<1x16xf32> to vector<16x16xf32>
    %620 = arith.addf %617, %619 : vector<16x16xf32>
    %c0_232 = arith.constant 0 : index
    %c0_233 = arith.constant 0 : index
    %621 = vector.load %arg50[%c0_232, %c0_233] : memref<16x16xf32, #tpu.memory_space<vmem>>, vector<16x16xf32>
    tpu.vector_store %arg50[%c0_232, %c0_233], %620 {strides = array<i32>} : memref<16x16xf32, #tpu.memory_space<vmem>>, vector<16x16xf32>,
    return
  }
}

</mosaic_0001>

<bundles_post_ra>
// kernel: pytransformer_forward.4
= control target key start
LH: loop header
LB: loop body
LE: loop exit
PB: predicated region body
PF: predicated region fallthrough
CT: control target
= control target key end

     0   :  { %s747_s15 = smov 0   ;;  %s749_s16 = smov 0   ;;  %s846_s0 = inlined_call_operand.vmem [shape: bf16[128,27], index: 0, kind: input, shape index: {}]   ;;  %s847_s1 = inlined_call_operand.vmem [shape: bf16[27,64], index: 1, kind: input, shape index: {}]   ;;  %s848_s2 = inlined_call_operand.vmem [shape: f32[1,64], index: 2, kind: input, shape index: {}]   ;;  %s849_s3 = inlined_call_operand.vmem [shape: f32[1,64], index: 3, kind: input, shape index: {}]   ;;  %s850_s4 = inlined_call_operand.vmem [shape: bf16[128,64], index: 4, kind: output, shape index: {}]  }
   0x1   :  { %s751_s17 = smov 0  }
   0x2 LB: > { %s33_s18 = sadd.s32 1, %s714_s16  ;;  %p621_p0 = scmp.ge.s32.totalorder %s718_s17, 1  ;;  %s718_s17 = sphi %s751_s17, %s14_s17   ;;  %s714_s16 = sphi %s749_s16, %s852_s16   ;;  %s710_s15 = sphi %s747_s15, %s851_s15  }
   0x3   : > { %p35_p1 = scmp.ge.s32.totalorder %s33_s18, 2  ;;  %p221_p2 = scmp.lt.s32.totalorder %s718_s17, 3 }
   0x5   : > { %s854_s18 = smov (%p35_p1, %s33_s18), 0  ;;  %p222_p3 = pnand %p621_p0, %p221_p2 }
   0x6   : > { %s622_s23 = sshll.u32 (!%p222_p3), %s710_s15, 3 }
   0x7   : > { %225 = sbr.rel (%p222_p3) target bundleno = 188 (0xbc), region = 36  ;;  %p268_p4 = scmp.lt.s32.totalorder (!%p222_p3), %s622_s23, 15 }
   0xc   : > { %v648_v0 = vld [vmem:[%s847_s1 + $0x8] sm:$0xf]  ;;  %v661_v1 = vld [vmem:[%s847_s1 + $0x8] sm:$0x30]  ;;  %vm378_vm0 = vcmask 1044480   ;;  %vm379_vm1 = vcmask 1045504  }
   0xd   : > { %v649_v2 = vor.u32 %v661_v1, %v648_v0  ;;  %vm305_vm2 = vcmask 523264   ;;  %v720_v3 = vmov 65535   ;;  %v721_v6 = vmov 0.0   ;;  %s856_s23 = smov (!%p268_p4, %s622_s23), 15  ;;  %v660_v8 = vld [vmem:[%s847_s1] sm:$0xff] }
   0xe   : > { %v380_v4 = vsel %vm378_vm0, 4294967295, %v720_v3  ;;  %306 = vst.msk [vmem:[#allocation2] sm:$0xff] %vm305_vm2, %v721_v6  ;;  %s623_s26 = sshll.u32 %s856_s23, 2  ;;  %vm365_vm3 = vcmask 220160   ;;  %v795_v23 = vld [vmem:[%s848_s2] ss:$0 sm:$0xff] }
   0xf   : > { %v381_v5 = vsel %vm379_vm1, %v380_v4, 0  ;;  %307 = vst.msk [vmem:[#allocation2 + $0x8] sm:$0xff] %vm305_vm2, %v721_v6  ;;  %s274_s29 = scalar_lea.vmem %s846_s0, %s623_s26  ;;  %v695_v30 = vld [vmem:[%s849_s3] ss:$0 sm:$0xff]  ;;  %s811_s10 = scalar_lea.vmem %s850_s4, %s623_s26  ;;  %vm482_vm4 = vcmask 519168  }
  0x10   : > { %v383_v7 = vand.u32 %v649_v2, %v381_v5  ;;  %308 = vst.msk [vmem:[#allocation2 + $0x10] sm:$0xff] %vm305_vm2, %v721_v6  ;;  %v656_v9 = vld [vmem:[%s274_s29] sm:$0xff]  ;;  %v657_v10 = vld [vmem:[%s274_s29 + $0x8] sm:$0xff]  ;;  %v658_v11 = vld [vmem:[%s274_s29 + $0x10] sm:$0xff] }
  0x11   : > { %309 = vst.msk [vmem:[#allocation2 + $0x18] sm:$0xff] %vm305_vm2, %v721_v6  ;;  %v659_v12 = vld [vmem:[%s274_s29 + $0x18] sm:$0xff] }
  0x12   : > { %391 = vmatpush.bf16.msra.mxu0 %v383_v7  ;;  %662 = vmatpush.bf16.msra.mxu1 %v383_v7  ;;  %310 = vst.msk [vmem:[#allocation2 + $0x20] sm:$0xff] %vm305_vm2, %v721_v6 }
  0x13   : > { %663 = vmatpush.bf16.msra.mxu2 %v383_v7  ;;  %664 = vmatpush.bf16.msra.mxu3 %v383_v7  ;;  %311 = vst.msk [vmem:[#allocation2 + $0x28] sm:$0xff] %vm305_vm2, %v721_v6 }
  0x14   : > { %312 = vst.msk [vmem:[#allocation2 + $0x30] sm:$0xff] %vm305_vm2, %v721_v6 }
  0x15   : > { %313 = vst.msk [vmem:[#allocation2 + $0x38] sm:$0xff] %vm305_vm2, %v721_v6  ;;  %v314_v13 = vld [vmem:[#allocation2] sm:$0xff] }
  0x16   : > { %392 = vmatpush.bf16.msra.mxu0 %v660_v8  ;;  %665 = vmatpush.bf16.msra.mxu1 %v660_v8  ;;  %v315_v21 = vld [vmem:[#allocation2 + $0x8] sm:$0xff] }
  0x17   : > { %666 = vmatpush.bf16.msra.mxu2 %v660_v8  ;;  %667 = vmatpush.bf16.msra.mxu3 %v660_v8  ;;  %v316_v14 = vld [vmem:[#allocation2 + $0x10] sm:$0xff] }
  0x18   : > { %v317_v22 = vld [vmem:[#allocation2 + $0x18] sm:$0xff] }
  0x19   : > { %650 = vmatmul.msk.bf16.vlgmr.msra.gmra.mxu0 %vm365_vm3, %v656_v9  ;;  %651 = vmatmul.msk.bf16.vlgmr.msra.gmra.mxu1 %vm365_vm3, %v657_v10  ;;  %v318_v19 = vld [vmem:[#allocation2 + $0x20] sm:$0xff] }
  0x1a   : > { %652 = vmatmul.msk.bf16.vlgmr.msra.gmra.mxu2 %vm365_vm3, %v658_v11  ;;  %653 = vmatmul.msk.bf16.vlgmr.msra.gmra.mxu3 %vm365_vm3, %v659_v12  ;;  %v319_v38 = vld [vmem:[#allocation2 + $0x28] sm:$0xff] }
  0x1b   : > { %v320_v20 = vld [vmem:[#allocation2 + $0x30] sm:$0xff] }
  0x1c   : > { %v321_v40 = vld [vmem:[#allocation2 + $0x38] sm:$0xff] }
  0x96   : > { %v394_v15 = vpop.f32.mrf.mxu0  ;;  %v399_v16 = vpop.f32.mrf.mxu1 }
  0x97   : > { %v414_v17 = vadd.f32 %v394_v15, %v314_v13  ;;  %v416_v18 = vadd.f32 %v399_v16, %v316_v14 }
  0x99   : > { %423 = vst.msk [vmem:[#allocation2] sm:$0xff] %vm305_vm2, %v414_v17 }
  0x9a   : > { %425 = vst.msk [vmem:[#allocation2 + $0x10] sm:$0xff] %vm305_vm2, %v416_v18 }
  0x9d   : > { %v404_v24 = vpop.f32.mrf.mxu2  ;;  %v409_v25 = vpop.f32.mrf.mxu3 }
  0x9e   : > { %v418_v26 = vadd.f32 %v404_v24, %v318_v19  ;;  %v420_v27 = vadd.f32 %v409_v25, %v320_v20  ;;  %v396_v28 = vpop.f32.mrf.mxu0  ;;  %v401_v29 = vpop.f32.mrf.mxu1 }
  0x9f   : > { %v415_v31 = vadd.f32 %v396_v28, %v315_v21  ;;  %v417_v32 = vadd.f32 %v401_v29, %v317_v22 }
  0xa0   : > { %v434_v33 = vld [vmem:[#allocation2] sm:$0xff]  ;;  %427 = vst.msk [vmem:[#allocation2 + $0x20] sm:$0xff] %vm305_vm2, %v418_v26 }
  0xa1   : > { %v446_v34 = vmul.f32 %v795_v23, %v434_v33  ;;  %v436_v35 = vld [vmem:[#allocation2 + $0x10] sm:$0xff]  ;;  %429 = vst.msk [vmem:[#allocation2 + $0x30] sm:$0xff] %vm305_vm2, %v420_v27 }
  0xa2   : > { %v448_v36 = vmul.f32 %v795_v23, %v436_v35  ;;  %424 = vst.msk [vmem:[#allocation2 + $0x8] sm:$0xff] %vm305_vm2, %v415_v31 }
  0xa3   : > { %v458_v37 = vadd.f32 %v695_v30, %v446_v34  ;;  %426 = vst.msk [vmem:[#allocation2 + $0x18] sm:$0xff] %vm305_vm2, %v417_v32 }
  0xa4   : > { %v460_v39 = vadd.f32 %v695_v30, %v448_v36 }
  0xa5   : > { %v466_v41 = vmax.f32 %v458_v37, 0.0  ;;  %v406_v42 = vpop.f32.mrf.mxu2  ;;  %v411_v43 = vpop.f32.mrf.mxu3 }
  0xa6   : > { %v468_v44 = vmax.f32 %v460_v39, 0.0  ;;  %v419_v45 = vadd.f32 %v406_v42, %v319_v38  ;;  %v421_v48 = vadd.f32 %v411_v43, %v321_v40 }
  0xa7   : > { %v474_v46 = vpack.c.bf16 %v466_v41, %v466_v41  ;;  %v438_v47 = vld [vmem:[#allocation2 + $0x20] sm:$0xff] }
  0xa8   : > { %v476_v49 = vpack.c.bf16 %v468_v44, %v468_v44  ;;  %v450_v50 = vmul.f32 %v795_v23, %v438_v47  ;;  %v440_v51 = vld [vmem:[#allocation2 + $0x30] sm:$0xff]  ;;  %428 = vst.msk [vmem:[#allocation2 + $0x28] sm:$0xff] %vm305_vm2, %v419_v45 }
  0xa9   : > { %483 = vst.msk [vmem:[%s811_s10] sm:$0xf] %vm482_vm4, %v474_v46  ;;  %v452_v52 = vmul.f32 %v795_v23, %v440_v51  ;;  %v435_v53 = vld [vmem:[#allocation2 + $0x8] sm:$0xff] }
  0xaa   : > { %485 = vst.msk [vmem:[%s811_s10 + $0x8] sm:$0xf] %vm482_vm4, %v476_v49  ;;  %v462_v54 = vadd.f32 %v695_v30, %v450_v50  ;;  %v447_v55 = vmul.f32 %v795_v23, %v435_v53  ;;  %v437_v56 = vld [vmem:[#allocation2 + $0x18] sm:$0xff] }
  0xab   : > { %v464_v57 = vadd.f32 %v695_v30, %v452_v52  ;;  %v449_v58 = vmul.f32 %v795_v23, %v437_v56  ;;  %430 = vst.msk [vmem:[#allocation2 + $0x38] sm:$0xff] %vm305_vm2, %v421_v48 }
  0xac   : > { %v470_v59 = vmax.f32 %v462_v54, 0.0  ;;  %v459_v60 = vadd.f32 %v695_v30, %v447_v55 }
  0xad   : > { %v472_v61 = vmax.f32 %v464_v57, 0.0  ;;  %v461_v62 = vadd.f32 %v695_v30, %v449_v58 }
  0xae   : > { %v478_v63 = vpack.c.bf16 %v470_v59, %v470_v59  ;;  %v467_v0 = vmax.f32 %v459_v60, 0.0 }
  0xaf   : > { %v480_v1 = vpack.c.bf16 %v472_v61, %v472_v61  ;;  %v469_v2 = vmax.f32 %v461_v62, 0.0  ;;  %v439_v3 = vld [vmem:[#allocation2 + $0x28] sm:$0xff] }
  0xb0   : > { %487 = vst.msk [vmem:[%s811_s10 + $0x10] sm:$0xf] %vm482_vm4, %v478_v63  ;;  %v475_v4 = vpack.c.bf16 %v467_v0, %v467_v0  ;;  %v451_v5 = vmul.f32 %v795_v23, %v439_v3 }
  0xb1   : > { %489 = vst.msk [vmem:[%s811_s10 + $0x18] sm:$0xf] %vm482_vm4, %v480_v1  ;;  %v477_v6 = vpack.c.bf16 %v469_v2, %v469_v2 }
  0xb2   : > { %484 = vst.msk [vmem:[%s811_s10 + $0x4] sm:$0xf] %vm482_vm4, %v475_v4  ;;  %v463_v7 = vadd.f32 %v695_v30, %v451_v5  ;;  %v441_v8 = vld [vmem:[#allocation2 + $0x38] sm:$0xff] }
  0xb3   : > { %486 = vst.msk [vmem:[%s811_s10 + $0xc] sm:$0xf] %vm482_vm4, %v477_v6  ;;  %v453_v9 = vmul.f32 %v795_v23, %v441_v8 }
  0xb4   : > { %v471_v10 = vmax.f32 %v463_v7, 0.0 }
  0xb5   : > { %v465_v11 = vadd.f32 %v695_v30, %v453_v9 }
  0xb6   : > { %v479_v12 = vpack.c.bf16 %v471_v10, %v471_v10 }
  0xb7   : > { %v473_v13 = vmax.f32 %v465_v11, 0.0 }
  0xb8   : > { %488 = vst.msk [vmem:[%s811_s10 + $0x14] sm:$0xf] %vm482_vm4, %v479_v12 }
  0xb9   : > { %v481_v14 = vpack.c.bf16 %v473_v13, %v473_v13 }
  0xbb   : > { %490 = vst.msk [vmem:[%s811_s10 + $0x1c] sm:$0xf] %vm482_vm4, %v481_v14 }
  0xbc PF: > { %s14_s17 = sadd.s32 1, %s718_s17   ;;  %s851_s15 = smov %s714_s16 }
  0xbd   : > { %p11_p5 = scmp.ge.s32.totalorder %s14_s17, 4   ;;  %s852_s16 = smov %s854_s18 }
  0xbf   :  { %13 = sbr.rel (!%p11_p5) target bundleno = 2 (0x2), region = 83 }

// kernel: pytransformer_forward.5
= control target key start
LH: loop header
LB: loop body
LE: loop exit
PB: predicated region body
PF: predicated region fallthrough
CT: control target
= control target key end

     0   :  { %s1163_s15 = smov 0   ;;  %s1165_s16 = smov 0   ;;  %s1334_s0 = inlined_call_operand.vmem [shape: bf16[32,576], index: 0, kind: input, shape index: {}]   ;;  %s1335_s1 = inlined_call_operand.vmem [shape: bf16[576,64], index: 1, kind: input, shape index: {}]   ;;  %s1336_s2 = inlined_call_operand.vmem [shape: f32[1,64], index: 2, kind: input, shape index: {}]   ;;  %s1337_s3 = inlined_call_operand.vmem [shape: f32[1,64], index: 3, kind: input, shape index: {}]   ;;  %s1338_s4 = inlined_call_operand.vmem [shape: bf16[32,64], index: 4, kind: output, shape index: {}]  }
   0x1   :  { %s1167_s17 = smov 0  }
   0x2 LB: > { %s33_s18 = sadd.s32 1, %s1131_s16  ;;  %p872_p0 = scmp.ge.s32.totalorder %s1135_s17, 1  ;;  %s1135_s17 = sphi %s1167_s17, %s14_s17   ;;  %s1131_s16 = sphi %s1165_s16, %s1340_s16   ;;  %s1127_s15 = sphi %s1163_s15, %s1339_s15  }
   0x3   : > { %p35_p1 = scmp.ge.s32.totalorder %s33_s18, 2  ;;  %p224_p2 = scmp.lt.s32.totalorder %s1135_s17, 3 }
   0x5   : > { %s1342_s18 = smov (%p35_p1, %s33_s18), 0  ;;  %p225_p3 = pnand %p872_p0, %p224_p2 }
   0x6   : > { %s873_s21 = sshll.u32 (!%p225_p3), %s1127_s15, 1 }
   0x7   : > { %228 = sbr.rel (%p225_p3) target bundleno = 215 (0xd7), region = 36  ;;  %p274_p4 = scmp.lt.s32.totalorder (!%p225_p3), %s873_s21, 3 }
   0xc   : > { %v1056_v0 = vld [vmem:[%s1335_s1 + $0x38] sm:$0xff]  ;;  %v1055_v4 = vld [vmem:[%s1335_s1 + $0x30] sm:$0xff]  ;;  %v1054_v8 = vld [vmem:[%s1335_s1 + $0x28] sm:$0xff]  ;;  %s1344_s21 = smov (!%p274_p4, %s873_s21), 3  ;;  %vm313_vm0 = vcmask 523264   ;;  %v1137_v51 = vmov 0.0  }
   0xd   : > { %v1064_v1 = vld [vmem:[%s1335_s1 + $0x78] sm:$0xff]  ;;  %641 = vmatpush.bf16.msra.mxu0 %v1056_v0  ;;  %v1063_v5 = vld [vmem:[%s1335_s1 + $0x70] sm:$0xff]  ;;  %v1062_v9 = vld [vmem:[%s1335_s1 + $0x68] sm:$0xff]  ;;  %s1085_s19 = smul.u32 20, %s1344_s21  ;;  %314 = vst.msk [vmem:[#allocation2] sm:$0xff] %vm313_vm0, %v1137_v51  ;;  %s876_s7 = sshll.u32 %s1344_s21, 2 }
   0xe   : > { %v1072_v2 = vld [vmem:[%s1335_s1 + $0xb8] sm:$0xff]  ;;  %655 = vmatpush.bf16.msra.mxu1 %v1064_v1  ;;  %v1071_v6 = vld [vmem:[%s1335_s1 + $0xb0] sm:$0xff]  ;;  %v1070_v10 = vld [vmem:[%s1335_s1 + $0xa8] sm:$0xff]  ;;  %315 = vst.msk [vmem:[#allocation2 + $0x8] sm:$0xff] %vm313_vm0, %v1137_v51  ;;  %s306_s10 = scalar_lea.vmem %s1338_s4, %s876_s7  ;;  %vm736_vm1 = vcmask 519168  }
   0xf   : > { %v1080_v3 = vld [vmem:[%s1335_s1 + $0xf8] sm:$0xff]  ;;  %669 = vmatpush.bf16.msra.mxu2 %v1072_v2  ;;  %v1079_v7 = vld [vmem:[%s1335_s1 + $0xf0] sm:$0xff]  ;;  %v1078_v11 = vld [vmem:[%s1335_s1 + $0xe8] sm:$0xff]  ;;  %s1268_s30 = scalar_lea.vmem %s1334_s0, %s1085_s19 }
  0x10   : > { %683 = vmatpush.bf16.msra.mxu3 %v1080_v3  ;;  %v1053_v12 = vld [vmem:[%s1335_s1 + $0x20] sm:$0xff]  ;;  %v1052_v16 = vld [vmem:[%s1335_s1 + $0x18] sm:$0xff]  ;;  %v1051_v20 = vld [vmem:[%s1335_s1 + $0x10] sm:$0xff] }
  0x11   : > { %642 = vmatpush.bf16.msra.mxu0 %v1055_v4  ;;  %v1061_v13 = vld [vmem:[%s1335_s1 + $0x60] sm:$0xff]  ;;  %v1060_v17 = vld [vmem:[%s1335_s1 + $0x58] sm:$0xff]  ;;  %v1059_v21 = vld [vmem:[%s1335_s1 + $0x50] sm:$0xff] }
  0x12   : > { %656 = vmatpush.bf16.msra.mxu1 %v1063_v5  ;;  %v1069_v14 = vld [vmem:[%s1335_s1 + $0xa0] sm:$0xff]  ;;  %v1068_v18 = vld [vmem:[%s1335_s1 + $0x98] sm:$0xff]  ;;  %v1067_v22 = vld [vmem:[%s1335_s1 + $0x90] sm:$0xff] }
  0x13   : > { %670 = vmatpush.bf16.msra.mxu2 %v1071_v6  ;;  %v1077_v15 = vld [vmem:[%s1335_s1 + $0xe0] sm:$0xff]  ;;  %v1076_v19 = vld [vmem:[%s1335_s1 + $0xd8] sm:$0xff]  ;;  %v1075_v23 = vld [vmem:[%s1335_s1 + $0xd0] sm:$0xff] }
  0x14   : > { %684 = vmatpush.bf16.msra.mxu3 %v1079_v7  ;;  %v1050_v24 = vld [vmem:[%s1335_s1 + $0x8] sm:$0xff]  ;;  %v1049_v28 = vld [vmem:[%s1335_s1] sm:$0xff]  ;;  %v1046_v33 = vld [vmem:[%s1268_s30 + $0x10] sm:$0xf0] }
  0x15   : > { %643 = vmatpush.bf16.msra.mxu0 %v1054_v8  ;;  %v1058_v25 = vld [vmem:[%s1335_s1 + $0x48] sm:$0xff]  ;;  %v1057_v29 = vld [vmem:[%s1335_s1 + $0x40] sm:$0xff]  ;;  %v881_v35 = vld [vmem:[%s1268_s30 + $0x14] sm:$0xf0] }
  0x16   : > { %657 = vmatpush.bf16.msra.mxu1 %v1062_v9  ;;  %v1066_v26 = vld [vmem:[%s1335_s1 + $0x88] sm:$0xff]  ;;  %v1065_v30 = vld [vmem:[%s1335_s1 + $0x80] sm:$0xff]  ;;  %v1047_v37 = vld [vmem:[%s1268_s30 + $0x18] sm:$0xf0] }
  0x17   : > { %671 = vmatpush.bf16.msra.mxu2 %v1070_v10  ;;  %v1074_v27 = vld [vmem:[%s1335_s1 + $0xc8] sm:$0xff]  ;;  %v1073_v31 = vld [vmem:[%s1335_s1 + $0xc0] sm:$0xff]  ;;  %v1084_v40 = vld [vmem:[%s1335_s1 + $0x118] sm:$0xff] }
  0x18   : > { %685 = vmatpush.bf16.msra.mxu3 %v1078_v11  ;;  %v879_v32 = vld [vmem:[%s1268_s30] sm:$0xf]  ;;  %v1044_v34 = vld [vmem:[%s1268_s30 + $0x4] sm:$0xf]  ;;  %v887_v36 = vld [vmem:[%s1268_s30 + $0x8] sm:$0xf] }
  0x19   : > { %644 = vmatpush.bf16.msra.mxu0 %v1053_v12  ;;  %v1045_v38 = vld [vmem:[%s1268_s30 + $0xc] sm:$0xf]  ;;  %v889_v39 = vld [vmem:[%s1268_s30 + $0x1c] sm:$0xf0]  ;;  %v880_v41 = vor.u32 %v1046_v33, %v879_v32  ;;  %v884_v42 = vor.u32 %v1044_v34, %v881_v35  ;;  %v888_v43 = vor.u32 %v1047_v37, %v887_v36  ;;  %v1083_v45 = vld [vmem:[%s1335_s1 + $0x110] sm:$0xff] }
  0x1a   : > { %658 = vmatpush.bf16.msra.mxu1 %v1061_v13  ;;  %v892_v44 = vor.u32 %v1045_v38, %v889_v39  ;;  %v1082_v46 = vld [vmem:[%s1335_s1 + $0x108] sm:$0xff]  ;;  %v1081_v47 = vld [vmem:[%s1335_s1 + $0x100] sm:$0xff]  ;;  %v895_v48 = vld [vmem:[%s1268_s30 + $0x10] sm:$0xf] }
  0x1b   : > { %672 = vmatpush.bf16.msra.mxu2 %v1069_v14  ;;  %v1048_v49 = vld [vmem:[%s1268_s30 + $0x20] sm:$0xf0]  ;;  %v317_v6 = vld [vmem:[#allocation2 + $0x8] sm:$0xff]  ;;  %v1111_v8 = vld [vmem:[%s1336_s2] ss:$0 sm:$0xff] }
  0x1c   : > { %686 = vmatpush.bf16.msra.mxu3 %v1077_v15  ;;  %v896_v50 = vor.u32 %v1048_v49, %v895_v48  ;;  %v316_v62 = vld [vmem:[#allocation2] sm:$0xff] }
  0x1d   : > { %645 = vmatpush.bf16.msra.mxu0 %v1052_v16  ;;  %v1112_v10 = vld [vmem:[%s1337_s3] ss:$0 sm:$0xff] }
  0x1e   : > { %659 = vmatpush.bf16.msra.mxu1 %v1060_v17 }
  0x1f   : > { %673 = vmatpush.bf16.msra.mxu2 %v1068_v18 }
  0x20   : > { %687 = vmatpush.bf16.msra.mxu3 %v1076_v19 }
  0x21   : > { %646 = vmatpush.bf16.msra.mxu0 %v1051_v20 }
  0x22   : > { %660 = vmatpush.bf16.msra.mxu1 %v1059_v21 }
  0x23   : > { %674 = vmatpush.bf16.msra.mxu2 %v1067_v22 }
  0x24   : > { %688 = vmatpush.bf16.msra.mxu3 %v1075_v23 }
  0x25   : > { %647 = vmatpush.bf16.msra.mxu0 %v1050_v24 }
  0x26   : > { %661 = vmatpush.bf16.msra.mxu1 %v1058_v25 }
  0x27   : > { %675 = vmatpush.bf16.msra.mxu2 %v1066_v26 }
  0x28   : > { %689 = vmatpush.bf16.msra.mxu3 %v1074_v27 }
  0x29   : > { %648 = vmatpush.bf16.msra.mxu0 %v1049_v28 }
  0x2a   : > { %662 = vmatpush.bf16.msra.mxu1 %v1057_v29 }
  0x2b   : > { %676 = vmatpush.bf16.msra.mxu2 %v1065_v30 }
  0x2c   : > { %690 = vmatpush.bf16.msra.mxu3 %v1073_v31  ;;  %649 = vmatmul.bf16.vlgmr.msra.gmra.mxu0 %v880_v41 }
  0x2d   : > { %701 = vmatpush.bf16.msrb.mxu0 %v1084_v40  ;;  %663 = vmatmul.bf16.vlgmr.msra.gmra.mxu1 %v884_v42 }
  0x2e   : > { %677 = vmatmul.bf16.vlgmr.msra.gmra.mxu2 %v888_v43 }
  0x2f   : > { %691 = vmatmul.bf16.vlgmr.msra.gmra.mxu3 %v892_v44 }
  0x31   : > { %702 = vmatpush.bf16.msrb.mxu0 %v1083_v45 }
  0x35   : > { %703 = vmatpush.bf16.msrb.mxu0 %v1082_v46 }
  0x39   : > { %704 = vmatpush.bf16.msrb.mxu0 %v1081_v47 }
  0x3c   : > { %1041 = vmatmul.msk.bf16.vlgmr.msrb.gmra.mxu0 %vm313_vm0, %v896_v50 }
  0xa9   : > { %v650_v52 = vpop.f32.mrf.mxu0 }
  0xaa   : > { %v664_v53 = vpop.f32.mrf.mxu1 }
  0xab   : > { %v665_v56 = vadd.f32 %v664_v53, %v650_v52 }
  0xb1   : > { %v678_v54 = vpop.f32.mrf.mxu2  ;;  %v652_v55 = vpop.f32.mrf.mxu0 }
  0xb2   : > { %v679_v57 = vadd.f32 %v678_v54, %v665_v56  ;;  %v692_v58 = vpop.f32.mrf.mxu3  ;;  %v666_v59 = vpop.f32.mrf.mxu1 }
  0xb3   : > { %v667_v0 = vadd.f32 %v666_v59, %v652_v55 }
  0xb4   : > { %v693_v60 = vadd.f32 %v692_v58, %v679_v57 }
  0xb9   : > { %v680_v61 = vpop.f32.mrf.mxu2  ;;  %v706_v63 = vpop.f32.mrf.mxu0 }
  0xba   : > { %v707_v1 = vadd.f32 %v706_v63, %v693_v60  ;;  %v681_v2 = vadd.f32 %v680_v61, %v667_v0  ;;  %v694_v4 = vpop.f32.mrf.mxu3 }
  0xbc   : > { %v711_v3 = vadd.f32 %v707_v1, %v316_v62  ;;  %v695_v5 = vadd.f32 %v694_v4, %v681_v2 }
  0xbe   : > { %713 = vst.msk [vmem:[#allocation2] sm:$0xff] %vm313_vm0, %v711_v3 }
  0xc1   : > { %v708_v7 = vpop.f32.mrf.mxu0 }
  0xc2   : > { %v709_v9 = vadd.f32 %v708_v7, %v695_v5 }
  0xc4   : > { %v712_v11 = vadd.f32 %v709_v9, %v317_v6 }
  0xc5   : > { %v718_v12 = vld [vmem:[#allocation2] sm:$0xff] }
  0xc6   : > { %v724_v13 = vmul.f32 %v1111_v8, %v718_v12  ;;  %714 = vst.msk [vmem:[#allocation2 + $0x8] sm:$0xff] %vm313_vm0, %v712_v11 }
  0xc8   : > { %v730_v14 = vadd.f32 %v1112_v10, %v724_v13 }
  0xca   : > { %v732_v15 = vmax.f32 %v730_v14, 0.0 }
  0xcc   : > { %v734_v16 = vpack.c.bf16 %v732_v15, %v732_v15 }
  0xcd   : > { %v719_v17 = vld [vmem:[#allocation2 + $0x8] sm:$0xff] }
  0xce   : > { %737 = vst.msk [vmem:[%s306_s10] sm:$0xf] %vm736_vm1, %v734_v16  ;;  %v725_v18 = vmul.f32 %v1111_v8, %v719_v17 }
  0xd0   : > { %v731_v19 = vadd.f32 %v1112_v10, %v725_v18 }
  0xd2   : > { %v733_v20 = vmax.f32 %v731_v19, 0.0 }
  0xd4   : > { %v735_v21 = vpack.c.bf16 %v733_v20, %v733_v20 }
  0xd6   : > { %738 = vst.msk [vmem:[%s306_s10 + $0x4] sm:$0xf] %vm736_vm1, %v735_v21 }
  0xd7 PF: > { %s14_s17 = sadd.s32 1, %s1135_s17   ;;  %s1339_s15 = smov %s1131_s16 }
  0xd8   : > { %p11_p5 = scmp.ge.s32.totalorder %s14_s17, 4   ;;  %s1340_s16 = smov %s1342_s18 }
  0xda   :  { %13 = sbr.rel (!%p11_p5) target bundleno = 2 (0x2), region = 83 }

// kernel: pytransformer_forward.6
= control target key start
LH: loop header
LB: loop body
LE: loop exit
PB: predicated region body
PF: predicated region fallthrough
CT: control target
= control target key end

     0   :  { %s1824_s3 = smov 4   ;;  %s1825_s7 = smov 5   ;;  %vm335_vm0 = vcmask 261120   ;;  %v1828_v31 = vmov 0   ;;  %vm363_vm1 = vcmask 64512   ;;  %vm398_vm3 = vcmask 1043456   ;;  %s2215_s0 = inlined_call_operand.smem [shape: u32[33], index: -1, kind: input, shape index: {}] }
   0x1   :  { %s1878_s6 = sld [smem:[%s2215_s0 + %s1824_s3]]   ;;  %s1826_s14 = smov 7   ;;  %1758 = vset.pattern.permute.xlu0 %v1828_v31  ;;  %v1837_v50 = vmov -1e+09  }
   0x2   :  { %s1883_s10 = sld [smem:[%s2215_s0 + %s1825_s7]]   ;;  %s1827_s18 = smov 6  }
   0x3   :  { %s1_s13 = sld [smem:[%s2215_s0]]   ;;  %s1829_s22 = smov 2  }
   0x4   :  { %s1496_s17 = sld [smem:[%s2215_s0 + %s1826_s14]]   ;;  %s1830_s26 = smov 3  }
   0x5   :  { %s1495_s21 = sld [smem:[%s2215_s0 + %s1827_s18]]   ;;  %s1831_s30 = smov 1  }
   0x6   :  { %s1919_s25 = sld [smem:[%s2215_s0 + %s1829_s22]]   ;;  %s1832_s4 = smov 88  }
   0x7   :  { %v1687_v0 = vld [vmem:[%s1878_s6 + $0x38] sm:$0xff]  ;;  %v1686_v2 = vld [vmem:[%s1878_s6 + $0x30] sm:$0xff]  ;;  %v1685_v4 = vld [vmem:[%s1878_s6 + $0x28] sm:$0xff]  ;;  %s1924_s29 = sld [smem:[%s2215_s0 + %s1830_s26]]   ;;  %s1833_s5 = smov 96  }
   0x8   :  { %v1695_v1 = vld [vmem:[%s1878_s6 + $0x78] sm:$0xff]  ;;  %288 = vmatpush.bf16.msra.mxu0 %v1687_v0  ;;  %v1694_v3 = vld [vmem:[%s1878_s6 + $0x70] sm:$0xff]  ;;  %v1693_v5 = vld [vmem:[%s1878_s6 + $0x68] sm:$0xff]  ;;  %s1490_s3 = sld [smem:[%s2215_s0 + %s1831_s30]]   ;;  %s1835_s7 = smov 80  }
   0x9   :  { %301 = vmatpush.bf16.msra.mxu1 %v1695_v1  ;;  %v1684_v6 = vld [vmem:[%s1878_s6 + $0x20] sm:$0xff]  ;;  %v1683_v8 = vld [vmem:[%s1878_s6 + $0x18] sm:$0xff]  ;;  %v1682_v10 = vld [vmem:[%s1878_s6 + $0x10] sm:$0xff]  ;;  %s1836_s8 = smov 104   ;;  %s1838_s9 = smov 64  }
   0xa   :  { %v1692_v7 = vld [vmem:[%s1878_s6 + $0x60] sm:$0xff]  ;;  %v1691_v9 = vld [vmem:[%s1878_s6 + $0x58] sm:$0xff]  ;;  %v1690_v11 = vld [vmem:[%s1878_s6 + $0x50] sm:$0xff]  ;;  %s1840_s11 = smov 56   ;;  %s1841_s12 = smov 8  }
   0xb   :  { %v1681_v12 = vld [vmem:[%s1878_s6 + $0x8] sm:$0xff]  ;;  %v148_v14 = vld [vmem:[%s1_s13] sm:$0xff]  ;;  %s1961_s15 = sld [smem:[%s2215_s0 + %s1841_s12]]   ;;  %s1842_s16 = smov 112  }
   0xc   :  { %289 = vmatpush.bf16.msra.mxu0 %v1686_v2  ;;  %v1689_v13 = vld [vmem:[%s1878_s6 + $0x48] sm:$0xff]  ;;  %v186_v15 = vunpack.c.l.b16 %v148_v14  ;;  %v187_v16 = vunpack.c.h.b16 %v148_v14  ;;  %v1680_v17 = vld [vmem:[%s1878_s6] sm:$0xff]  ;;  %s1844_s18 = smov 40   ;;  %s1845_s19 = smov 9  }
   0xd   :  { %302 = vmatpush.bf16.msra.mxu1 %v1694_v3  ;;  %v1688_v18 = vld [vmem:[%s1878_s6 + $0x40] sm:$0xff]  ;;  %v1697_v21 = vld [vmem:[%s1495_s21 + $0x8] sm:$0xff]  ;;  %s1834_s6 = smov 120   ;;  %s1498_s22 = sld [smem:[%s2215_s0 + %s1845_s19]]  }
   0xe   :  { %v188_v19 = vpack.c.b16 %v186_v15, %v186_v15  ;;  %v189_v20 = vpack.c.b16 %v187_v16, %v187_v16  ;;  %345 = vmatpush.bf16.msra.mxu2 %v1697_v21  ;;  %v1696_v22 = vld [vmem:[%s1495_s21] sm:$0xff]  ;;  %s1846_s23 = smov 10   ;;  %s1847_s27 = smov 11  }
   0xf   :  { %v1759_v23 = vld [vmem:[%s1883_s10] ss:$0 sm:$0xff]  ;;  %s1839_s10 = smov 72   ;;  %s2011_s26 = sld [smem:[%s2215_s0 + %s1846_s23]]  }
  0x10   :  { %290 = vmatpush.bf16.msra.mxu0 %v1685_v4  ;;  %v1760_v32 = vld [vmem:[%s1496_s17] ss:$0 sm:$0xff]  ;;  %s1843_s17 = smov 48   ;;  %s2017_s30 = sld [smem:[%s2215_s0 + %s1847_s27]]  }
  0x11   :  { %303 = vmatpush.bf16.msra.mxu1 %v1693_v5  ;;  %v135_v39 = vld [vmem:[%s1490_s3] sm:$0xff]  ;;  %s1849_s1 = smov 13   ;;  %s1850_s13 = smov 12  }
  0x12   :  { %346 = vmatpush.bf16.msra.mxu2 %v1696_v22  ;;  %v1761_v48 = vld [vmem:[%s1919_s25] ss:$0 sm:$0xff]  ;;  %s2027_s12 = sld [smem:[%s2215_s0 + %s1849_s1]]   ;;  %s1851_s20 = smov 14  }
  0x13   :  { %v1762_v49 = vld [vmem:[%s1924_s29] ss:$0 sm:$0xff]  ;;  %s1501_s19 = sld [smem:[%s2215_s0 + %s1850_s13]]   ;;  %s1852_s24 = smov 15  }
  0x14   :  { %291 = vmatpush.bf16.msra.mxu0 %v1684_v6  ;;  %v353_v59 = vld [vmem:[%s1961_s15] sm:$0xf]  ;;  %s2035_s23 = sld [smem:[%s2215_s0 + %s1851_s20]]   ;;  %s1854_s2 = smov 17  }
  0x15   :  { %304 = vmatpush.bf16.msra.mxu1 %v1692_v7  ;;  %v524_v61 = vsel %vm398_vm3, %v353_v59, 0  ;;  %s1504_s28 = sld [smem:[%s2215_s0 + %s1852_s24]]   ;;  %s1855_s14 = smov 19  }
  0x16   :  { %s2058_s13 = sld [smem:[%s2215_s0 + %s1854_s2]]   ;;  %s1856_s21 = smov 18  }
  0x17   :  { %s1508_s20 = sld [smem:[%s2215_s0 + %s1855_s14]]   ;;  %s1860_s27 = smov 23  }
  0x18   :  { %292 = vmatpush.bf16.msra.mxu0 %v1683_v8  ;;  %s1507_s24 = sld [smem:[%s2215_s0 + %s1856_s21]]   ;;  %s1869_s2 = smov 32  }
  0x19   :  { %305 = vmatpush.bf16.msra.mxu1 %v1691_v9  ;;  %s2161_s29 = sld [smem:[%s2215_s0 + %s1860_s27]]  }
  0x1c   :  { %293 = vmatpush.bf16.msra.mxu0 %v1682_v10 }
  0x1d   :  { %306 = vmatpush.bf16.msra.mxu1 %v1690_v11 }
  0x20   :  { %294 = vmatpush.bf16.msra.mxu0 %v1681_v12 }
  0x21   :  { %307 = vmatpush.bf16.msra.mxu1 %v1689_v13 }
  0x24   :  { %295 = vmatpush.bf16.msra.mxu0 %v1680_v17 }
  0x25   :  { %308 = vmatpush.bf16.msra.mxu1 %v1688_v18 }
  0x27   :  { %296 = vmatmul.bf16.vlgmr.msra.gmra.mxu0 %v188_v19 }
  0x28   :  { %309 = vmatmul.bf16.vlgmr.msra.gmra.mxu1 %v189_v20  ;;  %533 = vmatpush.bf16.msrb.mxu0 %v524_v61 }
  0xa4   :  { %v297_v24 = vpop.f32.mrf.mxu0 }
  0xa5   :  { %v310_v25 = vpop.f32.mrf.mxu1  ;;  %v298_v26 = vadd.f32 %v1759_v23, %v297_v24 }
  0xa7   :  { %v1911_v27 = vadd.f32 %v310_v25, %v298_v26 }
  0xa9   :  { %v314_v28 = vpack.c.bf16 %v1911_v27, %v1911_v27 }
  0xab   :  { %1594 = vmatmul.msk.bf16.vlgmr.msra.gmra.mxu2 %vm335_vm0, %v314_v28 }
  0xac   :  { %v299_v29 = vpop.f32.mrf.mxu0 }
  0xad   :  { %v312_v30 = vpop.f32.mrf.mxu1 }
 0x12e   :  { %v348_v33 = vpop.f32.mrf.mxu2 }
 0x12f   :  { %v349_v34 = vadd.f32 %v1760_v32, %v348_v33 }
 0x131   :  { %v352_v35 = vpack.c.bf16 %v349_v34, %v349_v34 }
 0x133   :  { %v359_v36 = vunpack.c.l.b16 %v352_v35 }
 0x135   :  { %v1929_v37 = vpack.c.b16 %v359_v36, %v359_v36 }
 0x136   :  { %v350_v38 = vpop.f32.mrf.mxu2 }
 0x137   :  { %433 = vrot.lane.b32.xlu2 %v1929_v37, %s1832_s4  ;;  %361 = vrot.lane.b32.xlu0 %v1929_v37, %s1833_s5 }
 0x13f   :  { %138 = vperm.xlu0 %1758, %v135_v39  }
 0x147   :  { %431 = vrot.lane.b32.xlu0 %v1929_v37, %s1834_s6 }
 0x14f   :  { %541 = vrot.lane.b32.xlu0 %v1929_v37, %s1835_s7 }
 0x157   :  { %629 = vrot.lane.b32.xlu0 %v1929_v37, %s1836_s8 }
 0x191   :  { %v434_v40 = vpop.permute.xlu2 %433 }
 0x192   :  { %v439_v43 = vsel %vm363_vm1, %v434_v40, 0 }
 0x1a9   :  { %v362_v41 = vpop.permute.xlu0 %361 }
 0x1aa   :  { %v368_v42 = vsel %vm363_vm1, %v362_v41, 0 }
 0x1ab   :  { %377 = vmatpush.bf16.xpose.msra.mxu3 %v368_v42 }
 0x1b1   :  { %v139_v44 = vpop.permute.xlu0 %138 }
 0x1b2   :  { %1595 = vmatmul.msk.bf16.vlgmr.msra.gmra.mxu3 %vm363_vm1, %v352_v35  ;;  %vm141_vm2 = vcmp.eq.s32.totalorder %v139_v44, %v1761_v48 }
 0x1b3   :  { %448 = vmatpush.bf16.xpose.msrb.mxu3 %v439_v43  ;;  %v142_v51 = vsel %vm141_vm2, 0.0, %v1837_v50 }
 0x1b4   :  { %v1948_v52 = vadd.f32 %v1762_v49, %v142_v51 }
 0x1b9   :  { %v432_v45 = vpop.permute.xlu0 %431 }
 0x1c1   :  { %v542_v46 = vpop.permute.xlu0 %541 }
 0x1c2   :  { %1597 = vmatmul.msk.bf16.vlgmr.msrb.gmra.mxu3 %vm363_vm1, %v432_v45  ;;  %v547_v47 = vsel %vm363_vm1, %v542_v46, 0 }
 0x1c3   :  { %556 = vmatpush.bf16.xpose.msrb.mxu1 %v547_v47 }
 0x1c9   :  { %v630_v28 = vpop.permute.xlu0 %629 }
 0x235   :  { %v379_v53 = vpop.f32.mrf.mxu3 }
 0x236   :  { %v380_v54 = vadd.f32 %v379_v53, %v1948_v52 }
 0x238   :  { %v383_v55 = vsel %vm363_vm1, %v380_v54, -inf }
 0x239   :  { %384 = vmax.xlane.f32.xlu1 %v383_v55 }
 0x23d   :  { %v381_v56 = vpop.f32.mrf.mxu3 }
 0x245   :  { %v450_v57 = vpop.f32.mrf.mxu3 }
 0x246   :  { %v451_v9 = vadd.f32 %v450_v57, %v1948_v52 }
 0x248   :  { %v454_v10 = vsel %vm363_vm1, %v451_v9, -inf }
 0x24d   :  { %v452_v58 = vpop.f32.mrf.mxu3 }
 0x24e   :  { %v354_v58 = vld [vmem:[%s1961_s15 + $0x4] sm:$0xf] }
 0x24f   :  { %v505_v59 = vsel %vm398_vm3, %v354_v58, 0  ;;  %v1763_v58 = vld [vmem:[%s1498_s22] ss:$0 sm:$0xff] }
 0x250   :  { %514 = vmatpush.bf16.msra.mxu3 %v505_v59 }
 0x252   :  { %393 = vrot.lane.b32.xlu1 %v1929_v37, %s1838_s9 }
 0x25a   :  { %631 = vrot.lane.b32.xlu1 %v1929_v37, %s1839_s10 }
 0x262   :  { %464 = vrot.lane.b32.xlu1 %v1929_v37, %s1840_s11 }
 0x2ac   :  { %v385_v60 = vpop.xlane.xlu1 %384 }
 0x2ad   :  { %v386_v62 = vsub.f32 %v380_v54, %v385_v60 }
 0x2af   :  { %v387_v63 = vmul.f32 1.442695, %v386_v62 }
 0x2b1   :  { %1780 = vpow2.f32 %v387_v63 }
 0x2b7   :  { %v1781_v0 = vpop.eup %1780 }
 0x2b8   :  { %v389_v1 = vsel %vm363_vm1, %v1781_v0, 0.0  ;;  %v392_v4 = vpack.c.bf16 %v1781_v0, %v1781_v0 }
 0x2b9   :  { %390 = vadd.xlane.f32.xlu2 %v389_v1 }
 0x2c4   :  { %v394_v2 = vpop.permute.xlu1 %393 }
 0x2c5   :  { %v400_v3 = vsel %vm398_vm3, %v394_v2, 0 }
 0x2c6   :  { %409 = vmatpush.bf16.msrb.mxu2 %v400_v3 }
 0x2c9   :  { %1596 = vmatmul.msk.bf16.vlgmr.msrb.gmra.mxu2 %vm363_vm1, %v392_v4 }
 0x2cc   :  { %v632_v5 = vpop.permute.xlu1 %631 }
 0x2cd   :  { %v637_v6 = vsel %vm363_vm1, %v632_v5, 0 }
 0x2ce   :  { %646 = vmatpush.bf16.xpose.msra.mxu0 %v637_v6 }
 0x2d1   :  { %539 = vrot.lane.b32.xlu2 %v1929_v37, %s1842_s16 }
 0x2d4   :  { %v465_v7 = vpop.permute.xlu1 %464 }
 0x2d5   :  { %v470_v8 = vsel %vm398_vm3, %v465_v7, 0 }
 0x2d6   :  { %479 = vmatpush.bf16.msra.mxu2 %v470_v8 }
 0x2fa   :  { %455 = vmax.xlane.f32.xlu2 %v454_v10 }
 0x312   :  { %572 = vrot.lane.b32.xlu2 %v1929_v37, %s1843_s17 }
 0x32c   :  { %v391_v11 = vpop.xlane.xlu2 %390 }
 0x32d   :  { %1782 = vrcp.f32 %v391_v11  ;;  %v426_v18 = vand.u32 2147483648, %v391_v11  ;;  %vm420_vm5 = vweird.f32 %v391_v11  ;;  %v424_v19 = vand.u32 2147483647, %v391_v11 }
 0x32f   :  { %v427_v21 = vor.u32 1.1754944e-38, %v426_v18  ;;  %vm425_vm7 = vcmp.eq.f32.partialorder %v424_v19, 8.507059e+37 }
 0x333   :  { %v1783_v13 = vpop.eup %1782 }
 0x334   :  { %v540_v12 = vpop.permute.xlu2 %539  ;;  %v416_v14 = vmul.f32 %v1783_v13, %v391_v11  ;;  %vm421_vm4 = vweird.f32 %v1783_v13 }
 0x335   :  { %1601 = vmatmul.msk.bf16.vlgmr.msrb.gmra.mxu1 %vm363_vm1, %v540_v12  ;;  %vm422_vm6 = vmor %vm420_vm5, %vm421_vm4 }
 0x336   :  { %v417_v15 = vsub.f32 1.0, %v416_v14 }
 0x338   :  { %v418_v16 = vmul.f32 %v1783_v13, %v417_v15  ;;  %v355_v15 = vld [vmem:[%s1961_s15 + $0x8] sm:$0xf] }
 0x33a   :  { %v419_v17 = vadd.f32 %v1783_v13, %v418_v16  ;;  %v613_v16 = vsel %vm398_vm3, %v355_v15, 0 }
 0x33b   :  { %622 = vmatpush.bf16.msrb.mxu3 %v613_v16  ;;  %v1702_v16 = vld [vmem:[%s2035_s23 + $0x10] sm:$0xff] }
 0x33c   :  { %v423_v20 = vsel %vm422_vm6, %v1783_v13, %v419_v17 }
 0x33d   :  { %v428_v23 = vsel %vm425_vm7, %v427_v21, %v423_v20 }
 0x34c   :  { %v411_v22 = vpop.f32.mrf.mxu2 }
 0x34d   :  { %v429_v24 = vmul.f32 %v428_v23, %v411_v22 }
 0x34f   :  { %v430_v25 = vpack.c.bf16 %v429_v24, %v429_v24 }
 0x351   :  { %1600 = vmatmul.msk.bf16.vlgmr.msrb.gmra.mxu0 %vm363_vm1, %v430_v25 }
 0x354   :  { %v413_v26 = vpop.f32.mrf.mxu2 }
 0x361   :  { %1604 = vmatmul.msk.bf16.vlgmr.msra.gmra.mxu0 %vm363_vm1, %v630_v28 }
 0x36d   :  { %v456_v29 = vpop.xlane.xlu2 %455 }
 0x36e   :  { %v457_v30 = vsub.f32 %v451_v9, %v456_v29 }
 0x370   :  { %v458_v31 = vmul.f32 1.442695, %v457_v30 }
 0x372   :  { %1784 = vpow2.f32 %v458_v31 }
 0x375   :  { %v573_v32 = vpop.permute.xlu2 %572 }
 0x376   :  { %v578_v33 = vsel %vm398_vm3, %v573_v32, 0 }
 0x377   :  { %587 = vmatpush.bf16.msrb.mxu2 %v578_v33  ;;  %v356_v33 = vld [vmem:[%s1961_s15 + $0xc] sm:$0xf] }
 0x378   :  { %v1785_v34 = vpop.eup %1784 }
 0x379   :  { %v463_v35 = vpack.c.bf16 %v1785_v34, %v1785_v34  ;;  %v460_v47 = vsel %vm363_vm1, %v1785_v34, 0.0  ;;  %v703_v34 = vsel %vm398_vm3, %v356_v33, 0  ;;  %v1700_v33 = vld [vmem:[%s2035_s23] sm:$0xff] }
 0x37b   :  { %1598 = vmatmul.msk.bf16.vlgmr.msra.gmra.mxu2 %vm363_vm1, %v463_v35 }
 0x37c   :  { %712 = vmatpush.bf16.msra.mxu2 %v703_v34  ;;  %v1766_v34 = vld [vmem:[%s2027_s12] ss:$0 sm:$0xff]  ;;  %s1862_s12 = smov 24  }
 0x37d   :  { %s1513_s15 = sld [smem:[%s2215_s0 + %s1862_s12]]  }
 0x3b2   :  { %v558_v36 = vpop.f32.mrf.mxu1 }
 0x3b3   :  { %v559_v38 = vadd.f32 %v558_v36, %v1948_v52 }
 0x3b5   :  { %v562_v39 = vsel %vm363_vm1, %v559_v38, -inf }
 0x3b6   :  { %563 = vmax.xlane.f32.xlu0 %v562_v39 }
 0x3ba   :  { %v560_v40 = vpop.f32.mrf.mxu1 }
 0x3ca   :  { %662 = vrot.lane.b32.xlu0 %v1929_v37, %s1844_s18 }
 0x3ce   :  { %v1985_v41 = vpop.f32.mrf.mxu0 }
 0x3d6   :  { %v537_v42 = vpop.f32.mrf.mxu0 }
 0x3de   :  { %v648_v43 = vpop.f32.mrf.mxu0 }
 0x3df   :  { %v649_v44 = vadd.f32 %v648_v43, %v1948_v52 }
 0x3e1   :  { %v652_v45 = vsel %vm363_vm1, %v649_v44, -inf }
 0x3e2   :  { %653 = vmax.xlane.f32.xlu1 %v652_v45 }
 0x3e6   :  { %v650_v46 = vpop.f32.mrf.mxu0 }
 0x3ea   :  { %461 = vadd.xlane.f32.xlu1 %v460_v47 }
 0x3fe   :  { %v481_v48 = vpop.f32.mrf.mxu2 }
 0x406   :  { %v483_v49 = vpop.f32.mrf.mxu2 }
 0x429   :  { %v564_v50 = vpop.xlane.xlu0 %563 }
 0x42a   :  { %v565_v51 = vsub.f32 %v559_v38, %v564_v50 }
 0x42c   :  { %v566_v53 = vmul.f32 1.442695, %v565_v51 }
 0x42e   :  { %1786 = vpow2.f32 %v566_v53 }
 0x434   :  { %v1787_v37 = vpop.eup %1786 }
 0x435   :  { %v571_v54 = vpack.c.bf16 %v1787_v37, %v1787_v37  ;;  %v568_v55 = vsel %vm363_vm1, %v1787_v37, 0.0 }
 0x436   :  { %569 = vadd.xlane.f32.xlu1 %v568_v55 }
 0x437   :  { %1602 = vmatmul.msk.bf16.vlgmr.msrb.gmra.mxu2 %vm363_vm1, %v571_v54 }
 0x43c   :  { %v663_v56 = vpop.permute.xlu0 %662 }
 0x43d   :  { %v668_v57 = vsel %vm398_vm3, %v663_v56, 0 }
 0x43e   :  { %677 = vmatpush.bf16.msra.mxu1 %v668_v57 }
 0x455   :  { %v654_v60 = vpop.xlane.xlu1 %653 }
 0x456   :  { %v655_v61 = vsub.f32 %v649_v44, %v654_v60 }
 0x458   :  { %v656_v62 = vmul.f32 1.442695, %v655_v61 }
 0x45a   :  { %1788 = vpow2.f32 %v656_v62 }
 0x45d   :  { %v462_v63 = vpop.xlane.xlu1 %461 }
 0x45e   :  { %1790 = vrcp.f32 %v462_v63  ;;  %v496_v6 = vand.u32 2147483648, %v462_v63  ;;  %v494_v8 = vand.u32 2147483647, %v462_v63  ;;  %vm490_vm9 = vweird.f32 %v462_v63 }
 0x460   :  { %v1789_v0 = vpop.eup %1788  ;;  %v497_v10 = vor.u32 1.1754944e-38, %v496_v6  ;;  %vm495_vm11 = vcmp.eq.f32.partialorder %v494_v8, 8.507059e+37 }
 0x461   :  { %v661_v1 = vpack.c.bf16 %v1789_v0, %v1789_v0  ;;  %v658_v2 = vsel %vm363_vm1, %v1789_v0, 0.0  ;;  %v1848_v0 = vmov 32.0  }
 0x462   :  { %659 = vadd.xlane.f32.xlu2 %v658_v2 }
 0x463   :  { %1605 = vmatmul.msk.bf16.vlgmr.msra.gmra.mxu1 %vm363_vm1, %v661_v1 }
 0x464   :  { %v1791_v3 = vpop.eup %1790 }
 0x465   :  { %v486_v4 = vmul.f32 %v1791_v3, %v462_v63  ;;  %vm491_vm8 = vweird.f32 %v1791_v3 }
 0x466   :  { %vm492_vm10 = vmor %vm490_vm9, %vm491_vm8 }
 0x467   :  { %v487_v5 = vsub.f32 1.0, %v486_v4 }
 0x469   :  { %v488_v7 = vmul.f32 %v1791_v3, %v487_v5 }
 0x46b   :  { %v489_v9 = vadd.f32 %v1791_v3, %v488_v7 }
 0x46d   :  { %v493_v11 = vsel %vm492_vm10, %v1791_v3, %v489_v9 }
 0x46e   :  { %v498_v12 = vsel %vm495_vm11, %v497_v10, %v493_v11  ;;  %v1699_v11 = vld [vmem:[%s1501_s19 + $0x8] sm:$0xff]  ;;  %vm838_vm11 = vcmask 523264  }
 0x46f   :  { %v499_v13 = vmul.f32 %v498_v12, %v481_v48  ;;  %v1698_v12 = vld [vmem:[%s1501_s19] sm:$0xff]  ;;  %s1863_s19 = smov 26  }
 0x470   :  { %s2177_s22 = sld [smem:[%s2215_s0 + %s1863_s19]]  }
 0x471   :  { %v500_v14 = vpack.c.bf16 %v499_v13, %v499_v13  ;;  %v1703_v13 = vld [vmem:[%s2035_s23 + $0x18] sm:$0xff] }
 0x472   :  { %846 = vmatpush.bf16.msrb.mxu0 %v1703_v13 }
 0x473   :  { %1599 = vmatmul.msk.bf16.vlgmr.msra.gmra.mxu3 %vm363_vm1, %v500_v14 }
 0x474   :  { %793 = vmatpush.bf16.msra.mxu3 %v1699_v11 }
 0x476   :  { %847 = vmatpush.bf16.msrb.mxu0 %v1702_v16 }
 0x478   :  { %794 = vmatpush.bf16.msra.mxu3 %v1698_v12 }
 0x4a9   :  { %v570_v17 = vpop.xlane.xlu1 %569 }
 0x4aa   :  { %1792 = vrcp.f32 %v570_v17  ;;  %v604_v21 = vand.u32 2147483648, %v570_v17  ;;  %v602_v23 = vand.u32 2147483647, %v570_v17  ;;  %vm598_vm13 = vweird.f32 %v570_v17 }
 0x4ac   :  { %v605_v25 = vor.u32 1.1754944e-38, %v604_v21  ;;  %vm603_vm15 = vcmp.eq.f32.partialorder %v602_v23, 8.507059e+37 }
 0x4b0   :  { %v1793_v18 = vpop.eup %1792 }
 0x4b1   :  { %v594_v19 = vmul.f32 %v1793_v18, %v570_v17  ;;  %vm599_vm12 = vweird.f32 %v1793_v18 }
 0x4b2   :  { %vm600_vm14 = vmor %vm598_vm13, %vm599_vm12 }
 0x4b3   :  { %v595_v20 = vsub.f32 1.0, %v594_v19 }
 0x4b5   :  { %v596_v22 = vmul.f32 %v1793_v18, %v595_v20 }
 0x4b7   :  { %v597_v24 = vadd.f32 %v1793_v18, %v596_v22 }
 0x4b9   :  { %v601_v26 = vsel %vm600_vm14, %v1793_v18, %v597_v24  ;;  %v1764_v24 = vld [vmem:[%s2011_s26] ss:$0 sm:$0xff]  ;;  %s1853_s26 = smov 16  }
 0x4ba   :  { %v589_v28 = vpop.f32.mrf.mxu2  ;;  %v606_v29 = vsel %vm603_vm15, %v605_v25, %v601_v26  ;;  %v1765_v26 = vld [vmem:[%s2017_s30] ss:$0 sm:$0xff]  ;;  %s2053_s1 = sld [smem:[%s2215_s0 + %s1853_s26]]   ;;  %s1861_s30 = smov 25  }
 0x4bb   :  { %v607_v30 = vmul.f32 %v606_v29, %v589_v28  ;;  %s2169_s3 = sld [smem:[%s2215_s0 + %s1861_s30]]   ;;  %s1868_s26 = smov 31  }
 0x4bd   :  { %v608_v31 = vpack.c.bf16 %v607_v30, %v607_v30 }
 0x4bf   :  { %1603 = vmatmul.msk.bf16.vlgmr.msrb.gmra.mxu3 %vm363_vm1, %v608_v31 }
 0x4c2   :  { %v591_v32 = vpop.f32.mrf.mxu2 }
 0x4c3   :  { %v1701_v32 = vld [vmem:[%s2035_s23 + $0x8] sm:$0xff]  ;;  %s1864_s23 = smov 27  }
 0x4c4   :  { %848 = vmatpush.bf16.msrb.mxu0 %v1701_v32 }
 0x4c8   :  { %849 = vmatpush.bf16.msrb.mxu0 %v1700_v33 }
 0x4d5   :  { %v660_v35 = vpop.xlane.xlu2 %659 }
 0x4d6   :  { %1794 = vrcp.f32 %v660_v35  ;;  %v694_v42 = vand.u32 2147483648, %v660_v35  ;;  %v692_v44 = vand.u32 2147483647, %v660_v35  ;;  %vm688_vm4 = vweird.f32 %v660_v35 }
 0x4d7   :  { %1796 = vrcp.f32 %v1848_v0 }
 0x4d8   :  { %v695_v46 = vor.u32 1.1754944e-38, %v694_v42  ;;  %vm693_vm6 = vcmp.eq.f32.partialorder %v692_v44, 8.507059e+37  ;;  %v1767_v42 = vld [vmem:[%s1504_s28] ss:$0 sm:$0xff] }
 0x4dc   :  { %v1795_v36 = vpop.eup %1794 }
 0x4dd   :  { %v684_v38 = vmul.f32 %v1795_v36, %v660_v35  ;;  %vm689_vm2 = vweird.f32 %v1795_v36  ;;  %v1797_v1 = vpop.eup %1796 }
 0x4de   :  { %vm690_vm5 = vmor %vm688_vm4, %vm689_vm2  ;;  %v730_v2 = vmul.f32 32.0, %v1797_v1  ;;  %vm734_vm7 = vweird.f32 %v1797_v1 }
 0x4df   :  { %v685_v39 = vsub.f32 1.0, %v684_v38 }
 0x4e0   :  { %v679_v40 = vpop.f32.mrf.mxu1  ;;  %v731_v3 = vsub.f32 1.0, %v730_v2 }
 0x4e1   :  { %v686_v43 = vmul.f32 %v1795_v36, %v685_v39 }
 0x4e2   :  { %v732_v4 = vmul.f32 %v1797_v1, %v731_v3 }
 0x4e3   :  { %v687_v45 = vadd.f32 %v1795_v36, %v686_v43 }
 0x4e4   :  { %v733_v5 = vadd.f32 %v1797_v1, %v732_v4 }
 0x4e5   :  { %v691_v47 = vsel %vm690_vm5, %v1795_v36, %v687_v45 }
 0x4e6   :  { %v696_v48 = vsel %vm693_vm6, %v695_v46, %v691_v47  ;;  %v2020_v6 = vsel %vm734_vm7, %v1797_v1, %v733_v5  ;;  %v1769_v1 = vld [vmem:[%s2058_s13] ss:$0 sm:$0xff]  ;;  %s1521_s13 = sld [smem:[%s2215_s0 + %s1869_s2]]  }
 0x4e7   :  { %v697_v49 = vmul.f32 %v696_v48, %v679_v40 }
 0x4e8   :  { %v681_v50 = vpop.f32.mrf.mxu1 }
 0x4e9   :  { %v698_v51 = vpack.c.bf16 %v697_v49, %v697_v49 }
 0x4eb   :  { %1606 = vmatmul.msk.bf16.vlgmr.msra.gmra.mxu2 %vm363_vm1, %v698_v51 }
 0x4f6   :  { %v516_v53 = vpop.f32.mrf.mxu3 }
 0x4f7   :  { %v536_v56 = vadd.f32 %v1985_v41, %v516_v53 }
 0x4fe   :  { %v518_v37 = vpop.f32.mrf.mxu3 }
 0x4ff   :  { %v1705_v37 = vld [vmem:[%s1507_s24 + $0x8] sm:$0xff] }
 0x500   :  { %918 = vmatpush.bf16.msrb.mxu1 %v1705_v37 }
 0x542   :  { %v624_v54 = vpop.f32.mrf.mxu3 }
 0x543   :  { %v628_v57 = vadd.f32 %v624_v54, %v536_v56  ;;  %v1704_v54 = vld [vmem:[%s1507_s24] sm:$0xff] }
 0x544   :  { %919 = vmatpush.bf16.msrb.mxu1 %v1704_v54 }
 0x54a   :  { %v626_v55 = vpop.f32.mrf.mxu3 }
 0x56e   :  { %v714_v59 = vpop.f32.mrf.mxu2 }
 0x56f   :  { %v718_v60 = vadd.f32 %v714_v59, %v628_v57 }
 0x571   :  { %v722_v61 = vadd.f32 %v1763_v58, %v718_v60 }
 0x573   :  { %v723_v62 = vadd.f32 %v722_v61, %v1911_v27 }
 0x575   :  { %v726_v41 = vsel %vm335_vm0, %v723_v62, 0.0 }
 0x576   :  { %727 = vadd.xlane.f32.xlu1 %v726_v41  ;;  %v716_v63 = vpop.f32.mrf.mxu2 }
 0x577   :  { %v1768_v63 = vld [vmem:[%s2053_s1] ss:$0 sm:$0xff]  ;;  %s1520_s1 = sld [smem:[%s2215_s0 + %s1868_s26]]  }
 0x5e9   :  { %v728_v27 = vpop.xlane.xlu1 %727 }
 0x5ea   :  { %v736_v7 = vmul.f32 %v2020_v6, %v728_v27  ;;  %v1770_v27 = vld [vmem:[%s1508_s20] ss:$0 sm:$0xff] }
 0x5ec   :  { %v737_v8 = vsub.f32 %v723_v62, %v736_v7 }
 0x5ee   :  { %v738_v9 = vmul.f32 %v737_v8, %v737_v8 }
 0x5f0   :  { %v739_v10 = vsel %vm335_vm0, %v738_v9, 0.0 }
 0x5f1   :  { %740 = vadd.xlane.f32.xlu0 %v739_v10 }
 0x664   :  { %v741_v14 = vpop.xlane.xlu0 %740 }
 0x665   :  { %v742_v15 = vmul.f32 %v741_v14, %v2020_v6 }
 0x667   :  { %v743_v17 = vadd.f32 1e-05, %v742_v15 }
 0x669   :  { %1798 = vrsqrt.f32 %v743_v17  ;;  %vm750_vm9 = vweird.f32 %v743_v17 }
 0x66f   :  { %v1799_v18 = vpop.eup %1798 }
 0x670   :  { %v745_v19 = vmul.f32 %v1799_v18, %v743_v17  ;;  %vm751_vm8 = vweird.f32 %v1799_v18 }
 0x671   :  { %vm752_vm10 = vmor %vm750_vm9, %vm751_vm8 }
 0x672   :  { %v746_v20 = vmul.f32 %v1799_v18, %v745_v19 }
 0x674   :  { %v747_v21 = vmul.f32 0.5, %v746_v20 }
 0x676   :  { %v748_v22 = vsub.f32 1.5, %v747_v21 }
 0x678   :  { %v749_v23 = vmul.f32 %v1799_v18, %v748_v22 }
 0x67a   :  { %v753_v25 = vsel %vm752_vm10, %v1799_v18, %v749_v23 }
 0x67b   :  { %v754_v28 = vmul.f32 %v753_v25, %v737_v8 }
 0x67d   :  { %v758_v29 = vmul.f32 %v1764_v24, %v754_v28 }
 0x67f   :  { %v762_v30 = vadd.f32 %v1765_v26, %v758_v29 }
 0x681   :  { %v763_v31 = vpack.c.bf16 %v762_v30, %v762_v30 }
 0x683   :  { %1615 = vmatmul.msk.bf16.vlgmr.msra.gmra.mxu3 %vm335_vm0, %v763_v31 }
 0x706   :  { %v796_v35 = vpop.f32.mrf.mxu3 }
 0x707   :  { %v797_v36 = vadd.f32 %v1766_v34, %v796_v35 }
 0x709   :  { %v800_v38 = vmax.f32 %v797_v36, 0.0 }
 0x70b   :  { %v801_v39 = vpack.c.bf16 %v800_v38, %v800_v38 }
 0x70d   :  { %1632 = vmatmul.msk.bf16.vlgmr.msrb.gmra.mxu0 %vm838_vm11, %v801_v39 }
 0x70e   :  { %v798_v40 = vpop.f32.mrf.mxu3 }
 0x78a   :  { %v851_v43 = vpop.f32.mrf.mxu0 }
 0x78b   :  { %v852_v44 = vadd.f32 %v1767_v42, %v851_v43 }
 0x78d   :  { %v855_v45 = vadd.f32 %v852_v44, %v762_v30 }
 0x78f   :  { %v858_v46 = vsel %vm335_vm0, %v855_v45, 0.0 }
 0x790   :  { %859 = vadd.xlane.f32.xlu1 %v858_v46 }
 0x792   :  { %v853_v47 = vpop.f32.mrf.mxu0 }
 0x803   :  { %v860_v48 = vpop.xlane.xlu1 %859 }
 0x804   :  { %v861_v49 = vmul.f32 %v860_v48, %v2020_v6 }
 0x806   :  { %v862_v50 = vsub.f32 %v855_v45, %v861_v49 }
 0x808   :  { %v863_v51 = vmul.f32 %v862_v50, %v862_v50 }
 0x80a   :  { %v864_v53 = vsel %vm335_vm0, %v863_v51, 0.0 }
 0x80b   :  { %865 = vadd.xlane.f32.xlu1 %v864_v53 }
 0x87e   :  { %v866_v55 = vpop.xlane.xlu1 %865 }
 0x87f   :  { %v867_v56 = vmul.f32 %v866_v55, %v2020_v6 }
 0x881   :  { %v868_v57 = vadd.f32 1e-05, %v867_v56 }
 0x883   :  { %1800 = vrsqrt.f32 %v868_v57  ;;  %vm875_vm13 = vweird.f32 %v868_v57 }
 0x889   :  { %v1801_v58 = vpop.eup %1800 }
 0x88a   :  { %v870_v59 = vmul.f32 %v1801_v58, %v868_v57  ;;  %vm876_vm12 = vweird.f32 %v1801_v58 }
 0x88b   :  { %vm877_vm14 = vmor %vm875_vm13, %vm876_vm12 }
 0x88c   :  { %v871_v60 = vmul.f32 %v1801_v58, %v870_v59 }
 0x88e   :  { %v872_v61 = vmul.f32 0.5, %v871_v60 }
 0x890   :  { %v873_v62 = vsub.f32 1.5, %v872_v61 }
 0x892   :  { %v874_v41 = vmul.f32 %v1801_v58, %v873_v62 }
 0x894   :  { %v878_v0 = vsel %vm877_vm14, %v1801_v58, %v874_v41 }
 0x895   :  { %v879_v2 = vmul.f32 %v878_v0, %v862_v50 }
 0x897   :  { %v883_v3 = vmul.f32 %v1768_v63, %v879_v2 }
 0x899   :  { %v2072_v4 = vadd.f32 %v1769_v1, %v883_v3 }
 0x89b   :  { %v888_v5 = vpack.c.bf16 %v2072_v4, %v2072_v4 }
 0x89d   :  { %1641 = vmatmul.msk.bf16.vlgmr.msrb.gmra.mxu1 %vm335_vm0, %v888_v5 }
 0x91a   :  { %v921_v7 = vpop.f32.mrf.mxu1 }
 0x91b   :  { %v922_v8 = vadd.f32 %v1770_v27, %v921_v7 }
 0x91d   :  { %v925_v9 = vpack.c.bf16 %v922_v8, %v922_v8 }
 0x91f   :  { %v932_v10 = vunpack.c.l.b16 %v925_v9 }
 0x921   :  { %v2077_v11 = vpack.c.b16 %v932_v10, %v932_v10 }
 0x922   :  { %v923_v12 = vpop.f32.mrf.mxu1 }
 0x923   :  { %965 = vrot.lane.b32.xlu0 %v2077_v11, %s1838_s9  ;;  %934 = vrot.lane.b32.xlu1 %v2077_v11, %s1833_s5  ;;  %s1516_s5 = sld [smem:[%s2215_s0 + %s1864_s23]]  }
 0x92b   :  { %1202 = vrot.lane.b32.xlu0 %v2077_v11, %s1839_s10  ;;  %1004 = vrot.lane.b32.xlu1 %v2077_v11, %s1832_s4  ;;  %s1857_s4 = smov 20   ;;  %s1866_s10 = smov 29  }
 0x933   :  { %1200 = vrot.lane.b32.xlu0 %v2077_v11, %s1836_s8  ;;  %1112 = vrot.lane.b32.xlu1 %v2077_v11, %s1835_s7  ;;  %s2103_s8 = sld [smem:[%s2215_s0 + %s1857_s4]]   ;;  %s1865_s7 = smov 28  }
 0x934   :  { %s1517_s9 = sld [smem:[%s2215_s0 + %s1865_s7]]  }
 0x939   :  { %v926_v25 = vld [vmem:[%s2103_s8] sm:$0xf] }
 0x93a   :  { %v1095_v26 = vsel %vm398_vm3, %v926_v25, 0 }
 0x93b   :  { %1110 = vrot.lane.b32.xlu1 %v2077_v11, %s1842_s16  ;;  %s1859_s16 = smov 22  }
 0x93c   :  { %s2155_s25 = sld [smem:[%s2215_s0 + %s1859_s16]]  }
 0x995   :  { %v966_v13 = vpop.permute.xlu0 %965  ;;  %v935_v14 = vpop.permute.xlu1 %934 }
 0x996   :  { %v971_v15 = vsel %vm398_vm3, %v966_v13, 0  ;;  %v940_v16 = vsel %vm363_vm1, %v935_v14, 0 }
 0x997   :  { %949 = vmatpush.bf16.xpose.msrb.mxu2 %v940_v16  ;;  %980 = vmatpush.bf16.msrb.mxu3 %v971_v15 }
 0x99b   :  { %1104 = vmatpush.bf16.msra.mxu3 %v1095_v26 }
 0x99d   :  { %v1005_v17 = vpop.permute.xlu1 %1004  ;;  %v1203_v32 = vpop.permute.xlu0 %1202 }
 0x99e   :  { %v1010_v18 = vsel %vm363_vm1, %v1005_v17, 0  ;;  %1642 = vmatmul.msk.bf16.vlgmr.msrb.gmra.mxu2 %vm363_vm1, %v925_v9  ;;  %v1208_v35 = vsel %vm363_vm1, %v1203_v32, 0 }
 0x99f   :  { %1019 = vmatpush.bf16.xpose.msra.mxu0 %v1010_v18 }
 0x9a5   :  { %v1113_v19 = vpop.permute.xlu1 %1112  ;;  %v1201_v57 = vpop.permute.xlu0 %1200 }
 0x9a6   :  { %v1118_v20 = vsel %vm363_vm1, %v1113_v19, 0 }
 0x9a7   :  { %1127 = vmatpush.bf16.xpose.msrb.mxu0 %v1118_v20 }
 0x9ad   :  { %v1111_v55 = vpop.permute.xlu1 %1110 }
 0xa21   :  { %v951_v21 = vpop.f32.mrf.mxu2 }
 0xa22   :  { %v952_v22 = vadd.f32 %v951_v21, %v1948_v52 }
 0xa24   :  { %v955_v23 = vsel %vm363_vm1, %v952_v22, -inf }
 0xa25   :  { %956 = vmax.xlane.f32.xlu2 %v955_v23 }
 0xa29   :  { %v953_v24 = vpop.f32.mrf.mxu2 }
 0xa98   :  { %v957_v28 = vpop.xlane.xlu2 %956 }
 0xa99   :  { %v958_v29 = vsub.f32 %v952_v22, %v957_v28 }
 0xa9b   :  { %v959_v30 = vmul.f32 1.442695, %v958_v29 }
 0xa9d   :  { %1802 = vpow2.f32 %v959_v30  ;;  %v927_v30 = vld [vmem:[%s2103_s8 + $0x4] sm:$0xf] }
 0xaa3   :  { %v1803_v31 = vpop.eup %1802 }
 0xaa4   :  { %v964_v33 = vpack.c.bf16 %v1803_v31, %v1803_v31  ;;  %v961_v34 = vsel %vm363_vm1, %v1803_v31, 0.0  ;;  %v1076_v31 = vsel %vm398_vm3, %v927_v30, 0 }
 0xaa5   :  { %962 = vadd.xlane.f32.xlu2 %v961_v34  ;;  %1085 = vmatpush.bf16.msra.mxu2 %v1076_v31 }
 0xaa6   :  { %1643 = vmatmul.msk.bf16.vlgmr.msrb.gmra.mxu3 %vm363_vm1, %v964_v33  ;;  %v928_v33 = vld [vmem:[%s2103_s8 + $0x8] sm:$0xf] }
 0xaa7   :  { %1217 = vmatpush.bf16.xpose.msrb.mxu3 %v1208_v35  ;;  %v1184_v34 = vsel %vm398_vm3, %v928_v33, 0 }
 0xaa9   :  { %1193 = vmatpush.bf16.msrb.mxu2 %v1184_v34 }
 0xabd   :  { %1002 = vrot.lane.b32.xlu2 %v2077_v11, %s1834_s6  ;;  %s1858_s6 = smov 21  }
 0xac5   :  { %1035 = vrot.lane.b32.xlu2 %v2077_v11, %s1840_s11  ;;  %s1510_s11 = sld [smem:[%s2215_s0 + %s1858_s6]]  }
 0xb18   :  { %v963_v36 = vpop.xlane.xlu2 %962 }
 0xb19   :  { %1804 = vrcp.f32 %v963_v36  ;;  %v997_v43 = vand.u32 2147483648, %v963_v36  ;;  %v995_v45 = vand.u32 2147483647, %v963_v36  ;;  %vm991_vm2 = vweird.f32 %v963_v36 }
 0xb1b   :  { %v998_v47 = vor.u32 1.1754944e-38, %v997_v43  ;;  %vm996_vm5 = vcmp.eq.f32.partialorder %v995_v45, 8.507059e+37 }
 0xb1f   :  { %v1805_v38 = vpop.eup %1804 }
 0xb20   :  { %v987_v39 = vmul.f32 %v1805_v38, %v963_v36  ;;  %v1003_v40 = vpop.permute.xlu2 %1002  ;;  %vm992_vm15 = vweird.f32 %v1805_v38 }
 0xb21   :  { %1644 = vmatmul.msk.bf16.vlgmr.msra.gmra.mxu0 %vm363_vm1, %v1003_v40  ;;  %vm993_vm4 = vmor %vm991_vm2, %vm992_vm15 }
 0xb22   :  { %v988_v42 = vsub.f32 1.0, %v987_v39 }
 0xb24   :  { %v989_v44 = vmul.f32 %v1805_v38, %v988_v42 }
 0xb26   :  { %v990_v46 = vadd.f32 %v1805_v38, %v989_v44 }
 0xb28   :  { %v1036_v48 = vpop.permute.xlu2 %1035  ;;  %v994_v49 = vsel %vm993_vm4, %v1805_v38, %v990_v46 }
 0xb29   :  { %v1041_v50 = vsel %vm398_vm3, %v1036_v48, 0  ;;  %v982_v51 = vpop.f32.mrf.mxu3  ;;  %v999_v53 = vsel %vm996_vm5, %v998_v47, %v994_v49 }
 0xb2a   :  { %v1000_v37 = vmul.f32 %v999_v53, %v982_v51  ;;  %1050 = vmatpush.bf16.msra.mxu1 %v1041_v50  ;;  %v929_v53 = vld [vmem:[%s2103_s8 + $0xc] sm:$0xf] }
 0xb2c   :  { %v1001_v54 = vpack.c.bf16 %v1000_v37, %v1000_v37  ;;  %v1274_v37 = vsel %vm398_vm3, %v929_v53, 0 }
 0xb2e   :  { %1647 = vmatmul.msk.bf16.vlgmr.msra.gmra.mxu3 %vm363_vm1, %v1001_v54 }
 0xb31   :  { %v984_v56 = vpop.f32.mrf.mxu3  ;;  %1648 = vmatmul.msk.bf16.vlgmr.msrb.gmra.mxu0 %vm363_vm1, %v1111_v55 }
 0xb3e   :  { %1651 = vmatmul.msk.bf16.vlgmr.msrb.gmra.mxu3 %vm363_vm1, %v1201_v57 }
 0xb9e   :  { %v1021_v58 = vpop.f32.mrf.mxu0 }
 0xb9f   :  { %v1022_v59 = vadd.f32 %v1021_v58, %v1948_v52 }
 0xba1   :  { %v1025_v60 = vsel %vm363_vm1, %v1022_v59, -inf }
 0xba2   :  { %1026 = vmax.xlane.f32.xlu1 %v1025_v60 }
 0xba6   :  { %v1023_v61 = vpop.f32.mrf.mxu0 }
 0xbae   :  { %v1129_v62 = vpop.f32.mrf.mxu0 }
 0xbaf   :  { %v1130_v41 = vadd.f32 %v1129_v62, %v1948_v52 }
 0xbb1   :  { %v2122_v63 = vpop.f32.mrf.mxu3  ;;  %v1133_v0 = vsel %vm363_vm1, %v1130_v41, -inf }
 0xbb2   :  { %1134 = vmax.xlane.f32.xlu0 %v1133_v0 }
 0xbb6   :  { %v1131_v1 = vpop.f32.mrf.mxu0 }
 0xbb9   :  { %v1108_v2 = vpop.f32.mrf.mxu3 }
 0xbbb   :  { %1143 = vrot.lane.b32.xlu1 %v2077_v11, %s1843_s17  ;;  %s1518_s17 = sld [smem:[%s2215_s0 + %s1866_s10]]  }
 0xbc1   :  { %v1219_v3 = vpop.f32.mrf.mxu3 }
 0xbc2   :  { %v1220_v5 = vadd.f32 %v1219_v3, %v1948_v52 }
 0xbc4   :  { %v1223_v27 = vsel %vm363_vm1, %v1220_v5, -inf }
 0xbc5   :  { %1224 = vmax.xlane.f32.xlu2 %v1223_v27 }
 0xbc6   :  { %1233 = vrot.lane.b32.xlu0 %v2077_v11, %s1844_s18  ;;  %s1867_s18 = smov 30  }
 0xbc7   :  { %s1519_s28 = sld [smem:[%s2215_s0 + %s1867_s18]]  }
 0xbc9   :  { %v1221_v7 = vpop.f32.mrf.mxu3 }
 0xc15   :  { %v1027_v8 = vpop.xlane.xlu1 %1026 }
 0xc16   :  { %v1028_v9 = vsub.f32 %v1022_v59, %v1027_v8 }
 0xc18   :  { %v1029_v10 = vmul.f32 1.442695, %v1028_v9 }
 0xc1a   :  { %1806 = vpow2.f32 %v1029_v10 }
 0xc20   :  { %v1807_v12 = vpop.eup %1806 }
 0xc21   :  { %v1034_v13 = vpack.c.bf16 %v1807_v12, %v1807_v12  ;;  %v1031_v14 = vsel %vm363_vm1, %v1807_v12, 0.0 }
 0xc22   :  { %1032 = vadd.xlane.f32.xlu2 %v1031_v14 }
 0xc23   :  { %1645 = vmatmul.msk.bf16.vlgmr.msra.gmra.mxu1 %vm363_vm1, %v1034_v13 }
 0xc25   :  { %v1135_v15 = vpop.xlane.xlu0 %1134 }
 0xc26   :  { %v1136_v52 = vsub.f32 %v1130_v41, %v1135_v15 }
 0xc28   :  { %v1137_v16 = vmul.f32 1.442695, %v1136_v52 }
 0xc2a   :  { %1808 = vpow2.f32 %v1137_v16 }
 0xc2d   :  { %v1144_v17 = vpop.permute.xlu1 %1143 }
 0xc2e   :  { %v1149_v18 = vsel %vm398_vm3, %v1144_v17, 0 }
 0xc2f   :  { %1158 = vmatpush.bf16.msrb.mxu1 %v1149_v18 }
 0xc30   :  { %v1809_v11 = vpop.eup %1808 }
 0xc31   :  { %v1142_v19 = vpack.c.bf16 %v1809_v11, %v1809_v11  ;;  %v1139_v20 = vsel %vm363_vm1, %v1809_v11, 0.0 }
 0xc32   :  { %1140 = vadd.xlane.f32.xlu2 %v1139_v20 }
 0xc33   :  { %1649 = vmatmul.msk.bf16.vlgmr.msrb.gmra.mxu1 %vm363_vm1, %v1142_v19 }
 0xc34   :  { %1283 = vmatpush.bf16.msra.mxu1 %v1274_v37  ;;  %v1773_v37 = vld [vmem:[%s2161_s29] ss:$0 sm:$0xff] }
 0xc38   :  { %v1225_v21 = vpop.xlane.xlu2 %1224  ;;  %v1234_v22 = vpop.permute.xlu0 %1233 }
 0xc39   :  { %v1226_v23 = vsub.f32 %v1220_v5, %v1225_v21  ;;  %v1239_v24 = vsel %vm398_vm3, %v1234_v22, 0 }
 0xc3a   :  { %1248 = vmatpush.bf16.msra.mxu0 %v1239_v24 }
 0xc3b   :  { %v1227_v25 = vmul.f32 1.442695, %v1226_v23 }
 0xc3d   :  { %1810 = vpow2.f32 %v1227_v25  ;;  %v1771_v25 = vld [vmem:[%s1510_s11] ss:$0 sm:$0xff] }
 0xc43   :  { %v1811_v26 = vpop.eup %1810 }
 0xc44   :  { %v1232_v28 = vpack.c.bf16 %v1811_v26, %v1811_v26  ;;  %v1229_v29 = vsel %vm363_vm1, %v1811_v26, 0.0 }
 0xc45   :  { %1230 = vadd.xlane.f32.xlu1 %v1229_v29 }
 0xc46   :  { %1652 = vmatmul.msk.bf16.vlgmr.msra.gmra.mxu0 %vm363_vm1, %v1232_v28 }
 0xc95   :  { %v1033_v32 = vpop.xlane.xlu2 %1032 }
 0xc96   :  { %1812 = vrcp.f32 %v1033_v32  ;;  %v1067_v40 = vand.u32 2147483648, %v1033_v32  ;;  %v1065_v43 = vand.u32 2147483647, %v1033_v32  ;;  %vm1061_vm7 = vweird.f32 %v1033_v32 }
 0xc98   :  { %v1068_v45 = vor.u32 1.1754944e-38, %v1067_v40  ;;  %vm1066_vm9 = vcmp.eq.f32.partialorder %v1065_v43, 8.507059e+37  ;;  %v1710_v43 = vld [vmem:[%s2177_s22 + $0x10] sm:$0xff] }
 0xc9c   :  { %v1813_v35 = vpop.eup %1812 }
 0xc9d   :  { %v1057_v36 = vmul.f32 %v1813_v35, %v1033_v32  ;;  %vm1062_vm6 = vweird.f32 %v1813_v35 }
 0xc9e   :  { %vm1063_vm8 = vmor %vm1061_vm7, %vm1062_vm6 }
 0xc9f   :  { %v1058_v38 = vsub.f32 1.0, %v1057_v36 }
 0xca0   :  { %v1052_v39 = vpop.f32.mrf.mxu1 }
 0xca1   :  { %v1059_v42 = vmul.f32 %v1813_v35, %v1058_v38  ;;  %v1706_v38 = vld [vmem:[%s1513_s15] sm:$0xff] }
 0xca3   :  { %v1060_v44 = vadd.f32 %v1813_v35, %v1059_v42 }
 0xca5   :  { %v1064_v46 = vsel %vm1063_vm8, %v1813_v35, %v1060_v44  ;;  %v1141_v47 = vpop.xlane.xlu2 %1140 }
 0xca6   :  { %v1069_v48 = vsel %vm1066_vm9, %v1068_v45, %v1064_v46  ;;  %1814 = vrcp.f32 %v1141_v47  ;;  %v1175_v58 = vand.u32 2147483648, %v1141_v47  ;;  %v1173_v60 = vand.u32 2147483647, %v1141_v47 }
 0xca7   :  { %v1070_v49 = vmul.f32 %v1069_v48, %v1052_v39  ;;  %vm1169_vm12 = vweird.f32 %v1141_v47  ;;  %v1711_v39 = vld [vmem:[%s2177_s22 + $0x18] sm:$0xff] }
 0xca8   :  { %v1054_v50 = vpop.f32.mrf.mxu1  ;;  %v1176_v62 = vor.u32 1.1754944e-38, %v1175_v58  ;;  %vm1174_vm14 = vcmp.eq.f32.partialorder %v1173_v60, 8.507059e+37  ;;  %1409 = vmatpush.bf16.msra.mxu3 %v1711_v39  ;;  %v1709_v58 = vld [vmem:[%s2177_s22 + $0x8] sm:$0xff]  ;;  %v1774_v60 = vld [vmem:[%s2169_s3] ss:$0 sm:$0xff] }
 0xca9   :  { %v1071_v51 = vpack.c.bf16 %v1070_v49, %v1070_v49 }
 0xcab   :  { %1646 = vmatmul.msk.bf16.vlgmr.msra.gmra.mxu2 %vm363_vm1, %v1071_v51  ;;  %v1772_v51 = vld [vmem:[%s2155_s25] ss:$0 sm:$0xff] }
 0xcac   :  { %v1815_v54 = vpop.eup %1814  ;;  %1410 = vmatpush.bf16.msra.mxu3 %v1710_v43 }
 0xcad   :  { %v1165_v55 = vmul.f32 %v1815_v54, %v1141_v47  ;;  %vm1170_vm10 = vweird.f32 %v1815_v54 }
 0xcae   :  { %vm1171_vm13 = vmor %vm1169_vm12, %vm1170_vm10 }
 0xcaf   :  { %v1166_v56 = vsub.f32 1.0, %v1165_v55 }
 0xcb0   :  { %v1160_v57 = vpop.f32.mrf.mxu1  ;;  %1411 = vmatpush.bf16.msra.mxu3 %v1709_v58 }
 0xcb1   :  { %v1167_v59 = vmul.f32 %v1815_v54, %v1166_v56 }
 0xcb3   :  { %v1168_v61 = vadd.f32 %v1815_v54, %v1167_v59  ;;  %v1708_v59 = vld [vmem:[%s2177_s22] sm:$0xff] }
 0xcb4   :  { %1412 = vmatpush.bf16.msra.mxu3 %v1708_v59 }
 0xcb5   :  { %v1172_v41 = vsel %vm1171_vm13, %v1815_v54, %v1168_v61 }
 0xcb6   :  { %v1177_v0 = vsel %vm1174_vm14, %v1176_v62, %v1172_v41 }
 0xcb7   :  { %v1178_v1 = vmul.f32 %v1177_v0, %v1160_v57 }
 0xcb8   :  { %v1162_v2 = vpop.f32.mrf.mxu1  ;;  %v1231_v3 = vpop.xlane.xlu1 %1230 }
 0xcb9   :  { %v1179_v5 = vpack.c.bf16 %v1178_v1, %v1178_v1  ;;  %1816 = vrcp.f32 %v1231_v3  ;;  %v1265_v9 = vand.u32 2147483648, %v1231_v3  ;;  %v1263_v13 = vand.u32 2147483647, %v1231_v3  ;;  %v1775_v2 = vld [vmem:[%s1516_s5] ss:$0 sm:$0xff] }
 0xcba   :  { %vm1259_vm15 = vweird.f32 %v1231_v3 }
 0xcbb   :  { %1650 = vmatmul.msk.bf16.vlgmr.msrb.gmra.mxu2 %vm363_vm1, %v1179_v5  ;;  %v1266_v15 = vor.u32 1.1754944e-38, %v1265_v9  ;;  %vm1264_vm4 = vcmp.eq.f32.partialorder %v1263_v13, 8.507059e+37 }
 0xcbf   :  { %v1817_v27 = vpop.eup %1816 }
 0xcc0   :  { %v1255_v7 = vmul.f32 %v1817_v27, %v1231_v3  ;;  %vm1260_vm3 = vweird.f32 %v1817_v27 }
 0xcc1   :  { %vm1261_vm2 = vmor %vm1259_vm15, %vm1260_vm3 }
 0xcc2   :  { %v1256_v8 = vsub.f32 1.0, %v1255_v7 }
 0xcc3   :  { %v1250_v10 = vpop.f32.mrf.mxu0 }
 0xcc4   :  { %v1257_v12 = vmul.f32 %v1817_v27, %v1256_v8 }
 0xcc6   :  { %v1258_v14 = vadd.f32 %v1817_v27, %v1257_v12 }
 0xcc8   :  { %v1262_v52 = vsel %vm1261_vm2, %v1817_v27, %v1258_v14 }
 0xcc9   :  { %v1267_v16 = vsel %vm1264_vm4, %v1266_v15, %v1262_v52 }
 0xcca   :  { %v1268_v17 = vmul.f32 %v1267_v16, %v1250_v10 }
 0xccb   :  { %v1252_v18 = vpop.f32.mrf.mxu0 }
 0xccc   :  { %v1269_v11 = vpack.c.bf16 %v1268_v17, %v1268_v17 }
 0xcce   :  { %1653 = vmatmul.msk.bf16.vlgmr.msra.gmra.mxu1 %vm363_vm1, %v1269_v11 }
 0xd2e   :  { %v1087_v19 = vpop.f32.mrf.mxu2 }
 0xd2f   :  { %v1107_v23 = vadd.f32 %v2122_v63, %v1087_v19 }
 0xd36   :  { %v1089_v20 = vpop.f32.mrf.mxu2 }
 0xd3e   :  { %v1195_v21 = vpop.f32.mrf.mxu2 }
 0xd3f   :  { %v1199_v24 = vadd.f32 %v1195_v21, %v1107_v23 }
 0xd46   :  { %v1197_v22 = vpop.f32.mrf.mxu2 }
 0xd47   :  { %v1776_v22 = vld [vmem:[%s1517_s9] ss:$0 sm:$0xff] }
 0xd4b   :  { %v1285_v26 = vpop.f32.mrf.mxu1 }
 0xd4c   :  { %v1289_v28 = vadd.f32 %v1285_v26, %v1199_v24 }
 0xd4e   :  { %v1293_v29 = vadd.f32 %v1771_v25, %v1289_v28  ;;  %v1777_v25 = vld [vmem:[%s1518_s17] ss:$0 sm:$0xff] }
 0xd50   :  { %v1294_v30 = vadd.f32 %v1293_v29, %v2072_v4  ;;  %v1707_v4 = vld [vmem:[%s1513_s15 + $0x8] sm:$0xff] }
 0xd51   :  { %1357 = vmatpush.bf16.msra.mxu2 %v1707_v4 }
 0xd52   :  { %v1297_v63 = vsel %vm335_vm0, %v1294_v30, 0.0 }
 0xd53   :  { %1298 = vadd.xlane.f32.xlu0 %v1297_v63  ;;  %v1287_v31 = vpop.f32.mrf.mxu1 }
 0xd55   :  { %1358 = vmatpush.bf16.msra.mxu2 %v1706_v38 }
 0xdc6   :  { %v1299_v32 = vpop.xlane.xlu0 %1298 }
 0xdc7   :  { %v1300_v33 = vmul.f32 %v1299_v32, %v2020_v6 }
 0xdc9   :  { %v1301_v34 = vsub.f32 %v1294_v30, %v1300_v33 }
 0xdcb   :  { %v1302_v35 = vmul.f32 %v1301_v34, %v1301_v34 }
 0xdcd   :  { %v1303_v36 = vsel %vm335_vm0, %v1302_v35, 0.0 }
 0xdce   :  { %1304 = vadd.xlane.f32.xlu2 %v1303_v36 }
 0xe41   :  { %v1305_v40 = vpop.xlane.xlu2 %1304 }
 0xe42   :  { %v1306_v42 = vmul.f32 %v1305_v40, %v2020_v6 }
 0xe44   :  { %v1307_v44 = vadd.f32 1e-05, %v1306_v42 }
 0xe46   :  { %1818 = vrsqrt.f32 %v1307_v44  ;;  %vm1314_vm5 = vweird.f32 %v1307_v44 }
 0xe4c   :  { %v1819_v45 = vpop.eup %1818 }
 0xe4d   :  { %v1309_v46 = vmul.f32 %v1819_v45, %v1307_v44  ;;  %vm1315_vm1 = vweird.f32 %v1819_v45  ;;  %v1778_v44 = vld [vmem:[%s1519_s28] ss:$0 sm:$0xff] }
 0xe4e   :  { %vm1316_vm6 = vmor %vm1314_vm5, %vm1315_vm1 }
 0xe4f   :  { %v1310_v47 = vmul.f32 %v1819_v45, %v1309_v46  ;;  %v1779_v46 = vld [vmem:[%s1520_s1] ss:$0 sm:$0xff] }
 0xe51   :  { %v1311_v48 = vmul.f32 0.5, %v1310_v47 }
 0xe53   :  { %v1312_v49 = vsub.f32 1.5, %v1311_v48 }
 0xe55   :  { %v1313_v50 = vmul.f32 %v1819_v45, %v1312_v49 }
 0xe57   :  { %v1317_v53 = vsel %vm1316_vm6, %v1819_v45, %v1313_v50 }
 0xe58   :  { %v1318_v54 = vmul.f32 %v1317_v53, %v1301_v34 }
 0xe5a   :  { %v1322_v55 = vmul.f32 %v1772_v51, %v1318_v54 }
 0xe5c   :  { %v1326_v56 = vadd.f32 %v1773_v37, %v1322_v55 }
 0xe5e   :  { %v1327_v57 = vpack.c.bf16 %v1326_v56, %v1326_v56 }
 0xe60   :  { %1662 = vmatmul.msk.bf16.vlgmr.msra.gmra.mxu2 %vm335_vm0, %v1327_v57 }
 0xee3   :  { %v1360_v61 = vpop.f32.mrf.mxu2 }
 0xee4   :  { %v1361_v62 = vadd.f32 %v1774_v60, %v1360_v61 }
 0xee6   :  { %v1364_v41 = vmax.f32 %v1361_v62, 0.0 }
 0xee8   :  { %v1365_v0 = vpack.c.bf16 %v1364_v41, %v1364_v41 }
 0xeea   :  { %1679 = vmatmul.msk.bf16.vlgmr.msra.gmra.mxu3 %vm838_vm11, %v1365_v0 }
 0xeeb   :  { %v1362_v1 = vpop.f32.mrf.mxu2 }
 0xf6d   :  { %v1414_v3 = vpop.f32.mrf.mxu3 }
 0xf6e   :  { %v1415_v5 = vadd.f32 %v1775_v2, %v1414_v3 }
 0xf70   :  { %v1418_v27 = vadd.f32 %v1415_v5, %v1326_v56 }
 0xf72   :  { %v1421_v7 = vsel %vm335_vm0, %v1418_v27, 0.0 }
 0xf73   :  { %1422 = vadd.xlane.f32.xlu2 %v1421_v7 }
 0xf75   :  { %v1416_v8 = vpop.f32.mrf.mxu3 }
 0xfe6   :  { %v1423_v9 = vpop.xlane.xlu2 %1422 }
 0xfe7   :  { %v1424_v10 = vmul.f32 %v1423_v9, %v2020_v6 }
 0xfe9   :  { %v1425_v12 = vsub.f32 %v1418_v27, %v1424_v10 }
 0xfeb   :  { %v1426_v13 = vmul.f32 %v1425_v12, %v1425_v12 }
 0xfed   :  { %v1427_v14 = vsel %vm335_vm0, %v1426_v13, 0.0 }
 0xfee   :  { %1428 = vadd.xlane.f32.xlu2 %v1427_v14 }
0x1061   :  { %v1429_v15 = vpop.xlane.xlu2 %1428 }
0x1062   :  { %v1430_v52 = vmul.f32 %v1429_v15, %v2020_v6 }
0x1064   :  { %v1431_v16 = vadd.f32 1e-05, %v1430_v52 }
0x1066   :  { %1820 = vrsqrt.f32 %v1431_v16  ;;  %vm1438_vm7 = vweird.f32 %v1431_v16 }
0x106c   :  { %v1821_v17 = vpop.eup %1820 }
0x106d   :  { %v1433_v18 = vmul.f32 %v1821_v17, %v1431_v16  ;;  %vm1439_vm11 = vweird.f32 %v1821_v17 }
0x106e   :  { %vm1440_vm8 = vmor %vm1438_vm7, %vm1439_vm11 }
0x106f   :  { %v1434_v11 = vmul.f32 %v1821_v17, %v1433_v18 }
0x1071   :  { %v1435_v19 = vmul.f32 0.5, %v1434_v11 }
0x1073   :  { %v1436_v20 = vsub.f32 1.5, %v1435_v19 }
0x1075   :  { %v1437_v21 = vmul.f32 %v1821_v17, %v1436_v20 }
0x1077   :  { %v1441_v23 = vsel %vm1440_vm8, %v1821_v17, %v1437_v21 }
0x1078   :  { %v1442_v24 = vmul.f32 %v1441_v23, %v1425_v12 }
0x107a   :  { %v1446_v26 = vmul.f32 %v1776_v22, %v1442_v24 }
0x107c   :  { %v1450_v28 = vadd.f32 %v1777_v25, %v1446_v26 }
0x107e   :  { %v1453_v29 = vsel %vm335_vm0, %v1450_v28, 0.0 }
0x107f   :  { %1454 = vadd.xlane.f32.xlu2 %v1453_v29 }
0x10f2   :  { %v1455_v30 = vpop.xlane.xlu2 %1454 }
0x10f3   :  { %v1456_v63 = vmul.f32 %v1455_v30, %v2020_v6 }
0x10f5   :  { %v1457_v31 = vsub.f32 %v1450_v28, %v1456_v63 }
0x10f7   :  { %v1458_v32 = vmul.f32 %v1457_v31, %v1457_v31 }
0x10f9   :  { %v1459_v33 = vsel %vm335_vm0, %v1458_v32, 0.0  ;;  %vm1484_vm0 = vcmask 257024  }
0x10fa   :  { %1460 = vadd.xlane.f32.xlu2 %v1459_v33 }
0x116d   :  { %v1461_v34 = vpop.xlane.xlu2 %1460 }
0x116e   :  { %v1462_v35 = vmul.f32 %v1461_v34, %v2020_v6 }
0x1170   :  { %v1463_v36 = vadd.f32 1e-05, %v1462_v35 }
0x1172   :  { %1822 = vrsqrt.f32 %v1463_v36  ;;  %vm1470_vm10 = vweird.f32 %v1463_v36 }
0x1178   :  { %v1823_v4 = vpop.eup %1822 }
0x1179   :  { %v1465_v38 = vmul.f32 %v1823_v4, %v1463_v36  ;;  %vm1471_vm9 = vweird.f32 %v1823_v4 }
0x117a   :  { %vm1472_vm12 = vmor %vm1470_vm10, %vm1471_vm9 }
0x117b   :  { %v1466_v39 = vmul.f32 %v1823_v4, %v1465_v38 }
0x117d   :  { %v1467_v40 = vmul.f32 0.5, %v1466_v39 }
0x117f   :  { %v1468_v42 = vsub.f32 1.5, %v1467_v40 }
0x1181   :  { %v1469_v43 = vmul.f32 %v1823_v4, %v1468_v42 }
0x1183   :  { %v1473_v45 = vsel %vm1472_vm12, %v1823_v4, %v1469_v43 }
0x1184   :  { %v1474_v6 = vmul.f32 %v1473_v45, %v1457_v31 }
0x1186   :  { %v1478_v47 = vmul.f32 %v1778_v44, %v1474_v6 }
0x1188   :  { %v1482_v48 = vadd.f32 %v1779_v46, %v1478_v47 }
0x118a   :  { %v1483_v49 = vpack.c.bf16 %v1482_v48, %v1482_v48 }
0x118c   :  { %1485 = vst.msk [vmem:[%s1521_s13] sm:$0xf] %vm1484_vm0, %v1483_v49 }

// kernel: pytransformer_forward.7
= control target key start
LH: loop header
LB: loop body
LE: loop exit
PB: predicated region body
PF: predicated region fallthrough
CT: control target
= control target key end

     0   :  { %s3565_s6 = smov 1   ;;  %s3566_s10 = smov 2   ;;  %s4529_s0 = inlined_call_operand.smem [shape: u32[51], index: -1, kind: input, shape index: {}] }
   0x1   :  { %s3640_s5 = sld [smem:[%s4529_s0]]   ;;  %s3567_s14 = smov 3  }
   0x2   :  { %s3645_s9 = sld [smem:[%s4529_s0 + %s3565_s6]]   ;;  %s3568_s18 = smov 4  }
   0x3   :  { %s3650_s13 = sld [smem:[%s4529_s0 + %s3566_s10]]   ;;  %s3569_s22 = smov 5  }
   0x4   :  { %s3655_s17 = sld [smem:[%s4529_s0 + %s3567_s14]]   ;;  %s3570_s26 = smov 6  }
   0x5   :  { %s3660_s21 = sld [smem:[%s4529_s0 + %s3568_s18]]   ;;  %s3571_s30 = smov 7  }
   0x6   :  { %s3665_s25 = sld [smem:[%s4529_s0 + %s3569_s22]]   ;;  %s3572_s4 = smov 8  }
   0x7   :  { %s3670_s29 = sld [smem:[%s4529_s0 + %s3570_s26]]   ;;  %s3573_s10 = smov 9  }
   0x8   :  { %s3675_s3 = sld [smem:[%s4529_s0 + %s3571_s30]]   ;;  %s3574_s15 = smov 10  }
   0x9   :  { %s3680_s8 = sld [smem:[%s4529_s0 + %s3572_s4]]   ;;  %s3575_s20 = smov 11  }
   0xa   :  { %s3685_s14 = sld [smem:[%s4529_s0 + %s3573_s10]]   ;;  %s3576_s26 = smov 12  }
   0xb   :  { %4540 = sst [smem:[#allocation5_spill]] %s3660_s21  ;;  %s3577_s1 = smov 13  }
   0xc   :  { %s3690_s19 = sld [smem:[%s4529_s0 + %s3574_s15]]   ;;  %s3578_s7 = smov 14  }
   0xd   :  { %s3695_s24 = sld [smem:[%s4529_s0 + %s3575_s20]]   ;;  %s3579_s15 = smov 15  }
   0xe   :  { %s3700_s30 = sld [smem:[%s4529_s0 + %s3576_s26]]   ;;  %s3580_s22 = smov 16  }
   0xf   :  { %s3705_s6 = sld [smem:[%s4529_s0 + %s3577_s1]]   ;;  %s3581_s28 = smov 17  }
  0x10   :  { %s3710_s12 = sld [smem:[%s4529_s0 + %s3578_s7]]   ;;  %s3582_s7 = smov 18  }
  0x11   :  { %s3715_s20 = sld [smem:[%s4529_s0 + %s3579_s15]]   ;;  %s3583_s15 = smov 19  }
  0x12   :  { %s3720_s27 = sld [smem:[%s4529_s0 + %s3580_s22]]   ;;  %s3584_s22 = smov 20  }
  0x13   :  { %s3725_s4 = sld [smem:[%s4529_s0 + %s3581_s28]]   ;;  %s3585_s28 = smov 21  }
  0x14   :  { %s3730_s21 = sld [smem:[%s4529_s0 + %s3582_s7]]   ;;  %s3586_s7 = smov 22  }
  0x15   :  { %4541 = sst [smem:[#allocation6_spill]] %s3705_s6 }
  0x16   :  { %s3735_s6 = sld [smem:[%s4529_s0 + %s3583_s15]]   ;;  %s3587_s15 = smov 23  }
  0x18   :  { %4542 = sst [smem:[#allocation7_spill]] %s3720_s27 }
  0x19   :  { %4543 = sst [smem:[#allocation8_spill]] %s3725_s4 }
  0x1a   :  { %4544 = sst [smem:[#allocation9_spill]] %s3730_s21 }
  0x1b   :  { %s3740_s27 = sld [smem:[%s4529_s0 + %s3584_s22]]   ;;  %s3588_s22 = smov 24  }
  0x1c   :  { %4545 = sst [smem:[#allocation10_spill]] %s3735_s6 }
  0x1d   :  { %s3745_s4 = sld [smem:[%s4529_s0 + %s3585_s28]]   ;;  %s3589_s28 = smov 25  }
  0x1e   :  { %s3750_s21 = sld [smem:[%s4529_s0 + %s3586_s7]]   ;;  %s3590_s7 = smov 26  }
  0x1f   :  { %s3755_s6 = sld [smem:[%s4529_s0 + %s3587_s15]]   ;;  %s3591_s15 = smov 27  }
  0x21   :  { %4546 = sst [smem:[#allocation11_spill]] %s3740_s27 }
  0x22   :  { %s3760_s27 = sld [smem:[%s4529_s0 + %s3588_s22]]   ;;  %s3592_s22 = smov 28  }
  0x23   :  { %4547 = sst [smem:[#allocation12_spill]] %s3745_s4 }
  0x24   :  { %4548 = sst [smem:[#allocation13_spill]] %s3750_s21 }
  0x25   :  { %4549 = sst [smem:[#allocation14_spill]] %s3755_s6 }
  0x26   :  { %s3765_s4 = sld [smem:[%s4529_s0 + %s3589_s28]]   ;;  %s3593_s28 = smov 29  }
  0x27   :  { %s3770_s21 = sld [smem:[%s4529_s0 + %s3590_s7]]   ;;  %s3594_s7 = smov 30  }
  0x28   :  { %4550 = sst [smem:[#allocation15_spill]] %s3760_s27 }
  0x29   :  { %s3775_s6 = sld [smem:[%s4529_s0 + %s3591_s15]]   ;;  %s3595_s15 = smov 31  }
  0x2a   :  { %s3780_s27 = sld [smem:[%s4529_s0 + %s3592_s22]]   ;;  %s3596_s22 = smov 32  }
  0x2c   :  { %4551 = sst [smem:[#allocation16_spill]] %s3765_s4 }
  0x2d   :  { %4552 = sst [smem:[#allocation17_spill]] %s3770_s21 }
  0x2e   :  { %s3785_s4 = sld [smem:[%s4529_s0 + %s3593_s28]]   ;;  %s3597_s28 = smov 33  }
  0x2f   :  { %4553 = sst [smem:[#allocation18_spill]] %s3775_s6 }
  0x30   :  { %4554 = sst [smem:[#allocation19_spill]] %s3780_s27 }
  0x31   :  { %s3790_s21 = sld [smem:[%s4529_s0 + %s3594_s7]]   ;;  %s3598_s7 = smov 34  }
  0x32   :  { %s3795_s6 = sld [smem:[%s4529_s0 + %s3595_s15]]   ;;  %s3599_s15 = smov 35  }
  0x33   :  { %s3800_s27 = sld [smem:[%s4529_s0 + %s3596_s22]]   ;;  %s3600_s22 = smov 36  }
  0x34   :  { %4555 = sst [smem:[#allocation20_spill]] %s3785_s4 }
  0x35   :  { %s3805_s4 = sld [smem:[%s4529_s0 + %s3597_s28]]   ;;  %s3601_s28 = smov 37  }
  0x37   :  { %4556 = sst [smem:[#allocation21_spill]] %s3790_s21 }
  0x38   :  { %4557 = sst [smem:[#allocation22_spill]] %s3795_s6 }
  0x39   :  { %4558 = sst [smem:[#allocation23_spill]] %s3800_s27 }
  0x3a   :  { %s3810_s21 = sld [smem:[%s4529_s0 + %s3598_s7]]   ;;  %s3602_s7 = smov 38  }
  0x3b   :  { %4559 = sst [smem:[#allocation24_spill]] %s3805_s4 }
  0x3c   :  { %s3815_s6 = sld [smem:[%s4529_s0 + %s3599_s15]]   ;;  %s3603_s15 = smov 39  }
  0x3d   :  { %s3820_s27 = sld [smem:[%s4529_s0 + %s3600_s22]]   ;;  %s3604_s22 = smov 40  }
  0x3e   :  { %s3825_s4 = sld [smem:[%s4529_s0 + %s3601_s28]]   ;;  %s3605_s28 = smov 41  }
  0x40   :  { %4560 = sst [smem:[#allocation25_spill]] %s3810_s21 }
  0x41   :  { %s3830_s21 = sld [smem:[%s4529_s0 + %s3602_s7]]   ;;  %s3606_s7 = smov 42  }
  0x42   :  { %4561 = sst [smem:[#allocation26_spill]] %s3815_s6 }
  0x43   :  { %4562 = sst [smem:[#allocation27_spill]] %s3820_s27 }
  0x44   :  { %4563 = sst [smem:[#allocation28_spill]] %s3825_s4 }
  0x45   :  { %s3835_s6 = sld [smem:[%s4529_s0 + %s3603_s15]]   ;;  %s3607_s15 = smov 43  }
  0x46   :  { %s3840_s27 = sld [smem:[%s4529_s0 + %s3604_s22]]   ;;  %s3608_s22 = smov 44  }
  0x47   :  { %4564 = sst [smem:[#allocation29_spill]] %s3830_s21 }
  0x48   :  { %s3845_s4 = sld [smem:[%s4529_s0 + %s3605_s28]]   ;;  %s3609_s28 = smov 45  }
  0x49   :  { %s3850_s21 = sld [smem:[%s4529_s0 + %s3606_s7]]   ;;  %s3610_s7 = smov 46  }
  0x4b   :  { %4565 = sst [smem:[#allocation30_spill]] %s3835_s6 }
  0x4c   :  { %4566 = sst [smem:[#allocation31_spill]] %s3840_s27 }
  0x4d   :  { %s3855_s6 = sld [smem:[%s4529_s0 + %s3607_s15]]   ;;  %s3611_s15 = smov 47  }
  0x4e   :  { %4567 = sst [smem:[#allocation32_spill]] %s3845_s4 }
  0x4f   :  { %4568 = sst [smem:[#allocation33_spill]] %s3850_s21 }
  0x50   :  { %s3860_s27 = sld [smem:[%s4529_s0 + %s3608_s22]]   ;;  %s3612_s22 = smov 48  }
  0x51   :  { %s3865_s4 = sld [smem:[%s4529_s0 + %s3609_s28]]   ;;  %s3613_s28 = smov 49  }
  0x52   :  { %s3870_s21 = sld [smem:[%s4529_s0 + %s3610_s7]]   ;;  %s3614_s7 = smov 50  }
  0x53   :  { %4569 = sst [smem:[#allocation34_spill]] %s3855_s6 }
  0x54   :  { %s3875_s6 = sld [smem:[%s4529_s0 + %s3611_s15]]  }
  0x56   :  { %4570 = sst [smem:[#allocation35_spill]] %s3860_s27 }
  0x57   :  { %4571 = sst [smem:[#allocation36_spill]] %s3865_s4 }
  0x58   :  { %4572 = sst [smem:[#allocation37_spill]] %s3870_s21 }
  0x59   :  { %s3880_s27 = sld [smem:[%s4529_s0 + %s3612_s22]]  }
  0x5a   :  { %s3885_s4 = sld [smem:[%s4529_s0 + %s3613_s28]]  }
  0x5b   :  { %s3890_s21 = sld [smem:[%s4529_s0 + %s3614_s7]]  }
  0x5c   :  { %v3254_v0 = vld [vmem:[%s3670_s29 + $0x8] sm:$0xff]  ;;  %v3253_v1 = vld [vmem:[%s3670_s29] sm:$0xff]  ;;  %vm258_vm0 = vcmask 261120  }
  0x5d   :  { %v3895_v2 = vld [vmem:[%s3640_s5] sm:$0xff]  ;;  %v3898_v3 = vld [vmem:[%s3640_s5 + $0x8] sm:$0xff]  ;;  %268 = vmatpush.bf16.msra.mxu0 %v3254_v0 }
  0x5e   :  { %v237_v4 = vpack.c.bf16 %v3898_v3, %v3895_v2 }
  0x61   :  { %269 = vmatpush.bf16.msra.mxu0 %v3253_v1 }
  0x64   :  { %3098 = vmatmul.msk.bf16.vlgmr.msra.gmra.mxu0 %vm258_vm0, %v237_v4 }
  0x65   :  { %106 = vsyncpa [#allocation3], 0  ;;  %v3615_v5 = vmov 0   ;;  %v3348_v7 = vld [vmem:[%s3675_s3] ss:$0 sm:$0xff]  ;;  %s3616_s0 = smov 96  }
  0x66   :  { %3346 = vset.pattern.permute.xlu0 %v3615_v5  ;;  %3347 = vset.pattern.permute.xlu1 %v3615_v5  ;;  %v208_v16 = vld [vmem:[%s3650_s13] sm:$0xff]  ;;  %s3617_s5 = smov 120   ;;  %v209_v17 = vld [vmem:[%s3650_s13 + $0x8] sm:$0xff]  ;;  %vm290_vm1 = vcmask 64512   ;;  %v3618_v23 = vmov -1e+09  }
  0x67   :  { %215 = vperm.xlu1 %3347, %v209_v17   ;;  %v3349_v20 = vld [vmem:[%s3655_s17] ss:$0 sm:$0xff]  ;;  %vm311_vm4 = vcmask 130048   ;;  %s3619_s13 = smov 88   ;;  %s3620_s17 = smov 64   ;;  %vm479_vm5 = vcmask 1043456  }
  0x68   :  { %v3350_v22 = vld [vmem:[%s3665_s25] ss:$0 sm:$0xff]  ;;  %s3621_s25 = smov 72   ;;  %s3622_s29 = smov 112  }
  0x69   :  { %v278_v35 = vld [vmem:[%s3680_s8] sm:$0xf]  ;;  %s3623_s3 = smov 104   ;;  %s3624_s15 = smov 80  }
  0x6a   :  { %v501_v37 = vsel %vm479_vm5, %v278_v35, 0  ;;  %s3625_s16 = smov 56   ;;  %s3626_s18 = smov 40  }
  0x6b   :  { %s3627_s22 = smov 48   ;;  %s4582_s23 = sld [smem:[#allocation13_spill]] }
  0x6c   :  { %s4583_s26 = sld [smem:[#allocation12_spill]] }
  0x6d   :  { %s4584_s28 = sld [smem:[#allocation14_spill]] }
  0x6e   :  { %s4585_s1 = sld [smem:[#allocation17_spill]] }
  0x6f   :  { %s4586_s2 = sld [smem:[#allocation15_spill]] }
  0x70   :  { %s4587_s7 = sld [smem:[#allocation16_spill]] }
  0x71   :  { %s4588_s10 = sld [smem:[#allocation18_spill]] }
  0x72   :  { %s4589_s11 = sld [smem:[#allocation19_spill]] }
  0xd9   :  { %v3921_v25 = vpop.permute.xlu1 %215 }
  0xda   :  { %vm219_vm3 = vcmp.eq.s32.totalorder %v3921_v25, %v3349_v20 }
  0xdb   :  { %v221_v29 = vsel %vm219_vm3, 0.0, %v3618_v23 }
  0xdc   :  { %v3929_v31 = vadd.f32 %v3350_v22, %v221_v29 }
  0xe1   :  { %v271_v6 = vpop.f32.mrf.mxu0 }
  0xe2   :  { %v272_v8 = vadd.f32 %v3348_v7, %v271_v6 }
  0xe4   :  { %v276_v10 = vpack.c.bf16 %v272_v8, %v272_v8 }
  0xe6   :  { %v285_v13 = vunpack.c.l.b16 %v276_v10 }
  0xe9   :  { %v273_v9 = vpop.f32.mrf.mxu0 }
  0xea   :  { %v274_v11 = vadd.f32 %v3348_v7, %v273_v9 }
  0xec   :  { %v277_v12 = vpack.c.bf16 %v274_v11, %v274_v11 }
  0xee   :  { %v286_v14 = vunpack.c.l.b16 %v277_v12 }
  0xf0   :  { %v3904_v15 = vpack.c.b16 %v286_v14, %v285_v13 }
  0xf2   :  { %288 = vrot.lane.b32.xlu0 %v3904_v15, %s3616_s0 }
  0xfa   :  { %212 = vperm.xlu0 %3346, %v208_v16  }
 0x102   :  { %382 = vrot.lane.b32.xlu0 %v3904_v15, %s3617_s5 }
 0x164   :  { %v289_v18 = vpop.permute.xlu0 %288 }
 0x165   :  { %v295_v19 = vsel %vm290_vm1, %v289_v18, 0 }
 0x166   :  { %304 = vmatpush.bf16.xpose.msra.mxu1 %v295_v19 }
 0x16c   :  { %v3916_v21 = vpop.permute.xlu0 %212 }
 0x16d   :  { %3099 = vmatmul.msk.bf16.vlgmr.msra.gmra.mxu1 %vm290_vm1, %v3904_v15  ;;  %vm218_vm2 = vcmp.eq.s32.totalorder %v3916_v21, %v3349_v20 }
 0x16e   :  { %v220_v24 = vsel %vm218_vm2, 0.0, %v3618_v23  ;;  %510 = vmatpush.bf16.msrb.mxu1 %v501_v37 }
 0x16f   :  { %v3923_v26 = vadd.f32 %v3350_v22, %v220_v24 }
 0x174   :  { %v383_v51 = vpop.permute.xlu0 %382 }
 0x1ea   :  { %v306_v27 = vpop.f32.mrf.mxu1 }
 0x1eb   :  { %v307_v28 = vadd.f32 %v306_v27, %v3923_v26 }
 0x1ed   :  { %v312_v30 = vsel %vm311_vm4, %v307_v28, -inf }
 0x1ee   :  { %313 = vmax.xlane.f32.xlu1 %v312_v30 }
 0x1f2   :  { %v308_v32 = vpop.f32.mrf.mxu1 }
 0x1f3   :  { %v309_v33 = vadd.f32 %v308_v32, %v3929_v31 }
 0x1f5   :  { %v315_v34 = vsel %vm311_vm4, %v309_v33, -inf }
 0x1f6   :  { %316 = vmax.xlane.f32.xlu2 %v315_v34 }
 0x207   :  { %384 = vrot.lane.b32.xlu1 %v3904_v15, %s3619_s13 }
 0x20e   :  { %331 = vrot.lane.b32.xlu2 %v3904_v15, %s3620_s17 }
 0x20f   :  { %635 = vrot.lane.b32.xlu1 %v3904_v15, %s3621_s25 }
 0x217   :  { %517 = vrot.lane.b32.xlu1 %v3904_v15, %s3622_s29 }
 0x261   :  { %v314_v36 = vpop.xlane.xlu1 %313 }
 0x262   :  { %v318_v38 = vsub.f32 %v307_v28, %v314_v36 }
 0x264   :  { %v320_v39 = vmul.f32 1.442695, %v318_v38 }
 0x266   :  { %3380 = vpow2.f32 %v320_v39 }
 0x269   :  { %v317_v40 = vpop.xlane.xlu2 %316 }
 0x26a   :  { %v319_v41 = vsub.f32 %v309_v33, %v317_v40 }
 0x26c   :  { %v3381_v42 = vpop.eup %3380  ;;  %v322_v43 = vmul.f32 1.442695, %v319_v41 }
 0x26d   :  { %v324_v44 = vsel %vm311_vm4, %v3381_v42, 0.0 }
 0x26e   :  { %3382 = vpow2.f32 %v322_v43  ;;  %325 = vadd.xlane.f32.xlu0 %v324_v44 }
 0x271   :  { %v332_v45 = vpop.permute.xlu2 %331 }
 0x272   :  { %344 = vmatpush.bf16.msra.mxu2 %v332_v45 }
 0x274   :  { %v3383_v46 = vpop.eup %3382 }
 0x275   :  { %v327_v47 = vsel %vm311_vm4, %v3383_v46, 0.0  ;;  %v330_v48 = vpack.c.bf16 %v3383_v46, %v3381_v42 }
 0x276   :  { %328 = vadd.xlane.f32.xlu2 %v327_v47 }
 0x277   :  { %3100 = vmatmul.msk.bf16.vlgmr.msra.gmra.mxu2 %vm311_vm4, %v330_v48 }
 0x279   :  { %v385_v49 = vpop.permute.xlu1 %384 }
 0x27a   :  { %v390_v50 = vsel %vm290_vm1, %v385_v49, 0 }
 0x27b   :  { %399 = vmatpush.bf16.xpose.msra.mxu3 %v390_v50 }
 0x281   :  { %v636_v52 = vpop.permute.xlu1 %635 }
 0x282   :  { %v641_v53 = vsel %vm290_vm1, %v636_v52, 0  ;;  %633 = vrot.lane.b32.xlu0 %v3904_v15, %s3623_s3  ;;  %3101 = vmatmul.msk.bf16.vlgmr.msra.gmra.mxu3 %vm290_vm1, %v383_v51 }
 0x283   :  { %650 = vmatpush.bf16.xpose.msra.mxu1 %v641_v53 }
 0x289   :  { %v518_v4 = vpop.permute.xlu1 %517 }
 0x28e   :  { %519 = vrot.lane.b32.xlu2 %v3904_v15, %s3624_s15 }
 0x296   :  { %425 = vrot.lane.b32.xlu2 %v3904_v15, %s3625_s16 }
 0x2e1   :  { %v326_v54 = vpop.xlane.xlu0 %325 }
 0x2e2   :  { %3384 = vrcp.f32 %v326_v54  ;;  %vm356_vm8 = vweird.f32 %v326_v54  ;;  %v362_v9 = vand.u32 2147483648, %v326_v54  ;;  %v360_v11 = vand.u32 2147483647, %v326_v54 }
 0x2e4   :  { %v363_v16 = vor.u32 1.1754944e-38, %v362_v9  ;;  %vm361_vm12 = vcmp.eq.f32.partialorder %v360_v11, 8.507059e+37 }
 0x2e8   :  { %v3385_v56 = vpop.eup %3384 }
 0x2e9   :  { %v329_v55 = vpop.xlane.xlu2 %328  ;;  %v352_v57 = vmul.f32 %v3385_v56, %v326_v54  ;;  %vm357_vm6 = vweird.f32 %v3385_v56 }
 0x2ea   :  { %3386 = vrcp.f32 %v329_v55  ;;  %v376_v10 = vand.u32 2147483648, %v329_v55  ;;  %vm358_vm9 = vmor %vm356_vm8, %vm357_vm6  ;;  %vm370_vm10 = vweird.f32 %v329_v55  ;;  %v374_v12 = vand.u32 2147483647, %v329_v55 }
 0x2eb   :  { %v353_v62 = vsub.f32 1.0, %v352_v57 }
 0x2ec   :  { %v377_v17 = vor.u32 1.1754944e-38, %v376_v10  ;;  %vm375_vm13 = vcmp.eq.f32.partialorder %v374_v12, 8.507059e+37 }
 0x2ed   :  { %v354_v1 = vmul.f32 %v3385_v56, %v353_v62 }
 0x2ef   :  { %v355_v7 = vadd.f32 %v3385_v56, %v354_v1 }
 0x2f0   :  { %v3387_v58 = vpop.eup %3386 }
 0x2f1   :  { %v366_v59 = vmul.f32 %v3387_v58, %v329_v55  ;;  %v520_v60 = vpop.permute.xlu2 %519  ;;  %vm371_vm7 = vweird.f32 %v3387_v58  ;;  %v359_v13 = vsel %vm358_vm9, %v3385_v56, %v355_v7 }
 0x2f2   :  { %v525_v61 = vsel %vm290_vm1, %v520_v60, 0  ;;  %vm372_vm11 = vmor %vm370_vm10, %vm371_vm7  ;;  %v364_v18 = vsel %vm361_vm12, %v363_v16, %v359_v13 }
 0x2f3   :  { %v367_v63 = vsub.f32 1.0, %v366_v59  ;;  %534 = vmatpush.bf16.xpose.msrb.mxu3 %v525_v61 }
 0x2f4   :  { %v634_v35 = vpop.permute.xlu0 %633 }
 0x2f5   :  { %v368_v0 = vmul.f32 %v3387_v58, %v367_v63 }
 0x2f7   :  { %v369_v8 = vadd.f32 %v3387_v58, %v368_v0 }
 0x2f9   :  { %v426_v5 = vpop.permute.xlu2 %425  ;;  %v373_v14 = vsel %vm372_vm11, %v3387_v58, %v369_v8 }
 0x2fa   :  { %v346_v6 = vpop.f32.mrf.mxu2  ;;  %438 = vmatpush.bf16.msrb.mxu2 %v426_v5  ;;  %3105 = vmatmul.msk.bf16.vlgmr.msrb.gmra.mxu3 %vm290_vm1, %v518_v4  ;;  %v378_v20 = vsel %vm375_vm13, %v377_v17, %v373_v14  ;;  %v279_v14 = vld [vmem:[%s3680_s8 + $0x4] sm:$0xf] }
 0x2fb   :  { %v379_v22 = vmul.f32 %v364_v18, %v346_v6  ;;  %v481_v17 = vsel %vm479_vm5, %v279_v14, 0 }
 0x2fc   :  { %490 = vmatpush.bf16.msrb.mxu0 %v481_v17 }
 0x302   :  { %v348_v19 = vpop.f32.mrf.mxu2 }
 0x303   :  { %v380_v24 = vmul.f32 %v378_v20, %v348_v19 }
 0x305   :  { %v381_v27 = vpack.c.bf16 %v380_v24, %v379_v22  ;;  %v401_v28 = vpop.f32.mrf.mxu3 }
 0x306   :  { %v402_v29 = vadd.f32 %v401_v28, %v3923_v26 }
 0x307   :  { %3104 = vmatmul.msk.bf16.vlgmr.msrb.gmra.mxu1 %vm290_vm1, %v381_v27 }
 0x308   :  { %v406_v30 = vsel %vm311_vm4, %v402_v29, -inf }
 0x309   :  { %407 = vmax.xlane.f32.xlu1 %v406_v30 }
 0x30d   :  { %v403_v32 = vpop.f32.mrf.mxu3 }
 0x30e   :  { %v404_v33 = vadd.f32 %v403_v32, %v3929_v31 }
 0x310   :  { %v409_v34 = vsel %vm311_vm4, %v404_v33, -inf }
 0x311   :  { %410 = vmax.xlane.f32.xlu0 %v409_v34 }
 0x317   :  { %3108 = vmatmul.msk.bf16.vlgmr.msra.gmra.mxu1 %vm290_vm1, %v634_v35 }
 0x37c   :  { %v408_v36 = vpop.xlane.xlu1 %407 }
 0x37d   :  { %v536_v37 = vpop.f32.mrf.mxu3  ;;  %v412_v39 = vsub.f32 %v402_v29, %v408_v36 }
 0x37e   :  { %v537_v38 = vadd.f32 %v536_v37, %v3923_v26 }
 0x37f   :  { %v414_v41 = vmul.f32 1.442695, %v412_v39 }
 0x380   :  { %v541_v40 = vsel %vm311_vm4, %v537_v38, -inf }
 0x381   :  { %542 = vmax.xlane.f32.xlu0 %v541_v40  ;;  %3388 = vpow2.f32 %v414_v41 }
 0x384   :  { %v3965_v42 = vpop.f32.mrf.mxu1  ;;  %v411_v43 = vpop.xlane.xlu0 %410 }
 0x385   :  { %v413_v44 = vsub.f32 %v404_v33, %v411_v43  ;;  %v538_v56 = vpop.f32.mrf.mxu3 }
 0x386   :  { %v539_v57 = vadd.f32 %v538_v56, %v3929_v31 }
 0x387   :  { %v416_v45 = vmul.f32 1.442695, %v413_v44  ;;  %v3389_v47 = vpop.eup %3388 }
 0x388   :  { %v544_v58 = vsel %vm311_vm4, %v539_v57, -inf  ;;  %v418_v59 = vsel %vm311_vm4, %v3389_v47, 0.0 }
 0x389   :  { %3390 = vpow2.f32 %v416_v45 }
 0x38c   :  { %v3967_v46 = vpop.f32.mrf.mxu1 }
 0x38f   :  { %v3391_v48 = vpop.eup %3390 }
 0x390   :  { %v424_v49 = vpack.c.bf16 %v3391_v48, %v3389_v47  ;;  %v421_v60 = vsel %vm311_vm4, %v3391_v48, 0.0 }
 0x392   :  { %3102 = vmatmul.msk.bf16.vlgmr.msrb.gmra.mxu2 %vm311_vm4, %v424_v49 }
 0x394   :  { %v652_v50 = vpop.f32.mrf.mxu1 }
 0x395   :  { %v653_v51 = vadd.f32 %v652_v50, %v3923_v26  ;;  %676 = vrot.lane.b32.xlu0 %v3904_v15, %s3626_s18 }
 0x397   :  { %v657_v52 = vsel %vm311_vm4, %v653_v51, -inf }
 0x398   :  { %658 = vmax.xlane.f32.xlu2 %v657_v52 }
 0x39c   :  { %v654_v53 = vpop.f32.mrf.mxu1 }
 0x39d   :  { %v655_v54 = vadd.f32 %v654_v53, %v3929_v31 }
 0x39f   :  { %v660_v55 = vsel %vm311_vm4, %v655_v54, -inf }
 0x3a0   :  { %661 = vmax.xlane.f32.xlu1 %v660_v55 }
 0x3a8   :  { %545 = vmax.xlane.f32.xlu1 %v544_v58 }
 0x3b0   :  { %419 = vadd.xlane.f32.xlu1 %v418_v59  ;;  %560 = vrot.lane.b32.xlu2 %v3904_v15, %s3627_s22  ;;  %v281_v59 = vld [vmem:[%s3680_s8 + $0xc] sm:$0xf] }
 0x3b8   :  { %422 = vadd.xlane.f32.xlu1 %v421_v60 }
 0x3f4   :  { %v543_v61 = vpop.xlane.xlu0 %542 }
 0x3f5   :  { %v547_v62 = vsub.f32 %v537_v38, %v543_v61  ;;  %v731_v61 = vsel %vm479_vm5, %v281_v59, 0 }
 0x3f7   :  { %v549_v63 = vmul.f32 1.442695, %v547_v62 }
 0x3f9   :  { %3392 = vpow2.f32 %v549_v63 }
 0x3ff   :  { %v3393_v0 = vpop.eup %3392 }
 0x400   :  { %v553_v1 = vsel %vm311_vm4, %v3393_v0, 0.0 }
 0x401   :  { %554 = vadd.xlane.f32.xlu2 %v553_v1 }
 0x407   :  { %v677_v4 = vpop.permute.xlu0 %676 }
 0x408   :  { %689 = vmatpush.bf16.msra.mxu3 %v677_v4 }
 0x40b   :  { %v659_v5 = vpop.xlane.xlu2 %658 }
 0x40c   :  { %v663_v6 = vsub.f32 %v653_v51, %v659_v5 }
 0x40e   :  { %v665_v7 = vmul.f32 1.442695, %v663_v6 }
 0x410   :  { %3394 = vpow2.f32 %v665_v7 }
 0x413   :  { %v662_v8 = vpop.xlane.xlu1 %661  ;;  %v561_v15 = vpop.permute.xlu2 %560 }
 0x414   :  { %v664_v9 = vsub.f32 %v655_v54, %v662_v8  ;;  %573 = vmatpush.bf16.msra.mxu2 %v561_v15 }
 0x415   :  { %v440_v37 = vpop.f32.mrf.mxu2 }
 0x416   :  { %v3395_v10 = vpop.eup %3394  ;;  %v667_v11 = vmul.f32 1.442695, %v664_v9 }
 0x417   :  { %v669_v12 = vsel %vm311_vm4, %v3395_v10, 0.0 }
 0x418   :  { %3396 = vpow2.f32 %v667_v11  ;;  %670 = vadd.xlane.f32.xlu0 %v669_v12  ;;  %740 = vmatpush.bf16.msrb.mxu2 %v731_v61 }
 0x41b   :  { %v546_v13 = vpop.xlane.xlu1 %545 }
 0x41c   :  { %v548_v16 = vsub.f32 %v539_v57, %v546_v13 }
 0x41d   :  { %v442_v54 = vpop.f32.mrf.mxu2 }
 0x41e   :  { %v3397_v18 = vpop.eup %3396  ;;  %v551_v19 = vmul.f32 1.442695, %v548_v16 }
 0x41f   :  { %v675_v20 = vpack.c.bf16 %v3397_v18, %v3395_v10  ;;  %v672_v22 = vsel %vm311_vm4, %v3397_v18, 0.0 }
 0x420   :  { %3398 = vpow2.f32 %v551_v19  ;;  %673 = vadd.xlane.f32.xlu1 %v672_v22 }
 0x421   :  { %3109 = vmatmul.msk.bf16.vlgmr.msra.gmra.mxu3 %vm311_vm4, %v675_v20 }
 0x423   :  { %v420_v24 = vpop.xlane.xlu1 %419 }
 0x424   :  { %3400 = vrcp.f32 %v420_v24  ;;  %v456_v40 = vand.u32 2147483648, %v420_v24  ;;  %vm450_vm15 = vweird.f32 %v420_v24  ;;  %v454_v41 = vand.u32 2147483647, %v420_v24 }
 0x426   :  { %v3399_v27 = vpop.eup %3398  ;;  %v457_v49 = vor.u32 1.1754944e-38, %v456_v40  ;;  %vm455_vm6 = vcmp.eq.f32.partialorder %v454_v41, 8.507059e+37 }
 0x427   :  { %v559_v28 = vpack.c.bf16 %v3399_v27, %v3393_v0  ;;  %v556_v29 = vsel %vm311_vm4, %v3399_v27, 0.0  ;;  %v280_v0 = vld [vmem:[%s3680_s8 + $0x8] sm:$0xf]  ;;  %s4573_s8 = sld [smem:[#allocation6_spill]] }
 0x428   :  { %557 = vadd.xlane.f32.xlu1 %v556_v29  ;;  %v615_v4 = vsel %vm479_vm5, %v280_v0, 0 }
 0x429   :  { %3106 = vmatmul.msk.bf16.vlgmr.msra.gmra.mxu2 %vm311_vm4, %v559_v28  ;;  %624 = vmatpush.bf16.msra.mxu0 %v615_v4 }
 0x42a   :  { %v3401_v30 = vpop.eup %3400 }
 0x42b   :  { %v446_v32 = vmul.f32 %v3401_v30, %v420_v24  ;;  %v423_v33 = vpop.xlane.xlu1 %422  ;;  %vm451_vm14 = vweird.f32 %v3401_v30 }
 0x42c   :  { %3402 = vrcp.f32 %v423_v33  ;;  %vm452_vm2 = vmor %vm450_vm15, %vm451_vm14  ;;  %v470_v44 = vand.u32 2147483648, %v423_v33  ;;  %v468_v48 = vand.u32 2147483647, %v423_v33  ;;  %vm464_vm7 = vweird.f32 %v423_v33 }
 0x42d   :  { %v447_v34 = vsub.f32 1.0, %v446_v32 }
 0x42e   :  { %v471_v51 = vor.u32 1.1754944e-38, %v470_v44  ;;  %vm469_vm9 = vcmp.eq.f32.partialorder %v468_v48, 8.507059e+37 }
 0x42f   :  { %v448_v35 = vmul.f32 %v3401_v30, %v447_v34 }
 0x431   :  { %v449_v38 = vadd.f32 %v3401_v30, %v448_v35 }
 0x432   :  { %v3403_v36 = vpop.eup %3402 }
 0x433   :  { %v460_v39 = vmul.f32 %v3403_v36, %v423_v33  ;;  %v453_v45 = vsel %vm452_vm2, %v3401_v30, %v449_v38  ;;  %vm465_vm3 = vweird.f32 %v3403_v36 }
 0x434   :  { %vm466_vm8 = vmor %vm464_vm7, %vm465_vm3  ;;  %v458_v52 = vsel %vm455_vm6, %v457_v49, %v453_v45 }
 0x435   :  { %v461_v43 = vsub.f32 1.0, %v460_v39  ;;  %v473_v56 = vmul.f32 %v458_v52, %v440_v37 }
 0x437   :  { %v462_v47 = vmul.f32 %v3403_v36, %v461_v43 }
 0x439   :  { %v463_v50 = vadd.f32 %v3403_v36, %v462_v47 }
 0x43b   :  { %v467_v53 = vsel %vm466_vm8, %v3403_v36, %v463_v50 }
 0x43c   :  { %v472_v55 = vsel %vm469_vm9, %v471_v51, %v467_v53 }
 0x43d   :  { %v474_v57 = vmul.f32 %v472_v55, %v442_v54 }
 0x43f   :  { %v475_v58 = vpack.c.bf16 %v474_v57, %v473_v56 }
 0x441   :  { %3103 = vmatmul.msk.bf16.vlgmr.msrb.gmra.mxu0 %vm290_vm1, %v475_v58 }
 0x474   :  { %v3993_v63 = vpop.xlane.xlu2 %554 }
 0x475   :  { %vm585_vm8 = vweird.f32 %v3993_v63  ;;  %v591_v47 = vand.u32 2147483648, %v3993_v63  ;;  %v589_v49 = vand.u32 2147483647, %v3993_v63 }
 0x477   :  { %v592_v54 = vor.u32 1.1754944e-38, %v591_v47 }
 0x48b   :  { %v671_v60 = vpop.xlane.xlu0 %670 }
 0x48c   :  { %3404 = vrcp.f32 %v671_v60  ;;  %vm701_vm12 = vweird.f32 %v671_v60  ;;  %v707_v24 = vand.u32 2147483648, %v671_v60  ;;  %v705_v28 = vand.u32 2147483647, %v671_v60 }
 0x48e   :  { %v708_v35 = vor.u32 1.1754944e-38, %v707_v24  ;;  %vm706_vm2 = vcmp.eq.f32.partialorder %v705_v28, 8.507059e+37 }
 0x492   :  { %v3405_v1 = vpop.eup %3404 }
 0x493   :  { %v674_v62 = vpop.xlane.xlu1 %673  ;;  %v697_v5 = vmul.f32 %v3405_v1, %v671_v60  ;;  %vm702_vm10 = vweird.f32 %v3405_v1 }
 0x494   :  { %3406 = vrcp.f32 %v674_v62  ;;  %v721_v27 = vand.u32 2147483648, %v674_v62  ;;  %vm703_vm13 = vmor %vm701_vm12, %vm702_vm10  ;;  %vm715_vm14 = vweird.f32 %v674_v62  ;;  %v719_v29 = vand.u32 2147483647, %v674_v62 }
 0x495   :  { %3408 = vrcp.f32 %v3993_v63  ;;  %v698_v9 = vsub.f32 1.0, %v697_v5  ;;  %vm590_vm12 = vcmp.eq.f32.partialorder %v589_v49, 8.507059e+37 }
 0x496   :  { %v722_v36 = vor.u32 1.1754944e-38, %v721_v27  ;;  %vm720_vm3 = vcmp.eq.f32.partialorder %v719_v29, 8.507059e+37 }
 0x497   :  { %v699_v12 = vmul.f32 %v3405_v1, %v698_v9 }
 0x499   :  { %v700_v20 = vadd.f32 %v3405_v1, %v699_v12 }
 0x49a   :  { %v3407_v6 = vpop.eup %3406 }
 0x49b   :  { %v711_v7 = vmul.f32 %v3407_v6, %v674_v62  ;;  %v558_v8 = vpop.xlane.xlu1 %557  ;;  %v3409_v15 = vpop.eup %3408  ;;  %vm716_vm11 = vweird.f32 %v3407_v6  ;;  %v704_v33 = vsel %vm703_vm13, %v3405_v1, %v700_v20 }
 0x49c   :  { %3410 = vrcp.f32 %v558_v8  ;;  %v581_v11 = vmul.f32 %v3409_v15, %v3993_v63  ;;  %vm717_vm15 = vmor %vm715_vm14, %vm716_vm11  ;;  %v709_v37 = vsel %vm706_vm2, %v708_v35, %v704_v33  ;;  %vm586_vm6 = vweird.f32 %v3409_v15 }
 0x49d   :  { %v712_v10 = vsub.f32 1.0, %v711_v7  ;;  %v605_v48 = vand.u32 2147483648, %v558_v8  ;;  %vm587_vm9 = vmor %vm585_vm8, %vm586_vm6  ;;  %vm599_vm10 = vweird.f32 %v558_v8  ;;  %v603_v51 = vand.u32 2147483647, %v558_v8 }
 0x49e   :  { %v582_v17 = vsub.f32 1.0, %v581_v11 }
 0x49f   :  { %v713_v13 = vmul.f32 %v3407_v6, %v712_v10  ;;  %v606_v55 = vor.u32 1.1754944e-38, %v605_v48  ;;  %vm604_vm13 = vcmp.eq.f32.partialorder %v603_v51, 8.507059e+37 }
 0x4a0   :  { %v583_v30 = vmul.f32 %v3409_v15, %v582_v17 }
 0x4a1   :  { %v714_v22 = vadd.f32 %v3407_v6, %v713_v13 }
 0x4a2   :  { %v3411_v14 = vpop.eup %3410  ;;  %v584_v39 = vadd.f32 %v3409_v15, %v583_v30 }
 0x4a3   :  { %v595_v16 = vmul.f32 %v3411_v14, %v558_v8  ;;  %v718_v34 = vsel %vm717_vm15, %v3407_v6, %v714_v22  ;;  %vm600_vm7 = vweird.f32 %v3411_v14  ;;  %v3352_v6 = vld [vmem:[%s3685_s14] ss:$0 sm:$0xff]  ;;  %s4574_s14 = sld [smem:[#allocation5_spill]] }
 0x4a4   :  { %v691_v18 = vpop.f32.mrf.mxu3  ;;  %v723_v41 = vsel %vm720_vm3, %v722_v36, %v718_v34  ;;  %vm601_vm11 = vmor %vm599_vm10, %vm600_vm7  ;;  %v588_v52 = vsel %vm587_vm9, %v3409_v15, %v584_v39  ;;  %v236_v39 = vld [vmem:[%s3645_s9] sm:$0xf] }
 0x4a5   :  { %v596_v19 = vsub.f32 1.0, %v595_v16  ;;  %v724_v43 = vmul.f32 %v709_v37, %v691_v18  ;;  %v593_v56 = vsel %vm590_vm12, %v592_v54, %v588_v52  ;;  %v3628_v18 = vmov 32.0   ;;  %v3258_v37 = vld [vmem:[%s3710_s12 + $0x8] sm:$0xff] }
 0x4a6   :  { %3412 = vrcp.f32 %v3628_v18  ;;  %886 = vmatpush.bf16.msrb.mxu1 %v3258_v37 }
 0x4a7   :  { %v597_v32 = vmul.f32 %v3411_v14, %v596_v19 }
 0x4a9   :  { %v598_v45 = vadd.f32 %v3411_v14, %v597_v32 }
 0x4ab   :  { %v602_v53 = vsel %vm601_vm11, %v3411_v14, %v598_v45  ;;  %v3255_v45 = vld [vmem:[%s3700_s30] sm:$0xff] }
 0x4ac   :  { %v575_v38 = vpop.f32.mrf.mxu2  ;;  %v693_v40 = vpop.f32.mrf.mxu3  ;;  %v607_v58 = vsel %vm604_vm13, %v606_v55, %v602_v53 }
 0x4ad   :  { %v725_v44 = vmul.f32 %v723_v41, %v693_v40  ;;  %v608_v59 = vmul.f32 %v593_v56, %v575_v38  ;;  %v3413_v19 = vpop.eup %3412  ;;  %v3257_v38 = vld [vmem:[%s3710_s12] sm:$0xff]  ;;  %v3256_v40 = vld [vmem:[%s3700_s30 + $0x8] sm:$0xff]  ;;  %s4579_s30 = sld [smem:[#allocation11_spill]] }
 0x4ae   :  { %v765_v20 = vmul.f32 32.0, %v3413_v19  ;;  %vm769_vm14 = vweird.f32 %v3413_v19  ;;  %887 = vmatpush.bf16.msrb.mxu1 %v3257_v38  ;;  %849 = vmatpush.bf16.msrb.mxu0 %v3256_v40  ;;  %s4580_s12 = sld [smem:[#allocation9_spill]] }
 0x4af   :  { %v726_v50 = vpack.c.bf16 %v725_v44, %v724_v43 }
 0x4b1   :  { %3110 = vmatmul.msk.bf16.vlgmr.msrb.gmra.mxu2 %vm290_vm1, %v726_v50  ;;  %3128 = vmatmul.msk.bf16.vlgmr.msrb.gmra.mxu1 %vm258_vm0, %v236_v39 }
 0x4b2   :  { %850 = vmatpush.bf16.msrb.mxu0 %v3255_v45 }
 0x4b4   :  { %v577_v57 = vpop.f32.mrf.mxu2 }
 0x4b5   :  { %v609_v60 = vmul.f32 %v607_v58, %v577_v57 }
 0x4b7   :  { %v610_v61 = vpack.c.bf16 %v609_v60, %v608_v59 }
 0x4b9   :  { %3107 = vmatmul.msk.bf16.vlgmr.msra.gmra.mxu0 %vm290_vm1, %v610_v61 }
 0x4be   :  { %v492_v62 = vpop.f32.mrf.mxu0 }
 0x4bf   :  { %v513_v0 = vadd.f32 %v3965_v42, %v492_v62  ;;  %v3353_v62 = vld [vmem:[%s3690_s19] ss:$0 sm:$0xff]  ;;  %s4575_s19 = sld [smem:[#allocation7_spill]] }
 0x4c6   :  { %v494_v63 = vpop.f32.mrf.mxu0 }
 0x4c7   :  { %v515_v15 = vadd.f32 %v3967_v46, %v494_v63  ;;  %v766_v46 = vsub.f32 1.0, %v765_v20 }
 0x4c9   :  { %v767_v22 = vmul.f32 %v3413_v19, %v766_v46 }
 0x534   :  { %v742_v1 = vpop.f32.mrf.mxu2 }
 0x536   :  { %v626_v4 = vpop.f32.mrf.mxu0 }
 0x537   :  { %v631_v5 = vadd.f32 %v626_v4, %v513_v0  ;;  %v3354_v4 = vld [vmem:[%s3695_s24] ss:$0 sm:$0xff]  ;;  %s4578_s24 = sld [smem:[#allocation8_spill]] }
 0x539   :  { %v747_v7 = vadd.f32 %v742_v1, %v631_v5 }
 0x53b   :  { %v752_v8 = vadd.f32 %v3352_v6, %v747_v7 }
 0x53c   :  { %v744_v13 = vpop.f32.mrf.mxu2 }
 0x53d   :  { %v754_v9 = vadd.f32 %v752_v8, %v3895_v2  ;;  %v768_v2 = vadd.f32 %v3413_v19, %v767_v22 }
 0x53e   :  { %v628_v10 = vpop.f32.mrf.mxu0 }
 0x53f   :  { %v632_v11 = vadd.f32 %v628_v10, %v515_v15  ;;  %v758_v12 = vsel %vm258_vm0, %v754_v9, 0.0  ;;  %v4011_v24 = vsel %vm769_vm14, %v3413_v19, %v768_v2  ;;  %v3355_v10 = vld [vmem:[%s3715_s20] ss:$0 sm:$0xff]  ;;  %s4581_s20 = sld [smem:[#allocation10_spill]] }
 0x540   :  { %759 = vadd.xlane.f32.xlu1 %v758_v12  ;;  %v3356_v19 = vld [vmem:[%s4573_s8] ss:$0 sm:$0xff]  ;;  %s4599_s8 = sld [smem:[#allocation26_spill]] }
 0x541   :  { %v748_v14 = vadd.f32 %v744_v13, %v632_v11  ;;  %v889_v11 = vpop.f32.mrf.mxu1 }
 0x542   :  { %v890_v12 = vadd.f32 %v3355_v10, %v889_v11 }
 0x543   :  { %v753_v16 = vadd.f32 %v3352_v6, %v748_v14 }
 0x544   :  { %v895_v13 = vpack.c.bf16 %v890_v12, %v890_v12 }
 0x545   :  { %v755_v42 = vadd.f32 %v753_v16, %v3898_v3 }
 0x546   :  { %v910_v14 = vsel %vm290_vm1, %v895_v13, 0  ;;  %v946_v16 = vunpack.c.l.b16 %v895_v13 }
 0x547   :  { %v761_v17 = vsel %vm258_vm0, %v755_v42, 0.0  ;;  %919 = vmatpush.bf16.xpose.msrb.mxu3 %v910_v14 }
 0x548   :  { %762 = vadd.xlane.f32.xlu1 %v761_v17 }
 0x549   :  { %v891_v17 = vpop.f32.mrf.mxu1 }
 0x5b3   :  { %v760_v27 = vpop.xlane.xlu1 %759 }
 0x5b4   :  { %v771_v28 = vmul.f32 %v4011_v24, %v760_v27 }
 0x5b6   :  { %v773_v3 = vsub.f32 %v754_v9, %v771_v28 }
 0x5b8   :  { %v775_v29 = vmul.f32 %v773_v3, %v773_v3 }
 0x5ba   :  { %v777_v30 = vsel %vm258_vm0, %v775_v29, 0.0 }
 0x5bb   :  { %778 = vadd.xlane.f32.xlu1 %v777_v30  ;;  %v763_v32 = vpop.xlane.xlu1 %762 }
 0x5bc   :  { %v772_v33 = vmul.f32 %v4011_v24, %v763_v32 }
 0x5be   :  { %v774_v34 = vsub.f32 %v755_v42, %v772_v33  ;;  %v4036_v42 = vpack.c.b16 %v946_v16, %v946_v16  ;;  %v3351_v33 = vld [vmem:[%s4574_s14] ss:$0 sm:$0xff]  ;;  %s4600_s14 = sld [smem:[#allocation24_spill]] }
 0x5bf   :  { %vm230_vm9 = vcmp.eq.s32.totalorder %v3916_v21, %v3351_v33  ;;  %vm231_vm10 = vcmp.eq.s32.totalorder %v3921_v25, %v3351_v33 }
 0x5c0   :  { %v776_v35 = vmul.f32 %v774_v34, %v774_v34  ;;  %v4055_v38 = vsel %vm231_vm10, 0.0, %v3618_v23 }
 0x5c2   :  { %v780_v36 = vsel %vm258_vm0, %v776_v35, 0.0 }
 0x5c3   :  { %781 = vadd.xlane.f32.xlu1 %v780_v36 }
 0x5dc   :  { %948 = vrot.lane.b32.xlu1 %v4036_v42, %s3616_s0 }
 0x5e4   :  { %1139 = vrot.lane.b32.xlu1 %v4036_v42, %s3622_s29 }
 0x62e   :  { %v779_v41 = vpop.xlane.xlu1 %778 }
 0x62f   :  { %v783_v43 = vmul.f32 %v779_v41, %v4011_v24 }
 0x631   :  { %v785_v44 = vadd.f32 1e-05, %v783_v43 }
 0x633   :  { %3414 = vrsqrt.f32 %v785_v44  ;;  %vm793_vm2 = vweird.f32 %v785_v44 }
 0x636   :  { %v782_v47 = vpop.xlane.xlu1 %781 }
 0x637   :  { %v784_v48 = vmul.f32 %v782_v47, %v4011_v24 }
 0x639   :  { %v3415_v49 = vpop.eup %3414  ;;  %v786_v50 = vadd.f32 1e-05, %v784_v48 }
 0x63a   :  { %v788_v51 = vmul.f32 %v3415_v49, %v785_v44  ;;  %vm794_vm15 = vweird.f32 %v3415_v49 }
 0x63b   :  { %3416 = vrsqrt.f32 %v786_v50  ;;  %vm795_vm3 = vmor %vm793_vm2, %vm794_vm15  ;;  %vm803_vm7 = vweird.f32 %v786_v50 }
 0x63c   :  { %v789_v52 = vmul.f32 %v3415_v49, %v788_v51 }
 0x63e   :  { %v790_v53 = vmul.f32 0.5, %v789_v52 }
 0x640   :  { %v791_v54 = vsub.f32 1.5, %v790_v53 }
 0x641   :  { %v3417_v55 = vpop.eup %3416 }
 0x642   :  { %v792_v56 = vmul.f32 %v3415_v49, %v791_v54  ;;  %v798_v57 = vmul.f32 %v3417_v55, %v786_v50  ;;  %vm804_vm6 = vweird.f32 %v3417_v55 }
 0x643   :  { %vm805_vm8 = vmor %vm803_vm7, %vm804_vm6 }
 0x644   :  { %v799_v58 = vmul.f32 %v3417_v55, %v798_v57  ;;  %v796_v59 = vsel %vm795_vm3, %v3415_v49, %v792_v56  ;;  %v896_v56 = vld [vmem:[%s4575_s19] sm:$0xf] }
 0x645   :  { %v807_v63 = vmul.f32 %v796_v59, %v773_v3  ;;  %v1121_v57 = vsel %vm479_vm5, %v896_v56, 0 }
 0x646   :  { %v800_v60 = vmul.f32 0.5, %v799_v58 }
 0x647   :  { %v812_v5 = vmul.f32 %v3353_v62, %v807_v63 }
 0x648   :  { %v801_v61 = vsub.f32 1.5, %v800_v60 }
 0x649   :  { %v4027_v8 = vadd.f32 %v3354_v4, %v812_v5 }
 0x64a   :  { %v802_v0 = vmul.f32 %v3417_v55, %v801_v61 }
 0x64c   :  { %v806_v1 = vsel %vm805_vm8, %v3417_v55, %v802_v0 }
 0x64d   :  { %v808_v6 = vmul.f32 %v806_v1, %v774_v34  ;;  %v4049_v34 = vsel %vm230_vm9, 0.0, %v3618_v23 }
 0x64e   :  { %v949_v30 = vpop.permute.xlu1 %948 }
 0x64f   :  { %v813_v7 = vmul.f32 %v3353_v62, %v808_v6  ;;  %v954_v32 = vsel %vm479_vm5, %v949_v30, 0 }
 0x650   :  { %963 = vmatpush.bf16.msra.mxu2 %v954_v32 }
 0x651   :  { %v4029_v15 = vadd.f32 %v3354_v4, %v813_v7 }
 0x653   :  { %v819_v9 = vpack.c.bf16 %v4029_v15, %v4027_v8 }
 0x654   :  { %1130 = vmatpush.bf16.msrb.mxu2 %v1121_v57 }
 0x655   :  { %3119 = vmatmul.msk.bf16.vlgmr.msrb.gmra.mxu0 %vm258_vm0, %v819_v9 }
 0x656   :  { %v1140_v51 = vpop.permute.xlu1 %1139 }
 0x657   :  { %v1145_v55 = vsel %vm290_vm1, %v1140_v51, 0 }
 0x6d2   :  { %v852_v18 = vpop.f32.mrf.mxu0 }
 0x6d3   :  { %v853_v20 = vadd.f32 %v3356_v19, %v852_v18 }
 0x6d5   :  { %v893_v22 = vpack.c.bf16 %v853_v20, %v853_v20 }
 0x6d7   :  { %v903_v28 = vunpack.c.l.b16 %v893_v22 }
 0x6da   :  { %v854_v46 = vpop.f32.mrf.mxu0 }
 0x6db   :  { %v855_v2 = vadd.f32 %v3356_v19, %v854_v46 }
 0x6dd   :  { %v894_v27 = vpack.c.bf16 %v855_v2, %v855_v2 }
 0x6df   :  { %v904_v3 = vunpack.c.l.b16 %v894_v27 }
 0x6e1   :  { %v905_v29 = vpack.c.b16 %v904_v3, %v903_v28 }
 0x6e3   :  { %1137 = vrot.lane.b32.xlu1 %v905_v29, %s3622_s29  ;;  %3129 = vmatmul.msk.bf16.vlgmr.msrb.gmra.mxu3 %vm290_vm1, %v905_v29 }
 0x755   :  { %v1138_v2 = vpop.permute.xlu1 %1137 }
 0x766   :  { %v921_v35 = vpop.f32.mrf.mxu3 }
 0x767   :  { %v922_v36 = vadd.f32 %v921_v35, %v4049_v34 }
 0x769   :  { %v926_v37 = vsel %vm290_vm1, %v922_v36, -inf }
 0x76a   :  { %927 = vmax.xlane.f32.xlu0 %v926_v37 }
 0x76e   :  { %v923_v39 = vpop.f32.mrf.mxu3 }
 0x76f   :  { %v924_v40 = vadd.f32 %v923_v39, %v4055_v38 }
 0x771   :  { %v929_v41 = vsel %vm290_vm1, %v924_v40, -inf }
 0x772   :  { %930 = vmax.xlane.f32.xlu2 %v929_v41 }
 0x77e   :  { %1003 = vrot.lane.b32.xlu0 %v4036_v42, %s3617_s5 }
 0x7dd   :  { %v928_v21 = vpop.xlane.xlu0 %927 }
 0x7de   :  { %v932_v43 = vsub.f32 %v922_v36, %v928_v21 }
 0x7e0   :  { %v934_v44 = vmul.f32 1.442695, %v932_v43 }
 0x7e2   :  { %3418 = vpow2.f32 %v934_v44 }
 0x7e5   :  { %v931_v45 = vpop.xlane.xlu2 %930 }
 0x7e6   :  { %v933_v47 = vsub.f32 %v924_v40, %v931_v45 }
 0x7e8   :  { %v3419_v48 = vpop.eup %3418  ;;  %v936_v25 = vmul.f32 1.442695, %v933_v47 }
 0x7e9   :  { %v938_v23 = vsel %vm290_vm1, %v3419_v48, 0.0 }
 0x7ea   :  { %3420 = vpow2.f32 %v936_v25  ;;  %939 = vadd.xlane.f32.xlu0 %v938_v23 }
 0x7f0   :  { %v3421_v49 = vpop.eup %3420  ;;  %v1004_v50 = vpop.permute.xlu0 %1003 }
 0x7f1   :  { %v944_v52 = vpack.c.bf16 %v3421_v49, %v3419_v48  ;;  %v1009_v53 = vsel %vm290_vm1, %v1004_v50, 0  ;;  %v941_v54 = vsel %vm290_vm1, %v3421_v49, 0.0 }
 0x7f2   :  { %942 = vadd.xlane.f32.xlu2 %v941_v54  ;;  %1018 = vmatpush.bf16.xpose.msra.mxu0 %v1009_v53 }
 0x7f3   :  { %3130 = vmatmul.msk.bf16.vlgmr.msra.gmra.mxu2 %vm290_vm1, %v944_v52 }
 0x7fa   :  { %1154 = vmatpush.bf16.xpose.msrb.mxu0 %v1145_v55 }
 0x7fe   :  { %1257 = vrot.lane.b32.xlu0 %v4036_v42, %s3623_s3 }
 0x806   :  { %1255 = vrot.lane.b32.xlu0 %v905_v29, %s3623_s3 }
 0x80a   :  { %1001 = vrot.lane.b32.xlu2 %v905_v29, %s3617_s5 }
 0x80e   :  { %1044 = vrot.lane.b32.xlu0 %v4036_v42, %s3619_s13 }
 0x85d   :  { %v940_v58 = vpop.xlane.xlu0 %939 }
 0x85e   :  { %3422 = vrcp.f32 %v940_v58  ;;  %vm975_vm13 = vweird.f32 %v940_v58  ;;  %v981_v13 = vand.u32 2147483648, %v940_v58  ;;  %v979_v17 = vand.u32 2147483647, %v940_v58 }
 0x860   :  { %v982_v46 = vor.u32 1.1754944e-38, %v981_v13  ;;  %vm980_vm3 = vcmp.eq.f32.partialorder %v979_v17, 8.507059e+37 }
 0x864   :  { %v3423_v60 = vpop.eup %3422 }
 0x865   :  { %v943_v59 = vpop.xlane.xlu2 %942  ;;  %v971_v61 = vmul.f32 %v3423_v60, %v940_v58  ;;  %vm976_vm11 = vweird.f32 %v3423_v60 }
 0x866   :  { %3424 = vrcp.f32 %v943_v59  ;;  %v995_v16 = vand.u32 2147483648, %v943_v59  ;;  %vm977_vm14 = vmor %vm975_vm13, %vm976_vm11  ;;  %vm989_vm15 = vweird.f32 %v943_v59  ;;  %v993_v18 = vand.u32 2147483647, %v943_v59 }
 0x867   :  { %v972_v1 = vsub.f32 1.0, %v971_v61 }
 0x868   :  { %v996_v22 = vor.u32 1.1754944e-38, %v995_v16  ;;  %vm994_vm6 = vcmp.eq.f32.partialorder %v993_v18, 8.507059e+37 }
 0x869   :  { %v973_v7 = vmul.f32 %v3423_v60, %v972_v1 }
 0x86b   :  { %v974_v11 = vadd.f32 %v3423_v60, %v973_v7 }
 0x86c   :  { %v3425_v62 = vpop.eup %3424 }
 0x86d   :  { %v985_v63 = vmul.f32 %v3425_v62, %v943_v59  ;;  %v1002_v0 = vpop.permute.xlu2 %1001  ;;  %vm990_vm12 = vweird.f32 %v3425_v62  ;;  %v978_v19 = vsel %vm977_vm14, %v3423_v60, %v974_v11 }
 0x86e   :  { %3131 = vmatmul.msk.bf16.vlgmr.msra.gmra.mxu0 %vm290_vm1, %v1002_v0  ;;  %vm991_vm2 = vmor %vm989_vm15, %vm990_vm12  ;;  %v983_v27 = vsel %vm980_vm3, %v982_v46, %v978_v19 }
 0x86f   :  { %v986_v4 = vsub.f32 1.0, %v985_v63 }
 0x870   :  { %v1258_v5 = vpop.permute.xlu0 %1257 }
 0x871   :  { %v1263_v6 = vsel %vm290_vm1, %v1258_v5, 0  ;;  %v987_v9 = vmul.f32 %v3425_v62, %v986_v4 }
 0x872   :  { %1272 = vmatpush.bf16.xpose.msra.mxu2 %v1263_v6 }
 0x873   :  { %v988_v12 = vadd.f32 %v3425_v62, %v987_v9 }
 0x875   :  { %v992_v20 = vsel %vm991_vm2, %v3425_v62, %v988_v12 }
 0x876   :  { %v965_v10 = vpop.f32.mrf.mxu2  ;;  %v997_v3 = vsel %vm994_vm6, %v996_v22, %v992_v20 }
 0x877   :  { %v998_v29 = vmul.f32 %v983_v27, %v965_v10 }
 0x878   :  { %v1256_v14 = vpop.permute.xlu0 %1255 }
 0x87e   :  { %v967_v28 = vpop.f32.mrf.mxu2  ;;  %3135 = vmatmul.msk.bf16.vlgmr.msrb.gmra.mxu0 %vm290_vm1, %v1138_v2 }
 0x87f   :  { %v999_v30 = vmul.f32 %v997_v3, %v967_v28 }
 0x880   :  { %v1045_v32 = vpop.permute.xlu0 %1044 }
 0x881   :  { %v1000_v33 = vpack.c.bf16 %v999_v30, %v998_v29  ;;  %v1050_v35 = vsel %vm479_vm5, %v1045_v32, 0 }
 0x882   :  { %1059 = vmatpush.bf16.msra.mxu1 %v1050_v35 }
 0x883   :  { %3134 = vmatmul.msk.bf16.vlgmr.msrb.gmra.mxu2 %vm290_vm1, %v1000_v33 }
 0x893   :  { %3138 = vmatmul.msk.bf16.vlgmr.msra.gmra.mxu2 %vm290_vm1, %v1256_v14 }
 0x8eb   :  { %v1020_v36 = vpop.f32.mrf.mxu0 }
 0x8ec   :  { %v1021_v37 = vadd.f32 %v1020_v36, %v4049_v34  ;;  %v897_v36 = vld [vmem:[%s4575_s19 + $0x4] sm:$0xf] }
 0x8ee   :  { %v1025_v39 = vsel %vm290_vm1, %v1021_v37, -inf }
 0x8ef   :  { %1026 = vmax.xlane.f32.xlu2 %v1025_v39 }
 0x8f3   :  { %v1022_v40 = vpop.f32.mrf.mxu0 }
 0x8f4   :  { %v1023_v41 = vadd.f32 %v1022_v40, %v4055_v38 }
 0x8f6   :  { %v1028_v21 = vsel %vm290_vm1, %v1023_v41, -inf }
 0x8f7   :  { %1029 = vmax.xlane.f32.xlu1 %v1028_v21 }
 0x8fb   :  { %v1156_v43 = vpop.f32.mrf.mxu0 }
 0x8fc   :  { %v1157_v44 = vadd.f32 %v1156_v43, %v4049_v34 }
 0x8fe   :  { %v1161_v45 = vsel %vm290_vm1, %v1157_v44, -inf }
 0x8ff   :  { %1162 = vmax.xlane.f32.xlu0 %v1161_v45 }
 0x903   :  { %v1158_v47 = vpop.f32.mrf.mxu0 }
 0x904   :  { %v1159_v48 = vadd.f32 %v1158_v47, %v4055_v38 }
 0x906   :  { %v4087_v25 = vpop.f32.mrf.mxu2  ;;  %v1164_v23 = vsel %vm290_vm1, %v1159_v48, -inf }
 0x907   :  { %1165 = vmax.xlane.f32.xlu2 %v1164_v23 }
 0x90e   :  { %v4090_v49 = vpop.f32.mrf.mxu2 }
 0x913   :  { %1298 = vrot.lane.b32.xlu0 %v4036_v42, %s3621_s25 }
 0x916   :  { %v1274_v50 = vpop.f32.mrf.mxu2 }
 0x917   :  { %v1275_v51 = vadd.f32 %v1274_v50, %v4049_v34 }
 0x919   :  { %v1279_v52 = vsel %vm290_vm1, %v1275_v51, -inf }
 0x91a   :  { %1280 = vmax.xlane.f32.xlu1 %v1279_v52 }
 0x91e   :  { %v1276_v53 = vpop.f32.mrf.mxu2 }
 0x91f   :  { %v1277_v54 = vadd.f32 %v1276_v53, %v4055_v38 }
 0x921   :  { %v1282_v55 = vsel %vm290_vm1, %v1277_v54, -inf }
 0x922   :  { %1283 = vmax.xlane.f32.xlu2 %v1282_v55 }
 0x933   :  { %1180 = vrot.lane.b32.xlu1 %v4036_v42, %s3624_s15 }
 0x962   :  { %v1027_v56 = vpop.xlane.xlu2 %1026 }
 0x963   :  { %v1031_v57 = vsub.f32 %v1021_v37, %v1027_v56  ;;  %v1101_v37 = vsel %vm479_vm5, %v897_v36, 0 }
 0x964   :  { %1110 = vmatpush.bf16.msra.mxu3 %v1101_v37 }
 0x965   :  { %v1033_v58 = vmul.f32 1.442695, %v1031_v57 }
 0x967   :  { %3426 = vpow2.f32 %v1033_v58 }
 0x96a   :  { %v1030_v59 = vpop.xlane.xlu1 %1029 }
 0x96b   :  { %v1032_v60 = vsub.f32 %v1023_v41, %v1030_v59 }
 0x96d   :  { %v3427_v61 = vpop.eup %3426  ;;  %v1035_v62 = vmul.f32 1.442695, %v1032_v60 }
 0x96e   :  { %v1037_v63 = vsel %vm290_vm1, %v3427_v61, 0.0 }
 0x96f   :  { %3428 = vpow2.f32 %v1035_v62  ;;  %1038 = vadd.xlane.f32.xlu2 %v1037_v63 }
 0x972   :  { %v1163_v0 = vpop.xlane.xlu0 %1162 }
 0x973   :  { %v1167_v1 = vsub.f32 %v1157_v44, %v1163_v0 }
 0x975   :  { %v3429_v4 = vpop.eup %3428  ;;  %v1169_v5 = vmul.f32 1.442695, %v1167_v1 }
 0x976   :  { %v1043_v6 = vpack.c.bf16 %v3429_v4, %v3427_v61  ;;  %v1040_v7 = vsel %vm290_vm1, %v3429_v4, 0.0 }
 0x977   :  { %3430 = vpow2.f32 %v1169_v5  ;;  %1041 = vadd.xlane.f32.xlu2 %v1040_v7  ;;  %v899_v5 = vld [vmem:[%s4575_s19 + $0xc] sm:$0xf] }
 0x978   :  { %3132 = vmatmul.msk.bf16.vlgmr.msra.gmra.mxu1 %vm290_vm1, %v1043_v6  ;;  %v1355_v6 = vsel %vm479_vm5, %v899_v5, 0 }
 0x97a   :  { %v1166_v42 = vpop.xlane.xlu2 %1165 }
 0x97b   :  { %v1168_v9 = vsub.f32 %v1159_v48, %v1166_v42 }
 0x97d   :  { %v3431_v10 = vpop.eup %3430  ;;  %v1171_v11 = vmul.f32 1.442695, %v1168_v9 }
 0x97e   :  { %v1173_v12 = vsel %vm290_vm1, %v3431_v10, 0.0 }
 0x97f   :  { %3432 = vpow2.f32 %v1171_v11  ;;  %1174 = vadd.xlane.f32.xlu2 %v1173_v12 }
 0x985   :  { %v3433_v13 = vpop.eup %3432  ;;  %v1299_v14 = vpop.permute.xlu0 %1298 }
 0x986   :  { %v1304_v16 = vsel %vm479_vm5, %v1299_v14, 0  ;;  %v1176_v17 = vsel %vm290_vm1, %v3433_v13, 0.0  ;;  %v1179_v35 = vpack.c.bf16 %v3433_v13, %v3431_v10  ;;  %v898_v10 = vld [vmem:[%s4575_s19 + $0x8] sm:$0xf]  ;;  %s4601_s19 = sld [smem:[#allocation27_spill]] }
 0x987   :  { %1177 = vadd.xlane.f32.xlu0 %v1176_v17  ;;  %1313 = vmatpush.bf16.msra.mxu0 %v1304_v16  ;;  %v1237_v11 = vsel %vm479_vm5, %v898_v10, 0 }
 0x988   :  { %1246 = vmatpush.bf16.msrb.mxu3 %v1237_v11 }
 0x98d   :  { %v1281_v18 = vpop.xlane.xlu1 %1280 }
 0x98e   :  { %v1285_v19 = vsub.f32 %v1275_v51, %v1281_v18 }
 0x990   :  { %v1287_v20 = vmul.f32 1.442695, %v1285_v19 }
 0x992   :  { %3434 = vpow2.f32 %v1287_v20 }
 0x995   :  { %v1284_v46 = vpop.xlane.xlu2 %1283 }
 0x996   :  { %v1286_v22 = vsub.f32 %v1277_v54, %v1284_v46 }
 0x998   :  { %v3435_v2 = vpop.eup %3434  ;;  %v1289_v27 = vmul.f32 1.442695, %v1286_v22 }
 0x999   :  { %v1291_v28 = vsel %vm290_vm1, %v3435_v2, 0.0 }
 0x99a   :  { %3436 = vpow2.f32 %v1289_v27  ;;  %1292 = vadd.xlane.f32.xlu1 %v1291_v28 }
 0x9a0   :  { %v3437_v3 = vpop.eup %3436 }
 0x9a1   :  { %v1297_v29 = vpack.c.bf16 %v3437_v3, %v3435_v2  ;;  %v1294_v30 = vsel %vm290_vm1, %v3437_v3, 0.0 }
 0x9a2   :  { %1295 = vadd.xlane.f32.xlu2 %v1294_v30 }
 0x9a3   :  { %3139 = vmatmul.msk.bf16.vlgmr.msra.gmra.mxu0 %vm290_vm1, %v1297_v29 }
 0x9a5   :  { %v1181_v32 = vpop.permute.xlu1 %1180 }
 0x9a6   :  { %v1186_v33 = vsel %vm479_vm5, %v1181_v32, 0 }
 0x9a7   :  { %1195 = vmatpush.bf16.msrb.mxu1 %v1186_v33 }
 0x9aa   :  { %3136 = vmatmul.msk.bf16.vlgmr.msrb.gmra.mxu1 %vm290_vm1, %v1179_v35 }
 0x9ab   :  { %1364 = vmatpush.bf16.msra.mxu1 %v1355_v6 }
 0x9e2   :  { %v1039_v39 = vpop.xlane.xlu2 %1038 }
 0x9e3   :  { %3438 = vrcp.f32 %v1039_v39  ;;  %vm1071_vm9 = vweird.f32 %v1039_v39  ;;  %v1077_v52 = vand.u32 2147483648, %v1039_v39  ;;  %v1075_v54 = vand.u32 2147483647, %v1039_v39 }
 0x9e5   :  { %v1078_v59 = vor.u32 1.1754944e-38, %v1077_v52  ;;  %vm1076_vm13 = vcmp.eq.f32.partialorder %v1075_v54, 8.507059e+37 }
 0x9e9   :  { %v3439_v40 = vpop.eup %3438 }
 0x9ea   :  { %v1067_v41 = vmul.f32 %v3439_v40, %v1039_v39  ;;  %v1042_v21 = vpop.xlane.xlu2 %1041  ;;  %vm1072_vm7 = vweird.f32 %v3439_v40 }
 0x9eb   :  { %3440 = vrcp.f32 %v1042_v21  ;;  %v1091_v53 = vand.u32 2147483648, %v1042_v21  ;;  %vm1073_vm10 = vmor %vm1071_vm9, %vm1072_vm7  ;;  %vm1085_vm11 = vweird.f32 %v1042_v21  ;;  %v1089_v56 = vand.u32 2147483647, %v1042_v21 }
 0x9ec   :  { %v1068_v43 = vsub.f32 1.0, %v1067_v41 }
 0x9ed   :  { %v1092_v60 = vor.u32 1.1754944e-38, %v1091_v53  ;;  %vm1090_vm14 = vcmp.eq.f32.partialorder %v1089_v56, 8.507059e+37 }
 0x9ee   :  { %v1069_v47 = vmul.f32 %v3439_v40, %v1068_v43 }
 0x9f0   :  { %v1070_v50 = vadd.f32 %v3439_v40, %v1069_v47 }
 0x9f1   :  { %v3441_v44 = vpop.eup %3440 }
 0x9f2   :  { %v1081_v45 = vmul.f32 %v3441_v44, %v1042_v21  ;;  %vm1086_vm8 = vweird.f32 %v3441_v44  ;;  %v1074_v57 = vsel %vm1073_vm10, %v3439_v40, %v1070_v50  ;;  %v4116_v7 = vpop.xlane.xlu2 %1174 }
 0x9f3   :  { %vm1087_vm12 = vmor %vm1085_vm11, %vm1086_vm8  ;;  %v1079_v61 = vsel %vm1076_vm13, %v1078_v59, %v1074_v57  ;;  %vm1207_vm9 = vweird.f32 %v4116_v7 }
 0x9f4   :  { %v1082_v48 = vsub.f32 1.0, %v1081_v45 }
 0x9f5   :  { %v1061_v23 = vpop.f32.mrf.mxu1 }
 0x9f6   :  { %v1083_v51 = vmul.f32 %v3441_v44, %v1082_v48  ;;  %v1094_v0 = vmul.f32 %v1079_v61, %v1061_v23 }
 0x9f8   :  { %v1084_v55 = vadd.f32 %v3441_v44, %v1083_v51 }
 0x9fa   :  { %v1088_v58 = vsel %vm1087_vm12, %v3441_v44, %v1084_v55  ;;  %v4118_v9 = vpop.xlane.xlu0 %1177  ;;  %v1213_v55 = vand.u32 2147483648, %v4116_v7 }
 0x9fb   :  { %v1093_v63 = vsel %vm1090_vm14, %v1092_v60, %v1088_v58  ;;  %v1227_v57 = vand.u32 2147483648, %v4118_v9  ;;  %v1211_v58 = vand.u32 2147483647, %v4116_v7  ;;  %v1225_v59 = vand.u32 2147483647, %v4118_v9 }
 0x9fd   :  { %v1063_v62 = vpop.f32.mrf.mxu1 }
 0x9fe   :  { %v1095_v1 = vmul.f32 %v1093_v63, %v1063_v62  ;;  %v1214_v63 = vor.u32 1.1754944e-38, %v1213_v55 }
 0xa00   :  { %v1096_v4 = vpack.c.bf16 %v1095_v1, %v1094_v0  ;;  %v1228_v0 = vor.u32 1.1754944e-38, %v1227_v57 }
 0xa02   :  { %3133 = vmatmul.msk.bf16.vlgmr.msra.gmra.mxu3 %vm290_vm1, %v1096_v4 }
 0xa0d   :  { %v1293_v42 = vpop.xlane.xlu1 %1292 }
 0xa0e   :  { %3442 = vrcp.f32 %v1293_v42  ;;  %vm1325_vm3 = vweird.f32 %v1293_v42  ;;  %v1331_v33 = vand.u32 2147483648, %v1293_v42  ;;  %v1329_v39 = vand.u32 2147483647, %v1293_v42 }
 0xa0f   :  { %3444 = vrcp.f32 %v4116_v7 }
 0xa10   :  { %3446 = vrcp.f32 %v4118_v9  ;;  %v1332_v45 = vor.u32 1.1754944e-38, %v1331_v33  ;;  %vm1330_vm10 = vcmp.eq.f32.partialorder %v1329_v39, 8.507059e+37 }
 0xa14   :  { %v3443_v12 = vpop.eup %3442 }
 0xa15   :  { %v1321_v13 = vmul.f32 %v3443_v12, %v1293_v42  ;;  %v1296_v14 = vpop.xlane.xlu2 %1295  ;;  %v3445_v16 = vpop.eup %3444  ;;  %vm1326_vm15 = vweird.f32 %v3443_v12 }
 0xa16   :  { %3448 = vrcp.f32 %v1296_v14  ;;  %v3447_v17 = vpop.eup %3446  ;;  %v1203_v19 = vmul.f32 %v3445_v16, %v4116_v7  ;;  %v1345_v36 = vand.u32 2147483648, %v1296_v14  ;;  %vm4126_vm6 = vmor %vm1325_vm3, %vm1326_vm15  ;;  %vm1339_vm7 = vweird.f32 %v1296_v14 }
 0xa17   :  { %v1322_v18 = vsub.f32 1.0, %v1321_v13  ;;  %v1217_v46 = vmul.f32 %v3447_v17, %v4118_v9  ;;  %v1343_v41 = vand.u32 2147483647, %v1296_v14  ;;  %vm1208_vm11 = vweird.f32 %v3445_v16 }
 0xa18   :  { %v1204_v27 = vsub.f32 1.0, %v1203_v19  ;;  %v1346_v47 = vor.u32 1.1754944e-38, %v1345_v36  ;;  %vm1222_vm13 = vweird.f32 %v3447_v17  ;;  %vm1209_vm14 = vmor %vm1207_vm9, %vm1208_vm11  ;;  %vm1221_vm15 = vweird.f32 %v4118_v9 }
 0xa19   :  { %v1323_v2 = vmul.f32 %v3443_v12, %v1322_v18  ;;  %v1218_v3 = vsub.f32 1.0, %v1217_v46  ;;  %vm1344_vm12 = vcmp.eq.f32.partialorder %v1343_v41, 8.507059e+37  ;;  %vm1212_vm3 = vcmp.eq.f32.partialorder %v1211_v58, 8.507059e+37 }
 0xa1a   :  { %v1205_v35 = vmul.f32 %v3445_v16, %v1204_v27 }
 0xa1b   :  { %v1324_v30 = vadd.f32 %v3443_v12, %v1323_v2  ;;  %v1219_v21 = vmul.f32 %v3447_v17, %v1218_v3 }
 0xa1c   :  { %v3449_v20 = vpop.eup %3448  ;;  %v1206_v23 = vadd.f32 %v3445_v16, %v1205_v35 }
 0xa1d   :  { %v1335_v22 = vmul.f32 %v3449_v20, %v1296_v14  ;;  %vm1340_vm2 = vweird.f32 %v3449_v20  ;;  %v1328_v43 = vsel %vm4126_vm6, %v3443_v12, %v1324_v30  ;;  %v1220_v53 = vadd.f32 %v3447_v17, %v1219_v21 }
 0xa1e   :  { %vm1341_vm8 = vmor %vm1339_vm7, %vm1340_vm2  ;;  %v1333_v50 = vsel %vm1330_vm10, %v1332_v45, %v1328_v43  ;;  %v1210_v61 = vsel %vm1209_vm14, %v3445_v16, %v1206_v23  ;;  %vm1226_vm6 = vcmp.eq.f32.partialorder %v1225_v59, 8.507059e+37  ;;  %v3357_v16 = vld [vmem:[%s4578_s24] ss:$0 sm:$0xff]  ;;  %s4621_s24 = sld [smem:[#allocation35_spill]] }
 0xa1f   :  { %v1336_v28 = vsub.f32 1.0, %v1335_v22  ;;  %vm1223_vm2 = vmor %vm1221_vm15, %vm1222_vm13  ;;  %v1215_v1 = vsel %vm1212_vm3, %v1214_v63, %v1210_v61  ;;  %v3358_v61 = vld [vmem:[%s4580_s12] ss:$0 sm:$0xff]  ;;  %vm1513_vm13 = vcmask 523264   ;;  %s4623_s12 = sld [smem:[#allocation37_spill]] }
 0xa20   :  { %v1315_v29 = vpop.f32.mrf.mxu0  ;;  %v1224_v62 = vsel %vm1223_vm2, %v3447_v17, %v1220_v53 }
 0xa21   :  { %v1337_v32 = vmul.f32 %v3449_v20, %v1336_v28  ;;  %v1348_v54 = vmul.f32 %v1333_v50, %v1315_v29  ;;  %v1229_v5 = vsel %vm1226_vm6, %v1228_v0, %v1224_v62 }
 0xa23   :  { %v1338_v40 = vadd.f32 %v3449_v20, %v1337_v32 }
 0xa25   :  { %v1342_v44 = vsel %vm1341_vm8, %v3449_v20, %v1338_v40 }
 0xa26   :  { %v1347_v52 = vsel %vm1344_vm12, %v1346_v47, %v1342_v44  ;;  %v3259_v44 = vld [vmem:[%s4579_s30] sm:$0xff] }
 0xa27   :  { %v1197_v48 = vpop.f32.mrf.mxu1 }
 0xa28   :  { %v1317_v51 = vpop.f32.mrf.mxu0  ;;  %v1230_v6 = vmul.f32 %v1215_v1, %v1197_v48  ;;  %v3359_v1 = vld [vmem:[%s4581_s20] ss:$0 sm:$0xff] }
 0xa29   :  { %v1349_v56 = vmul.f32 %v1347_v52, %v1317_v51 }
 0xa2b   :  { %v1350_v60 = vpack.c.bf16 %v1349_v56, %v1348_v54 }
 0xa2d   :  { %3140 = vmatmul.msk.bf16.vlgmr.msra.gmra.mxu1 %vm290_vm1, %v1350_v60 }
 0xa2f   :  { %v1199_v4 = vpop.f32.mrf.mxu1 }
 0xa30   :  { %v1231_v7 = vmul.f32 %v1229_v5, %v1199_v4 }
 0xa32   :  { %v1232_v42 = vpack.c.bf16 %v1231_v7, %v1230_v6 }
 0xa34   :  { %3137 = vmatmul.msk.bf16.vlgmr.msrb.gmra.mxu3 %vm290_vm1, %v1232_v42 }
 0xa85   :  { %v1112_v9 = vpop.f32.mrf.mxu3 }
 0xa86   :  { %v1133_v11 = vadd.f32 %v4087_v25, %v1112_v9 }
 0xa8d   :  { %v1114_v10 = vpop.f32.mrf.mxu3 }
 0xa8e   :  { %v1135_v19 = vadd.f32 %v4090_v49, %v1114_v10  ;;  %v3264_v10 = vld [vmem:[%s4582_s23 + $0x18] sm:$0xff] }
 0xa8f   :  { %1521 = vmatpush.bf16.msrb.mxu2 %v3264_v10 }
 0xaaa   :  { %v1366_v12 = vpop.f32.mrf.mxu1 }
 0xab2   :  { %v1368_v27 = vpop.f32.mrf.mxu1 }
 0xab7   :  { %v1248_v13 = vpop.f32.mrf.mxu3 }
 0xab8   :  { %v1253_v14 = vadd.f32 %v1248_v13, %v1133_v11  ;;  %v3263_v11 = vld [vmem:[%s4582_s23 + $0x10] sm:$0xff]  ;;  %v3261_v13 = vld [vmem:[%s4582_s23] sm:$0xff] }
 0xab9   :  { %1522 = vmatpush.bf16.msrb.mxu2 %v3263_v11 }
 0xaba   :  { %v1371_v17 = vadd.f32 %v1366_v12, %v1253_v14  ;;  %v3262_v12 = vld [vmem:[%s4582_s23 + $0x8] sm:$0xff]  ;;  %s3028_s23 = sshll.u32 %s3890_s21, 4  ;;  %s3029_s23 = int_to_ptr.hbm [resolvable:$true] %s3028_s23 }
 0xabc   :  { %v1376_v18 = vadd.f32 %v3357_v16, %v1371_v17 }
 0xabd   :  { %1523 = vmatpush.bf16.msrb.mxu2 %v3262_v12 }
 0xabe   :  { %v1378_v20 = vadd.f32 %v1376_v18, %v4027_v8 }
 0xabf   :  { %v1250_v46 = vpop.f32.mrf.mxu3 }
 0xac0   :  { %v1254_v22 = vadd.f32 %v1250_v46, %v1135_v19  ;;  %v1382_v2 = vsel %vm258_vm0, %v1378_v20, 0.0 }
 0xac1   :  { %1383 = vadd.xlane.f32.xlu2 %v1382_v2  ;;  %1524 = vmatpush.bf16.msrb.mxu2 %v3261_v13  ;;  %v3361_v2 = vld [vmem:[%s4584_s28] ss:$0 sm:$0xff] }
 0xac2   :  { %v1372_v28 = vadd.f32 %v1368_v27, %v1254_v22 }
 0xac4   :  { %v1377_v3 = vadd.f32 %v3357_v16, %v1372_v28  ;;  %v3360_v16 = vld [vmem:[%s4583_s26] ss:$0 sm:$0xff] }
 0xac6   :  { %v1379_v25 = vadd.f32 %v1377_v3, %v4029_v15  ;;  %v3260_v15 = vld [vmem:[%s4579_s30 + $0x8] sm:$0xff]  ;;  %s4622_s30 = sld [smem:[#allocation36_spill]] }
 0xac7   :  { %1466 = vmatpush.bf16.msra.mxu3 %v3260_v15 }
 0xac8   :  { %v1385_v29 = vsel %vm258_vm0, %v1379_v25, 0.0 }
 0xac9   :  { %1386 = vadd.xlane.f32.xlu2 %v1385_v29 }
 0xacb   :  { %1467 = vmatpush.bf16.msra.mxu3 %v3259_v44 }
 0xb34   :  { %v1384_v30 = vpop.xlane.xlu2 %1383 }
 0xb35   :  { %v1388_v32 = vmul.f32 %v1384_v30, %v4011_v24 }
 0xb37   :  { %v1390_v49 = vsub.f32 %v1378_v20, %v1388_v32 }
 0xb39   :  { %v1392_v8 = vmul.f32 %v1390_v49, %v1390_v49 }
 0xb3b   :  { %v1394_v33 = vsel %vm258_vm0, %v1392_v8, 0.0 }
 0xb3c   :  { %1395 = vadd.xlane.f32.xlu2 %v1394_v33  ;;  %v1387_v35 = vpop.xlane.xlu2 %1386 }
 0xb3d   :  { %v1389_v36 = vmul.f32 %v1387_v35, %v4011_v24 }
 0xb3f   :  { %v1391_v37 = vsub.f32 %v1379_v25, %v1389_v36 }
 0xb41   :  { %v1393_v39 = vmul.f32 %v1391_v37, %v1391_v37 }
 0xb43   :  { %v1397_v40 = vsel %vm258_vm0, %v1393_v39, 0.0 }
 0xb44   :  { %1398 = vadd.xlane.f32.xlu2 %v1397_v40 }
 0xbaf   :  { %v1396_v41 = vpop.xlane.xlu2 %1395 }
 0xbb0   :  { %v1400_v21 = vmul.f32 %v1396_v41, %v4011_v24 }
 0xbb2   :  { %v1402_v43 = vadd.f32 1e-05, %v1400_v21 }
 0xbb4   :  { %3450 = vrsqrt.f32 %v1402_v43  ;;  %vm1410_vm8 = vweird.f32 %v1402_v43 }
 0xbb7   :  { %v1399_v45 = vpop.xlane.xlu2 %1398 }
 0xbb8   :  { %v1401_v47 = vmul.f32 %v1399_v45, %v4011_v24 }
 0xbba   :  { %v3451_v48 = vpop.eup %3450  ;;  %v1403_v23 = vadd.f32 1e-05, %v1401_v47 }
 0xbbb   :  { %v1405_v50 = vmul.f32 %v3451_v48, %v1402_v43  ;;  %vm1411_vm7 = vweird.f32 %v3451_v48  ;;  %v3266_v43 = vld [vmem:[%s4585_s1 + $0x8] sm:$0xff] }
 0xbbc   :  { %3452 = vrsqrt.f32 %v1403_v23  ;;  %vm1412_vm9 = vmor %vm1410_vm8, %vm1411_vm7  ;;  %vm1420_vm11 = vweird.f32 %v1403_v23  ;;  %1619 = vmatpush.bf16.msrb.mxu0 %v3266_v43 }
 0xbbd   :  { %v1406_v51 = vmul.f32 %v3451_v48, %v1405_v50 }
 0xbbf   :  { %v1407_v52 = vmul.f32 0.5, %v1406_v51 }
 0xbc1   :  { %v1408_v53 = vsub.f32 1.5, %v1407_v52 }
 0xbc2   :  { %v3453_v54 = vpop.eup %3452 }
 0xbc3   :  { %v1409_v55 = vmul.f32 %v3451_v48, %v1408_v53  ;;  %v1415_v56 = vmul.f32 %v3453_v54, %v1403_v23  ;;  %vm1421_vm10 = vweird.f32 %v3453_v54 }
 0xbc4   :  { %vm1422_vm12 = vmor %vm1420_vm11, %vm1421_vm10 }
 0xbc5   :  { %v1416_v57 = vmul.f32 %v3453_v54, %v1415_v56  ;;  %v1413_v58 = vsel %vm1412_vm9, %v3451_v48, %v1409_v55  ;;  %v3265_v48 = vld [vmem:[%s4585_s1] sm:$0xff] }
 0xbc6   :  { %v1424_v62 = vmul.f32 %v1413_v58, %v1390_v49  ;;  %1620 = vmatpush.bf16.msrb.mxu0 %v3265_v48 }
 0xbc7   :  { %v1417_v59 = vmul.f32 0.5, %v1416_v57 }
 0xbc8   :  { %v1429_v4 = vmul.f32 %v3358_v61, %v1424_v62 }
 0xbc9   :  { %v1418_v60 = vsub.f32 1.5, %v1417_v59 }
 0xbca   :  { %v1434_v7 = vadd.f32 %v3359_v1, %v1429_v4 }
 0xbcb   :  { %v1419_v63 = vmul.f32 %v3453_v54, %v1418_v60 }
 0xbcd   :  { %v1423_v0 = vsel %vm1422_vm12, %v3453_v54, %v1419_v63 }
 0xbce   :  { %v1425_v5 = vmul.f32 %v1423_v0, %v1391_v37  ;;  %v3362_v0 = vld [vmem:[%s4586_s2] ss:$0 sm:$0xff] }
 0xbd0   :  { %v1430_v6 = vmul.f32 %v3358_v61, %v1425_v5 }
 0xbd2   :  { %v1435_v42 = vadd.f32 %v3359_v1, %v1430_v6  ;;  %v3363_v6 = vld [vmem:[%s4587_s7] ss:$0 sm:$0xff] }
 0xbd4   :  { %v1436_v9 = vpack.c.bf16 %v1435_v42, %v1434_v7 }
 0xbd6   :  { %3149 = vmatmul.msk.bf16.vlgmr.msra.gmra.mxu3 %vm258_vm0, %v1436_v9 }
 0xc59   :  { %v1469_v14 = vpop.f32.mrf.mxu3 }
 0xc5a   :  { %v1470_v17 = vadd.f32 %v3360_v16, %v1469_v14  ;;  %v3364_v14 = vld [vmem:[%s4588_s10] ss:$0 sm:$0xff] }
 0xc5c   :  { %v1474_v20 = vmax.f32 %v1470_v17, 0.0 }
 0xc61   :  { %v1471_v18 = vpop.f32.mrf.mxu3 }
 0xc62   :  { %v1472_v19 = vadd.f32 %v3360_v16, %v1471_v18 }
 0xc64   :  { %v1475_v46 = vmax.f32 %v1472_v19, 0.0 }
 0xc66   :  { %v1476_v22 = vpack.c.bf16 %v1475_v46, %v1474_v20 }
 0xc68   :  { %3166 = vmatmul.msk.bf16.vlgmr.msrb.gmra.mxu2 %vm1513_vm13, %v1476_v22 }
 0xceb   :  { %v1526_v27 = vpop.f32.mrf.mxu2 }
 0xcec   :  { %v1527_v28 = vadd.f32 %v3361_v2, %v1526_v27 }
 0xcee   :  { %v1531_v3 = vadd.f32 %v1527_v28, %v1434_v7 }
 0xcf0   :  { %v1535_v25 = vsel %vm258_vm0, %v1531_v3, 0.0 }
 0xcf1   :  { %1536 = vadd.xlane.f32.xlu0 %v1535_v25 }
 0xcf3   :  { %v1528_v29 = vpop.f32.mrf.mxu2 }
 0xcf4   :  { %v1529_v30 = vadd.f32 %v3361_v2, %v1528_v29 }
 0xcf6   :  { %v1532_v32 = vadd.f32 %v1529_v30, %v1435_v42 }
 0xcf8   :  { %v1538_v49 = vsel %vm258_vm0, %v1532_v32, 0.0 }
 0xcf9   :  { %1539 = vadd.xlane.f32.xlu1 %v1538_v49 }
 0xd64   :  { %v1537_v8 = vpop.xlane.xlu0 %1536 }
 0xd65   :  { %v1541_v33 = vmul.f32 %v1537_v8, %v4011_v24 }
 0xd67   :  { %v1543_v35 = vsub.f32 %v1531_v3, %v1541_v33 }
 0xd69   :  { %v1545_v36 = vmul.f32 %v1543_v35, %v1543_v35 }
 0xd6b   :  { %v1547_v37 = vsel %vm258_vm0, %v1545_v36, 0.0 }
 0xd6c   :  { %v1540_v39 = vpop.xlane.xlu1 %1539  ;;  %1548 = vadd.xlane.f32.xlu2 %v1547_v37 }
 0xd6d   :  { %v1542_v40 = vmul.f32 %v1540_v39, %v4011_v24  ;;  %v1629_v39 = vld [vmem:[%s4589_s11] sm:$0xf] }
 0xd6f   :  { %v1544_v15 = vsub.f32 %v1532_v32, %v1542_v40  ;;  %v1849_v40 = vsel %vm479_vm5, %v1629_v39, 0 }
 0xd71   :  { %v1546_v41 = vmul.f32 %v1544_v15, %v1544_v15 }
 0xd73   :  { %v1550_v21 = vsel %vm258_vm0, %v1546_v41, 0.0 }
 0xd74   :  { %1551 = vadd.xlane.f32.xlu0 %v1550_v21 }
 0xddf   :  { %v1549_v44 = vpop.xlane.xlu2 %1548 }
 0xde0   :  { %v1553_v45 = vmul.f32 %v1549_v44, %v4011_v24 }
 0xde2   :  { %v1555_v47 = vadd.f32 1e-05, %v1553_v45 }
 0xde4   :  { %3454 = vrsqrt.f32 %v1555_v47  ;;  %vm1563_vm15 = vweird.f32 %v1555_v47 }
 0xde7   :  { %v1552_v23 = vpop.xlane.xlu0 %1551 }
 0xde8   :  { %v1554_v50 = vmul.f32 %v1552_v23, %v4011_v24 }
 0xdea   :  { %v3455_v51 = vpop.eup %3454  ;;  %v1556_v52 = vadd.f32 1e-05, %v1554_v50 }
 0xdeb   :  { %v1558_v53 = vmul.f32 %v3455_v51, %v1555_v47  ;;  %vm1564_vm14 = vweird.f32 %v3455_v51 }
 0xdec   :  { %3456 = vrsqrt.f32 %v1556_v52  ;;  %vm1565_vm2 = vmor %vm1563_vm15, %vm1564_vm14  ;;  %vm1573_vm6 = vweird.f32 %v1556_v52 }
 0xded   :  { %v1559_v54 = vmul.f32 %v3455_v51, %v1558_v53 }
 0xdef   :  { %v1560_v55 = vmul.f32 0.5, %v1559_v54 }
 0xdf1   :  { %v1561_v56 = vsub.f32 1.5, %v1560_v55 }
 0xdf2   :  { %v3457_v57 = vpop.eup %3456 }
 0xdf3   :  { %v1562_v58 = vmul.f32 %v3455_v51, %v1561_v56  ;;  %v1568_v59 = vmul.f32 %v3457_v57, %v1556_v52  ;;  %vm1574_vm3 = vweird.f32 %v3457_v57 }
 0xdf4   :  { %vm1575_vm7 = vmor %vm1573_vm6, %vm1574_vm3 }
 0xdf5   :  { %v1569_v60 = vmul.f32 %v3457_v57, %v1568_v59  ;;  %v1566_v61 = vsel %vm1565_vm2, %v3455_v51, %v1562_v58 }
 0xdf6   :  { %v1577_v1 = vmul.f32 %v1566_v61, %v1543_v35 }
 0xdf7   :  { %v1570_v62 = vmul.f32 0.5, %v1569_v60 }
 0xdf8   :  { %v1582_v7 = vmul.f32 %v3362_v0, %v1577_v1 }
 0xdf9   :  { %v1571_v63 = vsub.f32 1.5, %v1570_v62 }
 0xdfa   :  { %v4179_v10 = vadd.f32 %v3363_v6, %v1582_v7 }
 0xdfb   :  { %v1572_v4 = vmul.f32 %v3457_v57, %v1571_v63 }
 0xdfd   :  { %v1576_v5 = vsel %vm1575_vm7, %v3457_v57, %v1572_v4 }
 0xdfe   :  { %v1578_v42 = vmul.f32 %v1576_v5, %v1544_v15 }
 0xe00   :  { %v1583_v9 = vmul.f32 %v3362_v0, %v1578_v42 }
 0xe02   :  { %v4181_v11 = vadd.f32 %v3363_v6, %v1583_v9 }
 0xe04   :  { %v1589_v12 = vpack.c.bf16 %v4181_v11, %v4179_v10 }
 0xe06   :  { %3175 = vmatmul.msk.bf16.vlgmr.msrb.gmra.mxu0 %vm258_vm0, %v1589_v12 }
 0xe83   :  { %v1622_v13 = vpop.f32.mrf.mxu0 }
 0xe84   :  { %v1623_v16 = vadd.f32 %v3364_v14, %v1622_v13 }
 0xe86   :  { %v1627_v18 = vpack.c.bf16 %v1623_v16, %v1623_v16 }
 0xe88   :  { %v1636_v46 = vunpack.c.l.b16 %v1627_v18 }
 0xe8b   :  { %v1624_v17 = vpop.f32.mrf.mxu0 }
 0xe8c   :  { %v1625_v19 = vadd.f32 %v3364_v14, %v1624_v17 }
 0xe8e   :  { %v1628_v20 = vpack.c.bf16 %v1625_v19, %v1625_v19 }
 0xe90   :  { %v1637_v22 = vunpack.c.l.b16 %v1628_v20 }
 0xe92   :  { %v4187_v2 = vpack.c.b16 %v1637_v22, %v1636_v46 }
 0xe94   :  { %1639 = vrot.lane.b32.xlu1 %v4187_v2, %s3616_s0 }
 0xe9c   :  { %1733 = vrot.lane.b32.xlu1 %v4187_v2, %s3619_s13 }
 0xea4   :  { %1983 = vrot.lane.b32.xlu1 %v4187_v2, %s3621_s25 }
 0xeac   :  { %1981 = vrot.lane.b32.xlu1 %v4187_v2, %s3623_s3 }
 0xf06   :  { %v1640_v27 = vpop.permute.xlu1 %1639 }
 0xf07   :  { %v1645_v28 = vsel %vm290_vm1, %v1640_v27, 0 }
 0xf08   :  { %1654 = vmatpush.bf16.xpose.msrb.mxu1 %v1645_v28 }
 0xf0e   :  { %v1734_v3 = vpop.permute.xlu1 %1733 }
 0xf0f   :  { %v1739_v25 = vsel %vm290_vm1, %v1734_v3, 0  ;;  %3176 = vmatmul.msk.bf16.vlgmr.msrb.gmra.mxu1 %vm290_vm1, %v4187_v2 }
 0xf10   :  { %1748 = vmatpush.bf16.xpose.msra.mxu2 %v1739_v25 }
 0xf16   :  { %v1984_v50 = vpop.permute.xlu1 %1983 }
 0xf17   :  { %v1989_v53 = vsel %vm290_vm1, %v1984_v50, 0 }
 0xf1e   :  { %v1982_v3 = vpop.permute.xlu1 %1981 }
 0xf8c   :  { %v1656_v29 = vpop.f32.mrf.mxu1 }
 0xf8d   :  { %v1657_v30 = vadd.f32 %v1656_v29, %v3923_v26 }
 0xf8f   :  { %v1661_v32 = vsel %vm311_vm4, %v1657_v30, -inf }
 0xf90   :  { %1662 = vmax.xlane.f32.xlu2 %v1661_v32 }
 0xf94   :  { %v1658_v49 = vpop.f32.mrf.mxu1 }
 0xf95   :  { %v1659_v8 = vadd.f32 %v1658_v49, %v3929_v31 }
 0xf97   :  { %v1664_v33 = vsel %vm311_vm4, %v1659_v8, -inf }
 0xf98   :  { %1665 = vmax.xlane.f32.xlu0 %v1664_v33 }
 0xfa8   :  { %1680 = vrot.lane.b32.xlu2 %v4187_v2, %s3620_s17  ;;  %s4594_s17 = sld [smem:[#allocation20_spill]] }
 0xfb0   :  { %1867 = vrot.lane.b32.xlu2 %v4187_v2, %s3624_s15 }
 0xfb8   :  { %1865 = vrot.lane.b32.xlu2 %v4187_v2, %s3622_s29 }
0x1003   :  { %v1663_v35 = vpop.xlane.xlu2 %1662 }
0x1004   :  { %v1667_v36 = vsub.f32 %v1657_v30, %v1663_v35 }
0x1006   :  { %v1669_v37 = vmul.f32 1.442695, %v1667_v36 }
0x1008   :  { %3458 = vpow2.f32 %v1669_v37 }
0x100b   :  { %v1666_v15 = vpop.xlane.xlu0 %1665  ;;  %v1681_v41 = vpop.permute.xlu2 %1680 }
0x100c   :  { %v1668_v21 = vsub.f32 %v1659_v8, %v1666_v15  ;;  %1693 = vmatpush.bf16.msrb.mxu3 %v1681_v41 }
0x100e   :  { %v3459_v43 = vpop.eup %3458  ;;  %v1671_v44 = vmul.f32 1.442695, %v1668_v21 }
0x100f   :  { %v1673_v45 = vsel %vm311_vm4, %v3459_v43, 0.0 }
0x1010   :  { %1858 = vmatpush.bf16.msra.mxu3 %v1849_v40  ;;  %3460 = vpow2.f32 %v1671_v44  ;;  %1674 = vadd.xlane.f32.xlu0 %v1673_v45 }
0x1013   :  { %v1868_v47 = vpop.permute.xlu2 %1867 }
0x1014   :  { %v1873_v48 = vsel %vm290_vm1, %v1868_v47, 0 }
0x1015   :  { %1882 = vmatpush.bf16.xpose.msrb.mxu2 %v1873_v48 }
0x1016   :  { %v3461_v23 = vpop.eup %3460 }
0x1017   :  { %v1679_v51 = vpack.c.bf16 %v3461_v23, %v3459_v43  ;;  %v1676_v52 = vsel %vm311_vm4, %v3461_v23, 0.0 }
0x1018   :  { %1677 = vadd.xlane.f32.xlu0 %v1676_v52 }
0x1019   :  { %3177 = vmatmul.msk.bf16.vlgmr.msrb.gmra.mxu3 %vm311_vm4, %v1679_v51 }
0x101a   :  { %1998 = vmatpush.bf16.xpose.msrb.mxu3 %v1989_v53 }
0x101b   :  { %v1866_v28 = vpop.permute.xlu2 %1865 }
0x102c   :  { %1731 = vrot.lane.b32.xlu0 %v4187_v2, %s3617_s5 }
0x1034   :  { %1774 = vrot.lane.b32.xlu0 %v4187_v2, %s3625_s16  ;;  %s4595_s16 = sld [smem:[#allocation25_spill]] }
0x1083   :  { %v1675_v54 = vpop.xlane.xlu0 %1674 }
0x1084   :  { %3462 = vrcp.f32 %v1675_v54  ;;  %vm1705_vm10 = vweird.f32 %v1675_v54  ;;  %v1711_v5 = vand.u32 2147483648, %v1675_v54  ;;  %v1709_v42 = vand.u32 2147483647, %v1675_v54 }
0x1086   :  { %v1712_v14 = vor.u32 1.1754944e-38, %v1711_v5  ;;  %vm1710_vm15 = vcmp.eq.f32.partialorder %v1709_v42, 8.507059e+37 }
0x108a   :  { %v3463_v56 = vpop.eup %3462 }
0x108b   :  { %v1678_v55 = vpop.xlane.xlu0 %1677  ;;  %v1701_v57 = vmul.f32 %v3463_v56, %v1675_v54  ;;  %vm1706_vm8 = vweird.f32 %v3463_v56 }
0x108c   :  { %3464 = vrcp.f32 %v1678_v55  ;;  %v1725_v7 = vand.u32 2147483648, %v1678_v55  ;;  %vm1707_vm11 = vmor %vm1705_vm10, %vm1706_vm8  ;;  %vm1719_vm12 = vweird.f32 %v1678_v55  ;;  %v1723_v9 = vand.u32 2147483647, %v1678_v55 }
0x108d   :  { %v1702_v60 = vsub.f32 1.0, %v1701_v57 }
0x108e   :  { %v1726_v16 = vor.u32 1.1754944e-38, %v1725_v7  ;;  %vm1724_vm2 = vcmp.eq.f32.partialorder %v1723_v9, 8.507059e+37 }
0x108f   :  { %v1703_v62 = vmul.f32 %v3463_v56, %v1702_v60 }
0x1091   :  { %v1704_v1 = vadd.f32 %v3463_v56, %v1703_v62 }
0x1092   :  { %v3465_v58 = vpop.eup %3464 }
0x1093   :  { %v1715_v59 = vmul.f32 %v3465_v58, %v1678_v55  ;;  %vm1720_vm9 = vweird.f32 %v3465_v58  ;;  %v1708_v12 = vsel %vm1707_vm11, %v3463_v56, %v1704_v1 }
0x1094   :  { %vm1721_vm14 = vmor %vm1719_vm12, %vm1720_vm9  ;;  %v1713_v17 = vsel %vm1710_vm15, %v1712_v14, %v1708_v12 }
0x1095   :  { %v1716_v61 = vsub.f32 1.0, %v1715_v59 }
0x1097   :  { %v1717_v63 = vmul.f32 %v3465_v58, %v1716_v61 }
0x1099   :  { %v1718_v4 = vadd.f32 %v3465_v58, %v1717_v63 }
0x109b   :  { %v1722_v13 = vsel %vm1721_vm14, %v3465_v58, %v1718_v4 }
0x109c   :  { %v1695_v0 = vpop.f32.mrf.mxu3  ;;  %v1727_v19 = vsel %vm1724_vm2, %v1726_v16, %v1722_v13 }
0x109d   :  { %v1728_v20 = vmul.f32 %v1713_v17, %v1695_v0 }
0x109e   :  { %v1732_v6 = vpop.permute.xlu0 %1731 }
0x109f   :  { %3178 = vmatmul.msk.bf16.vlgmr.msra.gmra.mxu2 %vm290_vm1, %v1732_v6 }
0x10a4   :  { %v1697_v18 = vpop.f32.mrf.mxu3 }
0x10a5   :  { %v1729_v46 = vmul.f32 %v1727_v19, %v1697_v18 }
0x10a6   :  { %v1775_v22 = vpop.permute.xlu0 %1774 }
0x10a7   :  { %v1730_v27 = vpack.c.bf16 %v1729_v46, %v1728_v20  ;;  %1787 = vmatpush.bf16.msra.mxu0 %v1775_v22  ;;  %v1630_v22 = vld [vmem:[%s4589_s11 + $0x4] sm:$0xf] }
0x10a9   :  { %3181 = vmatmul.msk.bf16.vlgmr.msra.gmra.mxu3 %vm290_vm1, %v1730_v27  ;;  %v1829_v27 = vsel %vm479_vm5, %v1630_v22, 0 }
0x10aa   :  { %1838 = vmatpush.bf16.msra.mxu1 %v1829_v27 }
0x10af   :  { %3182 = vmatmul.msk.bf16.vlgmr.msrb.gmra.mxu2 %vm290_vm1, %v1866_v28 }
0x10b9   :  { %3185 = vmatmul.msk.bf16.vlgmr.msrb.gmra.mxu3 %vm290_vm1, %v1982_v3 }
0x1122   :  { %v1750_v25 = vpop.f32.mrf.mxu2 }
0x1123   :  { %v1751_v29 = vadd.f32 %v1750_v25, %v3923_v26 }
0x1125   :  { %v1755_v30 = vsel %vm311_vm4, %v1751_v29, -inf }
0x1126   :  { %1756 = vmax.xlane.f32.xlu1 %v1755_v30 }
0x112a   :  { %v1752_v32 = vpop.f32.mrf.mxu2 }
0x112b   :  { %v1753_v49 = vadd.f32 %v1752_v32, %v3929_v31 }
0x112c   :  { %v4229_v8 = vpop.f32.mrf.mxu3 }
0x112d   :  { %v1758_v33 = vsel %vm311_vm4, %v1753_v49, -inf }
0x112e   :  { %1759 = vmax.xlane.f32.xlu2 %v1758_v33 }
0x1132   :  { %v1884_v35 = vpop.f32.mrf.mxu2 }
0x1133   :  { %v1885_v36 = vadd.f32 %v1884_v35, %v3923_v26 }
0x1134   :  { %v4233_v37 = vpop.f32.mrf.mxu3 }
0x1135   :  { %v1889_v39 = vsel %vm311_vm4, %v1885_v36, -inf }
0x1136   :  { %1890 = vmax.xlane.f32.xlu1 %v1889_v39 }
0x113a   :  { %v1886_v45 = vpop.f32.mrf.mxu2 }
0x113b   :  { %v1887_v47 = vadd.f32 %v1886_v45, %v3929_v31 }
0x113c   :  { %v2000_v40 = vpop.f32.mrf.mxu3 }
0x113d   :  { %v2001_v15 = vadd.f32 %v2000_v40, %v3923_v26  ;;  %v1892_v48 = vsel %vm311_vm4, %v1887_v47, -inf }
0x113f   :  { %v2005_v41 = vsel %vm311_vm4, %v2001_v15, -inf }
0x1140   :  { %2006 = vmax.xlane.f32.xlu0 %v2005_v41 }
0x1144   :  { %v2002_v21 = vpop.f32.mrf.mxu3 }
0x1145   :  { %v2003_v43 = vadd.f32 %v2002_v21, %v3929_v31 }
0x1147   :  { %v2008_v44 = vsel %vm311_vm4, %v2003_v43, -inf }
0x1148   :  { %2009 = vmax.xlane.f32.xlu2 %v2008_v44 }
0x114f   :  { %2024 = vrot.lane.b32.xlu1 %v4187_v2, %s3626_s18  ;;  %s4596_s18 = sld [smem:[#allocation23_spill]] }
0x1150   :  { %1893 = vmax.xlane.f32.xlu2 %v1892_v48 }
0x1154   :  { %1908 = vrot.lane.b32.xlu0 %v4187_v2, %s3627_s22  ;;  %s4597_s22 = sld [smem:[#allocation21_spill]] }
0x1199   :  { %v1757_v26 = vpop.xlane.xlu1 %1756 }
0x119a   :  { %v1761_v23 = vsub.f32 %v1751_v29, %v1757_v26 }
0x119c   :  { %v1763_v50 = vmul.f32 1.442695, %v1761_v23 }
0x119e   :  { %3466 = vpow2.f32 %v1763_v50 }
0x11a1   :  { %v1760_v51 = vpop.xlane.xlu2 %1759 }
0x11a2   :  { %v1762_v52 = vsub.f32 %v1753_v49, %v1760_v51 }
0x11a4   :  { %v3467_v53 = vpop.eup %3466  ;;  %v1765_v54 = vmul.f32 1.442695, %v1762_v52 }
0x11a5   :  { %v1767_v55 = vsel %vm311_vm4, %v3467_v53, 0.0 }
0x11a6   :  { %3468 = vpow2.f32 %v1765_v54  ;;  %1768 = vadd.xlane.f32.xlu2 %v1767_v55 }
0x11a9   :  { %v1891_v31 = vpop.xlane.xlu1 %1890 }
0x11aa   :  { %v1895_v56 = vsub.f32 %v1885_v36, %v1891_v31  ;;  %v1631_v31 = vld [vmem:[%s4589_s11 + $0x8] sm:$0xf] }
0x11ac   :  { %v3469_v57 = vpop.eup %3468  ;;  %v1897_v58 = vmul.f32 1.442695, %v1895_v56  ;;  %v1963_v56 = vsel %vm479_vm5, %v1631_v31, 0 }
0x11ad   :  { %v1773_v59 = vpack.c.bf16 %v3469_v57, %v3467_v53  ;;  %v1770_v60 = vsel %vm311_vm4, %v3469_v57, 0.0  ;;  %1972 = vmatpush.bf16.msrb.mxu1 %v1963_v56 }
0x11ae   :  { %3470 = vpow2.f32 %v1897_v58  ;;  %1771 = vadd.xlane.f32.xlu2 %v1770_v60  ;;  %v1632_v58 = vld [vmem:[%s4589_s11 + $0xc] sm:$0xf] }
0x11af   :  { %3179 = vmatmul.msk.bf16.vlgmr.msra.gmra.mxu0 %vm311_vm4, %v1773_v59  ;;  %v2079_v59 = vsel %vm479_vm5, %v1632_v58, 0 }
0x11b3   :  { %v2007_v2 = vpop.xlane.xlu0 %2006 }
0x11b4   :  { %v3471_v61 = vpop.eup %3470  ;;  %v2011_v62 = vsub.f32 %v2001_v15, %v2007_v2 }
0x11b5   :  { %v1901_v63 = vsel %vm311_vm4, %v3471_v61, 0.0 }
0x11b6   :  { %v2013_v0 = vmul.f32 1.442695, %v2011_v62  ;;  %1902 = vadd.xlane.f32.xlu0 %v1901_v63 }
0x11b8   :  { %3472 = vpow2.f32 %v2013_v0 }
0x11bb   :  { %v2010_v1 = vpop.xlane.xlu2 %2009 }
0x11bc   :  { %v2012_v4 = vsub.f32 %v2003_v43, %v2010_v1 }
0x11be   :  { %v3473_v5 = vpop.eup %3472  ;;  %v2015_v6 = vmul.f32 1.442695, %v2012_v4 }
0x11bf   :  { %v2017_v7 = vsel %vm311_vm4, %v3473_v5, 0.0 }
0x11c0   :  { %3474 = vpow2.f32 %v2015_v6  ;;  %2018 = vadd.xlane.f32.xlu1 %v2017_v7 }
0x11c1   :  { %v2025_v42 = vpop.permute.xlu1 %2024 }
0x11c2   :  { %2037 = vmatpush.bf16.msra.mxu2 %v2025_v42 }
0x11c3   :  { %v1894_v9 = vpop.xlane.xlu2 %1893 }
0x11c4   :  { %v1896_v12 = vsub.f32 %v1887_v47, %v1894_v9 }
0x11c6   :  { %v3475_v13 = vpop.eup %3474  ;;  %v1899_v14 = vmul.f32 1.442695, %v1896_v12  ;;  %v1909_v16 = vpop.permute.xlu0 %1908 }
0x11c7   :  { %v2023_v17 = vpack.c.bf16 %v3475_v13, %v3473_v5  ;;  %1921 = vmatpush.bf16.msrb.mxu0 %v1909_v16  ;;  %v2020_v46 = vsel %vm311_vm4, %v3475_v13, 0.0 }
0x11c8   :  { %3476 = vpow2.f32 %v1899_v14 }
0x11c9   :  { %3186 = vmatmul.msk.bf16.vlgmr.msra.gmra.mxu2 %vm311_vm4, %v2023_v17 }
0x11cb   :  { %2088 = vmatpush.bf16.msra.mxu0 %v2079_v59 }
0x11ce   :  { %v3477_v18 = vpop.eup %3476 }
0x11cf   :  { %v1907_v19 = vpack.c.bf16 %v3477_v18, %v3471_v61  ;;  %v1904_v20 = vsel %vm311_vm4, %v3477_v18, 0.0 }
0x11d0   :  { %1905 = vadd.xlane.f32.xlu2 %v1904_v20 }
0x11d1   :  { %3183 = vmatmul.msk.bf16.vlgmr.msrb.gmra.mxu0 %vm311_vm4, %v1907_v19 }
0x11d8   :  { %2021 = vadd.xlane.f32.xlu2 %v2020_v46 }
0x1219   :  { %v1769_v28 = vpop.xlane.xlu2 %1768 }
0x121a   :  { %3478 = vrcp.f32 %v1769_v28  ;;  %vm1799_vm7 = vweird.f32 %v1769_v28  ;;  %v1805_v15 = vand.u32 2147483648, %v1769_v28  ;;  %v1803_v21 = vand.u32 2147483647, %v1769_v28 }
0x121c   :  { %v1806_v48 = vor.u32 1.1754944e-38, %v1805_v15  ;;  %vm1804_vm11 = vcmp.eq.f32.partialorder %v1803_v21, 8.507059e+37 }
0x1220   :  { %v3479_v3 = vpop.eup %3478 }
0x1221   :  { %v1795_v25 = vmul.f32 %v3479_v3, %v1769_v28  ;;  %v1772_v29 = vpop.xlane.xlu2 %1771  ;;  %vm1800_vm3 = vweird.f32 %v3479_v3  ;;  %v3538_v28 = vld [vmem:[%s3645_s9] sm:$0xf]  ;;  %s4598_s9 = sld [smem:[#allocation22_spill]] }
0x1222   :  { %3480 = vrcp.f32 %v1772_v29  ;;  %v1819_v41 = vand.u32 2147483648, %v1772_v29  ;;  %vm1801_vm8 = vmor %vm1799_vm7, %vm1800_vm3  ;;  %vm1813_vm9 = vweird.f32 %v1772_v29  ;;  %v1817_v44 = vand.u32 2147483647, %v1772_v29 }
0x1223   :  { %v1796_v30 = vsub.f32 1.0, %v1795_v25 }
0x1224   :  { %v1820_v26 = vor.u32 1.1754944e-38, %v1819_v41  ;;  %vm1818_vm12 = vcmp.eq.f32.partialorder %v1817_v44, 8.507059e+37 }
0x1225   :  { %v1797_v33 = vmul.f32 %v3479_v3, %v1796_v30 }
0x1227   :  { %v1798_v39 = vadd.f32 %v3479_v3, %v1797_v33 }
0x1228   :  { %v3481_v32 = vpop.eup %3480 }
0x1229   :  { %v1809_v49 = vmul.f32 %v3481_v32, %v1772_v29  ;;  %vm1814_vm6 = vweird.f32 %v3481_v32  ;;  %v1802_v45 = vsel %vm1801_vm8, %v3479_v3, %v1798_v39  ;;  %v1903_v54 = vpop.xlane.xlu0 %1902 }
0x122a   :  { %vm1815_vm10 = vmor %vm1813_vm9, %vm1814_vm6  ;;  %v1807_v23 = vsel %vm1804_vm11, %v1806_v48, %v1802_v45  ;;  %3482 = vrcp.f32 %v1903_v54  ;;  %v1937_v12 = vand.u32 2147483647, %v1903_v54  ;;  %v1939_v14 = vand.u32 2147483648, %v1903_v54 }
0x122b   :  { %v1810_v35 = vsub.f32 1.0, %v1809_v49  ;;  %vm1933_vm2 = vweird.f32 %v1903_v54 }
0x122c   :  { %v1789_v36 = vpop.f32.mrf.mxu0  ;;  %vm1938_vm7 = vcmp.eq.f32.partialorder %v1937_v12, 8.507059e+37  ;;  %v1940_v29 = vor.u32 1.1754944e-38, %v1939_v14 }
0x122d   :  { %v1811_v40 = vmul.f32 %v3481_v32, %v1810_v35  ;;  %v1822_v52 = vmul.f32 %v1807_v23, %v1789_v36 }
0x122f   :  { %v1812_v43 = vadd.f32 %v3481_v32, %v1811_v40 }
0x1230   :  { %v3483_v60 = vpop.eup %3482 }
0x1231   :  { %v1816_v47 = vsel %vm1815_vm10, %v3481_v32, %v1812_v43  ;;  %v1929_v2 = vmul.f32 %v3483_v60, %v1903_v54  ;;  %vm1934_vm14 = vweird.f32 %v3483_v60 }
0x1232   :  { %v1821_v51 = vsel %vm1818_vm12, %v1820_v26, %v1816_v47  ;;  %vm4270_vm3 = vmor %vm1933_vm2, %vm1934_vm14 }
0x1233   :  { %v4260_v57 = vpop.xlane.xlu1 %2018  ;;  %v1930_v63 = vsub.f32 1.0, %v1929_v2 }
0x1234   :  { %v1791_v50 = vpop.f32.mrf.mxu0  ;;  %3484 = vrcp.f32 %v4260_v57  ;;  %vm2049_vm9 = vweird.f32 %v4260_v57  ;;  %v2053_v32 = vand.u32 2147483647, %v4260_v57  ;;  %v2055_v49 = vand.u32 2147483648, %v4260_v57 }
0x1235   :  { %v1823_v53 = vmul.f32 %v1821_v51, %v1791_v50  ;;  %v1931_v6 = vmul.f32 %v3483_v60, %v1930_v63 }
0x1236   :  { %v2056_v23 = vor.u32 1.1754944e-38, %v2055_v49 }
0x1237   :  { %v1824_v55 = vpack.c.bf16 %v1823_v53, %v1822_v52  ;;  %v1932_v13 = vadd.f32 %v3483_v60, %v1931_v6 }
0x1239   :  { %3180 = vmatmul.msk.bf16.vlgmr.msra.gmra.mxu1 %vm290_vm1, %v1824_v55  ;;  %v1936_v25 = vsel %vm4270_vm3, %v3483_v60, %v1932_v13  ;;  %vm2054_vm3 = vcmp.eq.f32.partialorder %v2053_v32, 8.507059e+37  ;;  %v3267_v32 = vld [vmem:[%s4596_s18] sm:$0xff] }
0x123a   :  { %v4265_v62 = vpop.eup %3484  ;;  %v1941_v39 = vsel %vm1938_vm7, %v1940_v29, %v1936_v25 }
0x123b   :  { %v2045_v0 = vmul.f32 %v4265_v62, %v4260_v57  ;;  %vm2050_vm10 = vweird.f32 %v4265_v62 }
0x123c   :  { %vm2051_vm14 = vmor %vm2049_vm9, %vm2050_vm10 }
0x123d   :  { %v2046_v7 = vsub.f32 1.0, %v2045_v0 }
0x123f   :  { %v2047_v18 = vmul.f32 %v4265_v62, %v2046_v7 }
0x1241   :  { %v2048_v36 = vadd.f32 %v4265_v62, %v2047_v18 }
0x1243   :  { %v1906_v61 = vpop.xlane.xlu2 %1905  ;;  %v2052_v47 = vsel %vm2051_vm14, %v4265_v62, %v2048_v36 }
0x1244   :  { %3486 = vrcp.f32 %v1906_v61  ;;  %v1953_v17 = vand.u32 2147483648, %v1906_v61  ;;  %vm1947_vm6 = vweird.f32 %v1906_v61  ;;  %v1951_v46 = vand.u32 2147483647, %v1906_v61 }
0x1245   :  { %v2057_v52 = vsel %vm2054_vm3, %v2056_v23, %v2052_v47  ;;  %v3366_v23 = vld [vmem:[%s4597_s22] ss:$0 sm:$0xff] }
0x1246   :  { %v1954_v33 = vor.u32 1.1754944e-38, %v1953_v17  ;;  %vm1952_vm11 = vcmp.eq.f32.partialorder %v1951_v46, 8.507059e+37 }
0x124a   :  { %v3487_v1 = vpop.eup %3486 }
0x124b   :  { %v1943_v4 = vmul.f32 %v3487_v1, %v1906_v61  ;;  %v2022_v5 = vpop.xlane.xlu2 %2021  ;;  %vm1948_vm15 = vweird.f32 %v3487_v1  ;;  %v3365_v61 = vld [vmem:[%s4594_s17] ss:$0 sm:$0xff] }
0x124c   :  { %3488 = vrcp.f32 %v2022_v5  ;;  %v2039_v27 = vpop.f32.mrf.mxu2  ;;  %vm4274_vm8 = vmor %vm1947_vm6, %vm1948_vm15  ;;  %v2067_v40 = vand.u32 2147483647, %v2022_v5  ;;  %v2069_v15 = vand.u32 2147483648, %v2022_v5  ;;  %vm2063_vm15 = vweird.f32 %v2022_v5 }
0x124d   :  { %v1944_v42 = vsub.f32 1.0, %v1943_v4  ;;  %v2072_v55 = vmul.f32 %v2057_v52, %v2039_v27  ;;  %v3269_v27 = vld [vmem:[%s4595_s16] sm:$0xff] }
0x124e   :  { %v1923_v9 = vpop.f32.mrf.mxu0  ;;  %v2070_v50 = vor.u32 1.1754944e-38, %v2069_v15  ;;  %vm2068_vm6 = vcmp.eq.f32.partialorder %v2067_v40, 8.507059e+37 }
0x124f   :  { %v1945_v16 = vmul.f32 %v3487_v1, %v1944_v42  ;;  %v1956_v43 = vmul.f32 %v1941_v39, %v1923_v9 }
0x1251   :  { %v1946_v20 = vadd.f32 %v3487_v1, %v1945_v16 }
0x1252   :  { %v3489_v22 = vpop.eup %3488 }
0x1253   :  { %v2059_v3 = vmul.f32 %v3489_v22, %v2022_v5  ;;  %v1950_v30 = vsel %vm4274_vm8, %v3487_v1, %v1946_v20  ;;  %vm2064_vm12 = vweird.f32 %v3489_v22 }
0x1254   :  { %v1955_v21 = vsel %vm1952_vm11, %v1954_v33, %v1950_v30  ;;  %vm2065_vm2 = vmor %vm2063_vm15, %vm2064_vm12  ;;  %v2041_v53 = vpop.f32.mrf.mxu2 }
0x1255   :  { %v2060_v35 = vsub.f32 1.0, %v2059_v3  ;;  %v3268_v3 = vld [vmem:[%s4596_s18 + $0x8] sm:$0xff] }
0x1256   :  { %v1925_v41 = vpop.f32.mrf.mxu0  ;;  %2190 = vmatpush.bf16.msra.mxu1 %v3268_v3 }
0x1257   :  { %v2061_v44 = vmul.f32 %v3489_v22, %v2060_v35  ;;  %v1957_v45 = vmul.f32 %v1955_v21, %v1925_v41 }
0x1259   :  { %v2062_v48 = vadd.f32 %v3489_v22, %v2061_v44  ;;  %v1958_v26 = vpack.c.bf16 %v1957_v45, %v1956_v43 }
0x125a   :  { %2191 = vmatpush.bf16.msra.mxu1 %v3267_v32 }
0x125b   :  { %v2066_v51 = vsel %vm2065_vm2, %v3489_v22, %v2062_v48  ;;  %3184 = vmatmul.msk.bf16.vlgmr.msrb.gmra.mxu1 %vm290_vm1, %v1958_v26  ;;  %v3270_v22 = vld [vmem:[%s4595_s16 + $0x8] sm:$0xff] }
0x125c   :  { %v2071_v54 = vsel %vm2068_vm6, %v2070_v50, %v2066_v51  ;;  %2224 = vmatpush.bf16.msra.mxu3 %v3270_v22 }
0x125d   :  { %v2073_v31 = vmul.f32 %v2071_v54, %v2041_v53  ;;  %v3367_v53 = vld [vmem:[%s4598_s9] ss:$0 sm:$0xff] }
0x125f   :  { %v2074_v56 = vpack.c.bf16 %v2073_v31, %v2072_v55 }
0x1260   :  { %2225 = vmatpush.bf16.msra.mxu3 %v3269_v27 }
0x1261   :  { %3187 = vmatmul.msk.bf16.vlgmr.msra.gmra.mxu0 %vm290_vm1, %v2074_v56 }
0x1263   :  { %3205 = vmatmul.msk.bf16.vlgmr.msra.gmra.mxu3 %vm258_vm0, %v3538_v28 }
0x12b6   :  { %v1840_v57 = vpop.f32.mrf.mxu1 }
0x12b7   :  { %v1861_v60 = vadd.f32 %v4229_v8, %v1840_v57 }
0x12be   :  { %v1842_v58 = vpop.f32.mrf.mxu1 }
0x12bf   :  { %v1863_v4 = vadd.f32 %v4233_v37, %v1842_v58 }
0x12d8   :  { %v1974_v59 = vpop.f32.mrf.mxu1 }
0x12d9   :  { %v1979_v2 = vadd.f32 %v1974_v59, %v1861_v60  ;;  %v3368_v59 = vld [vmem:[%s4599_s8] ss:$0 sm:$0xff] }
0x12de   :  { %v2090_v62 = vpop.f32.mrf.mxu0 }
0x12df   :  { %v2095_v63 = vadd.f32 %v2090_v62, %v1979_v2 }
0x12e0   :  { %v1976_v1 = vpop.f32.mrf.mxu1 }
0x12e1   :  { %v2100_v0 = vadd.f32 %v3365_v61, %v2095_v63  ;;  %v1980_v6 = vadd.f32 %v1976_v1, %v1863_v4 }
0x12e3   :  { %v2102_v5 = vadd.f32 %v2100_v0, %v4179_v10 }
0x12e5   :  { %v2106_v7 = vsel %vm258_vm0, %v2102_v5, 0.0 }
0x12e6   :  { %2107 = vadd.xlane.f32.xlu2 %v2106_v7  ;;  %v2092_v42 = vpop.f32.mrf.mxu0  ;;  %v2227_v60 = vpop.f32.mrf.mxu3 }
0x12e7   :  { %v2096_v9 = vadd.f32 %v2092_v42, %v1980_v6  ;;  %v2228_v2 = vadd.f32 %v3368_v59, %v2227_v60 }
0x12e9   :  { %v2101_v12 = vadd.f32 %v3365_v61, %v2096_v9  ;;  %v2233_v61 = vpack.c.bf16 %v2228_v2, %v2228_v2 }
0x12eb   :  { %v2103_v8 = vadd.f32 %v2101_v12, %v4181_v11  ;;  %v2248_v62 = vsel %vm290_vm1, %v2233_v61, 0  ;;  %v2284_v63 = vunpack.c.l.b16 %v2233_v61 }
0x12ec   :  { %2257 = vmatpush.bf16.xpose.msrb.mxu2 %v2248_v62 }
0x12ed   :  { %v2109_v13 = vsel %vm258_vm0, %v2103_v8, 0.0  ;;  %v4322_v0 = vpack.c.b16 %v2284_v63, %v2284_v63 }
0x12ee   :  { %2110 = vadd.xlane.f32.xlu2 %v2109_v13  ;;  %v2229_v1 = vpop.f32.mrf.mxu3 }
0x1359   :  { %v2108_v14 = vpop.xlane.xlu2 %2107 }
0x135a   :  { %v2112_v37 = vmul.f32 %v2108_v14, %v4011_v24 }
0x135c   :  { %v2114_v16 = vsub.f32 %v2102_v5, %v2112_v37  ;;  %v3369_v5 = vld [vmem:[%s4600_s14] ss:$0 sm:$0xff] }
0x135e   :  { %v2116_v10 = vmul.f32 %v2114_v16, %v2114_v16 }
0x1360   :  { %v2118_v17 = vsel %vm258_vm0, %v2116_v10, 0.0 }
0x1361   :  { %2119 = vadd.xlane.f32.xlu2 %v2118_v17  ;;  %v2111_v18 = vpop.xlane.xlu2 %2110 }
0x1362   :  { %v2113_v19 = vmul.f32 %v2111_v18, %v4011_v24 }
0x1364   :  { %v2115_v20 = vsub.f32 %v2103_v8, %v2113_v19 }
0x1366   :  { %v2117_v11 = vmul.f32 %v2115_v20, %v2115_v20 }
0x1368   :  { %v2121_v46 = vsel %vm258_vm0, %v2117_v11, 0.0 }
0x1369   :  { %2122 = vadd.xlane.f32.xlu2 %v2121_v46  ;;  %v2234_v46 = vld [vmem:[%s4601_s19] sm:$0xf] }
0x136a   :  { %v2459_v22 = vsel %vm479_vm5, %v2234_v46, 0 }
0x1381   :  { %2286 = vrot.lane.b32.xlu2 %v4322_v0, %s3616_s0  ;;  %s4614_s0 = sld [smem:[#allocation28_spill]] }
0x1389   :  { %2477 = vrot.lane.b32.xlu2 %v4322_v0, %s3622_s29 }
0x1391   :  { %2595 = vrot.lane.b32.xlu2 %v4322_v0, %s3623_s3 }
0x13d4   :  { %v2120_v25 = vpop.xlane.xlu2 %2119 }
0x13d5   :  { %v2124_v29 = vmul.f32 %v2120_v25, %v4011_v24 }
0x13d7   :  { %v2126_v30 = vadd.f32 1e-05, %v2124_v29 }
0x13d9   :  { %3490 = vrsqrt.f32 %v2126_v30  ;;  %vm2134_vm8 = vweird.f32 %v2126_v30 }
0x13dc   :  { %v2123_v49 = vpop.xlane.xlu2 %2122 }
0x13dd   :  { %v2125_v33 = vmul.f32 %v2123_v49, %v4011_v24 }
0x13df   :  { %v3491_v35 = vpop.eup %3490  ;;  %v2127_v36 = vadd.f32 1e-05, %v2125_v33 }
0x13e0   :  { %v2129_v39 = vmul.f32 %v3491_v35, %v2126_v30  ;;  %vm2135_vm7 = vweird.f32 %v3491_v35 }
0x13e1   :  { %3492 = vrsqrt.f32 %v2127_v36  ;;  %vm2136_vm9 = vmor %vm2134_vm8, %vm2135_vm7  ;;  %vm2144_vm11 = vweird.f32 %v2127_v36 }
0x13e2   :  { %v2130_v40 = vmul.f32 %v3491_v35, %v2129_v39 }
0x13e4   :  { %v2131_v15 = vmul.f32 0.5, %v2130_v40  ;;  %v2287_v37 = vpop.permute.xlu2 %2286 }
0x13e6   :  { %v2132_v41 = vsub.f32 1.5, %v2131_v15 }
0x13e7   :  { %v3493_v21 = vpop.eup %3492 }
0x13e8   :  { %v2133_v43 = vmul.f32 %v3491_v35, %v2132_v41  ;;  %v2139_v44 = vmul.f32 %v3493_v21, %v2127_v36  ;;  %vm2145_vm10 = vweird.f32 %v3493_v21 }
0x13e9   :  { %vm2146_vm12 = vmor %vm2144_vm11, %vm2145_vm10 }
0x13ea   :  { %v2140_v45 = vmul.f32 %v3493_v21, %v2139_v44  ;;  %v2137_v47 = vsel %vm2136_vm9, %v3491_v35, %v2133_v43 }
0x13eb   :  { %v2148_v50 = vmul.f32 %v2137_v47, %v2114_v16  ;;  %v2292_v16 = vsel %vm479_vm5, %v2287_v37, 0 }
0x13ec   :  { %v2141_v48 = vmul.f32 0.5, %v2140_v45  ;;  %2301 = vmatpush.bf16.msrb.mxu0 %v2292_v16  ;;  %v2478_v29 = vpop.permute.xlu2 %2477 }
0x13ed   :  { %v2153_v54 = vmul.f32 %v3366_v23, %v2148_v50 }
0x13ee   :  { %v2142_v26 = vsub.f32 1.5, %v2141_v48 }
0x13ef   :  { %v4313_v56 = vadd.f32 %v3367_v53, %v2153_v54 }
0x13f0   :  { %v2143_v51 = vmul.f32 %v3493_v21, %v2142_v26  ;;  %2468 = vmatpush.bf16.msra.mxu0 %v2459_v22 }
0x13f2   :  { %v2147_v52 = vsel %vm2146_vm12, %v3493_v21, %v2143_v51  ;;  %v2483_v21 = vsel %vm290_vm1, %v2478_v29, 0 }
0x13f3   :  { %v2149_v55 = vmul.f32 %v2147_v52, %v2115_v20 }
0x13f4   :  { %v2596_v36 = vpop.permute.xlu2 %2595 }
0x13f5   :  { %v2154_v31 = vmul.f32 %v3366_v23, %v2149_v55  ;;  %v2601_v43 = vsel %vm290_vm1, %v2596_v36, 0 }
0x13f7   :  { %v4315_v57 = vadd.f32 %v3367_v53, %v2154_v31 }
0x13f9   :  { %v2160_v58 = vpack.c.bf16 %v4315_v57, %v4313_v56 }
0x13fb   :  { %3196 = vmatmul.msk.bf16.vlgmr.msra.gmra.mxu1 %vm258_vm0, %v2160_v58 }
0x1478   :  { %v2193_v4 = vpop.f32.mrf.mxu1 }
0x1479   :  { %v2194_v6 = vadd.f32 %v3369_v5, %v2193_v4 }
0x147b   :  { %v2231_v42 = vpack.c.bf16 %v2194_v6, %v2194_v6 }
0x147d   :  { %v2241_v8 = vunpack.c.l.b16 %v2231_v42 }
0x1480   :  { %v2195_v7 = vpop.f32.mrf.mxu1 }
0x1481   :  { %v2196_v9 = vadd.f32 %v3369_v5, %v2195_v7 }
0x1483   :  { %v2232_v12 = vpack.c.bf16 %v2196_v9, %v2196_v9 }
0x1485   :  { %v2242_v13 = vunpack.c.l.b16 %v2232_v12 }
0x1487   :  { %v2243_v14 = vpack.c.b16 %v2242_v13, %v2241_v8 }
0x1489   :  { %3206 = vmatmul.msk.bf16.vlgmr.msrb.gmra.mxu2 %vm290_vm1, %v2243_v14 }
0x150c   :  { %v2259_v10 = vpop.f32.mrf.mxu2 }
0x150d   :  { %v2260_v17 = vadd.f32 %v2259_v10, %v4049_v34 }
0x150f   :  { %v2264_v18 = vsel %vm290_vm1, %v2260_v17, -inf }
0x1510   :  { %2265 = vmax.xlane.f32.xlu0 %v2264_v18 }
0x1514   :  { %v2261_v19 = vpop.f32.mrf.mxu2 }
0x1515   :  { %v2262_v20 = vadd.f32 %v2261_v19, %v4055_v38 }
0x1517   :  { %v2267_v11 = vsel %vm290_vm1, %v2262_v20, -inf }
0x1518   :  { %2268 = vmax.xlane.f32.xlu1 %v2267_v11 }
0x1524   :  { %2341 = vrot.lane.b32.xlu0 %v4322_v0, %s3617_s5 }
0x1583   :  { %v2266_v27 = vpop.xlane.xlu0 %2265 }
0x1584   :  { %v2270_v28 = vsub.f32 %v2260_v17, %v2266_v27 }
0x1586   :  { %v2272_v3 = vmul.f32 1.442695, %v2270_v28 }
0x1588   :  { %3494 = vpow2.f32 %v2272_v3 }
0x158b   :  { %v2269_v25 = vpop.xlane.xlu1 %2268 }
0x158c   :  { %v2271_v30 = vsub.f32 %v2262_v20, %v2269_v25 }
0x158e   :  { %v3495_v32 = vpop.eup %3494  ;;  %v2274_v49 = vmul.f32 1.442695, %v2271_v30 }
0x158f   :  { %v2276_v33 = vsel %vm290_vm1, %v3495_v32, 0.0 }
0x1590   :  { %3496 = vpow2.f32 %v2274_v49  ;;  %2277 = vadd.xlane.f32.xlu0 %v2276_v33 }
0x1596   :  { %v3497_v35 = vpop.eup %3496  ;;  %v2342_v39 = vpop.permute.xlu0 %2341 }
0x1597   :  { %v2282_v40 = vpack.c.bf16 %v3497_v35, %v3495_v32  ;;  %v2347_v15 = vsel %vm290_vm1, %v2342_v39, 0  ;;  %v2279_v41 = vsel %vm290_vm1, %v3497_v35, 0.0 }
0x1598   :  { %2280 = vadd.xlane.f32.xlu1 %v2279_v41  ;;  %2356 = vmatpush.bf16.xpose.msrb.mxu1 %v2347_v15 }
0x1599   :  { %3207 = vmatmul.msk.bf16.vlgmr.msrb.gmra.mxu0 %vm290_vm1, %v2282_v40 }
0x159a   :  { %2610 = vmatpush.bf16.xpose.msrb.mxu0 %v2601_v43 }
0x15a0   :  { %2492 = vmatpush.bf16.xpose.msra.mxu1 %v2483_v21 }
0x15a4   :  { %2475 = vrot.lane.b32.xlu0 %v2243_v14, %s3622_s29  ;;  %s4618_s29 = sld [smem:[#allocation33_spill]] }
0x15ac   :  { %2593 = vrot.lane.b32.xlu0 %v2243_v14, %s3623_s3  ;;  %s4619_s3 = sld [smem:[#allocation32_spill]] }
0x15b1   :  { %2339 = vrot.lane.b32.xlu1 %v2243_v14, %s3617_s5  ;;  %s4615_s5 = sld [smem:[#allocation31_spill]] }
0x15b4   :  { %2382 = vrot.lane.b32.xlu0 %v4322_v0, %s3619_s13  ;;  %s4616_s13 = sld [smem:[#allocation29_spill]] }
0x1603   :  { %v2278_v44 = vpop.xlane.xlu0 %2277 }
0x1604   :  { %3498 = vrcp.f32 %v2278_v44  ;;  %vm2313_vm2 = vweird.f32 %v2278_v44  ;;  %v2319_v58 = vand.u32 2147483648, %v2278_v44  ;;  %v2317_v60 = vand.u32 2147483647, %v2278_v44 }
0x1606   :  { %v2320_v1 = vor.u32 1.1754944e-38, %v2319_v58  ;;  %vm2318_vm8 = vcmp.eq.f32.partialorder %v2317_v60, 8.507059e+37 }
0x160a   :  { %v3499_v45 = vpop.eup %3498 }
0x160b   :  { %v2309_v47 = vmul.f32 %v3499_v45, %v2278_v44  ;;  %v2281_v48 = vpop.xlane.xlu1 %2280  ;;  %vm2314_vm14 = vweird.f32 %v3499_v45 }
0x160c   :  { %3500 = vrcp.f32 %v2281_v48  ;;  %v2333_v59 = vand.u32 2147483648, %v2281_v48  ;;  %vm2315_vm3 = vmor %vm2313_vm2, %vm2314_vm14  ;;  %vm2327_vm6 = vweird.f32 %v2281_v48  ;;  %v2331_v61 = vand.u32 2147483647, %v2281_v48 }
0x160d   :  { %v2310_v26 = vsub.f32 1.0, %v2309_v47 }
0x160e   :  { %v2334_v4 = vor.u32 1.1754944e-38, %v2333_v59  ;;  %vm2332_vm9 = vcmp.eq.f32.partialorder %v2331_v61, 8.507059e+37 }
0x160f   :  { %v2311_v51 = vmul.f32 %v3499_v45, %v2310_v26 }
0x1611   :  { %v2312_v55 = vadd.f32 %v3499_v45, %v2311_v51 }
0x1612   :  { %v3501_v23 = vpop.eup %3500 }
0x1613   :  { %v2323_v50 = vmul.f32 %v3501_v23, %v2281_v48  ;;  %vm2328_vm15 = vweird.f32 %v3501_v23  ;;  %v2316_v62 = vsel %vm2315_vm3, %v3499_v45, %v2312_v55 }
0x1614   :  { %vm2329_vm7 = vmor %vm2327_vm6, %vm2328_vm15  ;;  %v2321_v5 = vsel %vm2318_vm8, %v2320_v1, %v2316_v62 }
0x1615   :  { %v2324_v52 = vsub.f32 1.0, %v2323_v50 }
0x1616   :  { %v2476_v53 = vpop.permute.xlu0 %2475  ;;  %v2303_v54 = vpop.f32.mrf.mxu0 }
0x1617   :  { %v2325_v31 = vmul.f32 %v3501_v23, %v2324_v52  ;;  %v2336_v9 = vmul.f32 %v2321_v5, %v2303_v54 }
0x1619   :  { %v2326_v2 = vadd.f32 %v3501_v23, %v2325_v31 }
0x161b   :  { %v2330_v63 = vsel %vm2329_vm7, %v3501_v23, %v2326_v2 }
0x161c   :  { %v2335_v42 = vsel %vm2332_vm9, %v2334_v4, %v2330_v63 }
0x161e   :  { %v2594_v6 = vpop.permute.xlu0 %2593  ;;  %v2305_v7 = vpop.f32.mrf.mxu0 }
0x161f   :  { %v2337_v12 = vmul.f32 %v2335_v42, %v2305_v7 }
0x1621   :  { %v2338_v8 = vpack.c.bf16 %v2337_v12, %v2336_v9 }
0x1623   :  { %v2340_v13 = vpop.permute.xlu1 %2339  ;;  %3211 = vmatmul.msk.bf16.vlgmr.msra.gmra.mxu0 %vm290_vm1, %v2338_v8 }
0x1624   :  { %3208 = vmatmul.msk.bf16.vlgmr.msrb.gmra.mxu1 %vm290_vm1, %v2340_v13  ;;  %v2235_v13 = vld [vmem:[%s4601_s19 + $0x4] sm:$0xf] }
0x1626   :  { %v2383_v14 = vpop.permute.xlu0 %2382 }
0x1627   :  { %v2388_v37 = vsel %vm479_vm5, %v2383_v14, 0  ;;  %v2439_v14 = vsel %vm479_vm5, %v2235_v13, 0 }
0x1628   :  { %2397 = vmatpush.bf16.msrb.mxu3 %v2388_v37  ;;  %2448 = vmatpush.bf16.msra.mxu2 %v2439_v14 }
0x1633   :  { %3215 = vmatmul.msk.bf16.vlgmr.msrb.gmra.mxu0 %vm290_vm1, %v2594_v6 }
0x1634   :  { %3212 = vmatmul.msk.bf16.vlgmr.msra.gmra.mxu1 %vm290_vm1, %v2476_v53 }
0x16a0   :  { %v4357_v16 = vpop.f32.mrf.mxu0 }
0x16a1   :  { %v2358_v10 = vpop.f32.mrf.mxu1 }
0x16a2   :  { %v2359_v17 = vadd.f32 %v2358_v10, %v4049_v34 }
0x16a4   :  { %v2363_v18 = vsel %vm290_vm1, %v2359_v17, -inf }
0x16a5   :  { %2364 = vmax.xlane.f32.xlu1 %v2363_v18 }
0x16a8   :  { %v4361_v19 = vpop.f32.mrf.mxu0 }
0x16a9   :  { %v2360_v20 = vpop.f32.mrf.mxu1 }
0x16aa   :  { %v2361_v11 = vadd.f32 %v2360_v20, %v4055_v38 }
0x16ac   :  { %v2366_v46 = vsel %vm290_vm1, %v2361_v11, -inf }
0x16ad   :  { %2367 = vmax.xlane.f32.xlu2 %v2366_v46 }
0x16b0   :  { %v2612_v22 = vpop.f32.mrf.mxu0 }
0x16b1   :  { %v2613_v27 = vadd.f32 %v2612_v22, %v4049_v34  ;;  %v2494_v28 = vpop.f32.mrf.mxu1 }
0x16b2   :  { %v2495_v3 = vadd.f32 %v2494_v28, %v4049_v34 }
0x16b3   :  { %v2617_v25 = vsel %vm290_vm1, %v2613_v27, -inf }
0x16b4   :  { %v2499_v29 = vsel %vm290_vm1, %v2495_v3, -inf }
0x16b5   :  { %2500 = vmax.xlane.f32.xlu0 %v2499_v29  ;;  %2618 = vmax.xlane.f32.xlu2 %v2617_v25  ;;  %v2237_v25 = vld [vmem:[%s4601_s19 + $0xc] sm:$0xf] }
0x16b8   :  { %v2614_v33 = vpop.f32.mrf.mxu0 }
0x16b9   :  { %v2496_v30 = vpop.f32.mrf.mxu1  ;;  %v2615_v35 = vadd.f32 %v2614_v33, %v4055_v38 }
0x16ba   :  { %v2497_v32 = vadd.f32 %v2496_v30, %v4055_v38 }
0x16bb   :  { %v2620_v36 = vsel %vm290_vm1, %v2615_v35, -inf }
0x16bc   :  { %v2502_v49 = vsel %vm290_vm1, %v2497_v32, -inf }
0x16bd   :  { %2503 = vmax.xlane.f32.xlu1 %v2502_v49 }
0x16c5   :  { %2621 = vmax.xlane.f32.xlu1 %v2620_v36 }
0x16c9   :  { %2636 = vrot.lane.b32.xlu0 %v4322_v0, %s3621_s25  ;;  %s4617_s25 = sld [smem:[#allocation30_spill]] }
0x16cd   :  { %2518 = vrot.lane.b32.xlu2 %v4322_v0, %s3624_s15  ;;  %s4620_s15 = sld [smem:[#allocation34_spill]] }
0x1718   :  { %v2365_v34 = vpop.xlane.xlu1 %2364 }
0x1719   :  { %v2369_v39 = vsub.f32 %v2359_v17, %v2365_v34 }
0x171b   :  { %v2371_v40 = vmul.f32 1.442695, %v2369_v39 }
0x171d   :  { %3502 = vpow2.f32 %v2371_v40 }
0x1720   :  { %v2368_v15 = vpop.xlane.xlu2 %2367 }
0x1721   :  { %v2370_v41 = vsub.f32 %v2361_v11, %v2368_v15 }
0x1723   :  { %v3503_v21 = vpop.eup %3502  ;;  %v2373_v43 = vmul.f32 1.442695, %v2370_v41 }
0x1724   :  { %v2375_v44 = vsel %vm290_vm1, %v3503_v21, 0.0 }
0x1725   :  { %3504 = vpow2.f32 %v2373_v43  ;;  %2376 = vadd.xlane.f32.xlu1 %v2375_v44 }
0x1728   :  { %v2501_v38 = vpop.xlane.xlu0 %2500  ;;  %v2619_v45 = vpop.xlane.xlu2 %2618 }
0x1729   :  { %v2505_v47 = vsub.f32 %v2495_v3, %v2501_v38  ;;  %v2623_v48 = vsub.f32 %v2613_v27, %v2619_v45  ;;  %v2236_v27 = vld [vmem:[%s4601_s19 + $0x8] sm:$0xf] }
0x172a   :  { %v2575_v3 = vsel %vm479_vm5, %v2236_v27, 0 }
0x172b   :  { %v3505_v26 = vpop.eup %3504  ;;  %v2507_v23 = vmul.f32 1.442695, %v2505_v47  ;;  %v2625_v50 = vmul.f32 1.442695, %v2623_v48  ;;  %2584 = vmatpush.bf16.msrb.mxu2 %v2575_v3 }
0x172c   :  { %v2381_v0 = vpack.c.bf16 %v3505_v26, %v3503_v21  ;;  %v2378_v51 = vsel %vm290_vm1, %v3505_v26, 0.0 }
0x172d   :  { %3506 = vpow2.f32 %v2507_v23  ;;  %2379 = vadd.xlane.f32.xlu1 %v2378_v51 }
0x172e   :  { %3508 = vpow2.f32 %v2625_v50  ;;  %3209 = vmatmul.msk.bf16.vlgmr.msrb.gmra.mxu3 %vm290_vm1, %v2381_v0 }
0x1730   :  { %v2504_v52 = vpop.xlane.xlu1 %2503  ;;  %v2519_v53 = vpop.permute.xlu2 %2518 }
0x1731   :  { %v2506_v54 = vsub.f32 %v2497_v32, %v2504_v52  ;;  %v2524_v55 = vsel %vm479_vm5, %v2519_v53, 0  ;;  %v2693_v32 = vsel %vm479_vm5, %v2237_v25, 0 }
0x1732   :  { %2533 = vmatpush.bf16.msra.mxu3 %v2524_v55 }
0x1733   :  { %v3507_v31 = vpop.eup %3506  ;;  %v2509_v58 = vmul.f32 1.442695, %v2506_v54 }
0x1734   :  { %v3509_v59 = vpop.eup %3508  ;;  %v2511_v60 = vsel %vm290_vm1, %v3507_v31, 0.0 }
0x1735   :  { %3510 = vpow2.f32 %v2509_v58  ;;  %2512 = vadd.xlane.f32.xlu1 %v2511_v60  ;;  %v2629_v2 = vsel %vm290_vm1, %v3509_v59, 0.0 }
0x1736   :  { %2630 = vadd.xlane.f32.xlu0 %v2629_v2  ;;  %2702 = vmatpush.bf16.msrb.mxu3 %v2693_v32 }
0x1738   :  { %v2622_v61 = vpop.xlane.xlu1 %2621 }
0x1739   :  { %v2624_v62 = vsub.f32 %v2615_v35, %v2622_v61 }
0x173b   :  { %v3511_v63 = vpop.eup %3510  ;;  %v2627_v1 = vmul.f32 1.442695, %v2624_v62  ;;  %v2637_v4 = vpop.permute.xlu0 %2636 }
0x173c   :  { %v2517_v5 = vpack.c.bf16 %v3511_v63, %v3507_v31  ;;  %v2642_v6 = vsel %vm479_vm5, %v2637_v4, 0  ;;  %v2514_v7 = vsel %vm290_vm1, %v3511_v63, 0.0 }
0x173d   :  { %3512 = vpow2.f32 %v2627_v1  ;;  %2651 = vmatpush.bf16.msrb.mxu1 %v2642_v6  ;;  %2515 = vadd.xlane.f32.xlu2 %v2514_v7 }
0x173e   :  { %3213 = vmatmul.msk.bf16.vlgmr.msra.gmra.mxu3 %vm290_vm1, %v2517_v5 }
0x1743   :  { %v3513_v42 = vpop.eup %3512 }
0x1744   :  { %v2635_v9 = vpack.c.bf16 %v3513_v42, %v3509_v59  ;;  %v2632_v12 = vsel %vm290_vm1, %v3513_v42, 0.0 }
0x1745   :  { %2633 = vadd.xlane.f32.xlu1 %v2632_v12 }
0x1746   :  { %3216 = vmatmul.msk.bf16.vlgmr.msrb.gmra.mxu1 %vm290_vm1, %v2635_v9 }
0x1798   :  { %v2377_v8 = vpop.xlane.xlu1 %2376 }
0x1799   :  { %3514 = vrcp.f32 %v2377_v8  ;;  %vm2409_vm12 = vweird.f32 %v2377_v8  ;;  %v2415_v39 = vand.u32 2147483648, %v2377_v8  ;;  %v2413_v41 = vand.u32 2147483647, %v2377_v8 }
0x179b   :  { %v2416_v26 = vor.u32 1.1754944e-38, %v2415_v39  ;;  %vm2414_vm2 = vcmp.eq.f32.partialorder %v2413_v41, 8.507059e+37 }
0x179f   :  { %v3515_v10 = vpop.eup %3514 }
0x17a0   :  { %v2380_v37 = vpop.xlane.xlu1 %2379  ;;  %v2405_v17 = vmul.f32 %v3515_v10, %v2377_v8  ;;  %vm2410_vm10 = vweird.f32 %v3515_v10 }
0x17a1   :  { %3516 = vrcp.f32 %v2380_v37  ;;  %v2429_v40 = vand.u32 2147483648, %v2380_v37  ;;  %vm4405_vm14 = vmor %vm2409_vm12, %vm2410_vm10  ;;  %vm2423_vm5 = vweird.f32 %v2380_v37  ;;  %v2427_v21 = vand.u32 2147483647, %v2380_v37 }
0x17a2   :  { %v2406_v46 = vsub.f32 1.0, %v2405_v17 }
0x17a3   :  { %v2430_v23 = vor.u32 1.1754944e-38, %v2429_v40  ;;  %vm2428_vm3 = vcmp.eq.f32.partialorder %v2427_v21, 8.507059e+37 }
0x17a4   :  { %v2407_v29 = vmul.f32 %v3515_v10, %v2406_v46 }
0x17a6   :  { %v2408_v36 = vadd.f32 %v3515_v10, %v2407_v29 }
0x17a7   :  { %v3517_v18 = vpop.eup %3516 }
0x17a8   :  { %v2419_v20 = vmul.f32 %v3517_v18, %v2380_v37  ;;  %v4390_v11 = vpop.xlane.xlu1 %2512  ;;  %vm2424_vm11 = vweird.f32 %v3517_v18  ;;  %v2412_v45 = vsel %vm4405_vm14, %v3515_v10, %v2408_v36 }
0x17a9   :  { %3518 = vrcp.f32 %v4390_v11  ;;  %v4394_v28 = vpop.xlane.xlu0 %2630  ;;  %vm4413_vm15 = vmor %vm2423_vm5, %vm2424_vm11  ;;  %v2417_v53 = vsel %vm2414_vm2, %v2416_v26, %v2412_v45  ;;  %vm2545_vm6 = vweird.f32 %v4390_v11  ;;  %v2549_v7 = vand.u32 2147483647, %v4390_v11 }
0x17aa   :  { %v2420_v22 = vsub.f32 1.0, %v2419_v20  ;;  %3520 = vrcp.f32 %v4394_v28  ;;  %v2551_v9 = vand.u32 2147483648, %v4390_v11  ;;  %vm2663_vm9 = vweird.f32 %v4394_v28 }
0x17ab   :  { %v2667_v20 = vand.u32 2147483647, %v4394_v28 }
0x17ac   :  { %v2421_v30 = vmul.f32 %v3517_v18, %v2420_v22 }
0x17ae   :  { %v2422_v34 = vadd.f32 %v3517_v18, %v2421_v30  ;;  %v2552_v30 = vor.u32 1.1754944e-38, %v2551_v9 }
0x17af   :  { %v4403_v35 = vpop.eup %3518 }
0x17b0   :  { %v4400_v49 = vpop.xlane.xlu2 %2515  ;;  %v4409_v43 = vpop.eup %3520  ;;  %v2541_v44 = vmul.f32 %v4403_v35, %v4390_v11  ;;  %v2426_v47 = vsel %vm4413_vm15, %v3517_v18, %v2422_v34  ;;  %vm2546_vm7 = vweird.f32 %v4403_v35  ;;  %v2669_v11 = vand.u32 2147483648, %v4394_v28 }
0x17b1   :  { %3522 = vrcp.f32 %v4400_v49  ;;  %v2399_v33 = vpop.f32.mrf.mxu3  ;;  %v2659_v50 = vmul.f32 %v4409_v43, %v4394_v28  ;;  %v2431_v55 = vsel %vm2428_vm3, %v2430_v23, %v2426_v47  ;;  %vm2664_vm10 = vweird.f32 %v4409_v43  ;;  %vm4442_vm12 = vmor %vm2545_vm6, %vm2546_vm7 }
0x17b2   :  { %v2542_v52 = vsub.f32 1.0, %v2541_v44  ;;  %v2432_v58 = vmul.f32 %v2417_v53, %v2399_v33  ;;  %vm2559_vm11 = vweird.f32 %v4400_v49  ;;  %v2565_v13 = vand.u32 2147483648, %v4400_v49  ;;  %vm4457_vm15 = vmor %vm2663_vm9, %vm2664_vm10 }
0x17b3   :  { %v2660_v60 = vsub.f32 1.0, %v2659_v50  ;;  %v2563_v10 = vand.u32 2147483647, %v4400_v49  ;;  %vm2550_vm6 = vcmp.eq.f32.partialorder %v2549_v7, 8.507059e+37  ;;  %v2670_v36 = vor.u32 1.1754944e-38, %v2669_v11 }
0x17b4   :  { %v2543_v61 = vmul.f32 %v4403_v35, %v2542_v52  ;;  %v2566_v32 = vor.u32 1.1754944e-38, %v2565_v13  ;;  %v3370_v52 = vld [vmem:[%s4614_s0] ss:$0 sm:$0xff]  ;;  %v3272_v13 = vld [vmem:[%s4615_s5 + $0x8] sm:$0xff] }
0x17b5   :  { %v2661_v4 = vmul.f32 %v4409_v43, %v2660_v60  ;;  %vm2564_vm7 = vcmp.eq.f32.partialorder %v2563_v10, 8.507059e+37  ;;  %v3271_v10 = vld [vmem:[%s4615_s5] sm:$0xff] }
0x17b6   :  { %v2544_v6 = vadd.f32 %v4403_v35, %v2543_v61 }
0x17b7   :  { %v4421_v48 = vpop.eup %3522  ;;  %v2662_v37 = vadd.f32 %v4409_v43, %v2661_v4 }
0x17b8   :  { %v2555_v0 = vmul.f32 %v4421_v48, %v4400_v49  ;;  %v2634_v51 = vpop.xlane.xlu1 %2633  ;;  %vm2560_vm8 = vweird.f32 %v4421_v48  ;;  %v2548_v18 = vsel %vm4442_vm12, %v4403_v35, %v2544_v6 }
0x17b9   :  { %3524 = vrcp.f32 %v2634_v51  ;;  %v2401_v54 = vpop.f32.mrf.mxu3  ;;  %vm4453_vm5 = vmor %vm2559_vm11, %vm2560_vm8  ;;  %v2683_v22 = vand.u32 2147483648, %v2634_v51  ;;  %vm2677_vm2 = vweird.f32 %v2634_v51  ;;  %v2681_v29 = vand.u32 2147483647, %v2634_v51 }
0x17ba   :  { %v2556_v31 = vsub.f32 1.0, %v2555_v0  ;;  %v2433_v59 = vmul.f32 %v2431_v55, %v2401_v54  ;;  %v2666_v49 = vsel %vm4457_vm15, %v4409_v43, %v2662_v37  ;;  %v2553_v35 = vsel %vm2550_vm6, %v2552_v30, %v2548_v18 }
0x17bb   :  { %v2684_v40 = vor.u32 1.1754944e-38, %v2683_v22  ;;  %vm2668_vm8 = vcmp.eq.f32.partialorder %v2667_v20, 8.507059e+37  ;;  %vm2682_vm9 = vcmp.eq.f32.partialorder %v2681_v29, 8.507059e+37 }
0x17bc   :  { %v2434_v2 = vpack.c.bf16 %v2433_v59, %v2432_v58  ;;  %v2557_v62 = vmul.f32 %v4421_v48, %v2556_v31  ;;  %v2671_v21 = vsel %vm2668_vm8, %v2670_v36, %v2666_v49 }
0x17be   :  { %3210 = vmatmul.msk.bf16.vlgmr.msra.gmra.mxu2 %vm290_vm1, %v2434_v2  ;;  %v2558_v12 = vadd.f32 %v4421_v48, %v2557_v62 }
0x17bf   :  { %v3525_v63 = vpop.eup %3524  ;;  %2804 = vmatpush.bf16.msra.mxu2 %v3272_v13 }
0x17c0   :  { %v2673_v1 = vmul.f32 %v3525_v63, %v2634_v51  ;;  %vm2678_vm14 = vweird.f32 %v3525_v63  ;;  %v2562_v3 = vsel %vm4453_vm5, %v4421_v48, %v2558_v12 }
0x17c1   :  { %v2535_v5 = vpop.f32.mrf.mxu3  ;;  %vm4464_vm3 = vmor %vm2677_vm2, %vm2678_vm14  ;;  %v2567_v39 = vsel %vm2564_vm7, %v2566_v32, %v2562_v3 }
0x17c2   :  { %v2674_v42 = vsub.f32 1.0, %v2673_v1  ;;  %v2568_v15 = vmul.f32 %v2553_v35, %v2535_v5  ;;  %v3371_v35 = vld [vmem:[%s4616_s13] ss:$0 sm:$0xff] }
0x17c3   :  { %v2653_v8 = vpop.f32.mrf.mxu1  ;;  %2805 = vmatpush.bf16.msra.mxu2 %v3271_v10 }
0x17c4   :  { %v2675_v17 = vmul.f32 %v3525_v63, %v2674_v42  ;;  %v2686_v45 = vmul.f32 %v2671_v21, %v2653_v8 }
0x17c6   :  { %v2676_v25 = vadd.f32 %v3525_v63, %v2675_v17 }
0x17c8   :  { %v2680_v33 = vsel %vm4464_vm3, %v3525_v63, %v2676_v25 }
0x17c9   :  { %v2537_v34 = vpop.f32.mrf.mxu3  ;;  %v2685_v38 = vsel %vm2682_vm9, %v2684_v40, %v2680_v33  ;;  %v3372_v40 = vld [vmem:[%s4617_s25] ss:$0 sm:$0xff] }
0x17ca   :  { %v2569_v41 = vmul.f32 %v2567_v39, %v2537_v34 }
0x17cb   :  { %v2655_v44 = vpop.f32.mrf.mxu1 }
0x17cc   :  { %v2570_v47 = vpack.c.bf16 %v2569_v41, %v2568_v15  ;;  %v2687_v43 = vmul.f32 %v2685_v38, %v2655_v44 }
0x17ce   :  { %v2688_v48 = vpack.c.bf16 %v2687_v43, %v2686_v45  ;;  %3214 = vmatmul.msk.bf16.vlgmr.msrb.gmra.mxu2 %vm290_vm1, %v2570_v47  ;;  %v3276_v47 = vld [vmem:[%s4618_s29 + $0x18] sm:$0xff]  ;;  %v3275_v43 = vld [vmem:[%s4618_s29 + $0x10] sm:$0xff] }
0x17cf   :  { %2858 = vmatpush.bf16.msra.mxu0 %v3276_v47 }
0x17d0   :  { %3217 = vmatmul.msk.bf16.vlgmr.msrb.gmra.mxu3 %vm290_vm1, %v2688_v48  ;;  %v3274_v48 = vld [vmem:[%s4618_s29 + $0x8] sm:$0xff] }
0x17d3   :  { %2859 = vmatpush.bf16.msra.mxu0 %v3275_v43 }
0x17d7   :  { %2860 = vmatpush.bf16.msra.mxu0 %v3274_v48 }
0x1841   :  { %v2450_v26 = vpop.f32.mrf.mxu2 }
0x1842   :  { %v2471_v50 = vadd.f32 %v4357_v16, %v2450_v26  ;;  %v3273_v26 = vld [vmem:[%s4618_s29] sm:$0xff] }
0x1843   :  { %2861 = vmatpush.bf16.msra.mxu0 %v3273_v26 }
0x1849   :  { %v2452_v23 = vpop.f32.mrf.mxu2 }
0x184a   :  { %v2473_v31 = vadd.f32 %v4361_v19, %v2452_v23 }
0x1851   :  { %v2586_v0 = vpop.f32.mrf.mxu2 }
0x1852   :  { %v2591_v51 = vadd.f32 %v2586_v0, %v2471_v50  ;;  %v3373_v50 = vld [vmem:[%s4619_s3] ss:$0 sm:$0xff] }
0x1853   :  { %v2704_v53 = vpop.f32.mrf.mxu3 }
0x1854   :  { %v2709_v54 = vadd.f32 %v2704_v53, %v2591_v51 }
0x1856   :  { %v2714_v55 = vadd.f32 %v3370_v52, %v2709_v54 }
0x1858   :  { %v2716_v58 = vadd.f32 %v2714_v55, %v4313_v56 }
0x1859   :  { %v2588_v59 = vpop.f32.mrf.mxu2 }
0x185a   :  { %v2592_v60 = vadd.f32 %v2588_v59, %v2473_v31  ;;  %v2720_v2 = vsel %vm258_vm0, %v2716_v58, 0.0  ;;  %v3374_v31 = vld [vmem:[%s4620_s15] ss:$0 sm:$0xff] }
0x185b   :  { %v2706_v61 = vpop.f32.mrf.mxu3  ;;  %2721 = vadd.xlane.f32.xlu1 %v2720_v2 }
0x185c   :  { %v2710_v62 = vadd.f32 %v2706_v61, %v2592_v60 }
0x185e   :  { %v2715_v63 = vadd.f32 %v3370_v52, %v2710_v62 }
0x1860   :  { %v2717_v16 = vadd.f32 %v2715_v63, %v4315_v57 }
0x1862   :  { %v2723_v1 = vsel %vm258_vm0, %v2717_v16, 0.0 }
0x1863   :  { %2724 = vadd.xlane.f32.xlu1 %v2723_v1 }
0x18ce   :  { %v2722_v4 = vpop.xlane.xlu1 %2721 }
0x18cf   :  { %v2726_v5 = vmul.f32 %v2722_v4, %v4011_v24 }
0x18d1   :  { %v2728_v19 = vsub.f32 %v2716_v58, %v2726_v5 }
0x18d3   :  { %v2730_v56 = vmul.f32 %v2728_v19, %v2728_v19 }
0x18d5   :  { %v2732_v6 = vsel %vm258_vm0, %v2730_v56, 0.0 }
0x18d6   :  { %2733 = vadd.xlane.f32.xlu1 %v2732_v6  ;;  %v2725_v7 = vpop.xlane.xlu1 %2724 }
0x18d7   :  { %v2727_v42 = vmul.f32 %v2725_v7, %v4011_v24 }
0x18d9   :  { %v2729_v9 = vsub.f32 %v2717_v16, %v2727_v42 }
0x18db   :  { %v2731_v12 = vmul.f32 %v2729_v9, %v2729_v9 }
0x18dd   :  { %v2735_v57 = vsel %vm258_vm0, %v2731_v12, 0.0 }
0x18de   :  { %2736 = vadd.xlane.f32.xlu1 %v2735_v57 }
0x1949   :  { %v2734_v8 = vpop.xlane.xlu1 %2733 }
0x194a   :  { %v2738_v14 = vmul.f32 %v2734_v8, %v4011_v24 }
0x194c   :  { %v2740_v37 = vadd.f32 1e-05, %v2738_v14 }
0x194e   :  { %3526 = vrsqrt.f32 %v2740_v37  ;;  %vm2748_vm10 = vweird.f32 %v2740_v37 }
0x1951   :  { %v2737_v17 = vpop.xlane.xlu1 %2736 }
0x1952   :  { %v2739_v18 = vmul.f32 %v2737_v17, %v4011_v24 }
0x1954   :  { %v3527_v20 = vpop.eup %3526  ;;  %v2741_v11 = vadd.f32 1e-05, %v2739_v18 }
0x1955   :  { %v2743_v46 = vmul.f32 %v3527_v20, %v2740_v37  ;;  %vm2749_vm1 = vweird.f32 %v3527_v20 }
0x1956   :  { %3528 = vrsqrt.f32 %v2741_v11  ;;  %vm2750_vm11 = vmor %vm2748_vm10, %vm2749_vm1  ;;  %vm2758_vm14 = vweird.f32 %v2741_v11 }
0x1957   :  { %v2744_v22 = vmul.f32 %v3527_v20, %v2743_v46 }
0x1959   :  { %v2745_v27 = vmul.f32 0.5, %v2744_v22 }
0x195b   :  { %v2746_v3 = vsub.f32 1.5, %v2745_v27 }
0x195c   :  { %v3529_v25 = vpop.eup %3528 }
0x195d   :  { %v2747_v29 = vmul.f32 %v3527_v20, %v2746_v3  ;;  %v2753_v30 = vmul.f32 %v3529_v25, %v2741_v11  ;;  %vm2759_vm12 = vweird.f32 %v3529_v25 }
0x195e   :  { %vm2760_vm5 = vmor %vm2758_vm14, %vm2759_vm12 }
0x195f   :  { %v2754_v32 = vmul.f32 %v3529_v25, %v2753_v30  ;;  %v2751_v28 = vsel %vm2750_vm11, %v3527_v20, %v2747_v29 }
0x1960   :  { %v2762_v36 = vmul.f32 %v2751_v28, %v2728_v19  ;;  %v3376_v28 = vld [vmem:[%s4622_s30] ss:$0 sm:$0xff] }
0x1961   :  { %v2755_v49 = vmul.f32 0.5, %v2754_v32 }
0x1962   :  { %v2767_v15 = vmul.f32 %v3371_v35, %v2762_v36 }
0x1963   :  { %v2756_v33 = vsub.f32 1.5, %v2755_v49 }
0x1964   :  { %v2772_v44 = vadd.f32 %v3372_v40, %v2767_v15 }
0x1965   :  { %v2757_v34 = vmul.f32 %v3529_v25, %v2756_v33 }
0x1967   :  { %v2761_v39 = vsel %vm2760_vm5, %v3529_v25, %v2757_v34  ;;  %v3375_v25 = vld [vmem:[%s4621_s24] ss:$0 sm:$0xff] }
0x1968   :  { %v2763_v41 = vmul.f32 %v2761_v39, %v2729_v9 }
0x196a   :  { %v2768_v21 = vmul.f32 %v3371_v35, %v2763_v41 }
0x196c   :  { %v2773_v38 = vadd.f32 %v3372_v40, %v2768_v21 }
0x196e   :  { %v2774_v45 = vpack.c.bf16 %v2773_v38, %v2772_v44 }
0x1970   :  { %3226 = vmatmul.msk.bf16.vlgmr.msra.gmra.mxu2 %vm258_vm0, %v2774_v45 }
0x19f3   :  { %v2807_v23 = vpop.f32.mrf.mxu2 }
0x19f4   :  { %v2808_v0 = vadd.f32 %v3373_v50, %v2807_v23 }
0x19f6   :  { %v2812_v53 = vmax.f32 %v2808_v0, 0.0 }
0x19fb   :  { %v2809_v51 = vpop.f32.mrf.mxu2 }
0x19fc   :  { %v2810_v52 = vadd.f32 %v3373_v50, %v2809_v51 }
0x19fe   :  { %v2813_v54 = vmax.f32 %v2810_v52, 0.0 }
0x1a00   :  { %v2814_v55 = vpack.c.bf16 %v2813_v54, %v2812_v53  ;;  %v3278_v53 = vld [vmem:[%s3880_s27 + $0x8] sm:$0xff] }
0x1a01   :  { %3012 = vmatpush.bf16.msra.mxu1 %v3278_v53 }
0x1a02   :  { %3243 = vmatmul.msk.bf16.vlgmr.msra.gmra.mxu0 %vm1513_vm13, %v2814_v55 }
0x1a7f   :  { %v2863_v58 = vpop.f32.mrf.mxu0 }
0x1a80   :  { %v2864_v59 = vadd.f32 %v3374_v31, %v2863_v58 }
0x1a82   :  { %v2868_v60 = vadd.f32 %v2864_v59, %v2772_v44 }
0x1a84   :  { %v2872_v2 = vsel %vm258_vm0, %v2868_v60, 0.0 }
0x1a85   :  { %2873 = vadd.xlane.f32.xlu2 %v2872_v2 }
0x1a87   :  { %v2865_v61 = vpop.f32.mrf.mxu0 }
0x1a88   :  { %v2866_v62 = vadd.f32 %v3374_v31, %v2865_v61  ;;  %v3277_v31 = vld [vmem:[%s3880_s27] sm:$0xff]  ;;  %s3629_s27 = smov [#allocation2]  }
0x1a89   :  { %3013 = vmatpush.bf16.msra.mxu1 %v3277_v31  ;;  %s3026_s20 = sshll.u32 %s3629_s27, 4  ;;  %s3027_s20 = int_to_ptr.vmem [resolvable:$true] %s3026_s20 }
0x1a8a   :  { %v2869_v63 = vadd.f32 %v2866_v62, %v2773_v38 }
0x1a8c   :  { %v2875_v16 = vsel %vm258_vm0, %v2869_v63, 0.0 }
0x1a8d   :  { %2876 = vadd.xlane.f32.xlu0 %v2875_v16 }
0x1af8   :  { %v2874_v1 = vpop.xlane.xlu2 %2873 }
0x1af9   :  { %v2878_v4 = vmul.f32 %v2874_v1, %v4011_v24 }
0x1afb   :  { %v2880_v5 = vsub.f32 %v2868_v60, %v2878_v4 }
0x1afd   :  { %v2882_v19 = vmul.f32 %v2880_v5, %v2880_v5 }
0x1aff   :  { %v2884_v56 = vsel %vm258_vm0, %v2882_v19, 0.0 }
0x1b00   :  { %v2877_v6 = vpop.xlane.xlu0 %2876  ;;  %2885 = vadd.xlane.f32.xlu1 %v2884_v56 }
0x1b01   :  { %v2879_v7 = vmul.f32 %v2877_v6, %v4011_v24 }
0x1b03   :  { %v2881_v42 = vsub.f32 %v2869_v63, %v2879_v7 }
0x1b05   :  { %v2883_v9 = vmul.f32 %v2881_v42, %v2881_v42 }
0x1b07   :  { %v2887_v12 = vsel %vm258_vm0, %v2883_v9, 0.0 }
0x1b08   :  { %2888 = vadd.xlane.f32.xlu2 %v2887_v12 }
0x1b73   :  { %v2886_v57 = vpop.xlane.xlu1 %2885 }
0x1b74   :  { %v2890_v8 = vmul.f32 %v2886_v57, %v4011_v24  ;;  %v3378_v57 = vld [vmem:[%s3875_s6] ss:$0 sm:$0xff]  ;;  %s3551_s6 = sshra.s32 %s3029_s23, 4  ;;  %s3552_s6 = int_to_ptr.hbm [resolvable:$true] %s3551_s6 }
0x1b75   :  { %s3553_s26 = scalar_lea.hbm %s3552_s6, 16  ;;  %p3556_p1 = scmp.lt.s32.totalorder %s3552_s6, %s3890_s21 }
0x1b76   :  { %v2892_v13 = vadd.f32 1e-05, %v2890_v8  ;;  %p3554_p0 = scmp.ne.s32.totalorder %s3552_s6, %s3553_s26 }
0x1b78   :  { %3530 = vrsqrt.f32 %v2892_v13  ;;  %vm2900_vm15 = vweird.f32 %v2892_v13 }
0x1b7b   :  { %v2889_v14 = vpop.xlane.xlu2 %2888 }
0x1b7c   :  { %v2891_v37 = vmul.f32 %v2889_v14, %v4011_v24 }
0x1b7e   :  { %v3531_v10 = vpop.eup %3530  ;;  %v2893_v17 = vadd.f32 1e-05, %v2891_v37 }
0x1b7f   :  { %v2895_v18 = vmul.f32 %v3531_v10, %v2892_v13  ;;  %vm2901_vm13 = vweird.f32 %v3531_v10 }
0x1b80   :  { %3532 = vrsqrt.f32 %v2893_v17  ;;  %vm2902_vm2 = vmor %vm2900_vm15, %vm2901_vm13  ;;  %vm2910_vm6 = vweird.f32 %v2893_v17 }
0x1b81   :  { %v2896_v20 = vmul.f32 %v3531_v10, %v2895_v18  ;;  %v3379_v18 = vld [vmem:[%s3885_s4] ss:$0 sm:$0xff]  ;;  %s3555_s4 = scalar_lea.hbm %s3890_s21, 16 }
0x1b82   :  { %p3557_p2 = scmp.lt.s32.totalorder %s3555_s4, %s3553_s26 }
0x1b83   :  { %v2897_v11 = vmul.f32 0.5, %v2896_v20 }
0x1b84   :  { %p3558_p3 = por %p3557_p2, %p3556_p1 }
0x1b85   :  { %v2898_v46 = vsub.f32 1.5, %v2897_v11 }
0x1b86   :  { %v3533_v22 = vpop.eup %3532  ;;  %p3559_p4 = pnand %p3558_p3, %p3554_p0 }
0x1b87   :  { %v2899_v27 = vmul.f32 %v3531_v10, %v2898_v46  ;;  %v2905_v3 = vmul.f32 %v3533_v22, %v2893_v17  ;;  %vm2911_vm3 = vweird.f32 %v3533_v22 }
0x1b88   :  { %vm2912_vm7 = vmor %vm2910_vm6, %vm2911_vm3 }
0x1b89   :  { %v2906_v29 = vmul.f32 %v3533_v22, %v2905_v3  ;;  %v2903_v30 = vsel %vm2902_vm2, %v3531_v10, %v2899_v27 }
0x1b8a   :  { %v2914_v32 = vmul.f32 %v2903_v30, %v2880_v5 }
0x1b8b   :  { %v2907_v49 = vmul.f32 0.5, %v2906_v29 }
0x1b8c   :  { %v2919_v33 = vmul.f32 %v3375_v25, %v2914_v32 }
0x1b8d   :  { %v2908_v35 = vsub.f32 1.5, %v2907_v49 }
0x1b8e   :  { %v2924_v36 = vadd.f32 %v3376_v28, %v2919_v33 }
0x1b8f   :  { %v2909_v34 = vmul.f32 %v3533_v22, %v2908_v35 }
0x1b90   :  { %v2928_v39 = vsel %vm258_vm0, %v2924_v36, 0.0 }
0x1b91   :  { %2929 = vadd.xlane.f32.xlu0 %v2928_v39  ;;  %v2913_v40 = vsel %vm2912_vm7, %v3533_v22, %v2909_v34 }
0x1b92   :  { %v2915_v15 = vmul.f32 %v2913_v40, %v2881_v42 }
0x1b94   :  { %v2920_v41 = vmul.f32 %v3375_v25, %v2915_v15 }
0x1b96   :  { %v2925_v21 = vadd.f32 %v3376_v28, %v2920_v41 }
0x1b98   :  { %v2931_v44 = vsel %vm258_vm0, %v2925_v21, 0.0 }
0x1b99   :  { %2932 = vadd.xlane.f32.xlu1 %v2931_v44 }
0x1c04   :  { %v2930_v38 = vpop.xlane.xlu0 %2929 }
0x1c05   :  { %v2934_v45 = vmul.f32 %v2930_v38, %v4011_v24 }
0x1c07   :  { %v2936_v47 = vsub.f32 %v2924_v36, %v2934_v45 }
0x1c09   :  { %v2938_v43 = vmul.f32 %v2936_v47, %v2936_v47 }
0x1c0b   :  { %v2940_v48 = vsel %vm258_vm0, %v2938_v43, 0.0 }
0x1c0c   :  { %2941 = vadd.xlane.f32.xlu2 %v2940_v48  ;;  %v2933_v26 = vpop.xlane.xlu1 %2932 }
0x1c0d   :  { %v2935_v23 = vmul.f32 %v2933_v26, %v4011_v24 }
0x1c0f   :  { %v2937_v50 = vsub.f32 %v2925_v21, %v2935_v23 }
0x1c11   :  { %v2939_v0 = vmul.f32 %v2937_v50, %v2937_v50 }
0x1c13   :  { %v2943_v51 = vsel %vm258_vm0, %v2939_v0, 0.0 }
0x1c14   :  { %2944 = vadd.xlane.f32.xlu0 %v2943_v51 }
0x1c7f   :  { %v2942_v52 = vpop.xlane.xlu2 %2941 }
0x1c80   :  { %v2946_v54 = vmul.f32 %v2942_v52, %v4011_v24 }
0x1c82   :  { %v2948_v55 = vadd.f32 1e-05, %v2946_v54 }
0x1c84   :  { %3534 = vrsqrt.f32 %v2948_v55  ;;  %vm2956_vm9 = vweird.f32 %v2948_v55 }
0x1c87   :  { %v2945_v58 = vpop.xlane.xlu0 %2944 }
0x1c88   :  { %v2947_v59 = vmul.f32 %v2945_v58, %v4011_v24  ;;  %v3377_v24 = vld [vmem:[%s4623_s12] ss:$0 sm:$0xff] }
0x1c8a   :  { %v3535_v60 = vpop.eup %3534  ;;  %v2949_v2 = vadd.f32 1e-05, %v2947_v59 }
0x1c8b   :  { %v2951_v61 = vmul.f32 %v3535_v60, %v2948_v55  ;;  %vm2957_vm8 = vweird.f32 %v3535_v60 }
0x1c8c   :  { %3536 = vrsqrt.f32 %v2949_v2  ;;  %vm2958_vm1 = vmor %vm2956_vm9, %vm2957_vm8  ;;  %vm2966_vm11 = vweird.f32 %v2949_v2 }
0x1c8d   :  { %v2952_v62 = vmul.f32 %v3535_v60, %v2951_v61 }
0x1c8f   :  { %v2953_v63 = vmul.f32 0.5, %v2952_v62 }
0x1c91   :  { %v2954_v16 = vsub.f32 1.5, %v2953_v63 }
0x1c92   :  { %v3537_v1 = vpop.eup %3536 }
0x1c93   :  { %v2955_v4 = vmul.f32 %v3535_v60, %v2954_v16  ;;  %v2961_v5 = vmul.f32 %v3537_v1, %v2949_v2  ;;  %vm2967_vm10 = vweird.f32 %v3537_v1 }
0x1c94   :  { %vm2968_vm12 = vmor %vm2966_vm11, %vm2967_vm10 }
0x1c95   :  { %v2962_v19 = vmul.f32 %v3537_v1, %v2961_v5  ;;  %v2959_v56 = vsel %vm2958_vm1, %v3535_v60, %v2955_v4 }
0x1c96   :  { %v2970_v42 = vmul.f32 %v2959_v56, %v2936_v47 }
0x1c97   :  { %v2963_v6 = vmul.f32 0.5, %v2962_v19 }
0x1c98   :  { %v2975_v8 = vmul.f32 %v3377_v24, %v2970_v42 }
0x1c99   :  { %v2964_v7 = vsub.f32 1.5, %v2963_v6 }
0x1c9a   :  { %v2980_v37 = vadd.f32 %v3378_v57, %v2975_v8 }
0x1c9b   :  { %v2965_v9 = vmul.f32 %v3537_v1, %v2964_v7 }
0x1c9d   :  { %v2969_v12 = vsel %vm2968_vm12, %v3537_v1, %v2965_v9 }
0x1c9e   :  { %v2971_v13 = vmul.f32 %v2969_v12, %v2937_v50 }
0x1ca0   :  { %v2976_v14 = vmul.f32 %v3377_v24, %v2971_v13 }
0x1ca2   :  { %v2981_v10 = vadd.f32 %v3378_v57, %v2976_v14 }
0x1ca4   :  { %v2982_v17 = vpack.c.bf16 %v2981_v10, %v2980_v37 }
0x1ca6   :  { %3252 = vmatmul.msk.bf16.vlgmr.msra.gmra.mxu1 %vm258_vm0, %v2982_v17 }
0x1d23   :  { %v3015_v20 = vpop.f32.mrf.mxu1 }
0x1d24   :  { %v3016_v11 = vadd.f32 %v3379_v18, %v3015_v20 }
0x1d26   :  { %3020 = vst.msk [vmem:[#allocation2] sm:$0xff] %vm311_vm4, %v3016_v11 }
0x1d2b   :  { %v3017_v46 = vpop.f32.mrf.mxu1 }
0x1d2c   :  { %v3018_v22 = vadd.f32 %v3379_v18, %v3017_v46 }
0x1d2e   :  { %3021 = vst.msk [vmem:[#allocation2 + $0x8] sm:$0xff] %vm311_vm4, %v3018_v22 }
0x1d2f   :  { %3562 = shalt.err (!%p3559_p4)
}
0x1d30   :  { %s3630_s28 = smov 128   ;;  %s3631_s1 = smov 8  }
0x1d31   :  { %3034 = dma.vmem_to_hbm [thread:$0]  %s3027_s20, 256, %s3029_s23, [#allocation3], %s3630_s28, %s3630_s28, %s3631_s1  }
0x1d32   :  { %3563 = dma.done.wait [#allocation3], 256  }
0x1d33   :  { %3564 = vsyncadd [#allocation3], 4294967040 }
0x1d34   :  { %3039 = vsyncpa [#allocation3], 1 }

</bundles_post_ra>
